<compile_context>
chip_gen: v7x
topology: tpu7x:2x2x1
jax: 0.10.0
libtpu: 0.0.40
codegen_flags: <defaults>
</compile_context>

<pallas_src>
import jax
import jax.numpy as jnp
from jax.experimental import pallas as pl
from jax.experimental.pallas import tpu as pltpu


def edge_mlp_kernel(coll_ref, w1_ref, b1_ref, w2_ref, b2_ref,
                    gamma_ref, beta_ref, out_ref):
    # Layer 1 (MXU): bf16 operands, f32 accumulation.
    h = jnp.dot(coll_ref[...], w1_ref[...],
                preferred_element_type=jnp.float32) + b1_ref[...]
    h = jnp.maximum(h, 0.0)                                        # ReLU (VPU, f32)
    # Layer 2 (MXU): f32 operands, f32 accumulation (review: no bf16 cast of h).
    y = jnp.dot(h, w2_ref[...], preferred_element_type=jnp.float32) + b2_ref[...]
    # LayerNorm over the feature dim (torch defaults: biased variance, eps=1e-5).
    mean = jnp.mean(y, axis=-1, keepdims=True)
    var = jnp.mean((y - mean) ** 2, axis=-1, keepdims=True)
    y = (y - mean) * jax.lax.rsqrt(var + 1e-5)
    out_ref[...] = (y * gamma_ref[...] + beta_ref[...]).astype(out_ref.dtype)


def edge_block_forward(node_attr, edge_index, edge_attr, params, *, tile_e=2048):
    """EdgeBlock forward. node_attr [N,Fn] f32, edge_index [2,E] int32,
    edge_attr [E,Fe] f32. Returns new edge_attr [E, Dout] f32."""
    N, Fn = node_attr.shape
    E, Fe = edge_attr.shape
    senders, receivers = edge_index[0], edge_index[1]
    w1, b1, w2, b2, gamma, beta = params
    din, hidden = w1.shape
    dout = w2.shape[1]
    assert din == 2 * Fn + Fe

    # ---- O(E) index plumbing in plain JAX (scatter_add + row gathers) ----
    # Scatter-sum is done in f32 (accuracy of the unbounded sums), then the small
    # [N, Fn] table and edge_attr are cast to bf16 BEFORE the gathers/concat so the
    # [E, Din] slab is written to HBM exactly once, already in bf16.
    indeg = jnp.concatenate([senders, receivers], axis=0)
    outdeg = jnp.concatenate([receivers, senders], axis=0)
    node_avg = jnp.zeros((N, Fn), jnp.float32).at[indeg].add(node_attr[outdeg])
    node_avg_b = node_avg.astype(jnp.bfloat16)
    edge_attr_b = edge_attr.astype(jnp.bfloat16)
    collected = jnp.concatenate(
        [node_avg_b[senders], node_avg_b[receivers], edge_attr_b], axis=1)  # [E, Din] bf16

    # Pad the edge axis to a multiple of the tile; padded rows are zeros and are sliced
    # away after the call (LayerNorm of a zero row is finite, no NaNs).
    e_pad = pl.cdiv(E, tile_e) * tile_e
    collected = jnp.pad(collected, ((0, e_pad - E), (0, 0)))

    w1_b = w1.astype(jnp.bfloat16)   # MXU operand for layer 1; layer 2 stays f32.

    grid = (e_pad // tile_e,)
    const2d = lambda i: (0, 0)       # weights / biases / LN affine resident in VMEM

    # --- VMEM budget from lane-padded (128-lane) on-chip block sizes, double-buffered,
    #     with headroom; cap at 48 MiB so v7x (64 MiB physical) never overcommits. ---
    per_step_bytes = tile_e * 128 * 2 + tile_e * 128 * 4   # bf16 input block + f32 output block
    vmem_limit = int(min(48 << 20, max(32 << 20, 3 * per_step_bytes)))

    cost = pl.CostEstimate(
        flops=2 * e_pad * din * hidden + 2 * e_pad * hidden * dout + 8 * e_pad * dout,
        transcendentals=e_pad,  # one rsqrt per edge row
        bytes_accessed=(collected.size * 2 + e_pad * dout * 4
                        + w1_b.size * 2 + w2.size * 4
                        + (b1.size + b2.size + gamma.size + beta.size) * 4),
    )

    out = pl.pallas_call(
        edge_mlp_kernel,
        out_shape=jax.ShapeDtypeStruct((e_pad, dout), jnp.float32),
        grid=grid,
        in_specs=[
            pl.BlockSpec((tile_e, din), lambda i: (i, 0)),   # pipelined edge tiles (bf16)
            pl.BlockSpec((din, hidden), const2d),            # W1 (bf16, resident)
            pl.BlockSpec((1, hidden), const2d),              # b1 (f32)
            pl.BlockSpec((hidden, dout), const2d),           # W2 (f32, resident)
            pl.BlockSpec((1, dout), const2d),                # b2
            pl.BlockSpec((1, dout), const2d),                # gamma
            pl.BlockSpec((1, dout), const2d),                # beta
        ],
        out_specs=pl.BlockSpec((tile_e, dout), lambda i: (i, 0)),
        compiler_params=pltpu.CompilerParams(
            dimension_semantics=("parallel",),               # shards edge tiles across TCs on v7x
            vmem_limit_bytes=vmem_limit),
        cost_estimate=cost,
    )(collected, w1_b, b1, w2, b2, gamma, beta)
    return out[:E]


def reference_forward(node_attr, edge_index, edge_attr, params, *, bf16_inputs=False):
    """Pure-JAX reference mirroring the PyTorch module. With bf16_inputs=True the same
    upstream bf16 quantization the wrapper applies is mimicked (f32 math otherwise), so
    kernel math can be checked at a tight tolerance independent of that cast."""
    senders, receivers = edge_index[0], edge_index[1]
    indeg = jnp.concatenate([senders, receivers], axis=0)
    outdeg = jnp.concatenate([receivers, senders], axis=0)
    node_avg = jnp.zeros_like(node_attr).at[indeg].add(node_attr[outdeg])
    w1, b1, w2, b2, gamma, beta = params
    if bf16_inputs:
        node_avg = node_avg.astype(jnp.bfloat16).astype(jnp.float32)
        edge_attr = edge_attr.astype(jnp.bfloat16).astype(jnp.float32)
        w1 = w1.astype(jnp.bfloat16).astype(jnp.float32)
    collected = jnp.concatenate(
        [node_avg[senders], node_avg[receivers], edge_attr], axis=1)
    h = jnp.maximum(collected @ w1 + b1, 0.0)
    y = h @ w2 + b2
    mean = jnp.mean(y, axis=-1, keepdims=True)
    var = jnp.mean((y - mean) ** 2, axis=-1, keepdims=True)
    return (y - mean) * jax.lax.rsqrt(var + 1e-5) * gamma + beta


if __name__ == "__main__":
    # Small, module-consistent shapes; E > tile_e so the demo exercises a multi-step
    # grid at the production default tile size (2 grid steps of 2048 edge rows).
    N, Fn, E, Fe = 400, 4, 2500, 3
    hidden, dout = 32, 8
    din = 2 * Fn + Fe

    key = jax.random.PRNGKey(0)
    k = jax.random.split(key, 10)
    node_attr = jax.random.normal(k[0], (N, Fn), jnp.float32)
    edge_attr = jax.random.normal(k[1], (E, Fe), jnp.float32)
    senders = jax.random.randint(k[2], (E,), 0, N, dtype=jnp.int32)
    receivers = jax.random.randint(k[3], (E,), 0, N, dtype=jnp.int32)
    edge_index = jnp.stack([senders, receivers], axis=0)

    # Params for self.net (FVGN build_mlp: Linear -> ReLU -> Linear -> LayerNorm).
    # Non-trivial biases / LN affine so the test covers them.
    w1 = jax.random.normal(k[4], (din, hidden), jnp.float32) * 0.1
    b1 = jax.random.normal(k[5], (1, hidden), jnp.float32) * 0.1
    w2 = jax.random.normal(k[6], (hidden, dout), jnp.float32) * 0.1
    b2 = jax.random.normal(k[7], (1, dout), jnp.float32) * 0.3
    gamma = 1.0 + jax.random.normal(k[8], (1, dout), jnp.float32) * 0.2
    beta = jax.random.normal(k[9], (1, dout), jnp.float32) * 0.2
    params = (w1, b1, w2, b2, gamma, beta)

    out = edge_block_forward(node_attr, edge_index, edge_attr, params)  # default tile_e=2048
    out = jax.block_until_ready(out)
    assert out.shape == (E, dout)

    # (1) Kernel math vs a reference with matched upstream bf16 quantization (tight).
    ref_match = reference_forward(node_attr, edge_index, edge_attr, params, bf16_inputs=True)
    assert jnp.allclose(out, ref_match, atol=3e-2, rtol=3e-2), "mismatch vs matched-precision reference"
    # (2) End-to-end sanity vs the exact f32 PyTorch-mirror reference (includes the
    #     intentional bf16 input cast, hence the looser tolerance).
    ref_f32 = reference_forward(node_attr, edge_index, edge_attr, params)
    assert jnp.allclose(out, ref_f32, atol=1e-1, rtol=1e-1), "mismatch vs f32 reference"

    # TODO(synk): Data(x=..., edge_index=..., face=..., batch=...) container bookkeeping
    # is metadata passthrough with no kernel equivalent; only edge_attr_ is produced here.
    print("KERNEL_OK")
</pallas_src>

<mosaic_0001>
module attributes {stable_mosaic.version = 11 : i64} {
  func.func @edge_mlp_kernel(%arg0: i32, %arg1: memref<2048x11xbf16, #tpu.memory_space<vmem>>, %arg2: memref<11x32xbf16, #tpu.memory_space<vmem>>, %arg3: memref<1x32xf32, #tpu.memory_space<vmem>>, %arg4: memref<32x8xf32, #tpu.memory_space<vmem>>, %arg5: memref<1x8xf32, #tpu.memory_space<vmem>>, %arg6: memref<1x8xf32, #tpu.memory_space<vmem>>, %arg7: memref<1x8xf32, #tpu.memory_space<vmem>>, %arg8: memref<2048x8xf32, #tpu.memory_space<vmem>>) attributes {dimension_semantics = [#tpu.dimension_semantics<parallel>], iteration_bounds = array<i64: 2>, scalar_prefetch = 0 : i64, scratch_operands = 0 : i64, tpu.core_type = #tpu.core_type<tc>, window_params = [{transform_indices = @transform_0, window_bounds = array<i64: 2048, 11>}, {pipeline_mode = #tpu.pipeline_mode<synchronous>, transform_indices = @transform_1, window_bounds = array<i64: 11, 32>}, {pipeline_mode = #tpu.pipeline_mode<synchronous>, transform_indices = @transform_2, window_bounds = array<i64: 1, 32>}, {pipeline_mode = #tpu.pipeline_mode<synchronous>, transform_indices = @transform_3, window_bounds = array<i64: 32, 8>}, {pipeline_mode = #tpu.pipeline_mode<synchronous>, transform_indices = @transform_4, window_bounds = array<i64: 1, 8>}, {pipeline_mode = #tpu.pipeline_mode<synchronous>, transform_indices = @transform_5, window_bounds = array<i64: 1, 8>}, {pipeline_mode = #tpu.pipeline_mode<synchronous>, transform_indices = @transform_6, window_bounds = array<i64: 1, 8>}, {transform_indices = @transform_7, window_bounds = array<i64: 2048, 8>}]} {
    %c0 = arith.constant 0 : index
    %c0_0 = arith.constant 0 : index
    %0 = vector.load %arg1[%c0, %c0_0] : memref<2048x11xbf16, #tpu.memory_space<vmem>>, vector<2048x11xbf16>
    %c0_1 = arith.constant 0 : index
    %c0_2 = arith.constant 0 : index
    %1 = vector.load %arg2[%c0_1, %c0_2] : memref<11x32xbf16, #tpu.memory_space<vmem>>, vector<11x32xbf16>
    %cst = arith.constant dense<0.000000e+00> : vector<2048x32xf32>
    %2 = tpu.matmul %0, %1, %cst {dimension_numbers = #tpu.dot_dimension_numbers<[1], [0], [0], [1], [0, 0, 1, 1], [], []>} : vector<2048x11xbf16>, vector<11x32xbf16>, vector<2048x32xf32> -> vector<2048x32xf32>
    %c0_3 = arith.constant 0 : index
    %c0_4 = arith.constant 0 : index
    %3 = vector.load %arg3[%c0_3, %c0_4] : memref<1x32xf32, #tpu.memory_space<vmem>>, vector<1x32xf32>
    %4 = vector.broadcast %3 : vector<1x32xf32> to vector<2048x32xf32>
    %5 = arith.addf %2, %4 : vector<2048x32xf32>
    %cst_5 = arith.constant 0.000000e+00 : f32
    %6 = vector.broadcast %cst_5 : f32 to vector<2048x32xf32>
    %7 = arith.maximumf %5, %6 : vector<2048x32xf32>
    %c0_6 = arith.constant 0 : index
    %c0_7 = arith.constant 0 : index
    %8 = vector.load %arg4[%c0_6, %c0_7] : memref<32x8xf32, #tpu.memory_space<vmem>>, vector<32x8xf32>
    %cst_8 = arith.constant dense<0.000000e+00> : vector<2048x8xf32>
    %9 = tpu.matmul %7, %8, %cst_8 {dimension_numbers = #tpu.dot_dimension_numbers<[1], [0], [0], [1], [0, 0, 1, 1], [], []>} : vector<2048x32xf32>, vector<32x8xf32>, vector<2048x8xf32> -> vector<2048x8xf32>
    %c0_9 = arith.constant 0 : index
    %c0_10 = arith.constant 0 : index
    %10 = vector.load %arg5[%c0_9, %c0_10] : memref<1x8xf32, #tpu.memory_space<vmem>>, vector<1x8xf32>
    %11 = vector.broadcast %10 : vector<1x8xf32> to vector<2048x8xf32>
    %12 = arith.addf %9, %11 : vector<2048x8xf32>
    %cst_11 = arith.constant dense<0.000000e+00> : vector<2048xf32>
    %13 = vector.multi_reduction <add>, %12, %cst_11 [1] : vector<2048x8xf32> to vector<2048xf32>
    %14 = vector.shape_cast %13 : vector<2048xf32> to vector<2048x1xf32>
    %cst_12 = arith.constant 8.000000e+00 : f32
    %15 = vector.broadcast %cst_12 : f32 to vector<2048x1xf32>
    %16 = arith.divf %14, %15 : vector<2048x1xf32>
    %17 = vector.broadcast %16 : vector<2048x1xf32> to vector<2048x8xf32>
    %18 = arith.subf %12, %17 : vector<2048x8xf32>
    %19 = arith.mulf %18, %18 : vector<2048x8xf32>
    %cst_13 = arith.constant dense<0.000000e+00> : vector<2048xf32>
    %20 = vector.multi_reduction <add>, %19, %cst_13 [1] : vector<2048x8xf32> to vector<2048xf32>
    %21 = vector.shape_cast %20 : vector<2048xf32> to vector<2048x1xf32>
    %cst_14 = arith.constant 8.000000e+00 : f32
    %22 = vector.broadcast %cst_14 : f32 to vector<2048x1xf32>
    %23 = arith.divf %21, %22 : vector<2048x1xf32>
    %24 = vector.broadcast %16 : vector<2048x1xf32> to vector<2048x8xf32>
    %25 = arith.subf %12, %24 : vector<2048x8xf32>
    %cst_15 = arith.constant 9.99999974E-6 : f32
    %26 = vector.broadcast %cst_15 : f32 to vector<2048x1xf32>
    %27 = arith.addf %23, %26 : vector<2048x1xf32>
    %28 = math.rsqrt %27 : vector<2048x1xf32>
    %29 = vector.broadcast %28 : vector<2048x1xf32> to vector<2048x8xf32>
    %30 = arith.mulf %25, %29 : vector<2048x8xf32>
    %c0_16 = arith.constant 0 : index
    %c0_17 = arith.constant 0 : index
    %31 = vector.load %arg6[%c0_16, %c0_17] : memref<1x8xf32, #tpu.memory_space<vmem>>, vector<1x8xf32>
    %32 = vector.broadcast %31 : vector<1x8xf32> to vector<2048x8xf32>
    %33 = arith.mulf %30, %32 : vector<2048x8xf32>
    %c0_18 = arith.constant 0 : index
    %c0_19 = arith.constant 0 : index
    %34 = vector.load %arg7[%c0_18, %c0_19] : memref<1x8xf32, #tpu.memory_space<vmem>>, vector<1x8xf32>
    %35 = vector.broadcast %34 : vector<1x8xf32> to vector<2048x8xf32>
    %36 = arith.addf %33, %35 : vector<2048x8xf32>
    %c0_20 = arith.constant 0 : index
    %c0_21 = arith.constant 0 : index
    %37 = vector.load %arg8[%c0_20, %c0_21] : memref<2048x8xf32, #tpu.memory_space<vmem>>, vector<2048x8xf32>
    tpu.vector_store %arg8[%c0_20, %c0_21], %36 {strides = array<i32>} : memref<2048x8xf32, #tpu.memory_space<vmem>>, vector<2048x8xf32>,
    return
  }
  func.func @transform_0(%arg0: i32) -> (i32, i32) {
    %c0_i32 = arith.constant 0 : i32
    %c0_i32_0 = arith.constant 0 : i32
    return %arg0, %c0_i32 : i32, i32
  }
  func.func @transform_1(%arg0: i32) -> (i32, i32) {
    %c0_i32 = arith.constant 0 : i32
    %c0_i32_0 = arith.constant 0 : i32
    %c0_i32_1 = arith.constant 0 : i32
    return %c0_i32, %c0_i32_0 : i32, i32
  }
  func.func @transform_2(%arg0: i32) -> (i32, i32) {
    %c0_i32 = arith.constant 0 : i32
    %c0_i32_0 = arith.constant 0 : i32
    %c0_i32_1 = arith.constant 0 : i32
    return %c0_i32, %c0_i32_0 : i32, i32
  }
  func.func @transform_3(%arg0: i32) -> (i32, i32) {
    %c0_i32 = arith.constant 0 : i32
    %c0_i32_0 = arith.constant 0 : i32
    %c0_i32_1 = arith.constant 0 : i32
    return %c0_i32, %c0_i32_0 : i32, i32
  }
  func.func @transform_4(%arg0: i32) -> (i32, i32) {
    %c0_i32 = arith.constant 0 : i32
    %c0_i32_0 = arith.constant 0 : i32
    %c0_i32_1 = arith.constant 0 : i32
    return %c0_i32, %c0_i32_0 : i32, i32
  }
  func.func @transform_5(%arg0: i32) -> (i32, i32) {
    %c0_i32 = arith.constant 0 : i32
    %c0_i32_0 = arith.constant 0 : i32
    %c0_i32_1 = arith.constant 0 : i32
    return %c0_i32, %c0_i32_0 : i32, i32
  }
  func.func @transform_6(%arg0: i32) -> (i32, i32) {
    %c0_i32 = arith.constant 0 : i32
    %c0_i32_0 = arith.constant 0 : i32
    %c0_i32_1 = arith.constant 0 : i32
    return %c0_i32, %c0_i32_0 : i32, i32
  }
  func.func @transform_7(%arg0: i32) -> (i32, i32) {
    %c0_i32 = arith.constant 0 : i32
    %c0_i32_0 = arith.constant 0 : i32
    return %arg0, %c0_i32 : i32, i32
  }
}

</mosaic_0001>

<bundles_post_ra>
// kernel: tpu_custom_call.1
= control target key start
LH: loop header
LB: loop body
LE: loop exit
PB: predicated region body
PF: predicated region fallthrough
CT: control target
= control target key end

     0   :  { %12 = vsyncpa [#allocation3], 0  ;;  %s18190_s0 = inlined_call_operand.vmem [shape: bf16[4096,11], index: 0, kind: input, shape index: {}]   ;;  %s18191_s1 = inlined_call_operand.hbm [shape: bf16[11,32], index: 1, kind: input, shape index: {}]   ;;  %s18192_s2 = inlined_call_operand.hbm [shape: f32[1,32], index: 2, kind: input, shape index: {}]   ;;  %s18193_s3 = inlined_call_operand.vmem [shape: f32[32,8], index: 3, kind: input, shape index: {}]   ;;  %s18194_s4 = inlined_call_operand.hbm [shape: f32[1,8], index: 4, kind: input, shape index: {}]   ;;  %s18195_s5 = inlined_call_operand.hbm [shape: f32[1,8], index: 5, kind: input, shape index: {}]   ;;  %s18196_s6 = inlined_call_operand.hbm [shape: f32[1,8], index: 6, kind: input, shape index: {}]   ;;  %s18197_s7 = inlined_call_operand.vmem [shape: f32[4096,8], index: 7, kind: output, shape index: {}]  }
   0x1   :  { %13 = vsyncpa [#allocation5], 0 }
   0x2   :  { %14 = vsyncpa [#allocation8], 0  ;;  %s11830_s24 = smov 0  }
   0x3 LB: > { %s11782_s25 = smov [#allocation4]   ;;  %s9306_s27 = sadd.s32 4294967295, %s11780_s24   ;;  %s11780_s24 = sphi %s11830_s24, %s20_s24  }
   0x4   : > { %s229_s26 = sshll.u32 %s11782_s25, 4  ;;  %p9308_p0 = scmp.ge.s32.totalorder %s11780_s24, 1  ;;  %s11844_s26 = int_to_ptr.vmem [resolvable:$true] %s229_s26 }
   0x5   : > { %p203_p1 = scmp.lt.s32.totalorder %s11780_s24, 3  ;;  %p11840_p2 = scmp.eq.s32.totalorder %s9306_s27, 0 }
   0x6   : > { %s11783_s30 = smov [#allocation7]   ;;  %s11784_s9 = smov [#allocation2]  }
   0x7   : > { %s18631_s28 = scalar_select %p11840_p2, 1, 0 }
   0x8   : > { %p11846_p3 = pnand %p9308_p0, %p203_p1  ;;  %s254_s8 = sshll.u32 %s11783_s30, 4  ;;  %s11852_s8 = int_to_ptr.vmem [resolvable:$true] %s254_s8 }
   0x9   : > { %s215_s10 = sshll.u32 %s11784_s9, 4  ;;  %s11785_s12 = smov [#allocation6]   ;;  %s11860_s10 = int_to_ptr.vmem [resolvable:$true] %s215_s10 }
   0xa   : > { %s18632_s29 = scalar_select %p11846_p3, 1, 0 }
   0xb   : > { %p10911_p4 = pneg %p11846_p3  ;;  %s11862_s13 = sshll.u32 %s11785_s12, 4  ;;  %s244_s13 = int_to_ptr.vmem [resolvable:$true] %s11862_s13 }
   0xc   : > { %s11622_s16 = scalar_lea.hbm %s18192_s2, 16 }
   0xd   : > { %p11856_p5 = pnand %p11840_p2, %p10911_p4  ;;  %p11623_p6 = scmp.ne.s32.totalorder %s18192_s2, %s11622_s16 }
   0xe   : > { %p11629_p10 = scmp.lt.u32.totalorder %s11622_s16, %s18192_s2 }
   0xf   : > { %p11872_p7 = pneg %p11856_p5 }
  0x11   : > { %p11625_p8 = pnand %p11872_p7, %p11623_p6 }
  0x13   : > { %p11626_p9 = pneg %p11625_p8 }
  0x15   : > { %p11631_p11 = pnand %p11629_p10, %p11626_p9 }
  0x17   : > { %11634 = shalt.err (!%p11631_p11)
}
  0x18   : > { %s11635_s22 = scalar_lea.vmem %s11844_s26, 16  ;;  %s11642_s23 = scalar_lea.vmem %s11844_s26, 32 }
  0x19   : > { %p11636_p12 = scmp.ne.s32.totalorder %s11844_s26, %s11635_s22  ;;  %p11643_p1 = scmp.lt.s32.totalorder %s11844_s26, %s11844_s26 }
  0x1a   : > { %p11644_p4 = scmp.lt.s32.totalorder %s11642_s23, %s11635_s22 }
  0x1b   : > { %p11638_p13 = pnand %p11636_p12, %p11872_p7 }
  0x1c   : > { %p11645_p6 = por %p11644_p4, %p11643_p1 }
  0x1d   : > { %p11639_p0 = pneg %p11638_p13 }
  0x1f   : > { %p11646_p8 = pnand %p11645_p6, %p11639_p0 }
  0x21   : > { %11649 = shalt.err (!%p11646_p8)
}
  0x22   : > { %10917 = dma.hbm_to_vmem [thread:$0]  (!%p11856_p5), %s18192_s2, 16, %s11844_s26, [#allocation5]  }
  0x23   : > { %s11650_s14 = scalar_lea.hbm %s18195_s5, 16 }
  0x24   : > { %p11651_p9 = scmp.ne.s32.totalorder %s18195_s5, %s11650_s14  ;;  %p11657_p12 = scmp.lt.u32.totalorder %s11650_s14, %s18195_s5 }
  0x26   : > { %p11653_p10 = pnand %p11651_p9, %p11872_p7 }
  0x28   : > { %p11654_p11 = pneg %p11653_p10 }
  0x2a   : > { %p11659_p13 = pnand %p11657_p12, %p11654_p11 }
  0x2c   : > { %11662 = shalt.err (!%p11659_p13)
}
  0x2d   : > { %s11663_s26 = scalar_lea.vmem %s11852_s8, 16  ;;  %s11670_s20 = scalar_lea.vmem %s11852_s8, 32 }
  0x2e   : > { %p11664_p0 = scmp.ne.s32.totalorder %s11852_s8, %s11663_s26  ;;  %p11671_p6 = scmp.lt.s32.totalorder %s11852_s8, %s11852_s8 }
  0x2f   : > { %p11672_p8 = scmp.lt.s32.totalorder %s11670_s20, %s11663_s26 }
  0x30   : > { %p11666_p1 = pnand %p11664_p0, %p11872_p7 }
  0x31   : > { %p11673_p9 = por %p11672_p8, %p11671_p6 }
  0x32   : > { %p11667_p4 = pneg %p11666_p1 }
  0x34   : > { %p11674_p10 = pnand %p11673_p9, %p11667_p4 }
  0x36   : > { %11677 = shalt.err (!%p11674_p10)
}
  0x37   : > { %10923 = dma.hbm_to_vmem [thread:$0]  (!%p11856_p5), %s18195_s5, 16, %s11852_s8, [#allocation8]  }
  0x38   : > { %s11678_s30 = scalar_lea.hbm %s18191_s1, 128 }
  0x39   : > { %p11679_p11 = scmp.ne.s32.totalorder %s18191_s1, %s11678_s30  ;;  %p11685_p0 = scmp.lt.u32.totalorder %s11678_s30, %s18191_s1 }
  0x3b   : > { %p11681_p12 = pnand %p11679_p11, %p11872_p7 }
  0x3d   : > { %p11682_p13 = pneg %p11681_p12 }
  0x3f   : > { %p11687_p1 = pnand %p11685_p0, %p11682_p13 }
  0x41   : > { %11690 = shalt.err (!%p11687_p1)
}
  0x42   : > { %s11691_s8 = scalar_lea.vmem %s11860_s10, 128  ;;  %p11699_p9 = scmp.lt.s32.totalorder %s11860_s10, %s11860_s10 }
  0x43   : > { %p11692_p4 = scmp.ne.s32.totalorder %s11860_s10, %s11691_s8  ;;  %p11700_p10 = scmp.lt.s32.totalorder %s11691_s8, %s11691_s8 }
  0x45   : > { %p11694_p6 = pnand %p11692_p4, %p11872_p7  ;;  %p11701_p11 = por %p11700_p10, %p11699_p9 }
  0x47   : > { %p11695_p8 = pneg %p11694_p6 }
  0x49   : > { %p11702_p12 = pnand %p11701_p11, %p11695_p8 }
  0x4b   : > { %11705 = shalt.err (!%p11702_p12)
}
  0x4c   : > { %s11786_s16 = smov 64   ;;  %s11787_s17 = smov 4  }
  0x4d   : > { %10914 = dma.hbm_to_vmem [thread:$0]  (!%p11856_p5), %s18191_s1, 128, %s11860_s10, [#allocation3], %s11786_s16, %s11786_s16, %s11787_s17  }
  0x4e   : > { %s11706_s22 = scalar_lea.hbm %s18194_s4, 16 }
  0x4f   : > { %p11707_p13 = scmp.ne.s32.totalorder %s18194_s4, %s11706_s22  ;;  %p11713_p4 = scmp.lt.u32.totalorder %s11706_s22, %s18194_s4 }
  0x51   : > { %p11709_p0 = pnand %p11707_p13, %p11872_p7 }
  0x53   : > { %p11710_p1 = pneg %p11709_p0 }
  0x55   : > { %p11715_p6 = pnand %p11713_p4, %p11710_p1 }
  0x57   : > { %11718 = shalt.err (!%p11715_p6)
}
  0x58   : > { %s11719_s12 = scalar_lea.vmem %s244_s13, 16  ;;  %s11726_s10 = scalar_lea.vmem %s244_s13, 32 }
  0x59   : > { %p11720_p8 = scmp.ne.s32.totalorder %s244_s13, %s11719_s12  ;;  %p11727_p11 = scmp.lt.s32.totalorder %s244_s13, %s244_s13 }
  0x5a   : > { %p11728_p12 = scmp.lt.s32.totalorder %s11726_s10, %s11719_s12 }
  0x5b   : > { %p11722_p9 = pnand %p11720_p8, %p11872_p7 }
  0x5c   : > { %p11729_p2 = por %p11728_p12, %p11727_p11 }
  0x5d   : > { %p11723_p10 = pneg %p11722_p9 }
  0x5f   : > { %p11730_p3 = pnand %p11729_p2, %p11723_p10 }
  0x61   : > { %11733 = shalt.err (!%p11730_p3)
}
  0x62   : > { %10920 = dma.hbm_to_vmem [thread:$0]  (!%p11856_p5), %s18194_s4, 16, %s244_s13, [#allocation5]  }
  0x63   : > { %s11788_s8 = smov [#allocation9]   ;;  %s11734_s26 = scalar_lea.hbm %s18196_s6, 16 }
  0x64   : > { %s265_s16 = sshll.u32 %s11788_s8, 4  ;;  %p11735_p13 = scmp.ne.s32.totalorder %s18196_s6, %s11734_s26  ;;  %s266_s16 = int_to_ptr.vmem [resolvable:$true] %s265_s16 }
  0x65   : > { %p11741_p0 = scmp.lt.u32.totalorder %s11734_s26, %s18196_s6 }
  0x66   : > { %p11737_p2 = pnand %p11735_p13, %p11872_p7 }
  0x68   : > { %p11738_p3 = pneg %p11737_p2 }
  0x6a   : > { %p11743_p1 = pnand %p11741_p0, %p11738_p3 }
  0x6c   : > { %11746 = shalt.err (!%p11743_p1)
}
  0x6d   : > { %s11747_s13 = scalar_lea.vmem %s266_s16, 16  ;;  %s11754_s25 = scalar_lea.vmem %s266_s16, 32 }
  0x6e   : > { %p11748_p4 = scmp.ne.s32.totalorder %s266_s16, %s11747_s13  ;;  %p11755_p9 = scmp.lt.s32.totalorder %s266_s16, %s266_s16 }
  0x6f   : > { %p11756_p10 = scmp.lt.s32.totalorder %s11754_s25, %s11747_s13 }
  0x70   : > { %p11750_p6 = pnand %p11748_p4, %p11872_p7 }
  0x71   : > { %p11757_p11 = por %p11756_p10, %p11755_p9 }
  0x72   : > { %p11751_p8 = pneg %p11750_p6 }
  0x74   : > { %p11758_p12 = pnand %p11757_p11, %p11751_p8 }
  0x76   : > { %11761 = shalt.err (!%p11758_p12)
}
  0x77   : > { %10926 = dma.hbm_to_vmem [thread:$0]  (!%p11856_p5), %s18196_s6, 16, %s266_s16, [#allocation8]  }
  0x78   : > { %p18635_p13 = scmp.ne.s32.totalorder %s18632_s29, 0 }
  0x7a   : > { %287 = sbr.rel (%p18635_p13) target bundleno = 1767 (0x6e7), region = 48 }
  0x81   : > { %p18636_p2 = scmp.ne.s32.totalorder %s18631_s28, 0 }
  0x83   : > { %11767 = dma.done.wait (%p18636_p2), [#allocation3], 128  }
  0x84   : > { %11769 = vsyncadd (%p18636_p2), [#allocation3], 4294967168 }
  0x85   : > { %11771 = dma.done.wait (%p18636_p2), [#allocation5], 32  }
  0x86   : > { %11773 = vsyncadd (%p18636_p2), [#allocation5], 4294967264 }
  0x87   : > { %11775 = dma.done.wait (%p18636_p2), [#allocation8], 32  }
  0x88   : > { %11777 = vsyncadd (%p18636_p2), [#allocation8], 4294967264  ;;  %vm1643_vm0 = vcmask 1044480   ;;  %s9321_s29 = sshll.u32 %s9306_s27, 8  ;;  %vm1644_vm1 = vcmask 1045504   ;;  %v11789_v0 = vmov 65535  }
  0x89   : > { %p336_p5 = scmp.lt.s32.totalorder %s9321_s29, 511  ;;  %v1645_v1 = vsel %vm1643_vm0, 4294967295, %v11789_v0  ;;  %vm1258_vm2 = vcmask 89088   ;;  %v10953_v3 = vld [vmem:[#allocation2] sm:$0x3f]   ;;  %v2964_v29 = vld [vmem:[%s18193_s3 + $0x8] sm:$0xff] }
  0x8a   : > { %v1646_v2 = vsel %vm1644_vm1, %v1645_v1, 0  ;;  %v2963_v28 = vld [vmem:[%s18193_s3] sm:$0xff]  ;;  %v2965_v32 = vld [vmem:[%s18193_s3 + $0x10] sm:$0xff]  ;;  %v2966_v33 = vld [vmem:[%s18193_s3 + $0x18] sm:$0xff]  ;;  %vm2974_vm3 = vcmask 261120   ;;  %vm5088_vm4 = vcmask 64512  }
  0x8b   : > { %s19756_s29 = smov (!%p336_p5, %s9321_s29), 511  ;;  %v1648_v5 = vand.u32 %v10953_v3, %v1646_v2  ;;  %v10883_v30 = vpack.c.bf16 %v2964_v29, %v2963_v28  ;;  %v10887_v35 = vpack.c.bf16 %v2966_v33, %v2965_v32  ;;  %v12124_v2 = vld [vmem:[#allocation4] ss:$0 sm:$0xff] }
  0x8c   : > { %s9322_s11 = sshll.u32 %s19756_s29, 2  ;;  %s9324_s26 = sshll.u32 %s19756_s29, 3 }
  0x8d   : > { %s12000_s10 = scalar_lea.vmem %s18190_s0, %s9322_s11  ;;  %10233 = vmatprep.subr.bf16.mxu0 %v1648_v5  ;;  %10884 = vmatprep.subr.bf16.mxu1 %v10883_v30  ;;  %s13898_s22 = scalar_lea.vmem %s18197_s7, %s9324_s26 }
  0x8e   : > { %v10954_v4 = vld [vmem:[%s12000_s10] sm:$0xff]   ;;  %v10955_v6 = vld [vmem:[%s12000_s10 + $0x8] sm:$0xff]   ;;  %10234 = vmatpush3.bf16.msra.mxu0 %v1648_v5  ;;  %v10956_v7 = vld [vmem:[%s12000_s10 + $0x10] sm:$0xff]   ;;  %10886 = vmatpush3.bf16.msra.mxu1 %v10883_v30 }
  0x8f   : > { %10235 = vmatprep.mubr.msk.bf16.mxu0 %vm1258_vm2, %v10954_v4  ;;  %v10957_v8 = vld [vmem:[%s12000_s10 + $0x18] sm:$0xff]   ;;  %v10958_v9 = vld [vmem:[%s12000_s10 + $0x20] sm:$0xff]   ;;  %v10959_v10 = vld [vmem:[%s12000_s10 + $0x28] sm:$0xff]   ;;  %10888 = vmatprep.subr.bf16.mxu1 %v10887_v35 }
  0x90   : > { %v10960_v11 = vld [vmem:[%s12000_s10 + $0x30] sm:$0xff]   ;;  %v10961_v12 = vld [vmem:[%s12000_s10 + $0x38] sm:$0xff]   ;;  %v10962_v13 = vld [vmem:[%s12000_s10 + $0x40] sm:$0xff]  }
  0x91   : > { %10236 = vmatmul.mubr.msk.bf16.vlgmr.msra.gmra.mrb[0].mxu0 %vm1258_vm2, %v10955_v6  ;;  %v10963_v14 = vld [vmem:[%s12000_s10 + $0x48] sm:$0xff]   ;;  %v10964_v15 = vld [vmem:[%s12000_s10 + $0x50] sm:$0xff]   ;;  %v10965_v16 = vld [vmem:[%s12000_s10 + $0x58] sm:$0xff]  }
  0x92   : > { %10239 = vmatprep.mubr.msk.bf16.mxu0 %vm1258_vm2, %v10956_v7  ;;  %v10966_v17 = vld [vmem:[%s12000_s10 + $0x60] sm:$0xff]   ;;  %v10967_v18 = vld [vmem:[%s12000_s10 + $0x68] sm:$0xff]   ;;  %v10968_v19 = vld [vmem:[%s12000_s10 + $0x70] sm:$0xff]   ;;  %10890 = vmatpush3.bf16.msra.mxu1 %v10887_v35 }
  0x93   : > { %v10969_v20 = vld [vmem:[%s12000_s10 + $0x78] sm:$0xff]   ;;  %v10970_v21 = vld [vmem:[%s12000_s10 + $0x80] sm:$0xff]   ;;  %v10971_v22 = vld [vmem:[%s12000_s10 + $0x88] sm:$0xff]  }
  0x94   : > { %v10972_v23 = vld [vmem:[%s12000_s10 + $0x90] sm:$0xff]   ;;  %v10973_v24 = vld [vmem:[%s12000_s10 + $0x98] sm:$0xff]   ;;  %v10974_v25 = vld [vmem:[%s12000_s10 + $0xa0] sm:$0xff]  }
  0x95   : > { %v10975_v26 = vld [vmem:[%s12000_s10 + $0xa8] sm:$0xff]   ;;  %v10976_v27 = vld [vmem:[%s12000_s10 + $0xb0] sm:$0xff]   ;;  %v10977_v31 = vld [vmem:[%s12000_s10 + $0xb8] sm:$0xff]  }
  0x96   : > { %v10978_v34 = vld [vmem:[%s12000_s10 + $0xc0] sm:$0xff]   ;;  %v10979_v36 = vld [vmem:[%s12000_s10 + $0xc8] sm:$0xff]   ;;  %v10980_v37 = vld [vmem:[%s12000_s10 + $0xd0] sm:$0xff]  }
  0x97   : > { %v10981_v38 = vld [vmem:[%s12000_s10 + $0xd8] sm:$0xff]   ;;  %v10982_v39 = vld [vmem:[%s12000_s10 + $0xe0] sm:$0xff]   ;;  %v10983_v40 = vld [vmem:[%s12000_s10 + $0xe8] sm:$0xff]  }
  0x98   : > { %v10984_v41 = vld [vmem:[%s12000_s10 + $0xf0] sm:$0xff]   ;;  %v10985_v42 = vld [vmem:[%s12000_s10 + $0xf8] sm:$0xff]   ;;  %v10986_v43 = vld [vmem:[%s12000_s10 + $0x100] sm:$0xff]  }
  0x99   : > { %10240 = vmatmul.mubr.msk.bf16.gmra.mrb[4].mxu0 %vm1258_vm2, %v10957_v8  ;;  %v10987_v44 = vld [vmem:[%s12000_s10 + $0x108] sm:$0xff]   ;;  %v10988_v45 = vld [vmem:[%s12000_s10 + $0x110] sm:$0xff]   ;;  %v10989_v46 = vld [vmem:[%s12000_s10 + $0x118] sm:$0xff]  }
  0x9a   : > { %10243 = vmatprep.mubr.msk.bf16.mxu0 %vm1258_vm2, %v10958_v9  ;;  %v10990_v47 = vld [vmem:[%s12000_s10 + $0x120] sm:$0xff]   ;;  %v10991_v48 = vld [vmem:[%s12000_s10 + $0x128] sm:$0xff]   ;;  %v10992_v49 = vld [vmem:[%s12000_s10 + $0x130] sm:$0xff]  }
  0x9b   : > { %v10993_v50 = vld [vmem:[%s12000_s10 + $0x138] sm:$0xff]   ;;  %v10994_v51 = vld [vmem:[%s12000_s10 + $0x140] sm:$0xff]   ;;  %v10995_v52 = vld [vmem:[%s12000_s10 + $0x148] sm:$0xff]  }
  0x9c   : > { %v10996_v53 = vld [vmem:[%s12000_s10 + $0x150] sm:$0xff]   ;;  %v10997_v54 = vld [vmem:[%s12000_s10 + $0x158] sm:$0xff]   ;;  %v10998_v55 = vld [vmem:[%s12000_s10 + $0x160] sm:$0xff]  }
  0x9d   : > { %v10999_v56 = vld [vmem:[%s12000_s10 + $0x168] sm:$0xff]   ;;  %v11000_v57 = vld [vmem:[%s12000_s10 + $0x170] sm:$0xff]   ;;  %v11001_v58 = vld [vmem:[%s12000_s10 + $0x178] sm:$0xff]  }
  0x9e   : > { %v11002_v59 = vld [vmem:[%s12000_s10 + $0x180] sm:$0xff]   ;;  %v11003_v60 = vld [vmem:[%s12000_s10 + $0x188] sm:$0xff]   ;;  %v11004_v61 = vld [vmem:[%s12000_s10 + $0x190] sm:$0xff]  }
  0x9f   : > { %v11005_v62 = vld [vmem:[%s12000_s10 + $0x198] sm:$0xff]   ;;  %v11006_v63 = vld [vmem:[%s12000_s10 + $0x1a0] sm:$0xff]   ;;  %v11007_v0 = vld [vmem:[%s12000_s10 + $0x1a8] sm:$0xff]  }
  0xa0   : > { %v11008_v1 = vld [vmem:[%s12000_s10 + $0x1b0] sm:$0xff]   ;;  %v11009_v5 = vld [vmem:[%s12000_s10 + $0x1b8] sm:$0xff]   ;;  %v11010_v8 = vld [vmem:[%s12000_s10 + $0x1c0] sm:$0xff]  }
  0xa1   : > { %10244 = vmatmul.mubr.msk.bf16.gmra.mrb[8].mxu0 %vm1258_vm2, %v10959_v10  ;;  %v11013_v33 = vld [vmem:[%s12000_s10 + $0x1d8] sm:$0xff]  }
  0xa2   : > { %10247 = vmatprep.mubr.msk.bf16.mxu0 %vm1258_vm2, %v10960_v11 }
  0xa9   : > { %10248 = vmatmul.mubr.msk.bf16.gmra.mrb[12].mxu0 %vm1258_vm2, %v10961_v12 }
  0xaa   : > { %10251 = vmatprep.mubr.msk.bf16.mxu0 %vm1258_vm2, %v10962_v13 }
  0xb1   : > { %10252 = vmatmul.mubr.msk.bf16.gmra.mrb[16].mxu0 %vm1258_vm2, %v10963_v14 }
  0xb2   : > { %10255 = vmatprep.mubr.msk.bf16.mxu0 %vm1258_vm2, %v10964_v15 }
  0xb9   : > { %10256 = vmatmul.mubr.msk.bf16.gmra.mrb[20].mxu0 %vm1258_vm2, %v10965_v16 }
  0xba   : > { %10259 = vmatprep.mubr.msk.bf16.mxu0 %vm1258_vm2, %v10966_v17 }
  0xc1   : > { %10260 = vmatmul.mubr.msk.bf16.gmra.mrb[24].mxu0 %vm1258_vm2, %v10967_v18 }
  0xc2   : > { %10263 = vmatprep.mubr.msk.bf16.mxu0 %vm1258_vm2, %v10968_v19  ;;  %v11011_v19 = vld [vmem:[%s12000_s10 + $0x1c8] sm:$0xff]  }
  0xc9   : > { %10264 = vmatmul.mubr.msk.bf16.gmra.mrb[28].mxu0 %vm1258_vm2, %v10969_v20 }
  0xca   : > { %10267 = vmatprep.mubr.msk.bf16.mxu0 %vm1258_vm2, %v10970_v21 }
  0xd1   : > { %10268 = vmatmul.mubr.msk.bf16.gmra.mrb[32].mxu0 %vm1258_vm2, %v10971_v22 }
  0xd2   : > { %10271 = vmatprep.mubr.msk.bf16.mxu0 %vm1258_vm2, %v10972_v23  ;;  %v11012_v23 = vld [vmem:[%s12000_s10 + $0x1d0] sm:$0xff]  }
  0xd9   : > { %10272 = vmatmul.mubr.msk.bf16.gmra.mrb[36].mxu0 %vm1258_vm2, %v10973_v24 }
  0xda   : > { %10275 = vmatprep.mubr.msk.bf16.mxu0 %vm1258_vm2, %v10974_v25 }
  0xe1   : > { %10276 = vmatmul.mubr.msk.bf16.gmra.mrb[40].mxu0 %vm1258_vm2, %v10975_v26 }
  0xe2   : > { %10279 = vmatprep.mubr.msk.bf16.mxu0 %vm1258_vm2, %v10976_v27 }
  0xe9   : > { %10280 = vmatmul.mubr.msk.bf16.gmra.mrb[44].mxu0 %vm1258_vm2, %v10977_v31 }
  0xea   : > { %10283 = vmatprep.mubr.msk.bf16.mxu0 %vm1258_vm2, %v10978_v34 }
  0xf1   : > { %10284 = vmatmul.mubr.msk.bf16.gmra.mrb[48].mxu0 %vm1258_vm2, %v10979_v36 }
  0xf2   : > { %10287 = vmatprep.mubr.msk.bf16.mxu0 %vm1258_vm2, %v10980_v37  ;;  %v11014_v37 = vld [vmem:[%s12000_s10 + $0x1e0] sm:$0xff]  }
  0xf9   : > { %10288 = vmatmul.mubr.msk.bf16.gmra.mrb[52].mxu0 %vm1258_vm2, %v10981_v38 }
  0xfa   : > { %10291 = vmatprep.mubr.msk.bf16.mxu0 %vm1258_vm2, %v10982_v39 }
 0x101   : > { %10292 = vmatmul.mubr.msk.bf16.gmra.mrb[56].mxu0 %vm1258_vm2, %v10983_v40 }
 0x102   : > { %10295 = vmatprep.mubr.msk.bf16.mxu0 %vm1258_vm2, %v10984_v41 }
 0x109   : > { %10296 = vmatmul.mubr.msk.bf16.gmra.mrb[60].mxu0 %vm1258_vm2, %v10985_v42 }
 0x10a   : > { %10299 = vmatprep.mubr.msk.bf16.mxu0 %vm1258_vm2, %v10986_v43 }
 0x111   : > { %10300 = vmatmul.mubr.msk.bf16.gmra.mrb[64].mxu0 %vm1258_vm2, %v10987_v44 }
 0x112   : > { %10303 = vmatprep.mubr.msk.bf16.mxu0 %vm1258_vm2, %v10988_v45 }
 0x119   : > { %10304 = vmatmul.mubr.msk.bf16.gmra.mrb[68].mxu0 %vm1258_vm2, %v10989_v46 }
 0x11a   : > { %10307 = vmatprep.mubr.msk.bf16.mxu0 %vm1258_vm2, %v10990_v47  ;;  %v11015_v47 = vld [vmem:[%s12000_s10 + $0x1e8] sm:$0xff]  }
 0x121   : > { %10308 = vmatmul.mubr.msk.bf16.gmra.mrb[72].mxu0 %vm1258_vm2, %v10991_v48 }
 0x122   : > { %10311 = vmatprep.mubr.msk.bf16.mxu0 %vm1258_vm2, %v10992_v49 }
 0x129   : > { %10312 = vmatmul.mubr.msk.bf16.gmra.mrb[76].mxu0 %vm1258_vm2, %v10993_v50 }
 0x12a   : > { %10315 = vmatprep.mubr.msk.bf16.mxu0 %vm1258_vm2, %v10994_v51  ;;  %v11016_v51 = vld [vmem:[%s12000_s10 + $0x1f0] sm:$0xff]  }
 0x131   : > { %10316 = vmatmul.mubr.msk.bf16.gmra.mrb[80].mxu0 %vm1258_vm2, %v10995_v52 }
 0x132   : > { %10319 = vmatprep.mubr.msk.bf16.mxu0 %vm1258_vm2, %v10996_v53 }
 0x139   : > { %10320 = vmatmul.mubr.msk.bf16.gmra.mrb[84].mxu0 %vm1258_vm2, %v10997_v54 }
 0x13a   : > { %10323 = vmatprep.mubr.msk.bf16.mxu0 %vm1258_vm2, %v10998_v55 }
 0x141   : > { %10324 = vmatmul.mubr.msk.bf16.gmra.mrb[88].mxu0 %vm1258_vm2, %v10999_v56 }
 0x142   : > { %10327 = vmatprep.mubr.msk.bf16.mxu0 %vm1258_vm2, %v11000_v57 }
 0x149   : > { %10328 = vmatmul.mubr.msk.bf16.gmra.mrb[92].mxu0 %vm1258_vm2, %v11001_v58 }
 0x14a   : > { %10331 = vmatprep.mubr.msk.bf16.mxu0 %vm1258_vm2, %v11002_v59 }
 0x151   : > { %10332 = vmatmul.mubr.msk.bf16.gmra.mrb[96].mxu0 %vm1258_vm2, %v11003_v60 }
 0x152   : > { %10335 = vmatprep.mubr.msk.bf16.mxu0 %vm1258_vm2, %v11004_v61  ;;  %v11017_v61 = vld [vmem:[%s12000_s10 + $0x1f8] sm:$0xff]  }
 0x159   : > { %10336 = vmatmul.mubr.msk.bf16.gmra.mrb[100].mxu0 %vm1258_vm2, %v11005_v62 }
 0x15a   : > { %10339 = vmatprep.mubr.msk.bf16.mxu0 %vm1258_vm2, %v11006_v63 }
 0x161   : > { %10340 = vmatmul.mubr.msk.bf16.gmra.mrb[104].mxu0 %vm1258_vm2, %v11007_v0 }
 0x162   : > { %10343 = vmatprep.mubr.msk.bf16.mxu0 %vm1258_vm2, %v11008_v1  ;;  %v11018_v1 = vld [vmem:[%s12000_s10 + $0x200] sm:$0xff]  }
 0x164   : > { %v10237_v3 = vpop.f32.mrb[0].mxu0 }
 0x165   : > { %v1684_v4 = vpop.f32.mrb[1].mxu0  ;;  %v1693_v9 = vadd.f32 %v10237_v3, %v12124_v2 }
 0x166   : > { %v1685_v6 = vadd.f32 %v12124_v2, %v1684_v4  ;;  %v10238_v7 = vpop.f32.mrb[2].mxu0 }
 0x167   : > { %v1687_v10 = vpop.f32.mrb[3].mxu0  ;;  %v1696_v13 = vadd.f32 %v10238_v7, %v12124_v2  ;;  %v2709_v15 = vmax.f32 %v1693_v9, 0.0 }
 0x168   : > { %v2707_v11 = vmax.f32 %v1685_v6, 0.0  ;;  %v1688_v12 = vadd.f32 %v12124_v2, %v1687_v10 }
 0x169   : > { %10344 = vmatmul.mubr.msk.bf16.gmra.mrb[108].mxu0 %vm1258_vm2, %v11009_v5  ;;  %v2710_v20 = vmax.f32 %v1696_v13, 0.0 }
 0x16a   : > { %v2708_v14 = vmax.f32 %v1688_v12, 0.0  ;;  %10499 = vmatprep.mubr.msk.f32.mxu1 %vm2974_vm3, %v2707_v11  ;;  %10347 = vmatprep.mubr.msk.bf16.mxu0 %vm1258_vm2, %v11010_v8  ;;  %v11019_v12 = vld [vmem:[%s12000_s10 + $0x208] sm:$0xff]  }
 0x16c   : > { %v10241_v16 = vpop.f32.mrb[4].mxu0  ;;  %10500 = vmatmul.mubr.msk.f32.vlgmr.msra.gmra.mrb[0].mxu1 %vm2974_vm3, %v2708_v14 }
 0x16d   : > { %v1709_v17 = vadd.f32 %v10241_v16, %v12124_v2  ;;  %v1700_v18 = vpop.f32.mrb[5].mxu0  ;;  %10502 = vmatprep.mubr.msk.f32.mxu1 %vm2974_vm3, %v2709_v15  ;;  %v11020_v16 = vld [vmem:[%s12000_s10 + $0x210] sm:$0xff]  }
 0x16e   : > { %v1701_v21 = vadd.f32 %v12124_v2, %v1700_v18  ;;  %v10242_v22 = vpop.f32.mrb[6].mxu0 }
 0x16f   : > { %v1703_v24 = vpop.f32.mrb[7].mxu0  ;;  %v2713_v27 = vmax.f32 %v1709_v17, 0.0  ;;  %v1712_v28 = vadd.f32 %v10242_v22, %v12124_v2 }
 0x170   : > { %v2711_v25 = vmax.f32 %v1701_v21, 0.0  ;;  %v1704_v26 = vadd.f32 %v12124_v2, %v1703_v24  ;;  %10503 = vmatmul.mubr.msk.f32.gmra.mrb[2].mxu1 %vm2974_vm3, %v2710_v20 }
 0x171   : > { %10348 = vmatmul.mubr.msk.bf16.gmra.mrb[112].mxu0 %vm1258_vm2, %v11011_v19  ;;  %v2714_v34 = vmax.f32 %v1712_v28, 0.0 }
 0x172   : > { %v2712_v29 = vmax.f32 %v1704_v26, 0.0  ;;  %10505 = vmatprep.mubr.msk.f32.mxu1 %vm2974_vm3, %v2711_v25  ;;  %10351 = vmatprep.mubr.msk.bf16.mxu0 %vm1258_vm2, %v11012_v23  ;;  %v11021_v26 = vld [vmem:[%s12000_s10 + $0x218] sm:$0xff]  }
 0x174   : > { %v10245_v30 = vpop.f32.mrb[8].mxu0  ;;  %10506 = vmatmul.mubr.msk.f32.gmra.mrb[4].mxu1 %vm2974_vm3, %v2712_v29 }
 0x175   : > { %v1725_v31 = vadd.f32 %v10245_v30, %v12124_v2  ;;  %v1716_v32 = vpop.f32.mrb[9].mxu0  ;;  %10508 = vmatprep.mubr.msk.f32.mxu1 %vm2974_vm3, %v2713_v27  ;;  %v11022_v30 = vld [vmem:[%s12000_s10 + $0x220] sm:$0xff]  }
 0x176   : > { %v1717_v35 = vadd.f32 %v12124_v2, %v1716_v32  ;;  %v10246_v36 = vpop.f32.mrb[10].mxu0 }
 0x177   : > { %v1719_v38 = vpop.f32.mrb[11].mxu0  ;;  %v2717_v41 = vmax.f32 %v1725_v31, 0.0  ;;  %v1728_v42 = vadd.f32 %v10246_v36, %v12124_v2 }
 0x178   : > { %v2715_v39 = vmax.f32 %v1717_v35, 0.0  ;;  %v1720_v40 = vadd.f32 %v12124_v2, %v1719_v38  ;;  %10509 = vmatmul.mubr.msk.f32.gmra.mrb[6].mxu1 %vm2974_vm3, %v2714_v34 }
 0x179   : > { %10352 = vmatmul.mubr.msk.bf16.gmra.mrb[116].mxu0 %vm1258_vm2, %v11013_v33  ;;  %v2718_v48 = vmax.f32 %v1728_v42, 0.0 }
 0x17a   : > { %v2716_v43 = vmax.f32 %v1720_v40, 0.0  ;;  %10511 = vmatprep.mubr.msk.f32.mxu1 %vm2974_vm3, %v2715_v39  ;;  %10355 = vmatprep.mubr.msk.bf16.mxu0 %vm1258_vm2, %v11014_v37  ;;  %v11023_v40 = vld [vmem:[%s12000_s10 + $0x228] sm:$0xff]  }
 0x17c   : > { %v10249_v44 = vpop.f32.mrb[12].mxu0  ;;  %10512 = vmatmul.mubr.msk.f32.gmra.mrb[8].mxu1 %vm2974_vm3, %v2716_v43 }
 0x17d   : > { %v1741_v45 = vadd.f32 %v10249_v44, %v12124_v2  ;;  %v1732_v46 = vpop.f32.mrb[13].mxu0  ;;  %10514 = vmatprep.mubr.msk.f32.mxu1 %vm2974_vm3, %v2717_v41  ;;  %v11024_v44 = vld [vmem:[%s12000_s10 + $0x230] sm:$0xff]  }
 0x17e   : > { %v1733_v49 = vadd.f32 %v12124_v2, %v1732_v46  ;;  %v10250_v50 = vpop.f32.mrb[14].mxu0 }
 0x17f   : > { %v1735_v52 = vpop.f32.mrb[15].mxu0  ;;  %v2721_v55 = vmax.f32 %v1741_v45, 0.0  ;;  %v1744_v56 = vadd.f32 %v10250_v50, %v12124_v2 }
 0x180   : > { %v2719_v53 = vmax.f32 %v1733_v49, 0.0  ;;  %v1736_v54 = vadd.f32 %v12124_v2, %v1735_v52  ;;  %10515 = vmatmul.mubr.msk.f32.gmra.mrb[10].mxu1 %vm2974_vm3, %v2718_v48 }
 0x181   : > { %10356 = vmatmul.mubr.msk.bf16.gmra.mrb[120].mxu0 %vm1258_vm2, %v11015_v47  ;;  %v2722_v62 = vmax.f32 %v1744_v56, 0.0 }
 0x182   : > { %v2720_v57 = vmax.f32 %v1736_v54, 0.0  ;;  %10517 = vmatprep.mubr.msk.f32.mxu1 %vm2974_vm3, %v2719_v53  ;;  %10359 = vmatprep.mubr.msk.bf16.mxu0 %vm1258_vm2, %v11016_v51  ;;  %v11025_v54 = vld [vmem:[%s12000_s10 + $0x238] sm:$0xff]  }
 0x184   : > { %v10253_v58 = vpop.f32.mrb[16].mxu0  ;;  %10518 = vmatmul.mubr.msk.f32.gmra.mrb[12].mxu1 %vm2974_vm3, %v2720_v57 }
 0x185   : > { %v1757_v59 = vadd.f32 %v10253_v58, %v12124_v2  ;;  %v1748_v60 = vpop.f32.mrb[17].mxu0  ;;  %10520 = vmatprep.mubr.msk.f32.mxu1 %vm2974_vm3, %v2721_v55  ;;  %v11026_v58 = vld [vmem:[%s12000_s10 + $0x240] sm:$0xff]  }
 0x186   : > { %v1749_v63 = vadd.f32 %v12124_v2, %v1748_v60  ;;  %v10254_v0 = vpop.f32.mrb[18].mxu0 }
 0x187   : > { %v1751_v3 = vpop.f32.mrb[19].mxu0  ;;  %v2725_v6 = vmax.f32 %v1757_v59, 0.0  ;;  %v1760_v7 = vadd.f32 %v10254_v0, %v12124_v2 }
 0x188   : > { %v2723_v4 = vmax.f32 %v1749_v63, 0.0  ;;  %v1752_v5 = vadd.f32 %v12124_v2, %v1751_v3  ;;  %10521 = vmatmul.mubr.msk.f32.gmra.mrb[14].mxu1 %vm2974_vm3, %v2722_v62 }
 0x189   : > { %10360 = vmatmul.mubr.msk.bf16.gmra.mrb[124].mxu0 %vm1258_vm2, %v11017_v61  ;;  %v2726_v13 = vmax.f32 %v1760_v7, 0.0 }
 0x18a   : > { %v2724_v8 = vmax.f32 %v1752_v5, 0.0  ;;  %10523 = vmatprep.mubr.msk.f32.mxu1 %vm2974_vm3, %v2723_v4  ;;  %10363 = vmatprep.mubr.msk.bf16.mxu0 %vm1258_vm2, %v11018_v1  ;;  %v11027_v5 = vld [vmem:[%s12000_s10 + $0x248] sm:$0xff]  }
 0x18c   : > { %v10257_v9 = vpop.f32.mrb[20].mxu0  ;;  %10524 = vmatmul.mubr.msk.f32.gmra.mrb[16].mxu1 %vm2974_vm3, %v2724_v8 }
 0x18d   : > { %v1773_v10 = vadd.f32 %v10257_v9, %v12124_v2  ;;  %v1764_v11 = vpop.f32.mrb[21].mxu0  ;;  %10526 = vmatprep.mubr.msk.f32.mxu1 %vm2974_vm3, %v2725_v6 }
 0x18e   : > { %v1765_v14 = vadd.f32 %v12124_v2, %v1764_v11  ;;  %v10258_v15 = vpop.f32.mrb[22].mxu0 }
 0x18f   : > { %v1767_v17 = vpop.f32.mrb[23].mxu0  ;;  %v2729_v20 = vmax.f32 %v1773_v10, 0.0  ;;  %v1776_v21 = vadd.f32 %v10258_v15, %v12124_v2 }
 0x190   : > { %v2727_v18 = vmax.f32 %v1765_v14, 0.0  ;;  %v1768_v19 = vadd.f32 %v12124_v2, %v1767_v17  ;;  %10527 = vmatmul.mubr.msk.f32.gmra.mrb[18].mxu1 %vm2974_vm3, %v2726_v13 }
 0x191   : > { %10364 = vmatmul.mubr.msk.bf16.gmra.mrb[128].mxu0 %vm1258_vm2, %v11019_v12  ;;  %v2730_v27 = vmax.f32 %v1776_v21, 0.0 }
 0x192   : > { %v2728_v22 = vmax.f32 %v1768_v19, 0.0  ;;  %10529 = vmatprep.mubr.msk.f32.mxu1 %vm2974_vm3, %v2727_v18  ;;  %10367 = vmatprep.mubr.msk.bf16.mxu0 %vm1258_vm2, %v11020_v16 }
 0x194   : > { %v10261_v23 = vpop.f32.mrb[24].mxu0  ;;  %10530 = vmatmul.mubr.msk.f32.gmra.mrb[20].mxu1 %vm2974_vm3, %v2728_v22 }
 0x195   : > { %v1789_v24 = vadd.f32 %v10261_v23, %v12124_v2  ;;  %v1780_v25 = vpop.f32.mrb[25].mxu0  ;;  %10532 = vmatprep.mubr.msk.f32.mxu1 %vm2974_vm3, %v2729_v20 }
 0x196   : > { %v1781_v28 = vadd.f32 %v12124_v2, %v1780_v25  ;;  %v10262_v29 = vpop.f32.mrb[26].mxu0 }
 0x197   : > { %v1783_v31 = vpop.f32.mrb[27].mxu0  ;;  %v2733_v34 = vmax.f32 %v1789_v24, 0.0  ;;  %v1792_v35 = vadd.f32 %v10262_v29, %v12124_v2 }
 0x198   : > { %v2731_v32 = vmax.f32 %v1781_v28, 0.0  ;;  %v1784_v33 = vadd.f32 %v12124_v2, %v1783_v31  ;;  %10533 = vmatmul.mubr.msk.f32.gmra.mrb[22].mxu1 %vm2974_vm3, %v2730_v27 }
 0x199   : > { %10368 = vmatmul.mubr.msk.bf16.gmra.mrb[132].mxu0 %vm1258_vm2, %v11021_v26  ;;  %v2734_v41 = vmax.f32 %v1792_v35, 0.0 }
 0x19a   : > { %v2732_v36 = vmax.f32 %v1784_v33, 0.0  ;;  %10535 = vmatprep.mubr.msk.f32.mxu1 %vm2974_vm3, %v2731_v32  ;;  %10371 = vmatprep.mubr.msk.bf16.mxu0 %vm1258_vm2, %v11022_v30 }
 0x19c   : > { %v10265_v37 = vpop.f32.mrb[28].mxu0  ;;  %10536 = vmatmul.mubr.msk.f32.gmra.mrb[24].mxu1 %vm2974_vm3, %v2732_v36 }
 0x19d   : > { %v1805_v38 = vadd.f32 %v10265_v37, %v12124_v2  ;;  %v1796_v39 = vpop.f32.mrb[29].mxu0  ;;  %10538 = vmatprep.mubr.msk.f32.mxu1 %vm2974_vm3, %v2733_v34 }
 0x19e   : > { %v1797_v42 = vadd.f32 %v12124_v2, %v1796_v39  ;;  %v10266_v43 = vpop.f32.mrb[30].mxu0 }
 0x19f   : > { %v1799_v45 = vpop.f32.mrb[31].mxu0  ;;  %v2737_v48 = vmax.f32 %v1805_v38, 0.0  ;;  %v1808_v49 = vadd.f32 %v10266_v43, %v12124_v2 }
 0x1a0   : > { %v2735_v46 = vmax.f32 %v1797_v42, 0.0  ;;  %v1800_v47 = vadd.f32 %v12124_v2, %v1799_v45  ;;  %10539 = vmatmul.mubr.msk.f32.gmra.mrb[26].mxu1 %vm2974_vm3, %v2734_v41  ;;  %v11028_v42 = vld [vmem:[%s12000_s10 + $0x250] sm:$0xff]  }
 0x1a1   : > { %10372 = vmatmul.mubr.msk.bf16.gmra.mrb[136].mxu0 %vm1258_vm2, %v11023_v40  ;;  %v2738_v55 = vmax.f32 %v1808_v49, 0.0 }
 0x1a2   : > { %v2736_v50 = vmax.f32 %v1800_v47, 0.0  ;;  %10541 = vmatprep.mubr.msk.f32.mxu1 %vm2974_vm3, %v2735_v46  ;;  %10375 = vmatprep.mubr.msk.bf16.mxu0 %vm1258_vm2, %v11024_v44  ;;  %v11029_v46 = vld [vmem:[%s12000_s10 + $0x258] sm:$0xff]  }
 0x1a4   : > { %v10269_v51 = vpop.f32.mrb[32].mxu0  ;;  %10542 = vmatmul.mubr.msk.f32.gmra.mrb[28].mxu1 %vm2974_vm3, %v2736_v50 }
 0x1a5   : > { %v1821_v52 = vadd.f32 %v10269_v51, %v12124_v2  ;;  %v1812_v53 = vpop.f32.mrb[33].mxu0  ;;  %10544 = vmatprep.mubr.msk.f32.mxu1 %vm2974_vm3, %v2737_v48 }
 0x1a6   : > { %v1813_v56 = vadd.f32 %v12124_v2, %v1812_v53  ;;  %v10270_v57 = vpop.f32.mrb[34].mxu0 }
 0x1a7   : > { %v1815_v59 = vpop.f32.mrb[35].mxu0  ;;  %v2741_v62 = vmax.f32 %v1821_v52, 0.0  ;;  %v1824_v63 = vadd.f32 %v10270_v57, %v12124_v2 }
 0x1a8   : > { %v2739_v60 = vmax.f32 %v1813_v56, 0.0  ;;  %v1816_v61 = vadd.f32 %v12124_v2, %v1815_v59  ;;  %10545 = vmatmul.mubr.msk.f32.gmra.mrb[30].mxu1 %vm2974_vm3, %v2738_v55 }
 0x1a9   : > { %10376 = vmatmul.mubr.msk.bf16.gmra.mrb[140].mxu0 %vm1258_vm2, %v11025_v54  ;;  %v2742_v6 = vmax.f32 %v1824_v63, 0.0 }
 0x1aa   : > { %v2740_v0 = vmax.f32 %v1816_v61, 0.0  ;;  %10547 = vmatprep.mubr.msk.f32.mxu1 %vm2974_vm3, %v2739_v60  ;;  %10379 = vmatprep.mubr.msk.bf16.mxu0 %vm1258_vm2, %v11026_v58 }
 0x1ac   : > { %v10273_v1 = vpop.f32.mrb[36].mxu0  ;;  %10548 = vmatmul.mubr.msk.f32.gmra.mrb[32].mxu1 %vm2974_vm3, %v2740_v0 }
 0x1ad   : > { %v1837_v3 = vadd.f32 %v10273_v1, %v12124_v2  ;;  %v1828_v4 = vpop.f32.mrb[37].mxu0  ;;  %10550 = vmatprep.mubr.msk.f32.mxu1 %vm2974_vm3, %v2741_v62 }
 0x1ae   : > { %v1829_v7 = vadd.f32 %v12124_v2, %v1828_v4  ;;  %v10274_v8 = vpop.f32.mrb[38].mxu0 }
 0x1af   : > { %v1831_v9 = vpop.f32.mrb[39].mxu0  ;;  %v2745_v12 = vmax.f32 %v1837_v3, 0.0  ;;  %v1840_v13 = vadd.f32 %v10274_v8, %v12124_v2 }
 0x1b0   : > { %v2743_v10 = vmax.f32 %v1829_v7, 0.0  ;;  %v1832_v11 = vadd.f32 %v12124_v2, %v1831_v9  ;;  %10551 = vmatmul.mubr.msk.f32.gmra.mrb[34].mxu1 %vm2974_vm3, %v2742_v6  ;;  %v11031_v9 = vld [vmem:[%s12000_s10 + $0x268] sm:$0xff]  }
 0x1b1   : > { %10380 = vmatmul.mubr.msk.bf16.gmra.mrb[144].mxu0 %vm1258_vm2, %v11027_v5  ;;  %v2746_v18 = vmax.f32 %v1840_v13, 0.0  ;;  %v11030_v5 = vld [vmem:[%s12000_s10 + $0x260] sm:$0xff]  }
 0x1b2   : > { %v2744_v14 = vmax.f32 %v1832_v11, 0.0  ;;  %10553 = vmatprep.mubr.msk.f32.mxu1 %vm2974_vm3, %v2743_v10  ;;  %10383 = vmatprep.mubr.msk.bf16.mxu0 %vm1258_vm2, %v11028_v42 }
 0x1b4   : > { %v10277_v15 = vpop.f32.mrb[40].mxu0  ;;  %10554 = vmatmul.mubr.msk.f32.gmra.mrb[36].mxu1 %vm2974_vm3, %v2744_v14 }
 0x1b5   : > { %v1853_v16 = vadd.f32 %v10277_v15, %v12124_v2  ;;  %v1844_v17 = vpop.f32.mrb[41].mxu0  ;;  %10556 = vmatprep.mubr.msk.f32.mxu1 %vm2974_vm3, %v2745_v12 }
 0x1b6   : > { %v1845_v19 = vadd.f32 %v12124_v2, %v1844_v17  ;;  %v10278_v20 = vpop.f32.mrb[42].mxu0 }
 0x1b7   : > { %v1847_v21 = vpop.f32.mrb[43].mxu0  ;;  %v2749_v24 = vmax.f32 %v1853_v16, 0.0  ;;  %v1856_v25 = vadd.f32 %v10278_v20, %v12124_v2 }
 0x1b8   : > { %v2747_v22 = vmax.f32 %v1845_v19, 0.0  ;;  %v1848_v23 = vadd.f32 %v12124_v2, %v1847_v21  ;;  %10557 = vmatmul.mubr.msk.f32.gmra.mrb[38].mxu1 %vm2974_vm3, %v2746_v18 }
 0x1b9   : > { %v2750_v30 = vmax.f32 %v1856_v25, 0.0  ;;  %10384 = vmatmul.mubr.msk.bf16.gmra.mrb[148].mxu0 %vm1258_vm2, %v11029_v46 }
 0x1ba   : > { %v2748_v26 = vmax.f32 %v1848_v23, 0.0  ;;  %10559 = vmatprep.mubr.msk.f32.mxu1 %vm2974_vm3, %v2747_v22  ;;  %10387 = vmatprep.mubr.msk.bf16.mxu0 %vm1258_vm2, %v11030_v5 }
 0x1bc   : > { %v10281_v27 = vpop.f32.mrb[44].mxu0  ;;  %10560 = vmatmul.mubr.msk.f32.gmra.mrb[40].mxu1 %vm2974_vm3, %v2748_v26 }
 0x1bd   : > { %v1869_v28 = vadd.f32 %v10281_v27, %v12124_v2  ;;  %v1860_v29 = vpop.f32.mrb[45].mxu0  ;;  %10562 = vmatprep.mubr.msk.f32.mxu1 %vm2974_vm3, %v2749_v24 }
 0x1be   : > { %v1861_v31 = vadd.f32 %v12124_v2, %v1860_v29  ;;  %v10282_v32 = vpop.f32.mrb[46].mxu0 }
 0x1bf   : > { %v1863_v33 = vpop.f32.mrb[47].mxu0  ;;  %v2753_v36 = vmax.f32 %v1869_v28, 0.0  ;;  %v1872_v37 = vadd.f32 %v10282_v32, %v12124_v2 }
 0x1c0   : > { %v2751_v34 = vmax.f32 %v1861_v31, 0.0  ;;  %v1864_v35 = vadd.f32 %v12124_v2, %v1863_v33  ;;  %10563 = vmatmul.mubr.msk.f32.gmra.mrb[42].mxu1 %vm2974_vm3, %v2750_v30  ;;  %v11032_v31 = vld [vmem:[%s12000_s10 + $0x270] sm:$0xff]  }
 0x1c1   : > { %v2754_v43 = vmax.f32 %v1872_v37, 0.0  ;;  %10388 = vmatmul.mubr.msk.bf16.gmra.mrb[152].mxu0 %vm1258_vm2, %v11031_v9 }
 0x1c2   : > { %v2752_v38 = vmax.f32 %v1864_v35, 0.0  ;;  %10565 = vmatprep.mubr.msk.f32.mxu1 %vm2974_vm3, %v2751_v34  ;;  %v11033_v35 = vld [vmem:[%s12000_s10 + $0x278] sm:$0xff]   ;;  %10391 = vmatprep.mubr.msk.bf16.mxu0 %vm1258_vm2, %v11032_v31 }
 0x1c4   : > { %v10285_v39 = vpop.f32.mrb[48].mxu0  ;;  %10566 = vmatmul.mubr.msk.f32.gmra.mrb[44].mxu1 %vm2974_vm3, %v2752_v38 }
 0x1c5   : > { %v1885_v40 = vadd.f32 %v10285_v39, %v12124_v2  ;;  %v1876_v41 = vpop.f32.mrb[49].mxu0  ;;  %10568 = vmatprep.mubr.msk.f32.mxu1 %vm2974_vm3, %v2753_v36 }
 0x1c6   : > { %v1877_v44 = vadd.f32 %v12124_v2, %v1876_v41  ;;  %v10286_v45 = vpop.f32.mrb[50].mxu0 }
 0x1c7   : > { %v1879_v47 = vpop.f32.mrb[51].mxu0  ;;  %v2757_v50 = vmax.f32 %v1885_v40, 0.0  ;;  %v1888_v51 = vadd.f32 %v10286_v45, %v12124_v2 }
 0x1c8   : > { %v2755_v48 = vmax.f32 %v1877_v44, 0.0  ;;  %v1880_v49 = vadd.f32 %v12124_v2, %v1879_v47  ;;  %10569 = vmatmul.mubr.msk.f32.gmra.mrb[46].mxu1 %vm2974_vm3, %v2754_v43 }
 0x1c9   : > { %v2758_v56 = vmax.f32 %v1888_v51, 0.0  ;;  %10392 = vmatmul.mubr.msk.bf16.gmra.mrb[156].mxu0 %vm1258_vm2, %v11033_v35 }
 0x1ca   : > { %v2756_v52 = vmax.f32 %v1880_v49, 0.0  ;;  %10571 = vmatprep.mubr.msk.f32.mxu1 %vm2974_vm3, %v2755_v48 }
 0x1cc   : > { %v10289_v53 = vpop.f32.mrb[52].mxu0  ;;  %10572 = vmatmul.mubr.msk.f32.gmra.mrb[48].mxu1 %vm2974_vm3, %v2756_v52 }
 0x1cd   : > { %v1901_v54 = vadd.f32 %v10289_v53, %v12124_v2  ;;  %v1892_v55 = vpop.f32.mrb[53].mxu0  ;;  %10574 = vmatprep.mubr.msk.f32.mxu1 %vm2974_vm3, %v2757_v50 }
 0x1ce   : > { %v1893_v57 = vadd.f32 %v12124_v2, %v1892_v55  ;;  %v10290_v58 = vpop.f32.mrb[54].mxu0 }
 0x1cf   : > { %v1895_v59 = vpop.f32.mrb[55].mxu0  ;;  %v2761_v62 = vmax.f32 %v1901_v54, 0.0  ;;  %v1904_v63 = vadd.f32 %v10290_v58, %v12124_v2 }
 0x1d0   : > { %v2759_v60 = vmax.f32 %v1893_v57, 0.0  ;;  %v1896_v61 = vadd.f32 %v12124_v2, %v1895_v59  ;;  %10575 = vmatmul.mubr.msk.f32.gmra.mrb[50].mxu1 %vm2974_vm3, %v2758_v56  ;;  %v11034_v57 = vld [vmem:[%s12000_s10 + $0x280] sm:$0xff]  }
 0x1d1   : > { %v2762_v6 = vmax.f32 %v1904_v63, 0.0  ;;  %10395 = vmatprep.mubr.msk.bf16.mxu0 %vm1258_vm2, %v11034_v57 }
 0x1d2   : > { %v2760_v0 = vmax.f32 %v1896_v61, 0.0  ;;  %10577 = vmatprep.mubr.msk.f32.mxu1 %vm2974_vm3, %v2759_v60  ;;  %v11035_v61 = vld [vmem:[%s12000_s10 + $0x288] sm:$0xff]  }
 0x1d3   : > { %10396 = vmatmul.mubr.msk.bf16.gmra.mrb[160].mxu0 %vm1258_vm2, %v11035_v61 }
 0x1d4   : > { %v10293_v1 = vpop.f32.mrb[56].mxu0  ;;  %10578 = vmatmul.mubr.msk.f32.gmra.mrb[52].mxu1 %vm2974_vm3, %v2760_v0 }
 0x1d5   : > { %v1917_v3 = vadd.f32 %v10293_v1, %v12124_v2  ;;  %v1908_v4 = vpop.f32.mrb[57].mxu0  ;;  %10580 = vmatprep.mubr.msk.f32.mxu1 %vm2974_vm3, %v2761_v62 }
 0x1d6   : > { %v1909_v7 = vadd.f32 %v12124_v2, %v1908_v4  ;;  %v10294_v8 = vpop.f32.mrb[58].mxu0 }
 0x1d7   : > { %v1911_v10 = vpop.f32.mrb[59].mxu0  ;;  %v2765_v13 = vmax.f32 %v1917_v3, 0.0  ;;  %v1920_v14 = vadd.f32 %v10294_v8, %v12124_v2 }
 0x1d8   : > { %v2763_v11 = vmax.f32 %v1909_v7, 0.0  ;;  %v1912_v12 = vadd.f32 %v12124_v2, %v1911_v10  ;;  %10581 = vmatmul.mubr.msk.f32.gmra.mrb[54].mxu1 %vm2974_vm3, %v2762_v6 }
 0x1d9   : > { %v2766_v19 = vmax.f32 %v1920_v14, 0.0 }
 0x1da   : > { %v2764_v15 = vmax.f32 %v1912_v12, 0.0  ;;  %10583 = vmatprep.mubr.msk.f32.mxu1 %vm2974_vm3, %v2763_v11 }
 0x1dc   : > { %v10297_v16 = vpop.f32.mrb[60].mxu0  ;;  %10584 = vmatmul.mubr.msk.f32.gmra.mrb[56].mxu1 %vm2974_vm3, %v2764_v15 }
 0x1dd   : > { %v1933_v17 = vadd.f32 %v10297_v16, %v12124_v2  ;;  %v1924_v18 = vpop.f32.mrb[61].mxu0  ;;  %10586 = vmatprep.mubr.msk.f32.mxu1 %vm2974_vm3, %v2765_v13 }
 0x1de   : > { %v1925_v20 = vadd.f32 %v12124_v2, %v1924_v18  ;;  %v10298_v21 = vpop.f32.mrb[62].mxu0 }
 0x1df   : > { %v1927_v22 = vpop.f32.mrb[63].mxu0  ;;  %v2769_v25 = vmax.f32 %v1933_v17, 0.0  ;;  %v1936_v26 = vadd.f32 %v10298_v21, %v12124_v2  ;;  %v11036_v21 = vld [vmem:[%s12000_s10 + $0x290] sm:$0xff]  }
 0x1e0   : > { %v2767_v23 = vmax.f32 %v1925_v20, 0.0  ;;  %v1928_v24 = vadd.f32 %v12124_v2, %v1927_v22  ;;  %10587 = vmatmul.mubr.msk.f32.gmra.mrb[58].mxu1 %vm2974_vm3, %v2766_v19  ;;  %10399 = vmatprep.mubr.msk.bf16.mxu0 %vm1258_vm2, %v11036_v21 }
 0x1e1   : > { %v2770_v32 = vmax.f32 %v1936_v26, 0.0 }
 0x1e2   : > { %v2768_v27 = vmax.f32 %v1928_v24, 0.0  ;;  %10589 = vmatprep.mubr.msk.f32.mxu1 %vm2974_vm3, %v2767_v23  ;;  %v11037_v24 = vld [vmem:[%s12000_s10 + $0x298] sm:$0xff]  }
 0x1e3   : > { %10400 = vmatmul.mubr.msk.bf16.gmra.mrb[164].mxu0 %vm1258_vm2, %v11037_v24 }
 0x1e4   : > { %v10301_v28 = vpop.f32.mrb[64].mxu0  ;;  %10590 = vmatmul.mubr.msk.f32.gmra.mrb[60].mxu1 %vm2974_vm3, %v2768_v27 }
 0x1e5   : > { %v1949_v29 = vadd.f32 %v10301_v28, %v12124_v2  ;;  %v1940_v30 = vpop.f32.mrb[65].mxu0  ;;  %10592 = vmatprep.mubr.msk.f32.mxu1 %vm2974_vm3, %v2769_v25 }
 0x1e6   : > { %v1941_v33 = vadd.f32 %v12124_v2, %v1940_v30  ;;  %v10302_v34 = vpop.f32.mrb[66].mxu0 }
 0x1e7   : > { %v1943_v36 = vpop.f32.mrb[67].mxu0  ;;  %v2773_v39 = vmax.f32 %v1949_v29, 0.0  ;;  %v1952_v40 = vadd.f32 %v10302_v34, %v12124_v2 }
 0x1e8   : > { %v2771_v37 = vmax.f32 %v1941_v33, 0.0  ;;  %v1944_v38 = vadd.f32 %v12124_v2, %v1943_v36  ;;  %10593 = vmatmul.mubr.msk.f32.gmra.mrb[62].mxu1 %vm2974_vm3, %v2770_v32 }
 0x1e9   : > { %v2774_v45 = vmax.f32 %v1952_v40, 0.0 }
 0x1ea   : > { %v2772_v41 = vmax.f32 %v1944_v38, 0.0  ;;  %10595 = vmatprep.mubr.msk.f32.mxu1 %vm2974_vm3, %v2771_v37 }
 0x1ec   : > { %v10305_v42 = vpop.f32.mrb[68].mxu0  ;;  %10596 = vmatmul.mubr.msk.f32.gmra.mrb[64].mxu1 %vm2974_vm3, %v2772_v41 }
 0x1ed   : > { %v1965_v43 = vadd.f32 %v10305_v42, %v12124_v2  ;;  %v1956_v44 = vpop.f32.mrb[69].mxu0  ;;  %10598 = vmatprep.mubr.msk.f32.mxu1 %vm2974_vm3, %v2773_v39 }
 0x1ee   : > { %v1957_v46 = vadd.f32 %v12124_v2, %v1956_v44  ;;  %v10306_v47 = vpop.f32.mrb[70].mxu0 }
 0x1ef   : > { %v1959_v48 = vpop.f32.mrb[71].mxu0  ;;  %v2777_v51 = vmax.f32 %v1965_v43, 0.0  ;;  %v1968_v52 = vadd.f32 %v10306_v47, %v12124_v2  ;;  %v11038_v47 = vld [vmem:[%s12000_s10 + $0x2a0] sm:$0xff]  }
 0x1f0   : > { %v2775_v49 = vmax.f32 %v1957_v46, 0.0  ;;  %v1960_v50 = vadd.f32 %v12124_v2, %v1959_v48  ;;  %10599 = vmatmul.mubr.msk.f32.gmra.mrb[66].mxu1 %vm2974_vm3, %v2774_v45  ;;  %10403 = vmatprep.mubr.msk.bf16.mxu0 %vm1258_vm2, %v11038_v47 }
 0x1f1   : > { %v2778_v58 = vmax.f32 %v1968_v52, 0.0 }
 0x1f2   : > { %v2776_v53 = vmax.f32 %v1960_v50, 0.0  ;;  %10601 = vmatprep.mubr.msk.f32.mxu1 %vm2974_vm3, %v2775_v49  ;;  %v11039_v50 = vld [vmem:[%s12000_s10 + $0x2a8] sm:$0xff]  }
 0x1f3   : > { %10404 = vmatmul.mubr.msk.bf16.gmra.mrb[168].mxu0 %vm1258_vm2, %v11039_v50 }
 0x1f4   : > { %v10309_v54 = vpop.f32.mrb[72].mxu0  ;;  %10602 = vmatmul.mubr.msk.f32.gmra.mrb[68].mxu1 %vm2974_vm3, %v2776_v53 }
 0x1f5   : > { %v1981_v55 = vadd.f32 %v10309_v54, %v12124_v2  ;;  %v1972_v56 = vpop.f32.mrb[73].mxu0  ;;  %10604 = vmatprep.mubr.msk.f32.mxu1 %vm2974_vm3, %v2777_v51 }
 0x1f6   : > { %v1973_v59 = vadd.f32 %v12124_v2, %v1972_v56  ;;  %v10310_v60 = vpop.f32.mrb[74].mxu0 }
 0x1f7   : > { %v1975_v62 = vpop.f32.mrb[75].mxu0  ;;  %v2781_v1 = vmax.f32 %v1981_v55, 0.0  ;;  %v1984_v3 = vadd.f32 %v10310_v60, %v12124_v2 }
 0x1f8   : > { %v2779_v63 = vmax.f32 %v1973_v59, 0.0  ;;  %v1976_v0 = vadd.f32 %v12124_v2, %v1975_v62  ;;  %10605 = vmatmul.mubr.msk.f32.gmra.mrb[70].mxu1 %vm2974_vm3, %v2778_v58 }
 0x1f9   : > { %v2782_v8 = vmax.f32 %v1984_v3, 0.0 }
 0x1fa   : > { %v2780_v4 = vmax.f32 %v1976_v0, 0.0  ;;  %10607 = vmatprep.mubr.msk.f32.mxu1 %vm2974_vm3, %v2779_v63 }
 0x1fc   : > { %v10313_v5 = vpop.f32.mrb[76].mxu0  ;;  %10608 = vmatmul.mubr.msk.f32.gmra.mrb[72].mxu1 %vm2974_vm3, %v2780_v4 }
 0x1fd   : > { %v1997_v6 = vadd.f32 %v10313_v5, %v12124_v2  ;;  %v1988_v7 = vpop.f32.mrb[77].mxu0  ;;  %10610 = vmatprep.mubr.msk.f32.mxu1 %vm2974_vm3, %v2781_v1 }
 0x1fe   : > { %v1989_v9 = vadd.f32 %v12124_v2, %v1988_v7  ;;  %v10314_v10 = vpop.f32.mrb[78].mxu0 }
 0x1ff   : > { %v1991_v11 = vpop.f32.mrb[79].mxu0  ;;  %v2000_v13 = vadd.f32 %v10314_v10, %v12124_v2  ;;  %v2785_v15 = vmax.f32 %v1997_v6, 0.0  ;;  %v11040_v10 = vld [vmem:[%s12000_s10 + $0x2b0] sm:$0xff]  }
 0x200   : > { %v2783_v12 = vmax.f32 %v1989_v9, 0.0  ;;  %v1992_v14 = vadd.f32 %v12124_v2, %v1991_v11  ;;  %10611 = vmatmul.mubr.msk.f32.gmra.mrb[74].mxu1 %vm2974_vm3, %v2782_v8  ;;  %10407 = vmatprep.mubr.msk.bf16.mxu0 %vm1258_vm2, %v11040_v10 }
 0x201   : > { %v2786_v17 = vmax.f32 %v2000_v13, 0.0  ;;  %v11041_v13 = vld [vmem:[%s12000_s10 + $0x2b8] sm:$0xff]  }
 0x202   : > { %v2784_v16 = vmax.f32 %v1992_v14, 0.0  ;;  %10613 = vmatprep.mubr.msk.f32.mxu1 %vm2974_vm3, %v2783_v12  ;;  %10408 = vmatmul.mubr.msk.bf16.gmra.mrb[172].mxu0 %vm1258_vm2, %v11041_v13 }
 0x204   : > { %10614 = vmatmul.mubr.msk.f32.gmra.mrb[76].mxu1 %vm2974_vm3, %v2784_v16  ;;  %v10317_v18 = vpop.f32.mrb[80].mxu0 }
 0x205   : > { %10616 = vmatprep.mubr.msk.f32.mxu1 %vm2974_vm3, %v2785_v15  ;;  %v2013_v19 = vadd.f32 %v10317_v18, %v12124_v2  ;;  %v2004_v20 = vpop.f32.mrb[81].mxu0 }
 0x206   : > { %v2005_v22 = vadd.f32 %v12124_v2, %v2004_v20  ;;  %v10318_v23 = vpop.f32.mrb[82].mxu0 }
 0x207   : > { %v2007_v25 = vpop.f32.mrb[83].mxu0  ;;  %v2016_v27 = vadd.f32 %v10318_v23, %v12124_v2  ;;  %v2789_v29 = vmax.f32 %v2013_v19, 0.0 }
 0x208   : > { %10617 = vmatmul.mubr.msk.f32.gmra.mrb[78].mxu1 %vm2974_vm3, %v2786_v17  ;;  %v2787_v26 = vmax.f32 %v2005_v22, 0.0  ;;  %v2008_v28 = vadd.f32 %v12124_v2, %v2007_v25 }
 0x209   : > { %v2790_v31 = vmax.f32 %v2016_v27, 0.0 }
 0x20a   : > { %v2788_v30 = vmax.f32 %v2008_v28, 0.0  ;;  %10619 = vmatprep.mubr.msk.f32.mxu1 %vm2974_vm3, %v2787_v26 }
 0x20c   : > { %10620 = vmatmul.mubr.msk.f32.gmra.mrb[80].mxu1 %vm2974_vm3, %v2788_v30  ;;  %v10321_v32 = vpop.f32.mrb[84].mxu0 }
 0x20d   : > { %10622 = vmatprep.mubr.msk.f32.mxu1 %vm2974_vm3, %v2789_v29  ;;  %v2029_v33 = vadd.f32 %v10321_v32, %v12124_v2  ;;  %v2020_v34 = vpop.f32.mrb[85].mxu0 }
 0x20e   : > { %v2021_v35 = vadd.f32 %v12124_v2, %v2020_v34  ;;  %v10322_v36 = vpop.f32.mrb[86].mxu0 }
 0x20f   : > { %v2023_v37 = vpop.f32.mrb[87].mxu0  ;;  %v2032_v39 = vadd.f32 %v10322_v36, %v12124_v2  ;;  %v2793_v41 = vmax.f32 %v2029_v33, 0.0  ;;  %v11042_v36 = vld [vmem:[%s12000_s10 + $0x2c0] sm:$0xff]  }
 0x210   : > { %10623 = vmatmul.mubr.msk.f32.gmra.mrb[82].mxu1 %vm2974_vm3, %v2790_v31  ;;  %v2791_v38 = vmax.f32 %v2021_v35, 0.0  ;;  %v2024_v40 = vadd.f32 %v12124_v2, %v2023_v37  ;;  %10411 = vmatprep.mubr.msk.bf16.mxu0 %vm1258_vm2, %v11042_v36 }
 0x211   : > { %v2794_v43 = vmax.f32 %v2032_v39, 0.0  ;;  %v11043_v39 = vld [vmem:[%s12000_s10 + $0x2c8] sm:$0xff]  }
 0x212   : > { %v2792_v42 = vmax.f32 %v2024_v40, 0.0  ;;  %10625 = vmatprep.mubr.msk.f32.mxu1 %vm2974_vm3, %v2791_v38  ;;  %10412 = vmatmul.mubr.msk.bf16.gmra.mrb[176].mxu0 %vm1258_vm2, %v11043_v39 }
 0x214   : > { %10626 = vmatmul.mubr.msk.f32.gmra.mrb[84].mxu1 %vm2974_vm3, %v2792_v42  ;;  %v10325_v44 = vpop.f32.mrb[88].mxu0 }
 0x215   : > { %10628 = vmatprep.mubr.msk.f32.mxu1 %vm2974_vm3, %v2793_v41  ;;  %v2045_v45 = vadd.f32 %v10325_v44, %v12124_v2  ;;  %v2036_v46 = vpop.f32.mrb[89].mxu0 }
 0x216   : > { %v2037_v48 = vadd.f32 %v12124_v2, %v2036_v46  ;;  %v10326_v49 = vpop.f32.mrb[90].mxu0 }
 0x217   : > { %v2039_v51 = vpop.f32.mrb[91].mxu0  ;;  %v2048_v53 = vadd.f32 %v10326_v49, %v12124_v2  ;;  %v2797_v55 = vmax.f32 %v2045_v45, 0.0 }
 0x218   : > { %10629 = vmatmul.mubr.msk.f32.gmra.mrb[86].mxu1 %vm2974_vm3, %v2794_v43  ;;  %v2795_v52 = vmax.f32 %v2037_v48, 0.0  ;;  %v2040_v54 = vadd.f32 %v12124_v2, %v2039_v51  ;;  %v12410_v48 = vld [vmem:[#allocation6] ss:$0 sm:$0xff] }
 0x219   : > { %v2798_v57 = vmax.f32 %v2048_v53, 0.0 }
 0x21a   : > { %v2796_v56 = vmax.f32 %v2040_v54, 0.0  ;;  %10631 = vmatprep.mubr.msk.f32.mxu1 %vm2974_vm3, %v2795_v52 }
 0x21c   : > { %10632 = vmatmul.mubr.msk.f32.gmra.mrb[88].mxu1 %vm2974_vm3, %v2796_v56  ;;  %v10329_v58 = vpop.f32.mrb[92].mxu0 }
 0x21d   : > { %10634 = vmatprep.mubr.msk.f32.mxu1 %vm2974_vm3, %v2797_v55  ;;  %v2061_v59 = vadd.f32 %v10329_v58, %v12124_v2  ;;  %v2052_v60 = vpop.f32.mrb[93].mxu0  ;;  %v12419_v58 = vld [vmem:[#allocation4] ss:$0 sm:$0xff] }
 0x21e   : > { %v2053_v61 = vadd.f32 %v12124_v2, %v2052_v60  ;;  %v10330_v62 = vpop.f32.mrb[94].mxu0 }
 0x21f   : > { %v2055_v63 = vpop.f32.mrb[95].mxu0  ;;  %v2064_v1 = vadd.f32 %v10330_v62, %v12124_v2  ;;  %v2801_v4 = vmax.f32 %v2061_v59, 0.0 }
 0x220   : > { %10635 = vmatmul.mubr.msk.f32.gmra.mrb[90].mxu1 %vm2974_vm3, %v2798_v57  ;;  %v2799_v0 = vmax.f32 %v2053_v61, 0.0  ;;  %v2056_v3 = vadd.f32 %v12124_v2, %v2055_v63 }
 0x221   : > { %v2802_v6 = vmax.f32 %v2064_v1, 0.0 }
 0x222   : > { %v2800_v5 = vmax.f32 %v2056_v3, 0.0  ;;  %10637 = vmatprep.mubr.msk.f32.mxu1 %vm2974_vm3, %v2799_v0 }
 0x224   : > { %10638 = vmatmul.mubr.msk.f32.gmra.mrb[92].mxu1 %vm2974_vm3, %v2800_v5  ;;  %v10333_v7 = vpop.f32.mrb[96].mxu0 }
 0x225   : > { %10640 = vmatprep.mubr.msk.f32.mxu1 %vm2974_vm3, %v2801_v4  ;;  %v2077_v8 = vadd.f32 %v10333_v7, %v12124_v2  ;;  %v2068_v9 = vpop.f32.mrb[97].mxu0 }
 0x226   : > { %v2069_v11 = vadd.f32 %v12124_v2, %v2068_v9  ;;  %v10334_v12 = vpop.f32.mrb[98].mxu0 }
 0x227   : > { %v2071_v14 = vpop.f32.mrb[99].mxu0  ;;  %v2080_v16 = vadd.f32 %v10334_v12, %v12124_v2  ;;  %v2805_v18 = vmax.f32 %v2077_v8, 0.0  ;;  %v11044_v8 = vld [vmem:[%s12000_s10 + $0x2d0] sm:$0xff]  }
 0x228   : > { %10641 = vmatmul.mubr.msk.f32.gmra.mrb[94].mxu1 %vm2974_vm3, %v2802_v6  ;;  %v2803_v15 = vmax.f32 %v2069_v11, 0.0  ;;  %v2072_v17 = vadd.f32 %v12124_v2, %v2071_v14  ;;  %v11045_v14 = vld [vmem:[%s12000_s10 + $0x2d8] sm:$0xff]   ;;  %10415 = vmatprep.mubr.msk.bf16.mxu0 %vm1258_vm2, %v11044_v8 }
 0x229   : > { %v2806_v20 = vmax.f32 %v2080_v16, 0.0  ;;  %10416 = vmatmul.mubr.msk.bf16.gmra.mrb[180].mxu0 %vm1258_vm2, %v11045_v14 }
 0x22a   : > { %v2804_v19 = vmax.f32 %v2072_v17, 0.0  ;;  %10643 = vmatprep.mubr.msk.f32.mxu1 %vm2974_vm3, %v2803_v15 }
 0x22c   : > { %10644 = vmatmul.mubr.msk.f32.gmra.mrb[96].mxu1 %vm2974_vm3, %v2804_v19  ;;  %v10337_v21 = vpop.f32.mrb[100].mxu0 }
 0x22d   : > { %10646 = vmatprep.mubr.msk.f32.mxu1 %vm2974_vm3, %v2805_v18  ;;  %v2093_v22 = vadd.f32 %v10337_v21, %v12124_v2  ;;  %v2084_v23 = vpop.f32.mrb[101].mxu0 }
 0x22e   : > { %v2085_v24 = vadd.f32 %v12124_v2, %v2084_v23  ;;  %v10338_v25 = vpop.f32.mrb[102].mxu0 }
 0x22f   : > { %v2087_v26 = vpop.f32.mrb[103].mxu0  ;;  %v2096_v28 = vadd.f32 %v10338_v25, %v12124_v2  ;;  %v2809_v30 = vmax.f32 %v2093_v22, 0.0 }
 0x230   : > { %10647 = vmatmul.mubr.msk.f32.gmra.mrb[98].mxu1 %vm2974_vm3, %v2806_v20  ;;  %v2807_v27 = vmax.f32 %v2085_v24, 0.0  ;;  %v2088_v29 = vadd.f32 %v12124_v2, %v2087_v26 }
 0x231   : > { %v2810_v32 = vmax.f32 %v2096_v28, 0.0 }
 0x232   : > { %v2808_v31 = vmax.f32 %v2088_v29, 0.0  ;;  %10649 = vmatprep.mubr.msk.f32.mxu1 %vm2974_vm3, %v2807_v27 }
 0x234   : > { %10650 = vmatmul.mubr.msk.f32.gmra.mrb[100].mxu1 %vm2974_vm3, %v2808_v31  ;;  %v10341_v33 = vpop.f32.mrb[104].mxu0 }
 0x235   : > { %10652 = vmatprep.mubr.msk.f32.mxu1 %vm2974_vm3, %v2809_v30  ;;  %v2109_v34 = vadd.f32 %v10341_v33, %v12124_v2  ;;  %v2100_v35 = vpop.f32.mrb[105].mxu0 }
 0x236   : > { %v2101_v37 = vadd.f32 %v12124_v2, %v2100_v35  ;;  %v10342_v38 = vpop.f32.mrb[106].mxu0 }
 0x237   : > { %v2103_v40 = vpop.f32.mrb[107].mxu0  ;;  %v2112_v42 = vadd.f32 %v10342_v38, %v12124_v2  ;;  %v2813_v44 = vmax.f32 %v2109_v34, 0.0 }
 0x238   : > { %10653 = vmatmul.mubr.msk.f32.gmra.mrb[102].mxu1 %vm2974_vm3, %v2810_v32  ;;  %v2811_v41 = vmax.f32 %v2101_v37, 0.0  ;;  %v2104_v43 = vadd.f32 %v12124_v2, %v2103_v40 }
 0x239   : > { %v2814_v46 = vmax.f32 %v2112_v42, 0.0 }
 0x23a   : > { %v2812_v45 = vmax.f32 %v2104_v43, 0.0  ;;  %10655 = vmatprep.mubr.msk.f32.mxu1 %vm2974_vm3, %v2811_v41 }
 0x23c   : > { %10656 = vmatmul.mubr.msk.f32.gmra.mrb[104].mxu1 %vm2974_vm3, %v2812_v45  ;;  %v10345_v47 = vpop.f32.mrb[108].mxu0 }
 0x23d   : > { %10658 = vmatprep.mubr.msk.f32.mxu1 %vm2974_vm3, %v2813_v44  ;;  %v2125_v49 = vadd.f32 %v10345_v47, %v12124_v2  ;;  %v2116_v50 = vpop.f32.mrb[109].mxu0 }
 0x23e   : > { %v2117_v51 = vadd.f32 %v12124_v2, %v2116_v50  ;;  %v10346_v52 = vpop.f32.mrb[110].mxu0 }
 0x23f   : > { %v10501_v53 = vpop.f32.mrb[0].mxu1  ;;  %v2119_v54 = vpop.f32.mrb[111].mxu0  ;;  %v2128_v59 = vadd.f32 %v12419_v58, %v10346_v52  ;;  %v2817_v61 = vmax.f32 %v2125_v49, 0.0 }
 0x240   : > { %v12416_v55 = vadd.f32 %v10501_v53, %v12410_v48  ;;  %v3809_v56 = vpop.f32.mrb[1].mxu1  ;;  %10659 = vmatmul.mubr.msk.f32.gmra.mrb[106].mxu1 %vm2974_vm3, %v2814_v46  ;;  %v2815_v57 = vmax.f32 %v2117_v51, 0.0  ;;  %v2120_v60 = vadd.f32 %v12419_v58, %v2119_v54 }
 0x241   : > { %v12424_v2 = vadd.f32 %v12410_v48, %v3809_v56  ;;  %v2818_v4 = vmax.f32 %v2128_v59, 0.0 }
 0x242   : > { %v5092_v62 = vsel %vm5088_vm4, %v12416_v55, 0.0  ;;  %v2816_v63 = vmax.f32 %v2120_v60, 0.0  ;;  %10661 = vmatprep.mubr.msk.f32.mxu1 %vm2974_vm3, %v2815_v57 }
 0x243   : > { %5093 = vadd.xlane.f32.xlu0 %v5092_v62  ;;  %v10504_v0 = vpop.f32.mrb[2].mxu1  ;;  %v5089_v11 = vsel %vm5088_vm4, %v12424_v2, 0.0 }
 0x244   : > { %v12430_v1 = vadd.f32 %v10504_v0, %v12410_v48  ;;  %v3819_v3 = vpop.f32.mrb[3].mxu1  ;;  %10662 = vmatmul.mubr.msk.f32.gmra.mrb[108].mxu1 %vm2974_vm3, %v2816_v63  ;;  %v10349_v5 = vpop.f32.mrb[112].mxu0 }
 0x245   : > { %10664 = vmatprep.mubr.msk.f32.mxu1 %vm2974_vm3, %v2817_v61  ;;  %v2141_v6 = vadd.f32 %v12419_v58, %v10349_v5  ;;  %v2132_v7 = vpop.f32.mrb[113].mxu0  ;;  %v12437_v9 = vadd.f32 %v12410_v48, %v3819_v3  ;;  %v11046_v3 = vld [vmem:[%s12000_s10 + $0x2e0] sm:$0xff]  }
 0x246   : > { %v5098_v10 = vsel %vm5088_vm4, %v12430_v1, 0.0  ;;  %v2133_v12 = vadd.f32 %v12419_v58, %v2132_v7  ;;  %v10350_v13 = vpop.f32.mrb[114].mxu0  ;;  %v11047_v7 = vld [vmem:[%s12000_s10 + $0x2e8] sm:$0xff]   ;;  %10419 = vmatprep.mubr.msk.bf16.mxu0 %vm1258_vm2, %v11046_v3  ;;  %v11048_v3 = vld [vmem:[%s12000_s10 + $0x2f0] sm:$0xff]  }
 0x247   : > { %5099 = vadd.xlane.f32.xlu1 %v5098_v10  ;;  %v10507_v15 = vpop.f32.mrb[4].mxu1  ;;  %5090 = vadd.xlane.f32.xlu0 %v5089_v11  ;;  %v2135_v16 = vpop.f32.mrb[115].mxu0  ;;  %v2144_v19 = vadd.f32 %v12419_v58, %v10350_v13  ;;  %v2821_v22 = vmax.f32 %v2141_v6, 0.0  ;;  %v5095_v24 = vsel %vm5088_vm4, %v12437_v9, 0.0 }
 0x248   : > { %v3829_v17 = vpop.f32.mrb[5].mxu1  ;;  %10665 = vmatmul.mubr.msk.f32.gmra.mrb[110].mxu1 %vm2974_vm3, %v2818_v4  ;;  %v2819_v18 = vmax.f32 %v2133_v12, 0.0  ;;  %v2136_v20 = vadd.f32 %v12419_v58, %v2135_v16  ;;  %v12454_v23 = vadd.f32 %v10507_v15, %v12410_v48  ;;  %10420 = vmatmul.mubr.msk.bf16.gmra.mrb[184].mxu0 %vm1258_vm2, %v11047_v7  ;;  %v11049_v7 = vld [vmem:[%s12000_s10 + $0x2f8] sm:$0xff]  }
 0x249   : > { %v12450_v21 = vadd.f32 %v12410_v48, %v3829_v17  ;;  %v2822_v29 = vmax.f32 %v2144_v19, 0.0  ;;  %10423 = vmatprep.mubr.msk.bf16.mxu0 %vm1258_vm2, %v11048_v3 }
 0x24a   : > { %v2820_v25 = vmax.f32 %v2136_v20, 0.0  ;;  %10667 = vmatprep.mubr.msk.f32.mxu1 %vm2974_vm3, %v2819_v18  ;;  %v5104_v35 = vsel %vm5088_vm4, %v12454_v23, 0.0 }
 0x24b   : > { %v10510_v26 = vpop.f32.mrb[6].mxu1  ;;  %5096 = vadd.xlane.f32.xlu1 %v5095_v24  ;;  %v5101_v27 = vsel %vm5088_vm4, %v12450_v21, 0.0 }
 0x24c   : > { %v3839_v28 = vpop.f32.mrb[7].mxu1  ;;  %5102 = vadd.xlane.f32.xlu0 %v5101_v27  ;;  %10668 = vmatmul.mubr.msk.f32.gmra.mrb[112].mxu1 %vm2974_vm3, %v2820_v25  ;;  %v10353_v30 = vpop.f32.mrb[116].mxu0  ;;  %v12468_v34 = vadd.f32 %v10510_v26, %v12410_v48 }
 0x24d   : > { %v12463_v31 = vadd.f32 %v12410_v48, %v3839_v28  ;;  %10670 = vmatprep.mubr.msk.f32.mxu1 %vm2974_vm3, %v2821_v22  ;;  %v2157_v32 = vadd.f32 %v12419_v58, %v10353_v30  ;;  %v2148_v33 = vpop.f32.mrb[117].mxu0 }
 0x24e   : > { %v2149_v36 = vadd.f32 %v12419_v58, %v2148_v33  ;;  %v10354_v37 = vpop.f32.mrb[118].mxu0  ;;  %v5110_v49 = vsel %vm5088_vm4, %v12468_v34, 0.0 }
 0x24f   : > { %v10513_v38 = vpop.f32.mrb[8].mxu1  ;;  %5105 = vadd.xlane.f32.xlu1 %v5104_v35  ;;  %v5107_v39 = vsel %vm5088_vm4, %v12463_v31, 0.0  ;;  %v2151_v40 = vpop.f32.mrb[119].mxu0  ;;  %v2160_v43 = vadd.f32 %v12419_v58, %v10354_v37  ;;  %v2825_v46 = vmax.f32 %v2157_v32, 0.0 }
 0x250   : > { %v3849_v41 = vpop.f32.mrb[9].mxu1  ;;  %5108 = vadd.xlane.f32.xlu0 %v5107_v39  ;;  %10671 = vmatmul.mubr.msk.f32.gmra.mrb[114].mxu1 %vm2974_vm3, %v2822_v29  ;;  %v2823_v42 = vmax.f32 %v2149_v36, 0.0  ;;  %v2152_v44 = vadd.f32 %v12419_v58, %v2151_v40  ;;  %v12482_v47 = vadd.f32 %v10513_v38, %v12410_v48 }
 0x251   : > { %v12479_v45 = vadd.f32 %v12410_v48, %v3849_v41  ;;  %v2826_v54 = vmax.f32 %v2160_v43, 0.0  ;;  %10424 = vmatmul.mubr.msk.bf16.gmra.mrb[188].mxu0 %vm1258_vm2, %v11049_v7 }
 0x252   : > { %v2824_v50 = vmax.f32 %v2152_v44, 0.0  ;;  %10673 = vmatprep.mubr.msk.f32.mxu1 %vm2974_vm3, %v2823_v42  ;;  %v5116_v62 = vsel %vm5088_vm4, %v12482_v47, 0.0 }
 0x253   : > { %v10516_v51 = vpop.f32.mrb[10].mxu1  ;;  %5111 = vadd.xlane.f32.xlu1 %v5110_v49  ;;  %v5113_v52 = vsel %vm5088_vm4, %v12479_v45, 0.0 }
 0x254   : > { %v3859_v53 = vpop.f32.mrb[11].mxu1  ;;  %5114 = vadd.xlane.f32.xlu0 %v5113_v52  ;;  %10674 = vmatmul.mubr.msk.f32.gmra.mrb[116].mxu1 %vm2974_vm3, %v2824_v50  ;;  %v10357_v56 = vpop.f32.mrb[120].mxu0  ;;  %v12496_v61 = vadd.f32 %v10516_v51, %v12410_v48 }
 0x255   : > { %v12491_v57 = vadd.f32 %v12410_v48, %v3859_v53  ;;  %10676 = vmatprep.mubr.msk.f32.mxu1 %vm2974_vm3, %v2825_v46  ;;  %v2173_v59 = vadd.f32 %v12419_v58, %v10357_v56  ;;  %v2164_v60 = vpop.f32.mrb[121].mxu0 }
 0x256   : > { %v2165_v63 = vadd.f32 %v12419_v58, %v2164_v60  ;;  %v10358_v0 = vpop.f32.mrb[122].mxu0  ;;  %v5122_v16 = vsel %vm5088_vm4, %v12496_v61, 0.0 }
 0x257   : > { %v10519_v4 = vpop.f32.mrb[12].mxu1  ;;  %5117 = vadd.xlane.f32.xlu1 %v5116_v62  ;;  %v5119_v5 = vsel %vm5088_vm4, %v12491_v57, 0.0  ;;  %v2167_v6 = vpop.f32.mrb[123].mxu0  ;;  %v2176_v11 = vadd.f32 %v12419_v58, %v10358_v0  ;;  %v2829_v14 = vmax.f32 %v2173_v59, 0.0 }
 0x258   : > { %v3869_v8 = vpop.f32.mrb[13].mxu1  ;;  %5120 = vadd.xlane.f32.xlu0 %v5119_v5  ;;  %10677 = vmatmul.mubr.msk.f32.gmra.mrb[118].mxu1 %vm2974_vm3, %v2826_v54  ;;  %v2827_v10 = vmax.f32 %v2165_v63, 0.0  ;;  %v2168_v12 = vadd.f32 %v12419_v58, %v2167_v6  ;;  %v12513_v15 = vadd.f32 %v10519_v4, %v12410_v48 }
 0x259   : > { %v12509_v13 = vadd.f32 %v12410_v48, %v3869_v8  ;;  %v2830_v22 = vmax.f32 %v2176_v11, 0.0 }
 0x25a   : > { %v2828_v17 = vmax.f32 %v2168_v12, 0.0  ;;  %10679 = vmatprep.mubr.msk.f32.mxu1 %vm2974_vm3, %v2827_v10  ;;  %v5128_v29 = vsel %vm5088_vm4, %v12513_v15, 0.0 }
 0x25b   : > { %v10522_v18 = vpop.f32.mrb[14].mxu1  ;;  %5123 = vadd.xlane.f32.xlu1 %v5122_v16  ;;  %v5125_v19 = vsel %vm5088_vm4, %v12509_v13, 0.0 }
 0x25c   : > { %v3879_v20 = vpop.f32.mrb[15].mxu1  ;;  %5126 = vadd.xlane.f32.xlu0 %v5125_v19  ;;  %10680 = vmatmul.mubr.msk.f32.gmra.mrb[120].mxu1 %vm2974_vm3, %v2828_v17  ;;  %v10361_v24 = vpop.f32.mrb[124].mxu0  ;;  %v12528_v28 = vadd.f32 %v10522_v18, %v12410_v48 }
 0x25d   : > { %v12523_v25 = vadd.f32 %v12410_v48, %v3879_v20  ;;  %10682 = vmatprep.mubr.msk.f32.mxu1 %vm2974_vm3, %v2829_v14  ;;  %v2189_v26 = vadd.f32 %v12419_v58, %v10361_v24  ;;  %v2180_v27 = vpop.f32.mrb[125].mxu0 }
 0x25e   : > { %v2181_v30 = vadd.f32 %v12419_v58, %v2180_v27  ;;  %v10362_v32 = vpop.f32.mrb[126].mxu0  ;;  %v5134_v44 = vsel %vm5088_vm4, %v12528_v28, 0.0 }
 0x25f   : > { %v10525_v33 = vpop.f32.mrb[16].mxu1  ;;  %5129 = vadd.xlane.f32.xlu1 %v5128_v29  ;;  %v5131_v35 = vsel %vm5088_vm4, %v12523_v25, 0.0  ;;  %v2183_v36 = vpop.f32.mrb[127].mxu0  ;;  %v2192_v39 = vadd.f32 %v12419_v58, %v10362_v32  ;;  %v2833_v42 = vmax.f32 %v2189_v26, 0.0 }
 0x260   : > { %v3889_v37 = vpop.f32.mrb[17].mxu1  ;;  %5132 = vadd.xlane.f32.xlu0 %v5131_v35  ;;  %10683 = vmatmul.mubr.msk.f32.gmra.mrb[122].mxu1 %vm2974_vm3, %v2830_v22  ;;  %v2831_v38 = vmax.f32 %v2181_v30, 0.0  ;;  %v2184_v40 = vadd.f32 %v12419_v58, %v2183_v36  ;;  %v12542_v43 = vadd.f32 %v10525_v33, %v12410_v48 }
 0x261   : > { %v12539_v41 = vadd.f32 %v12410_v48, %v3889_v37  ;;  %v2834_v52 = vmax.f32 %v2192_v39, 0.0 }
 0x262   : > { %v2832_v46 = vmax.f32 %v2184_v40, 0.0  ;;  %10685 = vmatprep.mubr.msk.f32.mxu1 %vm2974_vm3, %v2831_v38  ;;  %v5140_v62 = vsel %vm5088_vm4, %v12542_v43, 0.0 }
 0x263   : > { %v10528_v49 = vpop.f32.mrb[18].mxu1  ;;  %5135 = vadd.xlane.f32.xlu1 %v5134_v44  ;;  %v5137_v50 = vsel %vm5088_vm4, %v12539_v41, 0.0 }
 0x264   : > { %v3899_v51 = vpop.f32.mrb[19].mxu1  ;;  %5138 = vadd.xlane.f32.xlu0 %v5137_v50  ;;  %10686 = vmatmul.mubr.msk.f32.gmra.mrb[124].mxu1 %vm2974_vm3, %v2832_v46  ;;  %v10365_v53 = vpop.f32.mrb[128].mxu0  ;;  %v12556_v60 = vadd.f32 %v10528_v49, %v12410_v48 }
 0x265   : > { %v12551_v54 = vadd.f32 %v12410_v48, %v3899_v51  ;;  %10688 = vmatprep.mubr.msk.f32.mxu1 %vm2974_vm3, %v2833_v42  ;;  %v2205_v56 = vadd.f32 %v12419_v58, %v10365_v53  ;;  %v2196_v59 = vpop.f32.mrb[129].mxu0 }
 0x266   : > { %v2197_v63 = vadd.f32 %v12419_v58, %v2196_v59  ;;  %v10366_v0 = vpop.f32.mrb[130].mxu0  ;;  %v5146_v18 = vsel %vm5088_vm4, %v12556_v60, 0.0 }
 0x267   : > { %v10531_v4 = vpop.f32.mrb[20].mxu1  ;;  %5141 = vadd.xlane.f32.xlu1 %v5140_v62  ;;  %v5143_v5 = vsel %vm5088_vm4, %v12551_v54, 0.0  ;;  %v2199_v6 = vpop.f32.mrb[131].mxu0  ;;  %v2208_v11 = vadd.f32 %v12419_v58, %v10366_v0  ;;  %v2837_v16 = vmax.f32 %v2205_v56, 0.0 }
 0x268   : > { %v3909_v8 = vpop.f32.mrb[21].mxu1  ;;  %5144 = vadd.xlane.f32.xlu0 %v5143_v5  ;;  %10689 = vmatmul.mubr.msk.f32.gmra.mrb[126].mxu1 %vm2974_vm3, %v2834_v52  ;;  %v2835_v10 = vmax.f32 %v2197_v63, 0.0  ;;  %v2200_v12 = vadd.f32 %v12419_v58, %v2199_v6  ;;  %v12573_v17 = vadd.f32 %v10531_v4, %v12410_v48 }
 0x269   : > { %v12569_v14 = vadd.f32 %v12410_v48, %v3909_v8  ;;  %v2838_v26 = vmax.f32 %v2208_v11, 0.0 }
 0x26a   : > { %v2836_v19 = vmax.f32 %v2200_v12, 0.0  ;;  %10691 = vmatprep.mubr.msk.f32.mxu1 %vm2974_vm3, %v2835_v10  ;;  %v5152_v35 = vsel %vm5088_vm4, %v12573_v17, 0.0  ;;  %v11050_v12 = vld [vmem:[%s12000_s10 + $0x300] sm:$0xff]  }
 0x26b   : > { %v10534_v20 = vpop.f32.mrb[22].mxu1  ;;  %5147 = vadd.xlane.f32.xlu1 %v5146_v18  ;;  %v5149_v22 = vsel %vm5088_vm4, %v12569_v14, 0.0  ;;  %10427 = vmatprep.mubr.msk.bf16.mxu0 %vm1258_vm2, %v11050_v12 }
 0x26c   : > { %v3919_v24 = vpop.f32.mrb[23].mxu1  ;;  %5150 = vadd.xlane.f32.xlu0 %v5149_v22  ;;  %10692 = vmatmul.mubr.msk.f32.gmra.mrb[128].mxu1 %vm2974_vm3, %v2836_v19  ;;  %v10369_v27 = vpop.f32.mrb[132].mxu0  ;;  %v12588_v33 = vadd.f32 %v10534_v20, %v12410_v48  ;;  %v11051_v20 = vld [vmem:[%s12000_s10 + $0x308] sm:$0xff]  }
 0x26d   : > { %v12583_v29 = vadd.f32 %v12410_v48, %v3919_v24  ;;  %10694 = vmatprep.mubr.msk.f32.mxu1 %vm2974_vm3, %v2837_v16  ;;  %v2221_v30 = vadd.f32 %v12419_v58, %v10369_v27  ;;  %v2212_v32 = vpop.f32.mrb[133].mxu0  ;;  %10428 = vmatmul.mubr.msk.bf16.gmra.mrb[192].mxu0 %vm1258_vm2, %v11051_v20 }
 0x26e   : > { %v2213_v36 = vadd.f32 %v12419_v58, %v2212_v32  ;;  %v10370_v37 = vpop.f32.mrb[134].mxu0  ;;  %v5158_v53 = vsel %vm5088_vm4, %v12588_v33, 0.0 }
 0x26f   : > { %v10537_v38 = vpop.f32.mrb[24].mxu1  ;;  %5153 = vadd.xlane.f32.xlu1 %v5152_v35  ;;  %v5155_v39 = vsel %vm5088_vm4, %v12583_v29, 0.0  ;;  %v2215_v40 = vpop.f32.mrb[135].mxu0  ;;  %v2224_v46 = vadd.f32 %v12419_v58, %v10370_v37  ;;  %v2841_v51 = vmax.f32 %v2221_v30, 0.0 }
 0x270   : > { %v3929_v42 = vpop.f32.mrb[25].mxu1  ;;  %5156 = vadd.xlane.f32.xlu0 %v5155_v39  ;;  %10695 = vmatmul.mubr.msk.f32.gmra.mrb[130].mxu1 %vm2974_vm3, %v2838_v26  ;;  %v2839_v44 = vmax.f32 %v2213_v36, 0.0  ;;  %v2216_v49 = vadd.f32 %v12419_v58, %v2215_v40  ;;  %v12602_v52 = vadd.f32 %v10537_v38, %v12410_v48 }
 0x271   : > { %v12599_v50 = vadd.f32 %v12410_v48, %v3929_v42  ;;  %v2842_v0 = vmax.f32 %v2224_v46, 0.0 }
 0x272   : > { %v2840_v56 = vmax.f32 %v2216_v49, 0.0  ;;  %10697 = vmatprep.mubr.msk.f32.mxu1 %vm2974_vm3, %v2839_v44  ;;  %v5164_v8 = vsel %vm5088_vm4, %v12602_v52, 0.0 }
 0x273   : > { %v10540_v59 = vpop.f32.mrb[26].mxu1  ;;  %5159 = vadd.xlane.f32.xlu1 %v5158_v53  ;;  %v5161_v62 = vsel %vm5088_vm4, %v12599_v50, 0.0 }
 0x274   : > { %v3939_v63 = vpop.f32.mrb[27].mxu1  ;;  %5162 = vadd.xlane.f32.xlu0 %v5161_v62  ;;  %10698 = vmatmul.mubr.msk.f32.gmra.mrb[132].mxu1 %vm2974_vm3, %v2840_v56  ;;  %v10373_v3 = vpop.f32.mrb[136].mxu0  ;;  %v12616_v7 = vadd.f32 %v10540_v59, %v12410_v48 }
 0x275   : > { %v12611_v4 = vadd.f32 %v12410_v48, %v3939_v63  ;;  %10700 = vmatprep.mubr.msk.f32.mxu1 %vm2974_vm3, %v2841_v51  ;;  %v2237_v5 = vadd.f32 %v12419_v58, %v10373_v3  ;;  %v2228_v6 = vpop.f32.mrb[137].mxu0 }
 0x276   : > { %v2229_v10 = vadd.f32 %v12419_v58, %v2228_v6  ;;  %v10374_v11 = vpop.f32.mrb[138].mxu0  ;;  %v5170_v36 = vsel %vm5088_vm4, %v12616_v7, 0.0 }
 0x277   : > { %v10543_v16 = vpop.f32.mrb[28].mxu1  ;;  %5165 = vadd.xlane.f32.xlu1 %v5164_v8  ;;  %v5167_v18 = vsel %vm5088_vm4, %v12611_v4, 0.0  ;;  %v2231_v19 = vpop.f32.mrb[139].mxu0  ;;  %v2240_v26 = vadd.f32 %v12419_v58, %v10374_v11  ;;  %v2845_v32 = vmax.f32 %v2237_v5, 0.0 }
 0x278   : > { %v3949_v22 = vpop.f32.mrb[29].mxu1  ;;  %5168 = vadd.xlane.f32.xlu0 %v5167_v18  ;;  %10701 = vmatmul.mubr.msk.f32.gmra.mrb[134].mxu1 %vm2974_vm3, %v2842_v0  ;;  %v2843_v24 = vmax.f32 %v2229_v10, 0.0  ;;  %v2232_v27 = vadd.f32 %v12419_v58, %v2231_v19  ;;  %v12633_v35 = vadd.f32 %v10543_v16, %v12410_v48 }
 0x279   : > { %v12629_v30 = vadd.f32 %v12410_v48, %v3949_v22  ;;  %v2846_v42 = vmax.f32 %v2240_v26, 0.0 }
 0x27a   : > { %v2844_v37 = vmax.f32 %v2232_v27, 0.0  ;;  %10703 = vmatprep.mubr.msk.f32.mxu1 %vm2974_vm3, %v2843_v24  ;;  %v5176_v56 = vsel %vm5088_vm4, %v12633_v35, 0.0 }
 0x27b   : > { %v10546_v38 = vpop.f32.mrb[30].mxu1  ;;  %5171 = vadd.xlane.f32.xlu1 %v5170_v36  ;;  %v5173_v39 = vsel %vm5088_vm4, %v12629_v30, 0.0 }
 0x27c   : > { %v3959_v40 = vpop.f32.mrb[31].mxu1  ;;  %5174 = vadd.xlane.f32.xlu0 %v5173_v39  ;;  %10704 = vmatmul.mubr.msk.f32.gmra.mrb[136].mxu1 %vm2974_vm3, %v2844_v37  ;;  %v10377_v44 = vpop.f32.mrb[140].mxu0  ;;  %v12648_v53 = vadd.f32 %v10546_v38, %v12410_v48  ;;  %v11052_v37 = vld [vmem:[%s12000_s10 + $0x310] sm:$0xff]  }
 0x27d   : > { %v12643_v46 = vadd.f32 %v12410_v48, %v3959_v40  ;;  %10706 = vmatprep.mubr.msk.f32.mxu1 %vm2974_vm3, %v2845_v32  ;;  %v2253_v49 = vadd.f32 %v12419_v58, %v10377_v44  ;;  %v2244_v51 = vpop.f32.mrb[141].mxu0  ;;  %v11053_v40 = vld [vmem:[%s12000_s10 + $0x318] sm:$0xff]   ;;  %10431 = vmatprep.mubr.msk.bf16.mxu0 %vm1258_vm2, %v11052_v37 }
 0x27e   : > { %18637 = vst [vmem:[#allocation13_spill] sm:$0xff] %v12648_v53  ;;  %v2245_v59 = vadd.f32 %v12419_v58, %v2244_v51  ;;  %v10378_v62 = vpop.f32.mrb[142].mxu0  ;;  %v5182_v18 = vsel %vm5088_vm4, %v12648_v53, 0.0  ;;  %10432 = vmatmul.mubr.msk.bf16.gmra.mrb[196].mxu0 %vm1258_vm2, %v11053_v40 }
 0x27f   : > { %v10549_v63 = vpop.f32.mrb[32].mxu1  ;;  %5177 = vadd.xlane.f32.xlu1 %v5176_v56  ;;  %v5179_v0 = vsel %vm5088_vm4, %v12643_v46, 0.0  ;;  %v2247_v3 = vpop.f32.mrb[143].mxu0  ;;  %v2849_v11 = vmax.f32 %v2253_v49, 0.0  ;;  %v2256_v12 = vadd.f32 %v12419_v58, %v10378_v62 }
 0x280   : > { %v3969_v5 = vpop.f32.mrb[33].mxu1  ;;  %5180 = vadd.xlane.f32.xlu0 %v5179_v0  ;;  %10707 = vmatmul.mubr.msk.f32.gmra.mrb[138].mxu1 %vm2974_vm3, %v2846_v42  ;;  %v2847_v6 = vmax.f32 %v2245_v59, 0.0  ;;  %v2248_v8 = vadd.f32 %v12419_v58, %v2247_v3  ;;  %v12662_v16 = vadd.f32 %v10549_v63, %v12410_v48 }
 0x281   : > { %v12658_v10 = vadd.f32 %v12410_v48, %v3969_v5  ;;  %v2850_v27 = vmax.f32 %v2256_v12, 0.0 }
 0x282   : > { %18639 = vst [vmem:[#allocation15_spill] sm:$0xff] %v12662_v16  ;;  %v2848_v19 = vmax.f32 %v2248_v8, 0.0  ;;  %10709 = vmatprep.mubr.msk.f32.mxu1 %vm2974_vm3, %v2847_v6  ;;  %v5188_v36 = vsel %vm5088_vm4, %v12662_v16, 0.0 }
 0x283   : > { %18638 = vst [vmem:[#allocation14_spill] sm:$0xff] %v12658_v10  ;;  %v10552_v20 = vpop.f32.mrb[34].mxu1  ;;  %5183 = vadd.xlane.f32.xlu1 %v5182_v18  ;;  %v5185_v22 = vsel %vm5088_vm4, %v12658_v10, 0.0 }
 0x284   : > { %v3979_v24 = vpop.f32.mrb[35].mxu1  ;;  %5186 = vadd.xlane.f32.xlu0 %v5185_v22  ;;  %10710 = vmatmul.mubr.msk.f32.gmra.mrb[140].mxu1 %vm2974_vm3, %v2848_v19  ;;  %v12675_v32 = vadd.f32 %v10552_v20, %v12410_v48  ;;  %v10381_v63 = vpop.f32.mrb[144].mxu0 }
 0x285   : > { %v12671_v26 = vadd.f32 %v12410_v48, %v3979_v24  ;;  %10712 = vmatprep.mubr.msk.f32.mxu1 %vm2974_vm3, %v2849_v11  ;;  %v2269_v3 = vadd.f32 %v12419_v58, %v10381_v63  ;;  %v2260_v5 = vpop.f32.mrb[145].mxu0 }
 0x286   : > { %18641 = vst [vmem:[#allocation17_spill] sm:$0xff] %v12675_v32  ;;  %v5194_v51 = vsel %vm5088_vm4, %v12675_v32, 0.0  ;;  %v2261_v11 = vadd.f32 %v12419_v58, %v2260_v5  ;;  %v10382_v12 = vpop.f32.mrb[146].mxu0 }
 0x287   : > { %18640 = vst [vmem:[#allocation16_spill] sm:$0xff] %v12671_v26  ;;  %v10555_v38 = vpop.f32.mrb[36].mxu1  ;;  %5189 = vadd.xlane.f32.xlu1 %v5188_v36  ;;  %v5191_v39 = vsel %vm5088_vm4, %v12671_v26, 0.0  ;;  %v2263_v20 = vpop.f32.mrb[147].mxu0  ;;  %v2853_v37 = vmax.f32 %v2269_v3, 0.0  ;;  %v11068_v26 = vld [vmem:[%s12000_s10 + $0x390] sm:$0xff]  }
 0x288   : > { %v3989_v42 = vpop.f32.mrb[37].mxu1  ;;  %5192 = vadd.xlane.f32.xlu0 %v5191_v39  ;;  %10713 = vmatmul.mubr.msk.f32.gmra.mrb[142].mxu1 %vm2974_vm3, %v2850_v27  ;;  %v12690_v49 = vadd.f32 %v10555_v38, %v12410_v48  ;;  %v2851_v24 = vmax.f32 %v2261_v11, 0.0  ;;  %v2264_v27 = vadd.f32 %v12419_v58, %v2263_v20  ;;  %v2272_v38 = vadd.f32 %v12419_v58, %v10382_v12 }
 0x289   : > { %v12685_v44 = vadd.f32 %v12410_v48, %v3989_v42 }
 0x28a   : > { %18643 = vst [vmem:[#allocation19_spill] sm:$0xff] %v12690_v49  ;;  %v5200_v8 = vsel %vm5088_vm4, %v12690_v49, 0.0  ;;  %v2852_v42 = vmax.f32 %v2264_v27, 0.0  ;;  %10715 = vmatprep.mubr.msk.f32.mxu1 %vm2974_vm3, %v2851_v24  ;;  %v2854_v63 = vmax.f32 %v2272_v38, 0.0 }
 0x28b   : > { %18642 = vst [vmem:[#allocation18_spill] sm:$0xff] %v12685_v44  ;;  %v10558_v56 = vpop.f32.mrb[38].mxu1  ;;  %5195 = vadd.xlane.f32.xlu1 %v5194_v51  ;;  %v5197_v59 = vsel %vm5088_vm4, %v12685_v44, 0.0 }
 0x28c   : > { %v3999_v62 = vpop.f32.mrb[39].mxu1  ;;  %5198 = vadd.xlane.f32.xlu0 %v5197_v59  ;;  %v12701_v6 = vadd.f32 %v10558_v56, %v12410_v48  ;;  %10716 = vmatmul.mubr.msk.f32.gmra.mrb[144].mxu1 %vm2974_vm3, %v2852_v42 }
 0x28d   : > { %v12697_v0 = vadd.f32 %v12410_v48, %v3999_v62  ;;  %10718 = vmatprep.mubr.msk.f32.mxu1 %vm2974_vm3, %v2853_v37 }
 0x28e   : > { %18645 = vst [vmem:[#allocation21_spill] sm:$0xff] %v12701_v6  ;;  %v5206_v40 = vsel %vm5088_vm4, %v12701_v6, 0.0 }
 0x28f   : > { %18644 = vst [vmem:[#allocation20_spill] sm:$0xff] %v12697_v0  ;;  %v10561_v18 = vpop.f32.mrb[40].mxu1  ;;  %5201 = vadd.xlane.f32.xlu1 %v5200_v8  ;;  %v5203_v19 = vsel %vm5088_vm4, %v12697_v0, 0.0  ;;  %v11054_v8 = vld [vmem:[%s12000_s10 + $0x320] sm:$0xff]  }
 0x290   : > { %v4009_v22 = vpop.f32.mrb[41].mxu1  ;;  %5204 = vadd.xlane.f32.xlu0 %v5203_v19  ;;  %v12714_v39 = vadd.f32 %v10561_v18, %v12410_v48  ;;  %v11055_v18 = vld [vmem:[%s12000_s10 + $0x328] sm:$0xff]   ;;  %10435 = vmatprep.mubr.msk.bf16.mxu0 %vm1258_vm2, %v11054_v8 }
 0x291   : > { %v12710_v36 = vadd.f32 %v12410_v48, %v4009_v22  ;;  %10719 = vmatmul.mubr.msk.f32.gmra.mrb[146].mxu1 %vm2974_vm3, %v2854_v63  ;;  %10436 = vmatmul.mubr.msk.bf16.gmra.mrb[200].mxu0 %vm1258_vm2, %v11055_v18 }
 0x292   : > { %18647 = vst [vmem:[#allocation23_spill] sm:$0xff] %v12714_v39  ;;  %v5212_v5 = vsel %vm5088_vm4, %v12714_v39, 0.0 }
 0x293   : > { %18646 = vst [vmem:[#allocation22_spill] sm:$0xff] %v12710_v36  ;;  %v10564_v51 = vpop.f32.mrb[42].mxu1  ;;  %5207 = vadd.xlane.f32.xlu1 %v5206_v40  ;;  %v5209_v56 = vsel %vm5088_vm4, %v12710_v36, 0.0  ;;  %v10385_v40 = vpop.f32.mrb[148].mxu0 }
 0x294   : > { %v4019_v59 = vpop.f32.mrb[43].mxu1  ;;  %5210 = vadd.xlane.f32.xlu0 %v5209_v56  ;;  %v12727_v3 = vadd.f32 %v10564_v51, %v12410_v48  ;;  %v2285_v51 = vadd.f32 %v12419_v58, %v10385_v40  ;;  %v2276_v56 = vpop.f32.mrb[149].mxu0 }
 0x295   : > { %v12723_v62 = vadd.f32 %v12410_v48, %v4019_v59  ;;  %v10386_v8 = vpop.f32.mrb[150].mxu0 }
 0x296   : > { %18649 = vst [vmem:[#allocation25_spill] sm:$0xff] %v12727_v3  ;;  %v5218_v24 = vsel %vm5088_vm4, %v12727_v3, 0.0  ;;  %v2279_v18 = vpop.f32.mrb[151].mxu0  ;;  %v2288_v40 = vadd.f32 %v12419_v58, %v10386_v8 }
 0x297   : > { %18648 = vst [vmem:[#allocation24_spill] sm:$0xff] %v12723_v62  ;;  %v10567_v11 = vpop.f32.mrb[44].mxu1  ;;  %5213 = vadd.xlane.f32.xlu1 %v5212_v5  ;;  %v5215_v12 = vsel %vm5088_vm4, %v12723_v62, 0.0  ;;  %v2277_v5 = vadd.f32 %v12419_v58, %v2276_v56 }
 0x298   : > { %v4029_v19 = vpop.f32.mrb[45].mxu1  ;;  %5216 = vadd.xlane.f32.xlu0 %v5215_v12  ;;  %v12742_v22 = vadd.f32 %v10567_v11, %v12410_v48  ;;  %v2858_v8 = vmax.f32 %v2288_v40, 0.0 }
 0x299   : > { %v12737_v20 = vadd.f32 %v12410_v48, %v4029_v19 }
 0x29a   : > { %18651 = vst [vmem:[#allocation27_spill] sm:$0xff] %v12742_v22  ;;  %v5224_v63 = vsel %vm5088_vm4, %v12742_v22, 0.0 }
 0x29b   : > { %18650 = vst [vmem:[#allocation26_spill] sm:$0xff] %v12737_v20  ;;  %v10570_v27 = vpop.f32.mrb[46].mxu1  ;;  %5219 = vadd.xlane.f32.xlu1 %v5218_v24  ;;  %v5221_v37 = vsel %vm5088_vm4, %v12737_v20, 0.0  ;;  %v2855_v24 = vmax.f32 %v2277_v5, 0.0 }
 0x29c   : > { %v4039_v38 = vpop.f32.mrb[47].mxu1  ;;  %5222 = vadd.xlane.f32.xlu0 %v5221_v37  ;;  %v12753_v59 = vadd.f32 %v10570_v27, %v12410_v48  ;;  %v2280_v37 = vadd.f32 %v12419_v58, %v2279_v18 }
 0x29d   : > { %v12749_v42 = vadd.f32 %v12410_v48, %v4039_v38  ;;  %v2857_v38 = vmax.f32 %v2285_v51, 0.0  ;;  %10721 = vmatprep.mubr.msk.f32.mxu1 %vm2974_vm3, %v2855_v24  ;;  %v11056_v24 = vld [vmem:[%s12000_s10 + $0x330] sm:$0xff]  }
 0x29e   : > { %18653 = vst [vmem:[#allocation29_spill] sm:$0xff] %v12753_v59  ;;  %10439 = vmatprep.mubr.msk.bf16.mxu0 %vm1258_vm2, %v11056_v24  ;;  %v10389_v24 = vpop.f32.mrb[152].mxu0 }
 0x29f   : > { %18652 = vst [vmem:[#allocation28_spill] sm:$0xff] %v12749_v42  ;;  %v10573_v11 = vpop.f32.mrb[48].mxu1  ;;  %5225 = vadd.xlane.f32.xlu1 %v5224_v63  ;;  %v5227_v12 = vsel %vm5088_vm4, %v12749_v42, 0.0  ;;  %v5230_v63 = vsel %vm5088_vm4, %v12753_v59, 0.0  ;;  %v2856_v42 = vmax.f32 %v2280_v37, 0.0 }
 0x2a0   : > { %v4049_v19 = vpop.f32.mrb[49].mxu1  ;;  %5228 = vadd.xlane.f32.xlu0 %v5227_v12  ;;  %v12766_v56 = vadd.f32 %v10573_v11, %v12410_v48 }
 0x2a1   : > { %v12762_v27 = vadd.f32 %v12410_v48, %v4049_v19  ;;  %10722 = vmatmul.mubr.msk.f32.gmra.mrb[148].mxu1 %vm2974_vm3, %v2856_v42 }
 0x2a2   : > { %18655 = vst [vmem:[#allocation31_spill] sm:$0xff] %v12766_v56  ;;  %10724 = vmatprep.mubr.msk.f32.mxu1 %vm2974_vm3, %v2857_v38  ;;  %v5236_v19 = vsel %vm5088_vm4, %v12766_v56, 0.0 }
 0x2a3   : > { %18654 = vst [vmem:[#allocation30_spill] sm:$0xff] %v12762_v27  ;;  %v10576_v5 = vpop.f32.mrb[50].mxu1  ;;  %5231 = vadd.xlane.f32.xlu1 %v5230_v63  ;;  %v5233_v12 = vsel %vm5088_vm4, %v12762_v27, 0.0 }
 0x2a4   : > { %v4059_v18 = vpop.f32.mrb[51].mxu1  ;;  %5234 = vadd.xlane.f32.xlu0 %v5233_v12  ;;  %v12779_v11 = vadd.f32 %v10576_v5, %v12410_v48  ;;  %v11057_v12 = vld [vmem:[%s12000_s10 + $0x338] sm:$0xff]  }
 0x2a5   : > { %v12775_v51 = vadd.f32 %v12410_v48, %v4059_v18  ;;  %10725 = vmatmul.mubr.msk.f32.gmra.mrb[150].mxu1 %vm2974_vm3, %v2858_v8  ;;  %10440 = vmatmul.mubr.msk.bf16.gmra.mrb[204].mxu0 %vm1258_vm2, %v11057_v12  ;;  %v2301_v8 = vadd.f32 %v12419_v58, %v10389_v24  ;;  %v2292_v12 = vpop.f32.mrb[153].mxu0 }
 0x2a6   : > { %18657 = vst [vmem:[#allocation33_spill] sm:$0xff] %v12779_v11  ;;  %v5242_v5 = vsel %vm5088_vm4, %v12779_v11, 0.0 }
 0x2a7   : > { %18656 = vst [vmem:[#allocation32_spill] sm:$0xff] %v12775_v51  ;;  %v10579_v37 = vpop.f32.mrb[52].mxu1  ;;  %5237 = vadd.xlane.f32.xlu1 %v5236_v19  ;;  %v5239_v63 = vsel %vm5088_vm4, %v12775_v51, 0.0  ;;  %v10390_v51 = vpop.f32.mrb[154].mxu0  ;;  %v2861_v59 = vmax.f32 %v2301_v8, 0.0 }
 0x2a8   : > { %v4069_v42 = vpop.f32.mrb[53].mxu1  ;;  %5240 = vadd.xlane.f32.xlu0 %v5239_v63  ;;  %v12794_v38 = vadd.f32 %v10579_v37, %v12410_v48 }
 0x2a9   : > { %v12789_v40 = vadd.f32 %v12410_v48, %v4069_v42 }
 0x2aa   : > { %18659 = vst [vmem:[#allocation35_spill] sm:$0xff] %v12794_v38  ;;  %v5248_v11 = vsel %vm5088_vm4, %v12794_v38, 0.0  ;;  %v2304_v38 = vadd.f32 %v12419_v58, %v10390_v51 }
 0x2ab   : > { %18658 = vst [vmem:[#allocation34_spill] sm:$0xff] %v12789_v40  ;;  %v10582_v18 = vpop.f32.mrb[54].mxu1  ;;  %5243 = vadd.xlane.f32.xlu1 %v5242_v5  ;;  %v5245_v19 = vsel %vm5088_vm4, %v12789_v40, 0.0  ;;  %v2293_v5 = vadd.f32 %v12419_v58, %v2292_v12  ;;  %v2295_v40 = vpop.f32.mrb[155].mxu0 }
 0x2ac   : > { %v4079_v63 = vpop.f32.mrb[55].mxu1  ;;  %5246 = vadd.xlane.f32.xlu0 %v5245_v19  ;;  %v12805_v37 = vadd.f32 %v10582_v18, %v12410_v48  ;;  %v2296_v24 = vadd.f32 %v12419_v58, %v2295_v40 }
 0x2ad   : > { %v12801_v42 = vadd.f32 %v12410_v48, %v4079_v63  ;;  %v2859_v27 = vmax.f32 %v2293_v5, 0.0 }
 0x2ae   : > { %18661 = vst [vmem:[#allocation37_spill] sm:$0xff] %v12805_v37 }
 0x2af   : > { %18660 = vst [vmem:[#allocation36_spill] sm:$0xff] %v12801_v42  ;;  %v10585_v56 = vpop.f32.mrb[56].mxu1  ;;  %5249 = vadd.xlane.f32.xlu1 %v5248_v11  ;;  %v5251_v19 = vsel %vm5088_vm4, %v12801_v42, 0.0  ;;  %v5254_v11 = vsel %vm5088_vm4, %v12805_v37, 0.0  ;;  %v2860_v42 = vmax.f32 %v2296_v24, 0.0  ;;  %10727 = vmatprep.mubr.msk.f32.mxu1 %vm2974_vm3, %v2859_v27 }
 0x2b0   : > { %v4089_v63 = vpop.f32.mrb[57].mxu1  ;;  %5252 = vadd.xlane.f32.xlu0 %v5251_v19  ;;  %v12818_v12 = vadd.f32 %v10585_v56, %v12410_v48  ;;  %v2862_v56 = vmax.f32 %v2304_v38, 0.0 }
 0x2b1   : > { %v12814_v18 = vadd.f32 %v12410_v48, %v4089_v63  ;;  %10728 = vmatmul.mubr.msk.f32.gmra.mrb[152].mxu1 %vm2974_vm3, %v2860_v42  ;;  %v11058_v63 = vld [vmem:[%s12000_s10 + $0x340] sm:$0xff]  }
 0x2b2   : > { %18663 = vst [vmem:[#allocation39_spill] sm:$0xff] %v12818_v12  ;;  %10730 = vmatprep.mubr.msk.f32.mxu1 %vm2974_vm3, %v2861_v59  ;;  %v5260_v27 = vsel %vm5088_vm4, %v12818_v12, 0.0  ;;  %10443 = vmatprep.mubr.msk.bf16.mxu0 %vm1258_vm2, %v11058_v63  ;;  %v10393_v63 = vpop.f32.mrb[156].mxu0 }
 0x2b3   : > { %18662 = vst [vmem:[#allocation38_spill] sm:$0xff] %v12814_v18  ;;  %v10588_v5 = vpop.f32.mrb[58].mxu1  ;;  %5255 = vadd.xlane.f32.xlu1 %v5254_v11  ;;  %v5257_v40 = vsel %vm5088_vm4, %v12814_v18, 0.0 }
 0x2b4   : > { %v4099_v19 = vpop.f32.mrb[59].mxu1  ;;  %5258 = vadd.xlane.f32.xlu0 %v5257_v40  ;;  %v12831_v8 = vadd.f32 %v10588_v5, %v12410_v48  ;;  %v11059_v40 = vld [vmem:[%s12000_s10 + $0x348] sm:$0xff]  }
 0x2b5   : > { %v12827_v51 = vadd.f32 %v12410_v48, %v4099_v19  ;;  %10731 = vmatmul.mubr.msk.f32.gmra.mrb[154].mxu1 %vm2974_vm3, %v2862_v56  ;;  %10444 = vmatmul.mubr.msk.bf16.gmra.mrb[208].mxu0 %vm1258_vm2, %v11059_v40  ;;  %v2317_v56 = vadd.f32 %v12419_v58, %v10393_v63  ;;  %v2308_v40 = vpop.f32.mrb[157].mxu0 }
 0x2b6   : > { %18665 = vst [vmem:[#allocation41_spill] sm:$0xff] %v12831_v8  ;;  %v5266_v5 = vsel %vm5088_vm4, %v12831_v8, 0.0 }
 0x2b7   : > { %18664 = vst [vmem:[#allocation40_spill] sm:$0xff] %v12827_v51  ;;  %v10591_v24 = vpop.f32.mrb[60].mxu1  ;;  %5261 = vadd.xlane.f32.xlu1 %v5260_v27  ;;  %v5263_v11 = vsel %vm5088_vm4, %v12827_v51, 0.0  ;;  %v10394_v51 = vpop.f32.mrb[158].mxu0  ;;  %v2865_v37 = vmax.f32 %v2317_v56, 0.0  ;;  %v11060_v56 = vld [vmem:[%s12000_s10 + $0x350] sm:$0xff]  }
 0x2b8   : > { %v4109_v42 = vpop.f32.mrb[61].mxu1  ;;  %5264 = vadd.xlane.f32.xlu0 %v5263_v11  ;;  %v12846_v59 = vadd.f32 %v10591_v24, %v12410_v48  ;;  %10447 = vmatprep.mubr.msk.bf16.mxu0 %vm1258_vm2, %v11060_v56 }
 0x2b9   : > { %v12841_v38 = vadd.f32 %v12410_v48, %v4109_v42 }
 0x2ba   : > { %18667 = vst [vmem:[#allocation43_spill] sm:$0xff] %v12846_v59  ;;  %v5272_v8 = vsel %vm5088_vm4, %v12846_v59, 0.0  ;;  %v2320_v59 = vadd.f32 %v12419_v58, %v10394_v51 }
 0x2bb   : > { %18666 = vst [vmem:[#allocation42_spill] sm:$0xff] %v12841_v38  ;;  %v10594_v19 = vpop.f32.mrb[62].mxu1  ;;  %5267 = vadd.xlane.f32.xlu1 %v5266_v5  ;;  %v5269_v27 = vsel %vm5088_vm4, %v12841_v38, 0.0  ;;  %v2309_v5 = vadd.f32 %v12419_v58, %v2308_v40  ;;  %v2311_v38 = vpop.f32.mrb[159].mxu0 }
 0x2bc   : > { %v4119_v11 = vpop.f32.mrb[63].mxu1  ;;  %5270 = vadd.xlane.f32.xlu0 %v5269_v27  ;;  %v12857_v24 = vadd.f32 %v10594_v19, %v12410_v48  ;;  %v2312_v63 = vadd.f32 %v12419_v58, %v2311_v38  ;;  %v10397_v56 = vpop.f32.mrb[160].mxu0 }
 0x2bd   : > { %v12853_v42 = vadd.f32 %v12410_v48, %v4119_v11  ;;  %v2863_v18 = vmax.f32 %v2309_v5, 0.0 }
 0x2be   : > { %18669 = vst [vmem:[#allocation45_spill] sm:$0xff] %v12857_v24 }
 0x2bf   : > { %18668 = vst [vmem:[#allocation44_spill] sm:$0xff] %v12853_v42  ;;  %v10597_v12 = vpop.f32.mrb[64].mxu1  ;;  %5273 = vadd.xlane.f32.xlu1 %v5272_v8  ;;  %v5275_v27 = vsel %vm5088_vm4, %v12853_v42, 0.0  ;;  %v5278_v8 = vsel %vm5088_vm4, %v12857_v24, 0.0  ;;  %v2864_v42 = vmax.f32 %v2312_v63, 0.0  ;;  %10733 = vmatprep.mubr.msk.f32.mxu1 %vm2974_vm3, %v2863_v18 }
 0x2c0   : > { %v4129_v11 = vpop.f32.mrb[65].mxu1  ;;  %5276 = vadd.xlane.f32.xlu0 %v5275_v27  ;;  %v12870_v40 = vadd.f32 %v10597_v12, %v12410_v48  ;;  %v2866_v12 = vmax.f32 %v2320_v59, 0.0  ;;  %v12892_v59 = vld [vmem:[#allocation6] ss:$0 sm:$0xff] }
 0x2c1   : > { %v12866_v19 = vadd.f32 %v12410_v48, %v4129_v11  ;;  %10734 = vmatmul.mubr.msk.f32.gmra.mrb[156].mxu1 %vm2974_vm3, %v2864_v42 }
 0x2c2   : > { %18671 = vst [vmem:[#allocation47_spill] sm:$0xff] %v12870_v40  ;;  %10736 = vmatprep.mubr.msk.f32.mxu1 %vm2974_vm3, %v2865_v37  ;;  %v5284_v18 = vsel %vm5088_vm4, %v12870_v40, 0.0 }
 0x2c3   : > { %18670 = vst [vmem:[#allocation46_spill] sm:$0xff] %v12866_v19  ;;  %v10600_v5 = vpop.f32.mrb[66].mxu1  ;;  %5279 = vadd.xlane.f32.xlu1 %v5278_v8  ;;  %v5281_v38 = vsel %vm5088_vm4, %v12866_v19, 0.0  ;;  %v11061_v8 = vld [vmem:[%s12000_s10 + $0x358] sm:$0xff]  }
 0x2c4   : > { %v4139_v27 = vpop.f32.mrb[67].mxu1  ;;  %5282 = vadd.xlane.f32.xlu0 %v5281_v38  ;;  %v12883_v51 = vadd.f32 %v10600_v5, %v12410_v48  ;;  %10448 = vmatmul.mubr.msk.bf16.gmra.mrb[212].mxu0 %vm1258_vm2, %v11061_v8 }
 0x2c5   : > { %v12879_v58 = vadd.f32 %v12410_v48, %v4139_v27  ;;  %10737 = vmatmul.mubr.msk.f32.gmra.mrb[158].mxu1 %vm2974_vm3, %v2866_v12  ;;  %v12909_v12 = vld [vmem:[#allocation4] ss:$0 sm:$0xff] }
 0x2c6   : > { %18673 = vst [vmem:[#allocation49_spill] sm:$0xff] %v12883_v51  ;;  %v5290_v5 = vsel %vm5088_vm4, %v12883_v51, 0.0  ;;  %v2333_v8 = vadd.f32 %v12909_v12, %v10397_v56 }
 0x2c7   : > { %18672 = vst [vmem:[#allocation48_spill] sm:$0xff] %v12879_v58  ;;  %v10603_v11 = vpop.f32.mrb[68].mxu1  ;;  %5285 = vadd.xlane.f32.xlu1 %v5284_v18  ;;  %v5287_v63 = vsel %vm5088_vm4, %v12879_v58, 0.0 }
 0x2c8   : > { %v4149_v42 = vpop.f32.mrb[69].mxu1  ;;  %5288 = vadd.xlane.f32.xlu0 %v5287_v63  ;;  %v12900_v48 = vadd.f32 %v12892_v59, %v10603_v11  ;;  %v2324_v11 = vpop.f32.mrb[161].mxu0  ;;  %v2869_v22 = vmax.f32 %v2333_v8, 0.0 }
 0x2c9   : > { %v12895_v37 = vadd.f32 %v12892_v59, %v4149_v42  ;;  %v2325_v51 = vadd.f32 %v12909_v12, %v2324_v11 }
 0x2ca   : > { %18675 = vst [vmem:[#allocation51_spill] sm:$0xff] %v12900_v48 }
 0x2cb   : > { %18674 = vst [vmem:[#allocation50_spill] sm:$0xff] %v12895_v37  ;;  %v10606_v38 = vpop.f32.mrb[70].mxu1  ;;  %5291 = vadd.xlane.f32.xlu1 %v5290_v5  ;;  %v5293_v27 = vsel %vm5088_vm4, %v12895_v37, 0.0  ;;  %v5296_v5 = vsel %vm5088_vm4, %v12900_v48, 0.0  ;;  %v10398_v37 = vpop.f32.mrb[162].mxu0  ;;  %v2867_v56 = vmax.f32 %v2325_v51, 0.0 }
 0x2cc   : > { %v4159_v18 = vpop.f32.mrb[71].mxu1  ;;  %5294 = vadd.xlane.f32.xlu0 %v5293_v27  ;;  %v12913_v42 = vadd.f32 %v12892_v59, %v10606_v38  ;;  %v2336_v48 = vadd.f32 %v12909_v12, %v10398_v37 }
 0x2cd   : > { %v12907_v63 = vadd.f32 %v12892_v59, %v4159_v18  ;;  %v2327_v18 = vpop.f32.mrb[163].mxu0  ;;  %10739 = vmatprep.mubr.msk.f32.mxu1 %vm2974_vm3, %v2867_v56 }
 0x2ce   : > { %18677 = vst [vmem:[#allocation53_spill] sm:$0xff] %v12913_v42  ;;  %v2328_v24 = vadd.f32 %v12909_v12, %v2327_v18  ;;  %v2870_v37 = vmax.f32 %v2336_v48, 0.0 }
 0x2cf   : > { %18676 = vst [vmem:[#allocation52_spill] sm:$0xff] %v12907_v63  ;;  %v10609_v58 = vpop.f32.mrb[72].mxu1  ;;  %5297 = vadd.xlane.f32.xlu1 %v5296_v5  ;;  %v5299_v27 = vsel %vm5088_vm4, %v12907_v63, 0.0  ;;  %v5302_v63 = vsel %vm5088_vm4, %v12913_v42, 0.0 }
 0x2d0   : > { %v5094_v40 = vpop.xlane.xlu0 %5093  ;;  %v4169_v19 = vpop.f32.mrb[73].mxu1  ;;  %5300 = vadd.xlane.f32.xlu0 %v5299_v27  ;;  %v12926_v11 = vadd.f32 %v12892_v59, %v10609_v58  ;;  %v2868_v20 = vmax.f32 %v2328_v24, 0.0 }
 0x2d1   : > { %v12922_v38 = vadd.f32 %v12892_v59, %v4169_v19  ;;  %v5859_v5 = vmul.f32 0.125, %v5094_v40 }
 0x2d2   : > { %18679 = vst [vmem:[#allocation55_spill] sm:$0xff] %v12926_v11  ;;  %10740 = vmatmul.mubr.msk.f32.gmra.mrb[160].mxu1 %vm2974_vm3, %v2868_v20  ;;  %v5308_v56 = vsel %vm5088_vm4, %v12926_v11, 0.0 }
 0x2d3   : > { %18678 = vst [vmem:[#allocation54_spill] sm:$0xff] %v12922_v38  ;;  %v10612_v51 = vpop.f32.mrb[74].mxu1  ;;  %5303 = vadd.xlane.f32.xlu1 %v5302_v63  ;;  %v5305_v19 = vsel %vm5088_vm4, %v12922_v38, 0.0  ;;  %10742 = vmatprep.mubr.msk.f32.mxu1 %vm2974_vm3, %v2869_v22  ;;  %v12939_v24 = vsub.f32 %v12416_v55, %v5859_v5  ;;  %v11063_v38 = vld [vmem:[%s12000_s10 + $0x368] sm:$0xff]  }
 0x2d4   : > { %v5100_v27 = vpop.xlane.xlu1 %5099  ;;  %v4179_v8 = vpop.f32.mrb[75].mxu1  ;;  %5306 = vadd.xlane.f32.xlu0 %v5305_v19  ;;  %v12942_v63 = vadd.f32 %v12892_v59, %v10612_v51  ;;  %v11062_v19 = vld [vmem:[%s12000_s10 + $0x360] sm:$0xff]  }
 0x2d5   : > { %v12935_v40 = vadd.f32 %v12892_v59, %v4179_v8  ;;  %v5091_v58 = vpop.xlane.xlu0 %5090  ;;  %18681 = vst [vmem:[#allocation57_spill] sm:$0xff] %v12939_v24  ;;  %10451 = vmatprep.mubr.msk.bf16.mxu0 %vm1258_vm2, %v11062_v19  ;;  %v5861_v5 = vmul.f32 0.125, %v5100_v27 }
 0x2d6   : > { %18682 = vst [vmem:[#allocation58_spill] sm:$0xff] %v12942_v63  ;;  %v5858_v18 = vmul.f32 0.125, %v5091_v58  ;;  %10743 = vmatmul.mubr.msk.f32.gmra.mrb[162].mxu1 %vm2974_vm3, %v2870_v37  ;;  %10452 = vmatmul.mubr.msk.bf16.gmra.mrb[216].mxu0 %vm1258_vm2, %v11063_v38 }
 0x2d7   : > { %18680 = vst [vmem:[#allocation56_spill] sm:$0xff] %v12935_v40  ;;  %5309 = vadd.xlane.f32.xlu1 %v5308_v56  ;;  %v5311_v20 = vsel %vm5088_vm4, %v12935_v40, 0.0  ;;  %v10615_v8 = vpop.f32.mrb[76].mxu1  ;;  %v5314_v40 = vsel %vm5088_vm4, %v12942_v63, 0.0  ;;  %v12970_v63 = vsub.f32 %v12430_v1, %v5861_v5 }
 0x2d8   : > { %v12951_v48 = vsub.f32 %v12424_v2, %v5858_v18  ;;  %v5097_v22 = vpop.xlane.xlu1 %5096  ;;  %5312 = vadd.xlane.f32.xlu0 %v5311_v20  ;;  %v4189_v55 = vpop.f32.mrb[77].mxu1  ;;  %v6371_v18 = vmul.f32 %v12939_v24, %v12939_v24  ;;  %v12973_v11 = vadd.f32 %v12892_v59, %v10615_v8 }
 0x2d9   : > { %v5860_v51 = vmul.f32 0.125, %v5097_v22  ;;  %v5103_v58 = vpop.xlane.xlu0 %5102  ;;  %v12957_v56 = vadd.f32 %v12892_v59, %v4189_v55  ;;  %v10401_v55 = vpop.f32.mrb[164].mxu0  ;;  %18686 = vst [vmem:[#allocation62_spill] sm:$0xff] %v12970_v63 }
 0x2da   : > { %18683 = vst [vmem:[#allocation59_spill] sm:$0xff] %v12951_v48  ;;  %v6370_v2 = vmul.f32 %v12951_v48, %v12951_v48  ;;  %18687 = vst [vmem:[#allocation63_spill] sm:$0xff] %v12973_v11  ;;  %v6629_v42 = vsel %vm5088_vm4, %v6371_v18, 0.0  ;;  %v5862_v3 = vmul.f32 0.125, %v5103_v58  ;;  %v2349_v8 = vadd.f32 %v12909_v12, %v10401_v55 }
 0x2db   : > { %18684 = vst [vmem:[#allocation60_spill] sm:$0xff] %v12957_v56  ;;  %v10618_v19 = vpop.f32.mrb[78].mxu1  ;;  %5315 = vadd.xlane.f32.xlu1 %v5314_v40  ;;  %v12966_v27 = vsub.f32 %v12437_v9, %v5860_v51  ;;  %v5317_v40 = vsel %vm5088_vm4, %v12957_v56, 0.0  ;;  %v2340_v9 = vpop.f32.mrb[165].mxu0 }
 0x2dc   : > { %v4199_v37 = vpop.f32.mrb[79].mxu1  ;;  %v5106_v20 = vpop.xlane.xlu1 %5105  ;;  %v6626_v38 = vsel %vm5088_vm4, %v6370_v2, 0.0  ;;  %v2341_v2 = vadd.f32 %v12909_v12, %v2340_v9  ;;  %v6373_v9 = vmul.f32 %v12970_v63, %v12970_v63  ;;  %v12994_v55 = vsub.f32 %v12450_v21, %v5862_v3  ;;  %v11064_v3 = vld [vmem:[%s12000_s10 + $0x370] sm:$0xff]  }
 0x2dd   : > { %18685 = vst [vmem:[#allocation61_spill] sm:$0xff] %v12966_v27  ;;  %6627 = vadd.xlane.f32.xlu0 %v6626_v38  ;;  %v5109_v22 = vpop.xlane.xlu0 %5108  ;;  %v10402_v38 = vpop.f32.mrb[166].mxu0  ;;  %v6372_v1 = vmul.f32 %v12966_v27, %v12966_v27  ;;  %v5863_v56 = vmul.f32 0.125, %v5106_v20  ;;  %v12997_v20 = vadd.f32 %v12892_v59, %v4199_v37  ;;  %10455 = vmatprep.mubr.msk.bf16.mxu0 %vm1258_vm2, %v11064_v3 }
 0x2de   : > { %v2871_v62 = vmax.f32 %v2341_v2, 0.0  ;;  %v2343_v48 = vpop.f32.mrb[167].mxu0  ;;  %v2352_v27 = vadd.f32 %v12909_v12, %v10402_v38  ;;  %18688 = vst [vmem:[#allocation64_spill] sm:$0xff] %v12994_v55 }
 0x2df   : > { %6630 = vadd.xlane.f32.xlu1 %v6629_v42  ;;  %v12978_v51 = vpop.f32.mrb[80].mxu1  ;;  %v5320_v42 = vsel %vm5088_vm4, %v12973_v11, 0.0  ;;  %v2344_v39 = vadd.f32 %v12909_v12, %v2343_v48  ;;  %18689 = vst [vmem:[#allocation65_spill] sm:$0xff] %v12997_v20  ;;  %v6632_v2 = vsel %vm5088_vm4, %v6372_v1, 0.0  ;;  %v2873_v11 = vmax.f32 %v2349_v8, 0.0  ;;  %v11065_v8 = vld [vmem:[%s12000_s10 + $0x378] sm:$0xff]  }
 0x2e0   : > { %v5112_v24 = vpop.xlane.xlu1 %5111  ;;  %v4209_v5 = vpop.f32.mrb[81].mxu1  ;;  %10745 = vmatprep.mubr.msk.f32.mxu1 %vm2974_vm3, %v2871_v62  ;;  %v13005_v48 = vadd.f32 %v12892_v59, %v10618_v19  ;;  %v13008_v21 = vsub.f32 %v12454_v23, %v5863_v56  ;;  %v6635_v62 = vsel %vm5088_vm4, %v6373_v9, 0.0  ;;  %v2874_v1 = vmax.f32 %v2352_v27, 0.0  ;;  %10456 = vmatmul.mubr.msk.bf16.gmra.mrb[220].mxu0 %vm1258_vm2, %v11065_v8 }
 0x2e1   : > { %5318 = vadd.xlane.f32.xlu0 %v5317_v40  ;;  %v5115_v18 = vpop.xlane.xlu0 %5114  ;;  %v2872_v38 = vmax.f32 %v2344_v39, 0.0  ;;  %v5323_v39 = vsel %vm5088_vm4, %v12997_v20, 0.0  ;;  %v6374_v23 = vmul.f32 %v12994_v55, %v12994_v55  ;;  %v5865_v27 = vmul.f32 0.125, %v5112_v24 }
 0x2e2   : > { %18690 = vst [vmem:[#allocation66_spill] sm:$0xff] %v13005_v48  ;;  %18691 = vst [vmem:[#allocation67_spill] sm:$0xff] %v13008_v21  ;;  %v5326_v9 = vsel %vm5088_vm4, %v13005_v48, 0.0 }
 0x2e3   : > { %5321 = vadd.xlane.f32.xlu1 %v5320_v42  ;;  %v12988_v58 = vpop.f32.mrb[82].mxu1  ;;  %10746 = vmatmul.mubr.msk.f32.gmra.mrb[164].mxu1 %vm2974_vm3, %v2872_v38  ;;  %v6375_v38 = vmul.f32 %v13008_v21, %v13008_v21  ;;  %v6638_v24 = vsel %vm5088_vm4, %v6374_v23, 0.0  ;;  %v13050_v48 = vsub.f32 %v12468_v34, %v5865_v27  ;;  %v5866_v21 = vmul.f32 0.125, %v5115_v18 }
 0x2e4   : > { %v5118_v40 = vpop.xlane.xlu1 %5117  ;;  %v13000_v42 = vpop.f32.mrb[83].mxu1  ;;  %10748 = vmatprep.mubr.msk.f32.mxu1 %vm2974_vm3, %v2873_v11 }
 0x2e5   : > { %6633 = vadd.xlane.f32.xlu0 %v6632_v2  ;;  %v13002_v63 = vpop.xlane.xlu0 %5120  ;;  %v5864_v2 = vmul.f32 0.125, %v5109_v22  ;;  %v13030_v22 = vadd.f32 %v12892_v59, %v4209_v5  ;;  %18694 = vst [vmem:[#allocation70_spill] sm:$0xff] %v13050_v48  ;;  %v5867_v6 = vmul.f32 0.125, %v5118_v40  ;;  %v13084_v40 = vadd.f32 %v12892_v59, %v13000_v42 }
 0x2e6   : > { %v5868_v44 = vmul.f32 0.125, %v13002_v63 }
 0x2e7   : > { %6636 = vadd.xlane.f32.xlu1 %v6635_v62  ;;  %v13012_v37 = vpop.f32.mrb[84].mxu1  ;;  %18692 = vst [vmem:[#allocation68_spill] sm:$0xff] %v13030_v22  ;;  %10749 = vmatmul.mubr.msk.f32.gmra.mrb[166].mxu1 %vm2974_vm3, %v2874_v1  ;;  %v13040_v11 = vsub.f32 %v12463_v31, %v5864_v2  ;;  %v6641_v31 = vsel %vm5088_vm4, %v6375_v38, 0.0  ;;  %v5329_v1 = vsel %vm5088_vm4, %v13030_v22, 0.0  ;;  %18697 = vst [vmem:[#allocation73_spill] sm:$0xff] %v13084_v40 }
 0x2e8   : > { %v13016_v36 = vpop.xlane.xlu1 %5123  ;;  %v13022_v56 = vpop.f32.mrb[85].mxu1 }
 0x2e9   : > { %5324 = vadd.xlane.f32.xlu0 %v5323_v39  ;;  %v13026_v19 = vpop.xlane.xlu0 %5126  ;;  %18693 = vst [vmem:[#allocation69_spill] sm:$0xff] %v13040_v11  ;;  %v10405_v39 = vpop.f32.mrb[168].mxu0  ;;  %v6376_v34 = vmul.f32 %v13040_v11, %v13040_v11  ;;  %v13122_v63 = vadd.f32 %v12892_v59, %v13022_v56 }
 0x2ea   : > { %v2356_v2 = vpop.f32.mrb[169].mxu0  ;;  %v2365_v11 = vadd.f32 %v12909_v12, %v10405_v39 }
 0x2eb   : > { %5327 = vadd.xlane.f32.xlu1 %v5326_v9  ;;  %v13036_v62 = vpop.f32.mrb[86].mxu1  ;;  %v13054_v9 = vadd.f32 %v12892_v59, %v12978_v51  ;;  %v10406_v20 = vpop.f32.mrb[170].mxu0  ;;  %18700 = vst [vmem:[#allocation76_spill] sm:$0xff] %v13122_v63 }
 0x2ec   : > { %v13042_v3 = vpop.xlane.xlu1 %5129  ;;  %v13045_v5 = vpop.f32.mrb[87].mxu1 }
 0x2ed   : > { %6639 = vadd.xlane.f32.xlu0 %v6638_v24  ;;  %v13047_v8 = vpop.xlane.xlu0 %5132  ;;  %18695 = vst [vmem:[#allocation71_spill] sm:$0xff] %v13054_v9  ;;  %v2357_v24 = vadd.f32 %v12909_v12, %v2356_v2  ;;  %v2359_v22 = vpop.f32.mrb[171].mxu0  ;;  %v6377_v2 = vmul.f32 %v13050_v48, %v13050_v48  ;;  %v11066_v48 = vld [vmem:[%s12000_s10 + $0x380] sm:$0xff]  }
 0x2ee   : > { %v2360_v0 = vadd.f32 %v12909_v12, %v2359_v22  ;;  %v2368_v22 = vadd.f32 %v12909_v12, %v10406_v20  ;;  %10459 = vmatprep.mubr.msk.bf16.mxu0 %vm1258_vm2, %v11066_v48  ;;  %v5872_v10 = vmul.f32 0.125, %v13047_v8 }
 0x2ef   : > { %6642 = vadd.xlane.f32.xlu1 %v6641_v31  ;;  %v13059_v23 = vpop.f32.mrb[88].mxu1  ;;  %v2875_v38 = vmax.f32 %v2357_v24, 0.0  ;;  %v5332_v31 = vsel %vm5088_vm4, %v13054_v9, 0.0  ;;  %v6647_v42 = vsel %vm5088_vm4, %v6377_v2, 0.0 }
 0x2f0   : > { %v13062_v55 = vpop.xlane.xlu1 %5135  ;;  %v13066_v51 = vpop.f32.mrb[89].mxu1  ;;  %v2876_v49 = vmax.f32 %v2360_v0, 0.0  ;;  %v5869_v0 = vmul.f32 0.125, %v13016_v36 }
 0x2f1   : > { %5330 = vadd.xlane.f32.xlu0 %v5329_v1  ;;  %v13068_v27 = vpop.xlane.xlu0 %5138  ;;  %10751 = vmatprep.mubr.msk.f32.mxu1 %vm2974_vm3, %v2875_v38  ;;  %v13080_v1 = vsub.f32 %v12479_v45, %v5866_v21  ;;  %v13095_v38 = vsub.f32 %v12482_v47, %v5867_v6  ;;  %v13099_v45 = vadd.f32 %v12892_v59, %v12988_v58  ;;  %v2877_v21 = vmax.f32 %v2365_v11, 0.0 }
 0x2f2   : > { %v5335_v47 = vsel %vm5088_vm4, %v13084_v40, 0.0  ;;  %v2878_v11 = vmax.f32 %v2368_v22, 0.0  ;;  %10752 = vmatmul.mubr.msk.f32.gmra.mrb[168].mxu1 %vm2974_vm3, %v2876_v49  ;;  %v13133_v49 = vsub.f32 %v12491_v57, %v5868_v44  ;;  %v5341_v44 = vsel %vm5088_vm4, %v13122_v63, 0.0 }
 0x2f3   : > { %5333 = vadd.xlane.f32.xlu1 %v5332_v31  ;;  %v13074_v18 = vpop.f32.mrb[90].mxu1  ;;  %18696 = vst [vmem:[#allocation72_spill] sm:$0xff] %v13080_v1  ;;  %v6644_v31 = vsel %vm5088_vm4, %v6376_v34, 0.0  ;;  %18698 = vst [vmem:[#allocation74_spill] sm:$0xff] %v13095_v38  ;;  %v6378_v6 = vmul.f32 %v13080_v1, %v13080_v1  ;;  %v5338_v2 = vsel %vm5088_vm4, %v13099_v45, 0.0  ;;  %10754 = vmatprep.mubr.msk.f32.mxu1 %vm2974_vm3, %v2877_v21  ;;  %v10409_v21 = vpop.f32.mrb[172].mxu0 }
 0x2f4   : > { %v13086_v24 = vpop.xlane.xlu1 %5141  ;;  %v13089_v9 = vpop.f32.mrb[91].mxu1  ;;  %18699 = vst [vmem:[#allocation75_spill] sm:$0xff] %v13099_v45  ;;  %18701 = vst [vmem:[#allocation77_spill] sm:$0xff] %v13133_v49  ;;  %v5870_v40 = vmul.f32 0.125, %v13026_v19  ;;  %v5873_v8 = vmul.f32 0.125, %v13062_v55 }
 0x2f5   : > { %6645 = vadd.xlane.f32.xlu0 %v6644_v31  ;;  %v13091_v39 = vpop.xlane.xlu0 %5144  ;;  %v11067_v31 = vld [vmem:[%s12000_s10 + $0x388] sm:$0xff]   ;;  %v6650_v56 = vsel %vm5088_vm4, %v6378_v6, 0.0  ;;  %v2372_v6 = vpop.f32.mrb[173].mxu0 }
 0x2f6   : > { %10460 = vmatmul.mubr.msk.bf16.gmra.mrb[224].mxu0 %vm1258_vm2, %v11067_v31  ;;  %10755 = vmatmul.mubr.msk.f32.gmra.mrb[170].mxu1 %vm2974_vm3, %v2878_v11  ;;  %v13144_v31 = vsub.f32 %v12496_v61, %v5869_v0  ;;  %v2373_v45 = vadd.f32 %v12909_v12, %v2372_v6  ;;  %v10410_v11 = vpop.f32.mrb[174].mxu0 }
 0x2f7   : > { %6648 = vadd.xlane.f32.xlu1 %v6647_v42  ;;  %v13103_v34 = vpop.f32.mrb[92].mxu1  ;;  %v6379_v42 = vmul.f32 %v13095_v38, %v13095_v38  ;;  %v2375_v38 = vpop.f32.mrb[175].mxu0  ;;  %10463 = vmatprep.mubr.msk.bf16.mxu0 %vm1258_vm2, %v11068_v26 }
 0x2f8   : > { %v13107_v32 = vpop.xlane.xlu1 %5147  ;;  %v13113_v58 = vpop.f32.mrb[93].mxu1  ;;  %18702 = vst [vmem:[#allocation78_spill] sm:$0xff] %v13144_v31  ;;  %v2879_v63 = vmax.f32 %v2373_v45, 0.0  ;;  %v6381_v19 = vmul.f32 %v13144_v31, %v13144_v31  ;;  %v13176_v45 = vsub.f32 %v12509_v13, %v5870_v40  ;;  %v13195_v13 = vadd.f32 %v12892_v59, %v13036_v62 }
 0x2f9   : > { %5336 = vadd.xlane.f32.xlu0 %v5335_v47  ;;  %v13116_v20 = vpop.xlane.xlu0 %5150  ;;  %v6653_v57 = vsel %vm5088_vm4, %v6379_v42, 0.0 }
 0x2fa   : > { %10757 = vmatprep.mubr.msk.f32.mxu1 %vm2974_vm3, %v2879_v63  ;;  %18704 = vst [vmem:[#allocation80_spill] sm:$0xff] %v13176_v45  ;;  %18707 = vst [vmem:[#allocation83_spill] sm:$0xff] %v13195_v13  ;;  %v6382_v62 = vmul.f32 %v13176_v45, %v13176_v45 }
 0x2fb   : > { %5339 = vadd.xlane.f32.xlu1 %v5338_v2  ;;  %v13130_v48 = vpop.f32.mrb[94].mxu1  ;;  %v13148_v2 = vadd.f32 %v12892_v59, %v13012_v37  ;;  %v6380_v37 = vmul.f32 %v13133_v49, %v13133_v49  ;;  %v2381_v49 = vadd.f32 %v12909_v12, %v10409_v21 }
 0x2fc   : > { %v13135_v36 = vpop.xlane.xlu1 %5153  ;;  %v13138_v22 = vpop.f32.mrb[95].mxu1 }
 0x2fd   : > { %6651 = vadd.xlane.f32.xlu0 %v6650_v56  ;;  %v13140_v47 = vpop.xlane.xlu0 %5156  ;;  %18703 = vst [vmem:[#allocation79_spill] sm:$0xff] %v13148_v2  ;;  %v5344_v6 = vsel %vm5088_vm4, %v13148_v2, 0.0  ;;  %v2881_v40 = vmax.f32 %v2381_v49, 0.0 }
 0x2ff   : > { %6654 = vadd.xlane.f32.xlu1 %v6653_v57  ;;  %v13153_v56 = vpop.f32.mrb[96].mxu1  ;;  %v5871_v57 = vmul.f32 0.125, %v13042_v3  ;;  %v13180_v3 = vadd.f32 %v12892_v59, %v13045_v5  ;;  %v6659_v5 = vsel %vm5088_vm4, %v6381_v19, 0.0  ;;  %v13218_v19 = vadd.f32 %v12892_v59, %v13066_v51 }
 0x300   : > { %v13157_v61 = vpop.xlane.xlu1 %5159  ;;  %v13161_v0 = vpop.f32.mrb[97].mxu1  ;;  %v6662_v51 = vsel %vm5088_vm4, %v6382_v62, 0.0 }
 0x301   : > { %5342 = vadd.xlane.f32.xlu0 %v5341_v44  ;;  %v13163_v42 = vpop.xlane.xlu0 %5162  ;;  %v2376_v44 = vadd.f32 %v12909_v12, %v2375_v38  ;;  %18705 = vst [vmem:[#allocation81_spill] sm:$0xff] %v13180_v3  ;;  %v2384_v38 = vadd.f32 %v12909_v12, %v10410_v11  ;;  %v13191_v63 = vsub.f32 %v12513_v15, %v5871_v57  ;;  %v5347_v15 = vsel %vm5088_vm4, %v13180_v3, 0.0 }
 0x302   : > { %18708 = vst [vmem:[#allocation84_spill] sm:$0xff] %v13218_v19  ;;  %v5874_v3 = vmul.f32 0.125, %v13068_v27 }
 0x303   : > { %5345 = vadd.xlane.f32.xlu1 %v5344_v6  ;;  %v13170_v1 = vpop.f32.mrb[98].mxu1  ;;  %v6656_v6 = vsel %vm5088_vm4, %v6380_v37, 0.0  ;;  %18706 = vst [vmem:[#allocation82_spill] sm:$0xff] %v13191_v63  ;;  %v2880_v16 = vmax.f32 %v2376_v44, 0.0  ;;  %v2882_v57 = vmax.f32 %v2384_v38, 0.0  ;;  %v5350_v44 = vsel %vm5088_vm4, %v13195_v13, 0.0 }
 0x304   : > { %v13182_v2 = vpop.xlane.xlu1 %5165  ;;  %v13185_v31 = vpop.f32.mrb[99].mxu1 }
 0x305   : > { %6657 = vadd.xlane.f32.xlu0 %v6656_v6  ;;  %v13187_v21 = vpop.xlane.xlu0 %5168  ;;  %v11069_v6 = vld [vmem:[%s12000_s10 + $0x398] sm:$0xff]   ;;  %10758 = vmatmul.mubr.msk.f32.gmra.mrb[172].mxu1 %vm2974_vm3, %v2880_v16  ;;  %v13229_v16 = vsub.f32 %v12523_v25, %v5872_v10  ;;  %v5353_v10 = vsel %vm5088_vm4, %v13218_v19, 0.0 }
 0x306   : > { %10760 = vmatprep.mubr.msk.f32.mxu1 %vm2974_vm3, %v2881_v40  ;;  %10464 = vmatmul.mubr.msk.bf16.gmra.mrb[228].mxu0 %vm1258_vm2, %v11069_v6  ;;  %v10413_v40 = vpop.f32.mrb[176].mxu0  ;;  %v13240_v6 = vsub.f32 %v12528_v28, %v5873_v8 }
 0x307   : > { %6660 = vadd.xlane.f32.xlu1 %v6659_v5  ;;  %v13199_v37 = vpop.f32.mrb[100].mxu1  ;;  %v6383_v5 = vmul.f32 %v13191_v63, %v13191_v63  ;;  %18709 = vst [vmem:[#allocation85_spill] sm:$0xff] %v13229_v16  ;;  %v2388_v62 = vpop.f32.mrb[177].mxu0 }
 0x308   : > { %v13203_v53 = vpop.xlane.xlu1 %5171  ;;  %v13209_v11 = vpop.f32.mrb[101].mxu1  ;;  %18710 = vst [vmem:[#allocation86_spill] sm:$0xff] %v13240_v6  ;;  %v2389_v13 = vadd.f32 %v12909_v12, %v2388_v62  ;;  %v6385_v27 = vmul.f32 %v13240_v6, %v13240_v6 }
 0x309   : > { %5348 = vadd.xlane.f32.xlu0 %v5347_v15  ;;  %v13212_v49 = vpop.xlane.xlu0 %5174  ;;  %10761 = vmatmul.mubr.msk.f32.gmra.mrb[174].mxu1 %vm2974_vm3, %v2882_v57  ;;  %v6665_v25 = vsel %vm5088_vm4, %v6383_v5, 0.0  ;;  %v10414_v57 = vpop.f32.mrb[178].mxu0 }
 0x30a   : > { %v2883_v19 = vmax.f32 %v2389_v13, 0.0  ;;  %v2391_v63 = vpop.f32.mrb[179].mxu0  ;;  %v13272_v13 = vsub.f32 %v12539_v41, %v5874_v3  ;;  %v13291_v41 = vadd.f32 %v12892_v59, %v13074_v18 }
 0x30b   : > { %5351 = vadd.xlane.f32.xlu1 %v5350_v44  ;;  %v13226_v26 = vpop.f32.mrb[102].mxu1  ;;  %v13244_v44 = vadd.f32 %v12892_v59, %v13059_v23  ;;  %v6384_v23 = vmul.f32 %v13229_v16, %v13229_v16  ;;  %v2397_v16 = vadd.f32 %v12909_v12, %v10413_v40 }
 0x30c   : > { %v13231_v55 = vpop.xlane.xlu1 %5177  ;;  %v13234_v38 = vpop.f32.mrb[103].mxu1  ;;  %10763 = vmatprep.mubr.msk.f32.mxu1 %vm2974_vm3, %v2883_v19  ;;  %18713 = vst [vmem:[#allocation89_spill] sm:$0xff] %v13272_v13  ;;  %18719 = vst [vmem:[#allocation95_spill] sm:$0xff] %v13291_v41  ;;  %v6386_v18 = vmul.f32 %v13272_v13, %v13272_v13 }
 0x30d   : > { %6663 = vadd.xlane.f32.xlu0 %v6662_v51  ;;  %v13236_v15 = vpop.xlane.xlu0 %5180  ;;  %18711 = vst [vmem:[#allocation87_spill] sm:$0xff] %v13244_v44  ;;  %v5356_v62 = vsel %vm5088_vm4, %v13244_v44, 0.0  ;;  %v2885_v3 = vmax.f32 %v2397_v16, 0.0 }
 0x30f   : > { %6666 = vadd.xlane.f32.xlu1 %v6665_v25  ;;  %v13249_v51 = vpop.f32.mrb[104].mxu1  ;;  %v5875_v25 = vmul.f32 0.125, %v13086_v24  ;;  %v13276_v24 = vadd.f32 %v12892_v59, %v13089_v9  ;;  %v6671_v9 = vsel %vm5088_vm4, %v6385_v27, 0.0  ;;  %v13314_v27 = vadd.f32 %v12892_v59, %v13113_v58 }
 0x310   : > { %v13253_v28 = vpop.xlane.xlu1 %5183  ;;  %v13257_v8 = vpop.f32.mrb[105].mxu1  ;;  %v6674_v58 = vsel %vm5088_vm4, %v6386_v18, 0.0 }
 0x311   : > { %5354 = vadd.xlane.f32.xlu0 %v5353_v10  ;;  %v13259_v5 = vpop.xlane.xlu0 %5186  ;;  %v2392_v10 = vadd.f32 %v12909_v12, %v2391_v63  ;;  %18714 = vst [vmem:[#allocation90_spill] sm:$0xff] %v13276_v24  ;;  %v2400_v63 = vadd.f32 %v12909_v12, %v10414_v57  ;;  %v13287_v19 = vsub.f32 %v12542_v43, %v5875_v25  ;;  %v5359_v43 = vsel %vm5088_vm4, %v13276_v24, 0.0 }
 0x312   : > { %18720 = vst [vmem:[#allocation96_spill] sm:$0xff] %v13314_v27  ;;  %v5878_v24 = vmul.f32 0.125, %v13116_v20 }
 0x313   : > { %5357 = vadd.xlane.f32.xlu1 %v5356_v62  ;;  %v13266_v45 = vpop.f32.mrb[106].mxu1  ;;  %v6668_v62 = vsel %vm5088_vm4, %v6384_v23, 0.0  ;;  %18718 = vst [vmem:[#allocation94_spill] sm:$0xff] %v13287_v19  ;;  %v2886_v25 = vmax.f32 %v2400_v63, 0.0 }
 0x314   : > { %18712 = vst [vmem:[#allocation88_spill] sm:$0xff] %v13266_v45  ;;  %v13278_v44 = vpop.xlane.xlu1 %5189  ;;  %v13281_v6 = vpop.f32.mrb[107].mxu1  ;;  %v11070_v45 = vld [vmem:[%s12000_s10 + $0x3a0] sm:$0xff]  }
 0x315   : > { %18715 = vst [vmem:[#allocation91_spill] sm:$0xff] %v13278_v44  ;;  %18716 = vst [vmem:[#allocation92_spill] sm:$0xff] %v13281_v6  ;;  %6669 = vadd.xlane.f32.xlu0 %v6668_v62  ;;  %v13283_v40 = vpop.xlane.xlu0 %5192  ;;  %v2884_v6 = vmax.f32 %v2392_v10, 0.0  ;;  %v11071_v62 = vld [vmem:[%s12000_s10 + $0x3a8] sm:$0xff]   ;;  %10467 = vmatprep.mubr.msk.bf16.mxu0 %vm1258_vm2, %v11070_v45  ;;  %v5362_v10 = vsel %vm5088_vm4, %v13291_v41, 0.0 }
 0x316   : > { %18717 = vst [vmem:[#allocation93_spill] sm:$0xff] %v13283_v40  ;;  %v5876_v40 = vmul.f32 0.125, %v13091_v39  ;;  %v5877_v39 = vmul.f32 0.125, %v13107_v32  ;;  %10468 = vmatmul.mubr.msk.bf16.gmra.mrb[232].mxu0 %vm1258_vm2, %v11071_v62 }
 0x317   : > { %6672 = vadd.xlane.f32.xlu1 %v6671_v9  ;;  %v13295_v23 = vpop.f32.mrb[108].mxu1  ;;  %10764 = vmatmul.mubr.msk.f32.gmra.mrb[176].mxu1 %vm2974_vm3, %v2884_v6  ;;  %v6387_v9 = vmul.f32 %v13287_v19, %v13287_v19 }
 0x318   : > { %v13299_v44 = vpop.xlane.xlu1 %5195  ;;  %v13305_v57 = vpop.f32.mrb[109].mxu1  ;;  %10766 = vmatprep.mubr.msk.f32.mxu1 %vm2974_vm3, %v2885_v3  ;;  %v13325_v6 = vsub.f32 %v12551_v54, %v5876_v40  ;;  %v13336_v62 = vsub.f32 %v12556_v60, %v5877_v39  ;;  %v5365_v40 = vsel %vm5088_vm4, %v13314_v27, 0.0 }
 0x319   : > { %5360 = vadd.xlane.f32.xlu0 %v5359_v43  ;;  %v13308_v16 = vpop.xlane.xlu0 %5198  ;;  %v10417_v3 = vpop.f32.mrb[180].mxu0  ;;  %v6677_v54 = vsel %vm5088_vm4, %v6387_v9, 0.0 }
 0x31a   : > { %18721 = vst [vmem:[#allocation97_spill] sm:$0xff] %v13325_v6  ;;  %18722 = vst [vmem:[#allocation98_spill] sm:$0xff] %v13336_v62  ;;  %v2404_v18 = vpop.f32.mrb[181].mxu0  ;;  %v6389_v20 = vmul.f32 %v13336_v62, %v13336_v62 }
 0x31b   : > { %5363 = vadd.xlane.f32.xlu1 %v5362_v10  ;;  %v13322_v45 = vpop.f32.mrb[110].mxu1  ;;  %10767 = vmatmul.mubr.msk.f32.gmra.mrb[178].mxu1 %vm2974_vm3, %v2886_v25  ;;  %v13340_v10 = vadd.f32 %v12892_v59, %v13103_v34  ;;  %v2405_v41 = vadd.f32 %v12909_v12, %v2404_v18  ;;  %v10418_v25 = vpop.f32.mrb[182].mxu0  ;;  %v6388_v34 = vmul.f32 %v13325_v6, %v13325_v6 }
 0x31c   : > { %v13327_v32 = vpop.xlane.xlu1 %5201  ;;  %v13330_v63 = vpop.f32.mrb[111].mxu1  ;;  %v2413_v6 = vadd.f32 %v12909_v12, %v10417_v3 }
 0x31d   : > { %6675 = vadd.xlane.f32.xlu0 %v6674_v58  ;;  %v13332_v43 = vpop.xlane.xlu0 %5204  ;;  %18723 = vst [vmem:[#allocation99_spill] sm:$0xff] %v13340_v10  ;;  %v2887_v27 = vmax.f32 %v2405_v41, 0.0  ;;  %v2407_v19 = vpop.f32.mrb[183].mxu0  ;;  %v5368_v18 = vsel %vm5088_vm4, %v13340_v10, 0.0  ;;  %v13368_v41 = vsub.f32 %v12569_v14, %v5878_v24  ;;  %v13387_v14 = vadd.f32 %v12892_v59, %v13130_v48 }
 0x31e   : > { %v2889_v24 = vmax.f32 %v2413_v6, 0.0 }
 0x31f   : > { %6678 = vadd.xlane.f32.xlu1 %v6677_v54  ;;  %v13345_v58 = vpop.f32.mrb[112].mxu1  ;;  %v5879_v54 = vmul.f32 0.125, %v13135_v36  ;;  %10769 = vmatprep.mubr.msk.f32.mxu1 %vm2974_vm3, %v2887_v27  ;;  %18725 = vst [vmem:[#allocation101_spill] sm:$0xff] %v13368_v41  ;;  %v13372_v36 = vadd.f32 %v12892_v59, %v13138_v22  ;;  %18731 = vst [vmem:[#allocation107_spill] sm:$0xff] %v13387_v14  ;;  %v6683_v22 = vsel %vm5088_vm4, %v6389_v20, 0.0 }
 0x320   : > { %v13349_v60 = vpop.xlane.xlu1 %5207  ;;  %v13353_v39 = vpop.f32.mrb[113].mxu1  ;;  %v6390_v48 = vmul.f32 %v13368_v41, %v13368_v41  ;;  %v13410_v20 = vadd.f32 %v12892_v59, %v13161_v0 }
 0x321   : > { %5366 = vadd.xlane.f32.xlu0 %v5365_v40  ;;  %v13355_v9 = vpop.xlane.xlu0 %5210  ;;  %v2408_v40 = vadd.f32 %v12909_v12, %v2407_v19  ;;  %18726 = vst [vmem:[#allocation102_spill] sm:$0xff] %v13372_v36  ;;  %v2416_v19 = vadd.f32 %v12909_v12, %v10418_v25  ;;  %v13383_v27 = vsub.f32 %v12573_v17, %v5879_v54  ;;  %v5371_v17 = vsel %vm5088_vm4, %v13372_v36, 0.0 }
 0x322   : > { %18732 = vst [vmem:[#allocation108_spill] sm:$0xff] %v13410_v20  ;;  %v6686_v0 = vsel %vm5088_vm4, %v6390_v48, 0.0  ;;  %v5882_v36 = vmul.f32 0.125, %v13163_v42 }
 0x323   : > { %5369 = vadd.xlane.f32.xlu1 %v5368_v18  ;;  %v13362_v13 = vpop.f32.mrb[114].mxu1  ;;  %v6680_v18 = vsel %vm5088_vm4, %v6388_v34, 0.0  ;;  %18730 = vst [vmem:[#allocation106_spill] sm:$0xff] %v13383_v27  ;;  %v2890_v54 = vmax.f32 %v2416_v19, 0.0 }
 0x324   : > { %18724 = vst [vmem:[#allocation100_spill] sm:$0xff] %v13362_v13  ;;  %v13374_v10 = vpop.xlane.xlu1 %5213  ;;  %v13377_v62 = vpop.f32.mrb[115].mxu1  ;;  %v11072_v13 = vld [vmem:[%s12000_s10 + $0x3b0] sm:$0xff]  }
 0x325   : > { %18727 = vst [vmem:[#allocation103_spill] sm:$0xff] %v13374_v10  ;;  %18728 = vst [vmem:[#allocation104_spill] sm:$0xff] %v13377_v62  ;;  %6681 = vadd.xlane.f32.xlu0 %v6680_v18  ;;  %v13379_v3 = vpop.xlane.xlu0 %5216  ;;  %v2888_v62 = vmax.f32 %v2408_v40, 0.0  ;;  %v11073_v18 = vld [vmem:[%s12000_s10 + $0x3b8] sm:$0xff]   ;;  %10471 = vmatprep.mubr.msk.bf16.mxu0 %vm1258_vm2, %v11072_v13  ;;  %v5374_v40 = vsel %vm5088_vm4, %v13387_v14, 0.0 }
 0x326   : > { %18729 = vst [vmem:[#allocation105_spill] sm:$0xff] %v13379_v3  ;;  %v5880_v3 = vmul.f32 0.125, %v13140_v47  ;;  %v5881_v47 = vmul.f32 0.125, %v13157_v61  ;;  %10472 = vmatmul.mubr.msk.bf16.gmra.mrb[236].mxu0 %vm1258_vm2, %v11073_v18 }
 0x327   : > { %6684 = vadd.xlane.f32.xlu1 %v6683_v22  ;;  %v13391_v34 = vpop.f32.mrb[116].mxu1  ;;  %10770 = vmatmul.mubr.msk.f32.gmra.mrb[180].mxu1 %vm2974_vm3, %v2888_v62  ;;  %v6391_v22 = vmul.f32 %v13383_v27, %v13383_v27 }
 0x328   : > { %v13395_v10 = vpop.xlane.xlu1 %5219  ;;  %v13401_v25 = vpop.f32.mrb[117].mxu1  ;;  %10772 = vmatprep.mubr.msk.f32.mxu1 %vm2974_vm3, %v2889_v24  ;;  %v13421_v62 = vsub.f32 %v12583_v29, %v5880_v3  ;;  %v13432_v18 = vsub.f32 %v12588_v33, %v5881_v47  ;;  %v5377_v3 = vsel %vm5088_vm4, %v13410_v20, 0.0 }
 0x329   : > { %5372 = vadd.xlane.f32.xlu0 %v5371_v17  ;;  %v13404_v6 = vpop.xlane.xlu0 %5222  ;;  %v10421_v24 = vpop.f32.mrb[184].mxu0  ;;  %v6689_v29 = vsel %vm5088_vm4, %v6391_v22, 0.0 }
 0x32a   : > { %18733 = vst [vmem:[#allocation109_spill] sm:$0xff] %v13421_v62  ;;  %18734 = vst [vmem:[#allocation110_spill] sm:$0xff] %v13432_v18  ;;  %v2420_v48 = vpop.f32.mrb[185].mxu0  ;;  %v6393_v42 = vmul.f32 %v13432_v18, %v13432_v18 }
 0x32b   : > { %5375 = vadd.xlane.f32.xlu1 %v5374_v40  ;;  %v13418_v13 = vpop.f32.mrb[118].mxu1  ;;  %10773 = vmatmul.mubr.msk.f32.gmra.mrb[182].mxu1 %vm2974_vm3, %v2890_v54  ;;  %v13436_v40 = vadd.f32 %v12892_v59, %v13153_v56  ;;  %v2421_v14 = vadd.f32 %v12909_v12, %v2420_v48  ;;  %v10422_v54 = vpop.f32.mrb[186].mxu0  ;;  %v6392_v56 = vmul.f32 %v13421_v62, %v13421_v62 }
 0x32c   : > { %v13423_v61 = vpop.xlane.xlu1 %5225  ;;  %v13426_v19 = vpop.f32.mrb[119].mxu1  ;;  %v2429_v62 = vadd.f32 %v12909_v12, %v10421_v24 }
 0x32d   : > { %6687 = vadd.xlane.f32.xlu0 %v6686_v0  ;;  %v13428_v17 = vpop.xlane.xlu0 %5228  ;;  %18735 = vst [vmem:[#allocation111_spill] sm:$0xff] %v13436_v40  ;;  %v2891_v20 = vmax.f32 %v2421_v14, 0.0  ;;  %v2423_v27 = vpop.f32.mrb[187].mxu0  ;;  %v5380_v48 = vsel %vm5088_vm4, %v13436_v40, 0.0  ;;  %v13464_v14 = vsub.f32 %v12599_v50, %v5882_v36  ;;  %v13483_v50 = vadd.f32 %v12892_v59, %v13170_v1 }
 0x32e   : > { %v2893_v36 = vmax.f32 %v2429_v62, 0.0 }
 0x32f   : > { %6690 = vadd.xlane.f32.xlu1 %v6689_v29  ;;  %v13441_v0 = vpop.f32.mrb[120].mxu1  ;;  %v5883_v29 = vmul.f32 0.125, %v13182_v2  ;;  %10775 = vmatprep.mubr.msk.f32.mxu1 %vm2974_vm3, %v2891_v20  ;;  %18737 = vst [vmem:[#allocation113_spill] sm:$0xff] %v13464_v14  ;;  %v13468_v2 = vadd.f32 %v12892_v59, %v13185_v31  ;;  %18743 = vst [vmem:[#allocation119_spill] sm:$0xff] %v13483_v50  ;;  %v6695_v31 = vsel %vm5088_vm4, %v6393_v42, 0.0 }
 0x330   : > { %v13445_v33 = vpop.xlane.xlu1 %5231  ;;  %v13449_v47 = vpop.f32.mrb[121].mxu1  ;;  %v6394_v1 = vmul.f32 %v13464_v14, %v13464_v14  ;;  %v13506_v42 = vadd.f32 %v12892_v59, %v13209_v11 }
 0x331   : > { %5378 = vadd.xlane.f32.xlu0 %v5377_v3  ;;  %v13451_v22 = vpop.xlane.xlu0 %5234  ;;  %v2424_v3 = vadd.f32 %v12909_v12, %v2423_v27  ;;  %18738 = vst [vmem:[#allocation114_spill] sm:$0xff] %v13468_v2  ;;  %v2432_v27 = vadd.f32 %v12909_v12, %v10422_v54  ;;  %v13479_v20 = vsub.f32 %v12602_v52, %v5883_v29  ;;  %v5383_v52 = vsel %vm5088_vm4, %v13468_v2, 0.0 }
 0x332   : > { %18744 = vst [vmem:[#allocation120_spill] sm:$0xff] %v13506_v42  ;;  %v6698_v11 = vsel %vm5088_vm4, %v6394_v1, 0.0  ;;  %v5886_v2 = vmul.f32 0.125, %v13212_v49 }
 0x333   : > { %5381 = vadd.xlane.f32.xlu1 %v5380_v48  ;;  %v13458_v41 = vpop.f32.mrb[122].mxu1  ;;  %v6692_v48 = vsel %vm5088_vm4, %v6392_v56, 0.0  ;;  %18742 = vst [vmem:[#allocation118_spill] sm:$0xff] %v13479_v20  ;;  %v2894_v29 = vmax.f32 %v2432_v27, 0.0 }
 0x334   : > { %18736 = vst [vmem:[#allocation112_spill] sm:$0xff] %v13458_v41  ;;  %v13470_v40 = vpop.xlane.xlu1 %5237  ;;  %v13473_v18 = vpop.f32.mrb[123].mxu1  ;;  %v11074_v41 = vld [vmem:[%s12000_s10 + $0x3c0] sm:$0xff]  }
 0x335   : > { %18739 = vst [vmem:[#allocation115_spill] sm:$0xff] %v13470_v40  ;;  %18740 = vst [vmem:[#allocation116_spill] sm:$0xff] %v13473_v18  ;;  %6693 = vadd.xlane.f32.xlu0 %v6692_v48  ;;  %v13475_v24 = vpop.xlane.xlu0 %5240  ;;  %v2892_v18 = vmax.f32 %v2424_v3, 0.0  ;;  %v11075_v48 = vld [vmem:[%s12000_s10 + $0x3c8] sm:$0xff]   ;;  %10475 = vmatprep.mubr.msk.bf16.mxu0 %vm1258_vm2, %v11074_v41  ;;  %v5386_v3 = vsel %vm5088_vm4, %v13483_v50, 0.0 }
 0x336   : > { %18741 = vst [vmem:[#allocation117_spill] sm:$0xff] %v13475_v24  ;;  %v5884_v24 = vmul.f32 0.125, %v13187_v21  ;;  %v5885_v21 = vmul.f32 0.125, %v13203_v53  ;;  %10476 = vmatmul.mubr.msk.bf16.gmra.mrb[240].mxu0 %vm1258_vm2, %v11075_v48 }
 0x337   : > { %6696 = vadd.xlane.f32.xlu1 %v6695_v31  ;;  %v13487_v56 = vpop.f32.mrb[124].mxu1  ;;  %10776 = vmatmul.mubr.msk.f32.gmra.mrb[184].mxu1 %vm2974_vm3, %v2892_v18  ;;  %v6395_v31 = vmul.f32 %v13479_v20, %v13479_v20 }
 0x338   : > { %v13491_v40 = vpop.xlane.xlu1 %5243  ;;  %v13497_v54 = vpop.f32.mrb[125].mxu1  ;;  %10778 = vmatprep.mubr.msk.f32.mxu1 %vm2974_vm3, %v2893_v36  ;;  %v13517_v18 = vsub.f32 %v12611_v4, %v5884_v24  ;;  %v13528_v48 = vsub.f32 %v12616_v7, %v5885_v21  ;;  %v5389_v24 = vsel %vm5088_vm4, %v13506_v42, 0.0 }
 0x339   : > { %5384 = vadd.xlane.f32.xlu0 %v5383_v52  ;;  %v13500_v62 = vpop.xlane.xlu0 %5246  ;;  %v10425_v36 = vpop.f32.mrb[188].mxu0  ;;  %v6701_v4 = vsel %vm5088_vm4, %v6395_v31, 0.0 }
 0x33a   : > { %18745 = vst [vmem:[#allocation121_spill] sm:$0xff] %v13517_v18  ;;  %18746 = vst [vmem:[#allocation122_spill] sm:$0xff] %v13528_v48  ;;  %v2436_v1 = vpop.f32.mrb[189].mxu0  ;;  %v6397_v49 = vmul.f32 %v13528_v48, %v13528_v48 }
 0x33b   : > { %5387 = vadd.xlane.f32.xlu1 %v5386_v3  ;;  %v13514_v41 = vpop.f32.mrb[126].mxu1  ;;  %10779 = vmatmul.mubr.msk.f32.gmra.mrb[186].mxu1 %vm2974_vm3, %v2894_v29  ;;  %v13532_v3 = vadd.f32 %v12892_v59, %v13199_v37  ;;  %v2437_v50 = vadd.f32 %v12909_v12, %v2436_v1  ;;  %v10426_v29 = vpop.f32.mrb[190].mxu0  ;;  %v6396_v59 = vmul.f32 %v13517_v18, %v13517_v18 }
 0x33c   : > { %v13519_v53 = vpop.xlane.xlu1 %5249  ;;  %v13522_v27 = vpop.f32.mrb[127].mxu1  ;;  %v2445_v18 = vadd.f32 %v12909_v12, %v10425_v36 }
 0x33d   : > { %6699 = vadd.xlane.f32.xlu0 %v6698_v11  ;;  %v13524_v52 = vpop.xlane.xlu0 %5252  ;;  %18747 = vst [vmem:[#allocation123_spill] sm:$0xff] %v13532_v3  ;;  %v2895_v31 = vmax.f32 %v2437_v50, 0.0  ;;  %v2439_v42 = vpop.f32.mrb[191].mxu0  ;;  %v5392_v1 = vsel %vm5088_vm4, %v13532_v3, 0.0  ;;  %v13560_v50 = vsub.f32 %v12629_v30, %v5886_v2  ;;  %v6704_v48 = vsel %vm5088_vm4, %v6396_v59, 0.0 }
 0x33e   : > { %v2897_v14 = vmax.f32 %v2445_v18, 0.0 }
 0x33f   : > { %6702 = vadd.xlane.f32.xlu1 %v6701_v4  ;;  %v13537_v11 = vpop.f32.mrb[128].mxu1  ;;  %v5887_v4 = vmul.f32 0.125, %v13231_v55  ;;  %10781 = vmatprep.mubr.msk.f32.mxu1 %vm2974_vm3, %v2895_v31  ;;  %18749 = vst [vmem:[#allocation125_spill] sm:$0xff] %v13560_v50  ;;  %v13562_v55 = vld [vmem:[#allocation6] ss:$0 sm:$0xff]  ;;  %v2448_v31 = vadd.f32 %v12909_v12, %v10426_v29 }
 0x340   : > { %v13541_v7 = vpop.xlane.xlu1 %5255  ;;  %v13545_v37 = vpop.f32.mrb[129].mxu1  ;;  %v13566_v3 = vadd.f32 %v13562_v55, %v13234_v38  ;;  %v13581_v2 = vadd.f32 %v13562_v55, %v13226_v26  ;;  %v6707_v38 = vsel %vm5088_vm4, %v6397_v49, 0.0 }
 0x341   : > { %5390 = vadd.xlane.f32.xlu0 %v5389_v24  ;;  %v13547_v21 = vpop.xlane.xlu0 %5258  ;;  %v2440_v24 = vadd.f32 %v12909_v12, %v2439_v42  ;;  %v13577_v30 = vsub.f32 %v12633_v35, %v5887_v4  ;;  %v6398_v12 = vmul.f32 %v13560_v50, %v13560_v50  ;;  %v2898_v29 = vmax.f32 %v2448_v31, 0.0 }
 0x342   : > { %18750 = vst [vmem:[#allocation126_spill] sm:$0xff] %v13566_v3  ;;  %18755 = vst [vmem:[#allocation131_spill] sm:$0xff] %v13581_v2  ;;  %v5395_v35 = vsel %vm5088_vm4, %v13566_v3, 0.0  ;;  %v13604_v4 = vadd.f32 %v13562_v55, %v13257_v8  ;;  %v5398_v49 = vsel %vm5088_vm4, %v13581_v2, 0.0 }
 0x343   : > { %5393 = vadd.xlane.f32.xlu1 %v5392_v1  ;;  %v13554_v20 = vpop.f32.mrb[130].mxu1  ;;  %18754 = vst [vmem:[#allocation130_spill] sm:$0xff] %v13577_v30  ;;  %v6710_v8 = vsel %vm5088_vm4, %v6398_v12, 0.0 }
 0x344   : > { %18748 = vst [vmem:[#allocation124_spill] sm:$0xff] %v13554_v20  ;;  %v13568_v1 = vpop.xlane.xlu1 %5261  ;;  %v13571_v36 = vpop.f32.mrb[131].mxu1  ;;  %v11076_v20 = vld [vmem:[%s12000_s10 + $0x3d0] sm:$0xff]   ;;  %18756 = vst [vmem:[#allocation132_spill] sm:$0xff] %v13604_v4 }
 0x345   : > { %18751 = vst [vmem:[#allocation127_spill] sm:$0xff] %v13568_v1  ;;  %18752 = vst [vmem:[#allocation128_spill] sm:$0xff] %v13571_v36  ;;  %6705 = vadd.xlane.f32.xlu0 %v6704_v48  ;;  %v13573_v42 = vpop.xlane.xlu0 %5264  ;;  %v2896_v36 = vmax.f32 %v2440_v24, 0.0  ;;  %v11077_v48 = vld [vmem:[%s12000_s10 + $0x3d8] sm:$0xff]   ;;  %10479 = vmatprep.mubr.msk.bf16.mxu0 %vm1258_vm2, %v11076_v20  ;;  %v6399_v24 = vmul.f32 %v13577_v30, %v13577_v30 }
 0x346   : > { %18753 = vst [vmem:[#allocation129_spill] sm:$0xff] %v13573_v42  ;;  %v5888_v42 = vmul.f32 0.125, %v13236_v15  ;;  %v5889_v15 = vmul.f32 0.125, %v13253_v28  ;;  %10480 = vmatmul.mubr.msk.bf16.gmra.mrb[244].mxu0 %vm1258_vm2, %v11077_v48 }
 0x347   : > { %6708 = vadd.xlane.f32.xlu1 %v6707_v38  ;;  %v13585_v59 = vpop.f32.mrb[132].mxu1  ;;  %10782 = vmatmul.mubr.msk.f32.gmra.mrb[188].mxu1 %vm2974_vm3, %v2896_v36 }
 0x348   : > { %v13589_v1 = vpop.xlane.xlu1 %5267  ;;  %v13595_v26 = vpop.f32.mrb[133].mxu1  ;;  %10784 = vmatprep.mubr.msk.f32.mxu1 %vm2974_vm3, %v2897_v14  ;;  %v13615_v36 = vsub.f32 %v12643_v46, %v5888_v42  ;;  %v6713_v46 = vsel %vm5088_vm4, %v6399_v24, 0.0  ;;  %v5401_v42 = vsel %vm5088_vm4, %v13604_v4, 0.0 }
 0x349   : > { %5396 = vadd.xlane.f32.xlu0 %v5395_v35  ;;  %v13598_v18 = vpop.xlane.xlu0 %5270  ;;  %v10429_v14 = vpop.f32.mrb[192].mxu0  ;;  %v18760_v35 = vld [vmem:[#allocation13_spill] sm:$0xff] }
 0x34a   : > { %18757 = vst [vmem:[#allocation133_spill] sm:$0xff] %v13615_v36  ;;  %v13626_v48 = vsub.f32 %v18760_v35, %v5889_v15  ;;  %v2452_v12 = vpop.f32.mrb[193].mxu0 }
 0x34b   : > { %5399 = vadd.xlane.f32.xlu1 %v5398_v49  ;;  %v13612_v20 = vpop.f32.mrb[134].mxu1  ;;  %10785 = vmatmul.mubr.msk.f32.gmra.mrb[190].mxu1 %vm2974_vm3, %v2898_v29  ;;  %v13630_v49 = vadd.f32 %v13562_v55, %v13249_v51  ;;  %v13638_v29 = vld [vmem:[#allocation4] ss:$0 sm:$0xff]  ;;  %v10430_v35 = vpop.f32.mrb[194].mxu0  ;;  %v6400_v51 = vmul.f32 %v13615_v36, %v13615_v36 }
 0x34c   : > { %v13617_v28 = vpop.xlane.xlu1 %5273  ;;  %v13620_v31 = vpop.f32.mrb[135].mxu1  ;;  %18761 = vst [vmem:[#allocation13_spill] sm:$0xff] %v13626_v48  ;;  %v2453_v15 = vadd.f32 %v13638_v29, %v2452_v12  ;;  %v6401_v12 = vmul.f32 %v13626_v48, %v13626_v48 }
 0x34d   : > { %18758 = vst [vmem:[#allocation134_spill] sm:$0xff] %v13620_v31  ;;  %6711 = vadd.xlane.f32.xlu0 %v6710_v8  ;;  %v13622_v38 = vpop.xlane.xlu0 %5276  ;;  %18762 = vst [vmem:[#allocation136_spill] sm:$0xff] %v13630_v49  ;;  %v5890_v8 = vmul.f32 0.125, %v13259_v5  ;;  %v2455_v5 = vpop.f32.mrb[195].mxu0 }
 0x34e   : > { %18759 = vst [vmem:[#allocation135_spill] sm:$0xff] %v13622_v38  ;;  %v2899_v30 = vmax.f32 %v2453_v15, 0.0  ;;  %v18768_v38 = vld [vmem:[#allocation14_spill] sm:$0xff]  ;;  %v18771_v15 = vld [vmem:[#allocation92_spill] sm:$0xff] }
 0x34f   : > { %6714 = vadd.xlane.f32.xlu1 %v6713_v46  ;;  %v13636_v2 = vpop.f32.mrb[136].mxu1  ;;  %v18767_v46 = vld [vmem:[#allocation91_spill] sm:$0xff]  ;;  %v13656_v31 = vsub.f32 %v18768_v38, %v5890_v8 }
 0x350   : > { %18763 = vst [vmem:[#allocation137_spill] sm:$0xff] %v13636_v2  ;;  %v13641_v3 = vpop.xlane.xlu1 %5279  ;;  %v13645_v24 = vpop.f32.mrb[137].mxu1  ;;  %v5891_v50 = vmul.f32 0.125, %v18767_v46  ;;  %v5404_v2 = vsel %vm5088_vm4, %v13630_v49, 0.0  ;;  %10787 = vmatprep.mubr.msk.f32.mxu1 %vm2974_vm3, %v2899_v30  ;;  %v13664_v46 = vadd.f32 %v13562_v55, %v18771_v15 }
 0x351   : > { %18764 = vst [vmem:[#allocation138_spill] sm:$0xff] %v13641_v3  ;;  %18765 = vst [vmem:[#allocation139_spill] sm:$0xff] %v13645_v24  ;;  %5402 = vadd.xlane.f32.xlu0 %v5401_v42  ;;  %v13647_v4 = vpop.xlane.xlu0 %5282  ;;  %v2456_v3 = vadd.f32 %v13638_v29, %v2455_v5  ;;  %v2461_v42 = vadd.f32 %v13638_v29, %v10429_v14  ;;  %v6716_v5 = vsel %vm5088_vm4, %v6400_v51, 0.0  ;;  %v11078_v51 = vld [vmem:[%s12000_s10 + $0x3e0] sm:$0xff]  }
 0x352   : > { %18766 = vst [vmem:[#allocation140_spill] sm:$0xff] %v13647_v4  ;;  %18769 = vst [vmem:[#allocation91_spill] sm:$0xff] %v13656_v31  ;;  %v18776_v4 = vld [vmem:[#allocation88_spill] sm:$0xff]  ;;  %10483 = vmatprep.mubr.msk.bf16.mxu0 %vm1258_vm2, %v11078_v51 }
 0x353   : > { %5405 = vadd.xlane.f32.xlu1 %v5404_v2  ;;  %v13658_v36 = vpop.f32.mrb[138].mxu1  ;;  %18772 = vst [vmem:[#allocation92_spill] sm:$0xff] %v13664_v46  ;;  %v2464_v2 = vadd.f32 %v13638_v29, %v10430_v35  ;;  %v2900_v38 = vmax.f32 %v2456_v3, 0.0  ;;  %v2901_v14 = vmax.f32 %v2461_v42, 0.0  ;;  %v13679_v15 = vadd.f32 %v13562_v55, %v18776_v4  ;;  %v11079_v3 = vld [vmem:[%s12000_s10 + $0x3e8] sm:$0xff]   ;;  %v18778_v35 = vld [vmem:[#allocation93_spill] sm:$0xff] }
 0x354   : > { %18770 = vst [vmem:[#allocation14_spill] sm:$0xff] %v13658_v36  ;;  %v13666_v49 = vpop.xlane.xlu1 %5285  ;;  %v13669_v48 = vpop.f32.mrb[139].mxu1  ;;  %v18774_v36 = vld [vmem:[#allocation15_spill] sm:$0xff]  ;;  %v6402_v4 = vmul.f32 %v13656_v31, %v13656_v31  ;;  %10484 = vmatmul.mubr.msk.bf16.gmra.mrb[248].mxu0 %vm1258_vm2, %v11079_v3  ;;  %v18780_v3 = vld [vmem:[#allocation16_spill] sm:$0xff]  ;;  %v18785_v31 = vld [vmem:[#allocation17_spill] sm:$0xff] }
 0x355   : > { %18773 = vst [vmem:[#allocation141_spill] sm:$0xff] %v13666_v49  ;;  %6717 = vadd.xlane.f32.xlu0 %v6716_v5  ;;  %v13672_v8 = vpop.xlane.xlu0 %5288  ;;  %v13675_v30 = vsub.f32 %v18774_v36, %v5891_v50  ;;  %18777 = vst [vmem:[#allocation88_spill] sm:$0xff] %v13679_v15  ;;  %v6719_v49 = vsel %vm5088_vm4, %v6401_v12, 0.0  ;;  %v2902_v24 = vmax.f32 %v2464_v2, 0.0  ;;  %10788 = vmatmul.mubr.msk.f32.gmra.mrb[192].mxu1 %vm2974_vm3, %v2900_v38  ;;  %v5892_v5 = vmul.f32 0.125, %v18778_v35 }
 0x356   : > { %10790 = vmatprep.mubr.msk.f32.mxu1 %vm2974_vm3, %v2901_v14  ;;  %v5407_v50 = vsel %vm5088_vm4, %v13664_v46, 0.0  ;;  %v5893_v12 = vmul.f32 0.125, %v13299_v44  ;;  %v13702_v2 = vadd.f32 %v13562_v55, %v13305_v57  ;;  %v5410_v38 = vsel %vm5088_vm4, %v13679_v15, 0.0  ;;  %v10433_v15 = vpop.f32.mrb[196].mxu0 }
 0x357   : > { %18775 = vst [vmem:[#allocation15_spill] sm:$0xff] %v13675_v30  ;;  %6720 = vadd.xlane.f32.xlu1 %v6719_v49  ;;  %v13697_v49 = vpop.f32.mrb[140].mxu1  ;;  %v6403_v14 = vmul.f32 %v13675_v30, %v13675_v30  ;;  %v13712_v35 = vsub.f32 %v18780_v3, %v5892_v5  ;;  %v6722_v44 = vsel %vm5088_vm4, %v6402_v4, 0.0  ;;  %v2468_v4 = vpop.f32.mrb[197].mxu0 }
 0x358   : > { %v13687_v42 = vpop.xlane.xlu1 %5291  ;;  %18779 = vst [vmem:[#allocation93_spill] sm:$0xff] %v13702_v2  ;;  %v13709_v51 = vpop.f32.mrb[141].mxu1  ;;  %v13722_v30 = vsub.f32 %v18785_v31, %v5893_v12 }
 0x359   : > { %5408 = vadd.xlane.f32.xlu0 %v5407_v50  ;;  %v13694_v36 = vpop.xlane.xlu0 %5294  ;;  %10791 = vmatmul.mubr.msk.f32.gmra.mrb[194].mxu1 %vm2974_vm3, %v2902_v24  ;;  %18781 = vst [vmem:[#allocation16_spill] sm:$0xff] %v13712_v35  ;;  %v13726_v24 = vadd.f32 %v13562_v55, %v13295_v23  ;;  %v6725_v5 = vsel %vm5088_vm4, %v6403_v14, 0.0  ;;  %v6404_v23 = vmul.f32 %v13712_v35, %v13712_v35 }
 0x35a   : > { %18786 = vst [vmem:[#allocation17_spill] sm:$0xff] %v13722_v30 }
 0x35b   : > { %5411 = vadd.xlane.f32.xlu1 %v5410_v38  ;;  %v13717_v57 = vpop.f32.mrb[142].mxu1  ;;  %18787 = vst [vmem:[#allocation145_spill] sm:$0xff] %v13726_v24  ;;  %v5413_v38 = vsel %vm5088_vm4, %v13702_v2, 0.0 }
 0x35c   : > { %v13714_v50 = vpop.xlane.xlu1 %5297  ;;  %18783 = vst [vmem:[#allocation143_spill] sm:$0xff] %v13717_v57  ;;  %v13731_v3 = vpop.f32.mrb[143].mxu1 }
 0x35d   : > { %18782 = vst [vmem:[#allocation142_spill] sm:$0xff] %v13714_v50  ;;  %6723 = vadd.xlane.f32.xlu0 %v6722_v44  ;;  %v13719_v46 = vpop.xlane.xlu0 %5300  ;;  %18788 = vst [vmem:[#allocation146_spill] sm:$0xff] %v13731_v3  ;;  %v2469_v44 = vadd.f32 %v13638_v29, %v2468_v4  ;;  %v10434_v57 = vpop.f32.mrb[198].mxu0  ;;  %v5895_v3 = vmul.f32 0.125, %v13327_v32  ;;  %v2477_v4 = vadd.f32 %v13638_v29, %v10433_v15 }
 0x35e   : > { %18784 = vst [vmem:[#allocation144_spill] sm:$0xff] %v13719_v46  ;;  %v5894_v46 = vmul.f32 0.125, %v13308_v16  ;;  %v2471_v12 = vpop.f32.mrb[199].mxu0  ;;  %v6405_v16 = vmul.f32 %v13722_v30, %v13722_v30  ;;  %v13754_v32 = vadd.f32 %v13562_v55, %v13330_v63  ;;  %v11080_v30 = vld [vmem:[%s12000_s10 + $0x3f0] sm:$0xff]  }
 0x35f   : > { %6726 = vadd.xlane.f32.xlu1 %v6725_v5  ;;  %v2903_v50 = vmax.f32 %v2469_v44, 0.0  ;;  %v2472_v2 = vadd.f32 %v13638_v29, %v2471_v12  ;;  %v5416_v5 = vsel %vm5088_vm4, %v13726_v24, 0.0  ;;  %v6728_v12 = vsel %vm5088_vm4, %v6404_v23, 0.0  ;;  %10487 = vmatprep.mubr.msk.bf16.mxu0 %vm1258_vm2, %v11080_v30 }
 0x360   : > { %v13735_v31 = vpop.xlane.xlu1 %5303  ;;  %18792 = vst [vmem:[#allocation148_spill] sm:$0xff] %v13754_v32  ;;  %v6731_v63 = vsel %vm5088_vm4, %v6405_v16, 0.0  ;;  %v5896_v23 = vmul.f32 0.125, %v13332_v43  ;;  %v5897_v16 = vmul.f32 0.125, %v13349_v60  ;;  %v13788_v43 = vadd.f32 %v13562_v55, %v13353_v39 }
 0x361   : > { %5414 = vadd.xlane.f32.xlu0 %v5413_v38  ;;  %v13739_v14 = vpop.xlane.xlu0 %5306  ;;  %v2904_v35 = vmax.f32 %v2472_v2, 0.0  ;;  %10793 = vmatprep.mubr.msk.f32.mxu1 %vm2974_vm3, %v2903_v50  ;;  %v18790_v38 = vld [vmem:[#allocation18_spill] sm:$0xff]  ;;  %v2905_v2 = vmax.f32 %v2477_v4, 0.0  ;;  %v18794_v50 = vld [vmem:[#allocation19_spill] sm:$0xff] }
 0x362   : > { %18789 = vst [vmem:[#allocation147_spill] sm:$0xff] %v13739_v14  ;;  %v13750_v14 = vsub.f32 %v18790_v38, %v5894_v46  ;;  %v13764_v46 = vsub.f32 %v18794_v50, %v5895_v3  ;;  %v13768_v38 = vadd.f32 %v13562_v55, %v13322_v45  ;;  %v13783_v45 = vpop.f32.mrb[144].mxu1  ;;  %18798 = vst [vmem:[#allocation152_spill] sm:$0xff] %v13788_v43  ;;  %v18799_v50 = vld [vmem:[#allocation20_spill] sm:$0xff] }
 0x363   : > { %5417 = vadd.xlane.f32.xlu1 %v5416_v5  ;;  %v2480_v5 = vadd.f32 %v13638_v29, %v10434_v57  ;;  %10794 = vmatmul.mubr.msk.f32.gmra.mrb[196].mxu1 %vm2974_vm3, %v2904_v35  ;;  %v11081_v57 = vld [vmem:[%s12000_s10 + $0x3f8] sm:$0xff]   ;;  %v5419_v35 = vsel %vm5088_vm4, %v13754_v32, 0.0  ;;  %v13795_v30 = vpop.f32.mrb[145].mxu1 }
 0x364   : > { %18791 = vst [vmem:[#allocation18_spill] sm:$0xff] %v13750_v14  ;;  %v13756_v44 = vpop.xlane.xlu1 %5309  ;;  %18795 = vst [vmem:[#allocation19_spill] sm:$0xff] %v13764_v46  ;;  %10796 = vmatprep.mubr.msk.f32.mxu1 %vm2974_vm3, %v2905_v2  ;;  %v6406_v3 = vmul.f32 %v13750_v14, %v13750_v14  ;;  %v6407_v2 = vmul.f32 %v13764_v46, %v13764_v46  ;;  %10488 = vmatmul.mubr.msk.bf16.gmra.mrb[252].mxu0 %vm1258_vm2, %v11081_v57  ;;  %v18803_v46 = vld [vmem:[#allocation21_spill] sm:$0xff] }
 0x365   : > { %6729 = vadd.xlane.f32.xlu0 %v6728_v12  ;;  %v13760_v15 = vpop.xlane.xlu0 %5312  ;;  %18796 = vst [vmem:[#allocation150_spill] sm:$0xff] %v13768_v38  ;;  %v2906_v24 = vmax.f32 %v2480_v5, 0.0  ;;  %v5422_v5 = vsel %vm5088_vm4, %v13768_v38, 0.0  ;;  %v10437_v38 = vpop.f32.mrb[200].mxu0  ;;  %v13806_v57 = vsub.f32 %v18803_v46, %v5897_v16  ;;  %v5898_v46 = vmul.f32 0.125, %v13355_v9 }
 0x366   : > { %18793 = vst [vmem:[#allocation149_spill] sm:$0xff] %v13760_v15  ;;  %v6734_v39 = vsel %vm5088_vm4, %v6406_v3, 0.0  ;;  %v5425_v3 = vsel %vm5088_vm4, %v13788_v43, 0.0 }
 0x367   : > { %6732 = vadd.xlane.f32.xlu1 %v6731_v63  ;;  %10797 = vmatmul.mubr.msk.f32.gmra.mrb[198].mxu1 %vm2974_vm3, %v2906_v24  ;;  %v13798_v63 = vsub.f32 %v18799_v50, %v5896_v23  ;;  %18804 = vst [vmem:[#allocation21_spill] sm:$0xff] %v13806_v57 }
 0x368   : > { %v13775_v4 = vpop.xlane.xlu1 %5315 }
 0x369   : > { %18797 = vst [vmem:[#allocation151_spill] sm:$0xff] %v13775_v4  ;;  %5420 = vadd.xlane.f32.xlu0 %v5419_v35  ;;  %18800 = vst [vmem:[#allocation20_spill] sm:$0xff] %v13798_v63  ;;  %v13801_v35 = vpop.f32.mrb[146].mxu1 }
 0x36a   : > { %v6628_v12 = vpop.xlane.xlu0 %6627  ;;  %18801 = vst [vmem:[#allocation153_spill] sm:$0xff] %v13801_v35  ;;  %v13803_v4 = vpop.f32.mrb[147].mxu1  ;;  %v18808_v35 = vld [vmem:[#allocation103_spill] sm:$0xff] }
 0x36b   : > { %v7394_v24 = vmul.f32 0.125, %v6628_v12  ;;  %5423 = vadd.xlane.f32.xlu1 %v5422_v5  ;;  %18802 = vst [vmem:[#allocation154_spill] sm:$0xff] %v13803_v4  ;;  %v13810_v12 = vadd.f32 %v13562_v55, %v13345_v58  ;;  %v6737_v5 = vsel %vm5088_vm4, %v6407_v2, 0.0  ;;  %v6408_v58 = vmul.f32 %v13798_v63, %v13798_v63 }
 0x36c   : > { %v6631_v60 = vpop.xlane.xlu1 %6630  ;;  %v5899_v43 = vmul.f32 0.125, %v18808_v35 }
 0x36d   : > { %v7650_v32 = vadd.f32 1e-05, %v7394_v24  ;;  %v7395_v14 = vmul.f32 0.125, %v6631_v60  ;;  %6735 = vadd.xlane.f32.xlu0 %v6734_v39  ;;  %18805 = vst [vmem:[#allocation155_spill] sm:$0xff] %v13810_v12  ;;  %v2484_v24 = vpop.f32.mrb[201].mxu0 }
 0x36e   : > { %v13812_v23 = vpop.xlane.xlu0 %5318  ;;  %v2485_v60 = vadd.f32 %v13638_v29, %v2484_v24  ;;  %v10438_v39 = vpop.f32.mrb[202].mxu0  ;;  %v2493_v24 = vadd.f32 %v13638_v29, %v10437_v38  ;;  %v18813_v38 = vld [vmem:[#allocation23_spill] sm:$0xff] }
 0x36f   : > { %18806 = vst [vmem:[#allocation156_spill] sm:$0xff] %v13812_v23  ;;  %11082 = vrsqrt.f32 %v7650_v32  ;;  %v7651_v50 = vadd.f32 1e-05, %v7395_v14  ;;  %6738 = vadd.xlane.f32.xlu1 %v6737_v5  ;;  %v2487_v23 = vpop.f32.mrb[203].mxu0  ;;  %v5428_v14 = vsel %vm5088_vm4, %v13810_v12, 0.0  ;;  %v6409_v32 = vmul.f32 %v13806_v57, %v13806_v57 }
 0x370   : > { %v13819_v16 = vpop.xlane.xlu1 %5321  ;;  %v2907_v2 = vmax.f32 %v2485_v60, 0.0  ;;  %v2488_v9 = vadd.f32 %v13638_v29, %v2487_v23  ;;  %v18811_v60 = vld [vmem:[#allocation104_spill] sm:$0xff]  ;;  %v6740_v12 = vsel %vm5088_vm4, %v6408_v58, 0.0  ;;  %v2496_v23 = vadd.f32 %v13638_v29, %v10438_v39  ;;  %v18818_v58 = vld [vmem:[#allocation105_spill] sm:$0xff] }
 0x371   : > { %18807 = vst [vmem:[#allocation157_spill] sm:$0xff] %v13819_v16  ;;  %11084 = vrsqrt.f32 %v7651_v50  ;;  %5426 = vadd.xlane.f32.xlu0 %v5425_v3  ;;  %v18809_v50 = vld [vmem:[#allocation22_spill] sm:$0xff]  ;;  %v13836_v35 = vadd.f32 %v13562_v55, %v18811_v60  ;;  %v6743_v60 = vsel %vm5088_vm4, %v6409_v32, 0.0 }
 0x372   : > { %v6634_v4 = vpop.xlane.xlu0 %6633  ;;  %10799 = vmatprep.mubr.msk.f32.mxu1 %vm2974_vm3, %v2907_v2  ;;  %v13832_v3 = vsub.f32 %v18809_v50, %v5898_v46  ;;  %v2908_v16 = vmax.f32 %v2488_v9, 0.0  ;;  %v18815_v2 = vld [vmem:[#allocation100_spill] sm:$0xff]  ;;  %v2910_v39 = vmax.f32 %v2496_v23, 0.0 }
 0x373   : > { %v7396_v5 = vmul.f32 0.125, %v6634_v4  ;;  %5429 = vadd.xlane.f32.xlu1 %v5428_v14  ;;  %18812 = vst [vmem:[#allocation22_spill] sm:$0xff] %v13836_v35  ;;  %v2909_v4 = vmax.f32 %v2493_v24, 0.0  ;;  %v13841_v14 = vsub.f32 %v18813_v38, %v5899_v43  ;;  %v13845_v46 = vadd.f32 %v13562_v55, %v18815_v2 }
 0x374   : > { %18810 = vst [vmem:[#allocation103_spill] sm:$0xff] %v13832_v3  ;;  %v6637_v63 = vpop.xlane.xlu1 %6636  ;;  %10800 = vmatmul.mubr.msk.f32.gmra.mrb[200].mxu1 %vm2974_vm3, %v2908_v16  ;;  %v5431_v9 = vsel %vm5088_vm4, %v13836_v35, 0.0  ;;  %v5901_v24 = vmul.f32 0.125, %v13395_v10  ;;  %v13860_v16 = vld [vmem:[#allocation7] ss:$0 sm:$0xff]  ;;  %v13873_v10 = vpop.f32.mrb[148].mxu1 }
 0x375   : > { %v7652_v57 = vadd.f32 1e-05, %v7396_v5  ;;  %v7397_v15 = vmul.f32 0.125, %v6637_v63  ;;  %6741 = vadd.xlane.f32.xlu0 %v6740_v12  ;;  %18814 = vst [vmem:[#allocation104_spill] sm:$0xff] %v13841_v14  ;;  %18816 = vst [vmem:[#allocation23_spill] sm:$0xff] %v13845_v46  ;;  %v5900_v63 = vmul.f32 0.125, %v18818_v58  ;;  %10802 = vmatprep.mubr.msk.f32.mxu1 %vm2974_vm3, %v2909_v4  ;;  %v6410_v5 = vmul.f32 %v13832_v3, %v13832_v3 }
 0x376   : > { %v13847_v50 = vpop.xlane.xlu0 %5324  ;;  %v13866_v4 = vadd.f32 %v13562_v55, %v13401_v25  ;;  %v5434_v38 = vsel %vm5088_vm4, %v13845_v46, 0.0  ;;  %v6411_v2 = vmul.f32 %v13841_v14, %v13841_v14  ;;  %v18822_v58 = vld [vmem:[#allocation24_spill] sm:$0xff]  ;;  %v13880_v25 = vpop.f32.mrb[149].mxu1  ;;  %v18824_v46 = vld [vmem:[#allocation57_spill] sm:$0xff]  ;;  %v13886_v14 = vadd.f32 %v13562_v55, %v13391_v34 }
 0x377   : > { %18817 = vst [vmem:[#allocation100_spill] sm:$0xff] %v13847_v50  ;;  %11086 = vrsqrt.f32 %v7652_v57  ;;  %v7653_v12 = vadd.f32 1e-05, %v7397_v15  ;;  %6744 = vadd.xlane.f32.xlu1 %v6743_v60  ;;  %v18820_v15 = vld [vmem:[#allocation59_spill] sm:$0xff]  ;;  %v6746_v3 = vsel %vm5088_vm4, %v6410_v5, 0.0 }
 0x378   : > { %v13853_v43 = vpop.xlane.xlu1 %5327  ;;  %18821 = vst [vmem:[#allocation59_spill] sm:$0xff] %v13866_v4  ;;  %10803 = vmatmul.mubr.msk.f32.gmra.mrb[202].mxu1 %vm2974_vm3, %v2910_v39  ;;  %18825 = vst [vmem:[#allocation57_spill] sm:$0xff] %v13886_v14  ;;  %v10441_v34 = vpop.f32.mrb[204].mxu0 }
 0x379   : > { %18819 = vst [vmem:[#allocation105_spill] sm:$0xff] %v13853_v43  ;;  %v11083_v32 = vpop.eup %11082  ;;  %11088 = vrsqrt.f32 %v7653_v12  ;;  %5432 = vadd.xlane.f32.xlu0 %v5431_v9  ;;  %v13876_v12 = vsub.f32 %v18822_v58, %v5900_v63  ;;  %v13878_v9 = vld [vmem:[#allocation9] ss:$0 sm:$0xff]  ;;  %v13889_v43 = vpop.f32.mrb[150].mxu1  ;;  %v18827_v63 = vld [vmem:[#allocation25_spill] sm:$0xff] }
 0x37a   : > { %v8162_v57 = vmul.f32 %v11083_v32, %v18820_v15  ;;  %v6640_v23 = vpop.xlane.xlu0 %6639  ;;  %18826 = vst [vmem:[#allocation158_spill] sm:$0xff] %v13889_v43  ;;  %v13892_v58 = vsub.f32 %v18827_v63, %v5901_v24  ;;  %v5437_v63 = vsel %vm5088_vm4, %v13866_v4, 0.0  ;;  %v2500_v43 = vpop.f32.mrb[205].mxu0  ;;  %v5903_v4 = vmul.f32 0.125, %v13423_v61 }
 0x37b   : > { %v11085_v60 = vpop.eup %11084  ;;  %18823 = vst [vmem:[#allocation24_spill] sm:$0xff] %v13876_v12  ;;  %v7398_v32 = vmul.f32 0.125, %v6640_v23  ;;  %5435 = vadd.xlane.f32.xlu1 %v5434_v38  ;;  %v5902_v23 = vmul.f32 0.125, %v13404_v6  ;;  %v13900_v38 = vpop.f32.mrb[151].mxu1  ;;  %v6749_v6 = vsel %vm5088_vm4, %v6411_v2, 0.0  ;;  %v2501_v2 = vadd.f32 %v13638_v29, %v2500_v43 }
 0x37c   : > { %v8425_v15 = vmul.f32 %v13860_v16, %v8162_v57  ;;  %v8163_v35 = vmul.f32 %v11085_v60, %v18824_v46  ;;  %v6643_v39 = vpop.xlane.xlu1 %6642  ;;  %18828 = vst [vmem:[#allocation25_spill] sm:$0xff] %v13892_v58  ;;  %18829 = vst [vmem:[#allocation159_spill] sm:$0xff] %v13900_v38  ;;  %v6413_v43 = vmul.f32 %v13892_v58, %v13892_v58 }
 0x37d   : > { %v7654_v46 = vadd.f32 1e-05, %v7398_v32  ;;  %v7399_v57 = vmul.f32 0.125, %v6643_v39  ;;  %6747 = vadd.xlane.f32.xlu0 %v6746_v3  ;;  %v6412_v3 = vmul.f32 %v13876_v12, %v13876_v12  ;;  %v10442_v39 = vpop.f32.mrb[206].mxu0  ;;  %v2911_v50 = vmax.f32 %v2501_v2, 0.0 }
 0x37e   : > { %v8688_v5 = vadd.f32 %v13878_v9, %v8425_v15  ;;  %v8426_v60 = vmul.f32 %v13860_v16, %v8163_v35  ;;  %v13904_v24 = vpop.xlane.xlu0 %5330  ;;  %v2509_v2 = vadd.f32 %v13638_v29, %v10441_v34  ;;  %v6755_v34 = vsel %vm5088_vm4, %v6413_v43, 0.0 }
 0x37f   : > { %18830 = vst [vmem:[#allocation160_spill] sm:$0xff] %v13904_v24  ;;  %11090 = vrsqrt.f32 %v7654_v46  ;;  %v7655_v32 = vadd.f32 1e-05, %v7399_v57  ;;  %6750 = vadd.xlane.f32.xlu1 %v6749_v6  ;;  %v2503_v24 = vpop.f32.mrb[207].mxu0  ;;  %v5440_v46 = vsel %vm5088_vm4, %v13886_v14, 0.0  ;;  %v18832_v6 = vld [vmem:[#allocation26_spill] sm:$0xff]  ;;  %10805 = vmatprep.mubr.msk.f32.mxu1 %vm2974_vm3, %v2911_v50 }
 0x380   : > { %8944 = vst.msk [vmem:[%s13898_s22] sm:$0xff] %vm5088_vm4, %v8688_v5  ;;  %v8689_v35 = vadd.f32 %v13878_v9, %v8426_v60  ;;  %v13914_v15 = vpop.xlane.xlu1 %5333  ;;  %v2504_v57 = vadd.f32 %v13638_v29, %v2503_v24  ;;  %v13922_v12 = vsub.f32 %v18832_v6, %v5902_v23  ;;  %v18834_v5 = vld [vmem:[#allocation61_spill] sm:$0xff]  ;;  %v6752_v24 = vsel %vm5088_vm4, %v6412_v3, 0.0 }
 0x381   : > { %18831 = vst [vmem:[#allocation161_spill] sm:$0xff] %v13914_v15  ;;  %v11087_v38 = vpop.eup %11086  ;;  %11092 = vrsqrt.f32 %v7655_v32  ;;  %5438 = vadd.xlane.f32.xlu0 %v5437_v63  ;;  %v13931_v63 = vadd.f32 %v13562_v55, %v13418_v13  ;;  %v18838_v13 = vld [vmem:[#allocation27_spill] sm:$0xff]  ;;  %v2913_v50 = vmax.f32 %v2509_v2, 0.0 }
 0x382   : > { %18833 = vst [vmem:[#allocation26_spill] sm:$0xff] %v13922_v12  ;;  %8945 = vst.msk [vmem:[%s13898_s22 + $0x8] sm:$0xff] %vm5088_vm4, %v8689_v35  ;;  %v8164_v60 = vmul.f32 %v11087_v38, %v18834_v5  ;;  %v6646_v15 = vpop.xlane.xlu0 %6645  ;;  %v2912_v23 = vmax.f32 %v2504_v57, 0.0  ;;  %v18836_v35 = vld [vmem:[#allocation62_spill] sm:$0xff]  ;;  %v13938_v38 = vadd.f32 %v13562_v55, %v13426_v19  ;;  %v13943_v58 = vsub.f32 %v18838_v13, %v5903_v4 }
 0x383   : > { %v11089_v61 = vpop.eup %11088  ;;  %18835 = vst [vmem:[#allocation61_spill] sm:$0xff] %v13931_v63  ;;  %v7400_v32 = vmul.f32 0.125, %v6646_v15  ;;  %5441 = vadd.xlane.f32.xlu1 %v5440_v46  ;;  %v2512_v46 = vadd.f32 %v13638_v29, %v10442_v39  ;;  %v5904_v4 = vmul.f32 0.125, %v13428_v17  ;;  %v6414_v43 = vmul.f32 %v13922_v12, %v13922_v12 }
 0x384   : > { %v8427_v6 = vmul.f32 %v13860_v16, %v8164_v60  ;;  %v8165_v14 = vmul.f32 %v11089_v61, %v18836_v35  ;;  %18837 = vst [vmem:[#allocation62_spill] sm:$0xff] %v13938_v38  ;;  %v6649_v5 = vpop.xlane.xlu1 %6648  ;;  %18839 = vst [vmem:[#allocation27_spill] sm:$0xff] %v13943_v58  ;;  %10806 = vmatmul.mubr.msk.f32.gmra.mrb[204].mxu1 %vm2974_vm3, %v2912_v23  ;;  %v5905_v23 = vmul.f32 0.125, %v13445_v33  ;;  %v5446_v13 = vsel %vm5088_vm4, %v13931_v63, 0.0 }
 0x385   : > { %v7656_v15 = vadd.f32 1e-05, %v7400_v32  ;;  %v7401_v3 = vmul.f32 0.125, %v6649_v5  ;;  %6753 = vadd.xlane.f32.xlu0 %v6752_v24  ;;  %v2914_v32 = vmax.f32 %v2512_v46, 0.0  ;;  %10808 = vmatprep.mubr.msk.f32.mxu1 %vm2974_vm3, %v2913_v50  ;;  %v13970_v5 = vadd.f32 %v13562_v55, %v13449_v47  ;;  %v18845_v50 = vld [vmem:[#allocation67_spill] sm:$0xff] }
 0x386   : > { %v8690_v57 = vadd.f32 %v13878_v9, %v8427_v6  ;;  %v8428_v19 = vmul.f32 %v13860_v16, %v8165_v14  ;;  %v13949_v60 = vpop.xlane.xlu0 %5336  ;;  %v5443_v14 = vsel %vm5088_vm4, %v13938_v38, 0.0  ;;  %v18841_v6 = vld [vmem:[#allocation64_spill] sm:$0xff]  ;;  %v18853_v38 = vld [vmem:[#allocation30_spill] sm:$0xff] }
 0x387   : > { %11094 = vrsqrt.f32 %v7656_v15  ;;  %v7657_v61 = vadd.f32 1e-05, %v7401_v3  ;;  %6756 = vadd.xlane.f32.xlu1 %v6755_v34  ;;  %18842 = vst [vmem:[#allocation64_spill] sm:$0xff] %v13970_v5  ;;  %v6415_v15 = vmul.f32 %v13943_v58, %v13943_v58  ;;  %v18843_v3 = vld [vmem:[#allocation28_spill] sm:$0xff] }
 0x388   : > { %8946 = vst.msk [vmem:[%s13898_s22 + $0x10] sm:$0xff] %vm5088_vm4, %v8690_v57  ;;  %v8691_v39 = vadd.f32 %v13878_v9, %v8428_v19  ;;  %v13956_v24 = vpop.xlane.xlu1 %5339  ;;  %10809 = vmatmul.mubr.msk.f32.gmra.mrb[206].mxu1 %vm2974_vm3, %v2914_v32  ;;  %v13977_v46 = vsub.f32 %v18843_v3, %v5904_v4  ;;  %v13979_v19 = vpop.f32.mrb[152].mxu1 }
 0x389   : > { %18840 = vst [vmem:[#allocation162_spill] sm:$0xff] %v13956_v24  ;;  %v11091_v17 = vpop.eup %11090  ;;  %11096 = vrsqrt.f32 %v7657_v61  ;;  %5444 = vadd.xlane.f32.xlu0 %v5443_v14  ;;  %v13985_v61 = vadd.f32 %v13562_v55, %v13441_v0  ;;  %v13988_v14 = vpop.f32.mrb[153].mxu1  ;;  %v18861_v24 = vld [vmem:[#allocation31_spill] sm:$0xff] }
 0x38a   : > { %8947 = vst.msk [vmem:[%s13898_s22 + $0x18] sm:$0xff] %vm5088_vm4, %v8691_v39  ;;  %v8166_v35 = vmul.f32 %v11091_v17, %v18841_v6  ;;  %v6652_v2 = vpop.xlane.xlu0 %6651  ;;  %18844 = vst [vmem:[#allocation28_spill] sm:$0xff] %v13977_v46  ;;  %v6758_v39 = vsel %vm5088_vm4, %v6414_v43, 0.0  ;;  %v18847_v17 = vld [vmem:[#allocation29_spill] sm:$0xff]  ;;  %v5906_v6 = vmul.f32 0.125, %v13451_v22  ;;  %v6761_v43 = vsel %vm5088_vm4, %v6415_v15, 0.0 }
 0x38b   : > { %v11093_v33 = vpop.eup %11092  ;;  %v7402_v57 = vmul.f32 0.125, %v6652_v2  ;;  %5447 = vadd.xlane.f32.xlu1 %v5446_v13  ;;  %18846 = vst [vmem:[#allocation67_spill] sm:$0xff] %v13985_v61  ;;  %v13991_v4 = vsub.f32 %v18847_v17, %v5905_v23  ;;  %v5449_v23 = vsel %vm5088_vm4, %v13970_v5, 0.0  ;;  %v18852_v5 = vld [vmem:[#allocation115_spill] sm:$0xff] }
 0x38c   : > { %v8429_v34 = vmul.f32 %v13860_v16, %v8166_v35  ;;  %v8167_v47 = vmul.f32 %v11093_v33, %v18845_v50  ;;  %v6655_v32 = vpop.xlane.xlu1 %6654  ;;  %v13994_v35 = vpop.f32.mrb[154].mxu1  ;;  %v5907_v63 = vmul.f32 0.125, %v18852_v5 }
 0x38d   : > { %18848 = vst [vmem:[#allocation29_spill] sm:$0xff] %v13991_v4  ;;  %v7658_v2 = vadd.f32 1e-05, %v7402_v57  ;;  %v7403_v13 = vmul.f32 0.125, %v6655_v32  ;;  %6759 = vadd.xlane.f32.xlu0 %v6758_v39  ;;  %18849 = vst [vmem:[#allocation163_spill] sm:$0xff] %v13994_v35  ;;  %v10445_v50 = vpop.f32.mrb[208].mxu0  ;;  %v6416_v57 = vmul.f32 %v13977_v46, %v13977_v46  ;;  %v14017_v46 = vsub.f32 %v18853_v38, %v5906_v6 }
 0x38e   : > { %v8692_v33 = vadd.f32 %v13878_v9, %v8429_v34  ;;  %v8430_v0 = vmul.f32 %v13860_v16, %v8167_v47  ;;  %v13998_v3 = vpop.xlane.xlu0 %5342  ;;  %v14005_v32 = vpop.f32.mrb[155].mxu1  ;;  %v6417_v12 = vmul.f32 %v13991_v4, %v13991_v4  ;;  %v14037_v35 = vsub.f32 %v18861_v24, %v5907_v63  ;;  %v18863_v63 = vld [vmem:[#allocation117_spill] sm:$0xff] }
 0x38f   : > { %18850 = vst [vmem:[#allocation164_spill] sm:$0xff] %v13998_v3  ;;  %11098 = vrsqrt.f32 %v7658_v2  ;;  %v7659_v22 = vadd.f32 1e-05, %v7403_v13  ;;  %6762 = vadd.xlane.f32.xlu1 %v6761_v43  ;;  %v2516_v34 = vpop.f32.mrb[209].mxu0  ;;  %v5452_v2 = vsel %vm5088_vm4, %v13985_v61, 0.0  ;;  %18854 = vst [vmem:[#allocation115_spill] sm:$0xff] %v14017_v46 }
 0x390   : > { %8948 = vst.msk [vmem:[%s13898_s22 + $0x20] sm:$0xff] %vm5088_vm4, %v8692_v33  ;;  %v8693_v47 = vadd.f32 %v13878_v9, %v8430_v0  ;;  %v14010_v39 = vpop.xlane.xlu1 %5345  ;;  %v10446_v15 = vpop.f32.mrb[210].mxu0  ;;  %v2517_v13 = vadd.f32 %v13638_v29, %v2516_v34  ;;  %v18855_v33 = vld [vmem:[#allocation69_spill] sm:$0xff]  ;;  %v6764_v38 = vsel %vm5088_vm4, %v6416_v57, 0.0  ;;  %v2525_v57 = vadd.f32 %v13638_v29, %v10445_v50 }
 0x391   : > { %18851 = vst [vmem:[#allocation165_spill] sm:$0xff] %v14010_v39  ;;  %v11095_v17 = vpop.eup %11094  ;;  %11100 = vrsqrt.f32 %v7659_v22  ;;  %5450 = vadd.xlane.f32.xlu0 %v5449_v23  ;;  %v2519_v43 = vpop.f32.mrb[211].mxu0  ;;  %v18856_v22 = vld [vmem:[#allocation112_spill] sm:$0xff]  ;;  %v18858_v39 = vld [vmem:[#allocation70_spill] sm:$0xff]  ;;  %v5908_v24 = vmul.f32 0.125, %v18863_v63 }
 0x392   : > { %8949 = vst.msk [vmem:[%s13898_s22 + $0x28] sm:$0xff] %vm5088_vm4, %v8693_v47  ;;  %v8168_v0 = vmul.f32 %v11095_v17, %v18855_v33  ;;  %v6658_v58 = vpop.xlane.xlu0 %6657  ;;  %v2520_v5 = vadd.f32 %v13638_v29, %v2519_v43  ;;  %v14027_v61 = vadd.f32 %v13562_v55, %v18856_v22  ;;  %v2915_v6 = vmax.f32 %v2517_v13, 0.0  ;;  %v18859_v33 = vld [vmem:[#allocation116_spill] sm:$0xff]  ;;  %18862 = vst [vmem:[#allocation112_spill] sm:$0xff] %v14037_v35  ;;  %v18868_v63 = vld [vmem:[#allocation74_spill] sm:$0xff] }
 0x393   : > { %v11097_v23 = vpop.eup %11096  ;;  %v7404_v34 = vmul.f32 0.125, %v6658_v58  ;;  %5453 = vadd.xlane.f32.xlu1 %v5452_v2  ;;  %v14034_v3 = vadd.f32 %v13562_v55, %v18859_v33  ;;  %v2917_v50 = vmax.f32 %v2525_v57, 0.0  ;;  %v6419_v57 = vmul.f32 %v14037_v35, %v14037_v35 }
 0x394   : > { %18857 = vst [vmem:[#allocation30_spill] sm:$0xff] %v14027_v61  ;;  %v8431_v47 = vmul.f32 %v13860_v16, %v8168_v0  ;;  %v8169_v17 = vmul.f32 %v11097_v23, %v18858_v39  ;;  %v6661_v4 = vpop.xlane.xlu1 %6660  ;;  %v2916_v43 = vmax.f32 %v2520_v5, 0.0  ;;  %10811 = vmatprep.mubr.msk.f32.mxu1 %vm2974_vm3, %v2915_v6  ;;  %v6767_v0 = vsel %vm5088_vm4, %v6417_v12, 0.0 }
 0x395   : > { %18860 = vst [vmem:[#allocation69_spill] sm:$0xff] %v14034_v3  ;;  %v7660_v22 = vadd.f32 1e-05, %v7404_v34  ;;  %v7405_v58 = vmul.f32 0.125, %v6661_v4  ;;  %6765 = vadd.xlane.f32.xlu0 %v6764_v38  ;;  %v2528_v5 = vadd.f32 %v13638_v29, %v10446_v15  ;;  %v5455_v12 = vsel %vm5088_vm4, %v14034_v3, 0.0 }
 0x396   : > { %v8694_v2 = vadd.f32 %v13878_v9, %v8431_v47  ;;  %v8432_v39 = vmul.f32 %v13860_v16, %v8169_v17  ;;  %v14043_v13 = vpop.xlane.xlu0 %5348  ;;  %10812 = vmatmul.mubr.msk.f32.gmra.mrb[208].mxu1 %vm2974_vm3, %v2916_v43  ;;  %v6418_v15 = vmul.f32 %v14017_v46, %v14017_v46  ;;  %v5909_v47 = vmul.f32 0.125, %v13491_v40  ;;  %v18864_v17 = vld [vmem:[#allocation72_spill] sm:$0xff] }
 0x397   : > { %11102 = vrsqrt.f32 %v7660_v22  ;;  %v7661_v4 = vadd.f32 1e-05, %v7405_v58  ;;  %6768 = vadd.xlane.f32.xlu1 %v6767_v0  ;;  %v2918_v38 = vmax.f32 %v2528_v5, 0.0  ;;  %10814 = vmatprep.mubr.msk.f32.mxu1 %vm2974_vm3, %v2917_v50  ;;  %v14065_v43 = vadd.f32 %v13562_v55, %v13497_v54 }
 0x398   : > { %8950 = vst.msk [vmem:[%s13898_s22 + $0x30] sm:$0xff] %vm5088_vm4, %v8694_v2  ;;  %v8695_v23 = vadd.f32 %v13878_v9, %v8432_v39  ;;  %v14052_v34 = vpop.xlane.xlu1 %5351  ;;  %v5458_v58 = vsel %vm5088_vm4, %v14027_v61, 0.0  ;;  %v18866_v2 = vld [vmem:[#allocation32_spill] sm:$0xff] }
 0x399   : > { %v11099_v6 = vpop.eup %11098  ;;  %11104 = vrsqrt.f32 %v7661_v4  ;;  %5456 = vadd.xlane.f32.xlu0 %v5455_v12  ;;  %18865 = vst [vmem:[#allocation70_spill] sm:$0xff] %v14065_v43  ;;  %v14073_v39 = vsub.f32 %v18866_v2, %v5908_v24  ;;  %v14079_v4 = vadd.f32 %v13562_v55, %v13487_v56  ;;  %v18870_v12 = vld [vmem:[#allocation33_spill] sm:$0xff] }
 0x39a   : > { %8951 = vst.msk [vmem:[%s13898_s22 + $0x38] sm:$0xff] %vm5088_vm4, %v8695_v23  ;;  %v8170_v33 = vmul.f32 %v11099_v6, %v18864_v17  ;;  %v6664_v22 = vpop.xlane.xlu0 %6663  ;;  %10815 = vmatmul.mubr.msk.f32.gmra.mrb[210].mxu1 %vm2974_vm3, %v2918_v38  ;;  %v6770_v23 = vsel %vm5088_vm4, %v6418_v15, 0.0  ;;  %v14083_v6 = vsub.f32 %v18870_v12, %v5909_v47  ;;  %v5910_v38 = vmul.f32 0.125, %v13500_v62 }
 0x39b   : > { %v11101_v40 = vpop.eup %11100  ;;  %18867 = vst [vmem:[#allocation116_spill] sm:$0xff] %v14073_v39  ;;  %v7406_v0 = vmul.f32 0.125, %v6664_v22  ;;  %5459 = vadd.xlane.f32.xlu1 %v5458_v58  ;;  %18869 = vst [vmem:[#allocation31_spill] sm:$0xff] %v14079_v4  ;;  %v14086_v22 = vpop.f32.mrb[156].mxu1  ;;  %v5461_v15 = vsel %vm5088_vm4, %v14065_v43, 0.0  ;;  %v6420_v2 = vmul.f32 %v14073_v39, %v14073_v39 }
 0x39c   : > { %v8433_v5 = vmul.f32 %v13860_v16, %v8170_v33  ;;  %v8171_v54 = vmul.f32 %v11101_v40, %v18868_v63  ;;  %v6667_v50 = vpop.xlane.xlu1 %6666  ;;  %18871 = vst [vmem:[#allocation117_spill] sm:$0xff] %v14083_v6  ;;  %v6773_v40 = vsel %vm5088_vm4, %v6419_v57, 0.0  ;;  %v14095_v47 = vpop.f32.mrb[157].mxu1  ;;  %v6421_v61 = vmul.f32 %v14083_v6, %v14083_v6 }
 0x39d   : > { %v7662_v24 = vadd.f32 1e-05, %v7406_v0  ;;  %v7407_v17 = vmul.f32 0.125, %v6667_v50  ;;  %6771 = vadd.xlane.f32.xlu0 %v6770_v23  ;;  %v14099_v0 = vpop.f32.mrb[158].mxu1  ;;  %v10449_v57 = vpop.f32.mrb[212].mxu0  ;;  %v5911_v50 = vmul.f32 0.125, %v13519_v53  ;;  %v14129_v6 = vadd.f32 %v13562_v55, %v13522_v27 }
 0x39e   : > { %v8696_v33 = vadd.f32 %v13878_v9, %v8433_v5  ;;  %v8434_v58 = vmul.f32 %v13860_v16, %v8171_v54  ;;  %v14090_v56 = vpop.xlane.xlu0 %5354  ;;  %v14107_v23 = vpop.f32.mrb[159].mxu1  ;;  %v6779_v27 = vsel %vm5088_vm4, %v6421_v61, 0.0 }
 0x39f   : > { %11106 = vrsqrt.f32 %v7662_v24  ;;  %v7663_v62 = vadd.f32 1e-05, %v7407_v17  ;;  %6774 = vadd.xlane.f32.xlu1 %v6773_v40  ;;  %v2532_v12 = vpop.f32.mrb[213].mxu0  ;;  %v18873_v24 = vld [vmem:[#allocation34_spill] sm:$0xff]  ;;  %v18875_v40 = vld [vmem:[#allocation77_spill] sm:$0xff]  ;;  %18878 = vst [vmem:[#allocation33_spill] sm:$0xff] %v14129_v6 }
 0x3a0   : > { %8952 = vst.msk [vmem:[%s13898_s22 + $0x40] sm:$0xff] %vm5088_vm4, %v8696_v33  ;;  %v8697_v5 = vadd.f32 %v13878_v9, %v8434_v58  ;;  %v14104_v63 = vpop.xlane.xlu1 %5357  ;;  %v14110_v17 = vsub.f32 %v18873_v24, %v5910_v38  ;;  %v5464_v58 = vsel %vm5088_vm4, %v14079_v4, 0.0  ;;  %v10450_v53 = vpop.f32.mrb[214].mxu0  ;;  %v6776_v38 = vsel %vm5088_vm4, %v6420_v2, 0.0 }
 0x3a1   : > { %18872 = vst [vmem:[#allocation72_spill] sm:$0xff] %v14104_v63  ;;  %v11103_v54 = vpop.eup %11102  ;;  %11108 = vrsqrt.f32 %v7663_v62  ;;  %5462 = vadd.xlane.f32.xlu0 %v5461_v15  ;;  %v14121_v15 = vadd.f32 %v13562_v55, %v13514_v41  ;;  %v18879_v41 = vld [vmem:[#allocation35_spill] sm:$0xff]  ;;  %v5912_v63 = vmul.f32 0.125, %v13524_v52  ;;  %v5467_v61 = vsel %vm5088_vm4, %v14129_v6, 0.0 }
 0x3a2   : > { %18874 = vst [vmem:[#allocation32_spill] sm:$0xff] %v14110_v17  ;;  %8953 = vst.msk [vmem:[%s13898_s22 + $0x48] sm:$0xff] %vm5088_vm4, %v8697_v5  ;;  %v8172_v33 = vmul.f32 %v11103_v54, %v18875_v40  ;;  %v6670_v43 = vpop.xlane.xlu0 %6669  ;;  %v2533_v5 = vadd.f32 %v13638_v29, %v2532_v12  ;;  %v2535_v54 = vpop.f32.mrb[215].mxu0  ;;  %v18877_v40 = vld [vmem:[#allocation78_spill] sm:$0xff]  ;;  %v14133_v46 = vsub.f32 %v18879_v41, %v5911_v50 }
 0x3a3   : > { %v11105_v62 = vpop.eup %11104  ;;  %18876 = vst [vmem:[#allocation74_spill] sm:$0xff] %v14121_v15  ;;  %v7408_v3 = vmul.f32 0.125, %v6670_v43  ;;  %5465 = vadd.xlane.f32.xlu1 %v5464_v58  ;;  %v2536_v35 = vadd.f32 %v13638_v29, %v2535_v54  ;;  %v6422_v52 = vmul.f32 %v14110_v17, %v14110_v17  ;;  %v18902_v17 = vld [vmem:[#allocation39_spill] sm:$0xff] }
 0x3a4   : > { %v8435_v24 = vmul.f32 %v13860_v16, %v8172_v33  ;;  %v8173_v4 = vmul.f32 %v11105_v62, %v18877_v40  ;;  %v6673_v39 = vpop.xlane.xlu1 %6672  ;;  %18880 = vst [vmem:[#allocation34_spill] sm:$0xff] %v14133_v46  ;;  %v2919_v12 = vmax.f32 %v2533_v5, 0.0 }
 0x3a5   : > { %v7664_v43 = vadd.f32 1e-05, %v7408_v3  ;;  %v7409_v2 = vmul.f32 0.125, %v6673_v39  ;;  %6777 = vadd.xlane.f32.xlu0 %v6776_v38  ;;  %v2920_v40 = vmax.f32 %v2536_v35, 0.0  ;;  %v2541_v3 = vadd.f32 %v13638_v29, %v10449_v57 }
 0x3a6   : > { %v8698_v58 = vadd.f32 %v13878_v9, %v8435_v24  ;;  %v8436_v33 = vmul.f32 %v13860_v16, %v8173_v4  ;;  %v14137_v62 = vpop.xlane.xlu0 %5360  ;;  %10817 = vmatprep.mubr.msk.f32.mxu1 %vm2974_vm3, %v2919_v12  ;;  %v2544_v35 = vadd.f32 %v13638_v29, %v10450_v53  ;;  %v5913_v57 = vmul.f32 0.125, %v13541_v7  ;;  %v18882_v24 = vld [vmem:[#allocation80_spill] sm:$0xff] }
 0x3a7   : > { %11110 = vrsqrt.f32 %v7664_v43  ;;  %v7665_v54 = vadd.f32 1e-05, %v7409_v2  ;;  %6780 = vadd.xlane.f32.xlu1 %v6779_v27  ;;  %10818 = vmatmul.mubr.msk.f32.gmra.mrb[212].mxu1 %vm2974_vm3, %v2920_v40  ;;  %v5470_v38 = vsel %vm5088_vm4, %v14121_v15, 0.0  ;;  %v2921_v5 = vmax.f32 %v2541_v3, 0.0  ;;  %v18884_v12 = vld [vmem:[#allocation36_spill] sm:$0xff]  ;;  %v18886_v40 = vld [vmem:[#allocation82_spill] sm:$0xff] }
 0x3a8   : > { %8954 = vst.msk [vmem:[%s13898_s22 + $0x50] sm:$0xff] %vm5088_vm4, %v8698_v58  ;;  %v8699_v39 = vadd.f32 %v13878_v9, %v8436_v33  ;;  %v14146_v4 = vpop.xlane.xlu1 %5363  ;;  %v14162_v43 = vadd.f32 %v13562_v55, %v13545_v37  ;;  %v6423_v53 = vmul.f32 %v14133_v46, %v14133_v46  ;;  %v2922_v2 = vmax.f32 %v2544_v35, 0.0  ;;  %v18887_v55 = vld [vmem:[#allocation37_spill] sm:$0xff] }
 0x3a9   : > { %18881 = vst [vmem:[#allocation77_spill] sm:$0xff] %v14146_v4  ;;  %v11107_v50 = vpop.eup %11106  ;;  %11112 = vrsqrt.f32 %v7665_v54  ;;  %5468 = vadd.xlane.f32.xlu0 %v5467_v61  ;;  %v14167_v58 = vsub.f32 %v18884_v12, %v5912_v63  ;;  %10820 = vmatprep.mubr.msk.f32.mxu1 %vm2974_vm3, %v2921_v5  ;;  %v6782_v37 = vsel %vm5088_vm4, %v6422_v52, 0.0  ;;  %v14177_v61 = vld [vmem:[#allocation6] ss:$0 sm:$0xff] }
 0x3aa   : > { %8955 = vst.msk [vmem:[%s13898_s22 + $0x58] sm:$0xff] %vm5088_vm4, %v8699_v39  ;;  %v8174_v41 = vmul.f32 %v11107_v50, %v18882_v24  ;;  %18883 = vst [vmem:[#allocation78_spill] sm:$0xff] %v14162_v43  ;;  %v6676_v29 = vpop.xlane.xlu0 %6675  ;;  %v14175_v39 = vsub.f32 %v18887_v55, %v5913_v57  ;;  %v14181_v63 = vadd.f32 %v14177_v61, %v13537_v11  ;;  %v6785_v24 = vsel %vm5088_vm4, %v6423_v53, 0.0 }
 0x3ab   : > { %v11109_v7 = vpop.eup %11108  ;;  %18885 = vst [vmem:[#allocation35_spill] sm:$0xff] %v14167_v58  ;;  %v7410_v33 = vmul.f32 0.125, %v6676_v29  ;;  %5471 = vadd.xlane.f32.xlu1 %v5470_v38  ;;  %10821 = vmatmul.mubr.msk.f32.gmra.mrb[214].mxu1 %vm2974_vm3, %v2922_v2  ;;  %v5473_v57 = vsel %vm5088_vm4, %v14162_v43, 0.0  ;;  %v5914_v11 = vmul.f32 0.125, %v13547_v21  ;;  %v6424_v2 = vmul.f32 %v14167_v58, %v14167_v58  ;;  %v18895_v43 = vld [vmem:[#allocation38_spill] sm:$0xff]  ;;  %v18900_v58 = vld [vmem:[#allocation128_spill] sm:$0xff] }
 0x3ac   : > { %v8437_v27 = vmul.f32 %v13860_v16, %v8174_v41  ;;  %v8175_v54 = vmul.f32 %v11109_v7, %v18886_v40  ;;  %v6679_v3 = vpop.xlane.xlu1 %6678  ;;  %18888 = vst [vmem:[#allocation80_spill] sm:$0xff] %v14175_v39  ;;  %18889 = vst [vmem:[#allocation36_spill] sm:$0xff] %v14181_v63  ;;  %v14190_v41 = vpop.f32.mrb[160].mxu1  ;;  %v18893_v40 = vld [vmem:[#allocation127_spill] sm:$0xff] }
 0x3ad   : > { %v7666_v35 = vadd.f32 1e-05, %v7410_v33  ;;  %v7411_v50 = vmul.f32 0.125, %v6679_v3  ;;  %6783 = vadd.xlane.f32.xlu0 %v6782_v37  ;;  %v14195_v7 = vpop.f32.mrb[161].mxu1  ;;  %v5915_v21 = vmul.f32 0.125, %v18893_v40  ;;  %v18894_v37 = vld [vmem:[#allocation85_spill] sm:$0xff]  ;;  %v14215_v40 = vsub.f32 %v18895_v43, %v5914_v11 }
 0x3ae   : > { %v8700_v38 = vadd.f32 %v13878_v9, %v8437_v27  ;;  %v8438_v5 = vmul.f32 %v13860_v16, %v8175_v54  ;;  %v14185_v52 = vpop.xlane.xlu0 %5366  ;;  %v14202_v33 = vpop.f32.mrb[162].mxu1  ;;  %v14228_v43 = vld [vmem:[#allocation4] ss:$0 sm:$0xff] }
 0x3af   : > { %18890 = vst [vmem:[#allocation82_spill] sm:$0xff] %v14185_v52  ;;  %11114 = vrsqrt.f32 %v7666_v35  ;;  %v7667_v29 = vadd.f32 1e-05, %v7411_v50  ;;  %6786 = vadd.xlane.f32.xlu1 %v6785_v24  ;;  %18892 = vst [vmem:[#allocation166_spill] sm:$0xff] %v14202_v33  ;;  %v10453_v54 = vpop.f32.mrb[216].mxu0  ;;  %v14205_v3 = vpop.f32.mrb[163].mxu1 }
 0x3b0   : > { %8956 = vst.msk [vmem:[%s13898_s22 + $0x60] sm:$0xff] %vm5088_vm4, %v8700_v38  ;;  %v8701_v53 = vadd.f32 %v13878_v9, %v8438_v5  ;;  %v14200_v12 = vpop.xlane.xlu1 %5369  ;;  %v5476_v50 = vsel %vm5088_vm4, %v14181_v63, 0.0  ;;  %v6425_v38 = vmul.f32 %v14175_v39, %v14175_v39  ;;  %v2548_v5 = vpop.f32.mrb[217].mxu0  ;;  %18896 = vst [vmem:[#allocation127_spill] sm:$0xff] %v14215_v40  ;;  %v18899_v63 = vld [vmem:[#allocation86_spill] sm:$0xff]  ;;  %v14226_v39 = vadd.f32 %v14177_v61, %v18900_v58 }
 0x3b1   : > { %18891 = vst [vmem:[#allocation37_spill] sm:$0xff] %v14200_v12  ;;  %v11111_v27 = vpop.eup %11110  ;;  %11116 = vrsqrt.f32 %v7667_v29  ;;  %5474 = vadd.xlane.f32.xlu0 %v5473_v57  ;;  %v18897_v57 = vld [vmem:[#allocation124_spill] sm:$0xff]  ;;  %v2549_v11 = vadd.f32 %v14228_v43, %v2548_v5  ;;  %v18904_v5 = vld [vmem:[#allocation129_spill] sm:$0xff] }
 0x3b2   : > { %8957 = vst.msk [vmem:[%s13898_s22 + $0x68] sm:$0xff] %vm5088_vm4, %v8701_v53  ;;  %v8176_v55 = vmul.f32 %v11111_v27, %v18894_v37  ;;  %v6682_v35 = vpop.xlane.xlu0 %6681  ;;  %v14219_v29 = vadd.f32 %v14177_v61, %v18897_v57  ;;  %v6788_v53 = vsel %vm5088_vm4, %v6424_v2, 0.0  ;;  %v10454_v27 = vpop.f32.mrb[218].mxu0  ;;  %18901 = vst [vmem:[#allocation38_spill] sm:$0xff] %v14226_v39  ;;  %v6791_v12 = vsel %vm5088_vm4, %v6425_v38, 0.0 }
 0x3b3   : > { %v11113_v24 = vpop.eup %11112  ;;  %v7412_v15 = vmul.f32 0.125, %v6682_v35  ;;  %5477 = vadd.xlane.f32.xlu1 %v5476_v50  ;;  %v2551_v57 = vpop.f32.mrb[219].mxu0  ;;  %v14232_v35 = vsub.f32 %v18902_v17, %v5915_v21  ;;  %v2923_v52 = vmax.f32 %v2549_v11, 0.0  ;;  %v5916_v4 = vmul.f32 0.125, %v18904_v5 }
 0x3b4   : > { %18898 = vst [vmem:[#allocation85_spill] sm:$0xff] %v14219_v29  ;;  %v8439_v37 = vmul.f32 %v13860_v16, %v8176_v55  ;;  %v8177_v6 = vmul.f32 %v11113_v24, %v18899_v63  ;;  %v6685_v46 = vpop.xlane.xlu1 %6684  ;;  %v2552_v55 = vadd.f32 %v14228_v43, %v2551_v57  ;;  %v6426_v21 = vmul.f32 %v14215_v40, %v14215_v40  ;;  %v18905_v57 = vld [vmem:[#allocation89_spill] sm:$0xff] }
 0x3b5   : > { %18903 = vst [vmem:[#allocation124_spill] sm:$0xff] %v14232_v35  ;;  %v7668_v2 = vadd.f32 1e-05, %v7412_v15  ;;  %v7413_v50 = vmul.f32 0.125, %v6685_v46  ;;  %6789 = vadd.xlane.f32.xlu0 %v6788_v53  ;;  %v2557_v38 = vadd.f32 %v14228_v43, %v10453_v54  ;;  %10823 = vmatprep.mubr.msk.f32.mxu1 %vm2974_vm3, %v2923_v52  ;;  %v2560_v11 = vadd.f32 %v14228_v43, %v10454_v27 }
 0x3b6   : > { %v8702_v63 = vadd.f32 %v13878_v9, %v8439_v37  ;;  %v8440_v58 = vmul.f32 %v13860_v16, %v8177_v6  ;;  %v14237_v24 = vpop.xlane.xlu0 %5372  ;;  %v2924_v17 = vmax.f32 %v2552_v55, 0.0  ;;  %v5479_v6 = vsel %vm5088_vm4, %v14226_v39, 0.0  ;;  %v18907_v55 = vld [vmem:[#allocation40_spill] sm:$0xff]  ;;  %v18920_v39 = vld [vmem:[#allocation134_spill] sm:$0xff] }
 0x3b7   : > { %11118 = vrsqrt.f32 %v7668_v2  ;;  %v7669_v33 = vadd.f32 1e-05, %v7413_v50  ;;  %6792 = vadd.xlane.f32.xlu1 %v6791_v12  ;;  %v5917_v12 = vmul.f32 0.125, %v13589_v1  ;;  %v5482_v37 = vsel %vm5088_vm4, %v14219_v29, 0.0 }
 0x3b8   : > { %8958 = vst.msk [vmem:[%s13898_s22 + $0x70] sm:$0xff] %vm5088_vm4, %v8702_v63  ;;  %v8703_v46 = vadd.f32 %v13878_v9, %v8440_v58  ;;  %v14244_v15 = vpop.xlane.xlu1 %5375  ;;  %10824 = vmatmul.mubr.msk.f32.gmra.mrb[216].mxu1 %vm2974_vm3, %v2924_v17  ;;  %v14262_v54 = vadd.f32 %v14177_v61, %v13595_v26  ;;  %v6427_v1 = vmul.f32 %v14232_v35, %v14232_v35  ;;  %v2926_v58 = vmax.f32 %v2560_v11, 0.0  ;;  %v18909_v17 = vld [vmem:[#allocation94_spill] sm:$0xff]  ;;  %v18922_v35 = vld [vmem:[#allocation43_spill] sm:$0xff] }
 0x3b9   : > { %v11115_v53 = vpop.eup %11114  ;;  %11120 = vrsqrt.f32 %v7669_v33  ;;  %5480 = vadd.xlane.f32.xlu0 %v5479_v6  ;;  %v2925_v33 = vmax.f32 %v2557_v38, 0.0  ;;  %v14267_v63 = vsub.f32 %v18907_v55, %v5916_v4  ;;  %v6794_v26 = vsel %vm5088_vm4, %v6426_v21, 0.0 }
 0x3ba   : > { %8959 = vst.msk [vmem:[%s13898_s22 + $0x78] sm:$0xff] %vm5088_vm4, %v8703_v46  ;;  %v8178_v2 = vmul.f32 %v11115_v53, %v18905_v57  ;;  %18906 = vst [vmem:[#allocation86_spill] sm:$0xff] %v14262_v54  ;;  %v6688_v52 = vpop.xlane.xlu0 %6687  ;;  %v18910_v53 = vld [vmem:[#allocation41_spill] sm:$0xff]  ;;  %v14278_v38 = vadd.f32 %v14177_v61, %v13585_v59  ;;  %v5918_v59 = vmul.f32 0.125, %v13598_v18  ;;  %v5919_v18 = vmul.f32 0.125, %v13617_v28 }
 0x3bb   : > { %v11117_v50 = vpop.eup %11116  ;;  %18908 = vst [vmem:[#allocation128_spill] sm:$0xff] %v14267_v63  ;;  %v7414_v27 = vmul.f32 0.125, %v6688_v52  ;;  %5483 = vadd.xlane.f32.xlu1 %v5482_v37  ;;  %10826 = vmatprep.mubr.msk.f32.mxu1 %vm2974_vm3, %v2925_v33  ;;  %v14274_v57 = vsub.f32 %v18910_v53, %v5917_v12  ;;  %v6797_v52 = vsel %vm5088_vm4, %v6427_v1, 0.0  ;;  %v5485_v12 = vsel %vm5088_vm4, %v14262_v54, 0.0  ;;  %v14288_v33 = vpop.f32.mrb[164].mxu1  ;;  %v18916_v54 = vld [vmem:[#allocation42_spill] sm:$0xff] }
 0x3bc   : > { %v8441_v5 = vmul.f32 %v13860_v16, %v8178_v2  ;;  %v8179_v46 = vmul.f32 %v11117_v50, %v18909_v17  ;;  %v6691_v6 = vpop.xlane.xlu1 %6690  ;;  %18912 = vst [vmem:[#allocation129_spill] sm:$0xff] %v14278_v38  ;;  %10827 = vmatmul.mubr.msk.f32.gmra.mrb[218].mxu1 %vm2974_vm3, %v2926_v58  ;;  %v6428_v55 = vmul.f32 %v14267_v63, %v14267_v63 }
 0x3bd   : > { %18911 = vst [vmem:[#allocation39_spill] sm:$0xff] %v14274_v57  ;;  %v7670_v4 = vadd.f32 1e-05, %v7414_v27  ;;  %v7415_v37 = vmul.f32 0.125, %v6691_v6  ;;  %6795 = vadd.xlane.f32.xlu0 %v6794_v26  ;;  %v14293_v27 = vpop.f32.mrb[165].mxu1  ;;  %v18915_v26 = vld [vmem:[#allocation97_spill] sm:$0xff]  ;;  %v14313_v28 = vsub.f32 %v18916_v54, %v5918_v59 }
 0x3be   : > { %v8704_v11 = vadd.f32 %v13878_v9, %v8441_v5  ;;  %v8442_v2 = vmul.f32 %v13860_v16, %v8179_v46  ;;  %v14283_v21 = vpop.xlane.xlu0 %5378  ;;  %v14300_v5 = vpop.f32.mrb[166].mxu1 }
 0x3bf   : > { %18913 = vst [vmem:[#allocation89_spill] sm:$0xff] %v14283_v21  ;;  %11122 = vrsqrt.f32 %v7670_v4  ;;  %v7671_v50 = vadd.f32 1e-05, %v7415_v37  ;;  %6798 = vadd.xlane.f32.xlu1 %v6797_v52  ;;  %v10457_v46 = vpop.f32.mrb[220].mxu0  ;;  %v14303_v6 = vpop.f32.mrb[167].mxu1  ;;  %v5488_v37 = vsel %vm5088_vm4, %v14278_v38, 0.0 }
 0x3c0   : > { %8960 = vst.msk [vmem:[%s13898_s22 + $0x80] sm:$0xff] %vm5088_vm4, %v8704_v11  ;;  %v8705_v1 = vadd.f32 %v13878_v9, %v8442_v2  ;;  %v14298_v58 = vpop.xlane.xlu1 %5381  ;;  %v6429_v11 = vmul.f32 %v14274_v57, %v14274_v57  ;;  %v2564_v2 = vpop.f32.mrb[221].mxu0  ;;  %18917 = vst [vmem:[#allocation94_spill] sm:$0xff] %v14313_v28  ;;  %v18919_v38 = vld [vmem:[#allocation98_spill] sm:$0xff]  ;;  %v14324_v57 = vadd.f32 %v14177_v61, %v18920_v39 }
 0x3c1   : > { %18914 = vst [vmem:[#allocation40_spill] sm:$0xff] %v14298_v58  ;;  %v11119_v17 = vpop.eup %11118  ;;  %11124 = vrsqrt.f32 %v7671_v50  ;;  %5486 = vadd.xlane.f32.xlu0 %v5485_v12  ;;  %v14317_v12 = vadd.f32 %v14177_v61, %v13612_v20  ;;  %v2565_v54 = vadd.f32 %v14228_v43, %v2564_v2  ;;  %v14328_v20 = vsub.f32 %v18922_v35, %v5919_v18  ;;  %v18925_v2 = vld [vmem:[#allocation135_spill] sm:$0xff] }
 0x3c2   : > { %8961 = vst.msk [vmem:[%s13898_s22 + $0x88] sm:$0xff] %vm5088_vm4, %v8705_v1  ;;  %v8180_v53 = vmul.f32 %v11119_v17, %v18915_v26  ;;  %v6694_v4 = vpop.xlane.xlu0 %6693  ;;  %v6800_v1 = vsel %vm5088_vm4, %v6428_v55, 0.0  ;;  %v10458_v17 = vpop.f32.mrb[222].mxu0  ;;  %18921 = vst [vmem:[#allocation97_spill] sm:$0xff] %v14324_v57  ;;  %v6803_v39 = vsel %vm5088_vm4, %v6429_v11, 0.0  ;;  %v5920_v58 = vmul.f32 0.125, %v18925_v2 }
 0x3c3   : > { %v11121_v52 = vpop.eup %11120  ;;  %18918 = vst [vmem:[#allocation41_spill] sm:$0xff] %v14317_v12  ;;  %v7416_v50 = vmul.f32 0.125, %v6694_v4  ;;  %5489 = vadd.xlane.f32.xlu1 %v5488_v37  ;;  %v2567_v59 = vpop.f32.mrb[223].mxu0  ;;  %18923 = vst [vmem:[#allocation42_spill] sm:$0xff] %v14328_v20  ;;  %v2927_v40 = vmax.f32 %v2565_v54, 0.0  ;;  %v6430_v11 = vmul.f32 %v14313_v28, %v14313_v28 }
 0x3c4   : > { %v8443_v26 = vmul.f32 %v13860_v16, %v8180_v53  ;;  %v8181_v29 = vmul.f32 %v11121_v52, %v18919_v38  ;;  %v6697_v63 = vpop.xlane.xlu1 %6696  ;;  %v2568_v55 = vadd.f32 %v14228_v43, %v2567_v59  ;;  %v5494_v59 = vsel %vm5088_vm4, %v14317_v12, 0.0  ;;  %v18934_v12 = vld [vmem:[#allocation45_spill] sm:$0xff] }
 0x3c5   : > { %v7672_v4 = vadd.f32 1e-05, %v7416_v50  ;;  %v7417_v37 = vmul.f32 0.125, %v6697_v63  ;;  %6801 = vadd.xlane.f32.xlu0 %v6800_v1  ;;  %v2573_v50 = vadd.f32 %v14228_v43, %v10457_v46  ;;  %10829 = vmatprep.mubr.msk.f32.mxu1 %vm2974_vm3, %v2927_v40 }
 0x3c6   : > { %v8706_v53 = vadd.f32 %v13878_v9, %v8443_v26  ;;  %v8444_v38 = vmul.f32 %v13860_v16, %v8181_v29  ;;  %v14333_v52 = vpop.xlane.xlu0 %5384  ;;  %v2928_v35 = vmax.f32 %v2568_v55, 0.0  ;;  %v5491_v29 = vsel %vm5088_vm4, %v14324_v57, 0.0  ;;  %v18927_v26 = vld [vmem:[#allocation138_spill] sm:$0xff] }
 0x3c7   : > { %18924 = vst [vmem:[#allocation98_spill] sm:$0xff] %v14333_v52  ;;  %11126 = vrsqrt.f32 %v7672_v4  ;;  %v7673_v21 = vadd.f32 1e-05, %v7417_v37  ;;  %6804 = vadd.xlane.f32.xlu1 %v6803_v39  ;;  %v5921_v54 = vmul.f32 0.125, %v18927_v26  ;;  %v2576_v4 = vadd.f32 %v14228_v43, %v10458_v17  ;;  %v18928_v37 = vld [vmem:[#allocation101_spill] sm:$0xff]  ;;  %v18931_v17 = vld [vmem:[#allocation44_spill] sm:$0xff] }
 0x3c8   : > { %8962 = vst.msk [vmem:[%s13898_s22 + $0x90] sm:$0xff] %vm5088_vm4, %v8706_v53  ;;  %v8707_v63 = vadd.f32 %v13878_v9, %v8444_v38  ;;  %v14340_v18 = vpop.xlane.xlu1 %5387  ;;  %10830 = vmatmul.mubr.msk.f32.gmra.mrb[220].mxu1 %vm2974_vm3, %v2928_v35  ;;  %v18929_v53 = vld [vmem:[#allocation139_spill] sm:$0xff]  ;;  %v2929_v38 = vmax.f32 %v2573_v50, 0.0  ;;  %v14363_v26 = vsub.f32 %v18931_v17, %v5920_v58  ;;  %v18936_v50 = vld [vmem:[#allocation137_spill] sm:$0xff]  ;;  %v14429_v52 = vld [vmem:[#allocation9] ss:$0 sm:$0xff] }
 0x3c9   : > { %18926 = vst [vmem:[#allocation134_spill] sm:$0xff] %v14340_v18  ;;  %v11123_v1 = vpop.eup %11122  ;;  %11128 = vrsqrt.f32 %v7673_v21  ;;  %5492 = vadd.xlane.f32.xlu0 %v5491_v29  ;;  %v14358_v46 = vadd.f32 %v14177_v61, %v18929_v53  ;;  %v6431_v21 = vmul.f32 %v14328_v20, %v14328_v20  ;;  %v2930_v29 = vmax.f32 %v2576_v4, 0.0  ;;  %v18948_v20 = vld [vmem:[#allocation110_spill] sm:$0xff] }
 0x3ca   : > { %8963 = vst.msk [vmem:[%s13898_s22 + $0x98] sm:$0xff] %vm5088_vm4, %v8707_v63  ;;  %v8182_v55 = vmul.f32 %v11123_v1, %v18928_v37  ;;  %v6700_v40 = vpop.xlane.xlu0 %6699  ;;  %18932 = vst [vmem:[#allocation135_spill] sm:$0xff] %v14363_v26  ;;  %v18933_v63 = vld [vmem:[#allocation106_spill] sm:$0xff]  ;;  %v6806_v53 = vsel %vm5088_vm4, %v6430_v11, 0.0  ;;  %10832 = vmatprep.mubr.msk.f32.mxu1 %vm2974_vm3, %v2929_v38  ;;  %v14370_v57 = vsub.f32 %v18934_v12, %v5921_v54  ;;  %v14384_v54 = vpop.f32.mrb[168].mxu1 }
 0x3cb   : > { %18930 = vst [vmem:[#allocation43_spill] sm:$0xff] %v14358_v46  ;;  %v11125_v39 = vpop.eup %11124  ;;  %v7418_v2 = vmul.f32 0.125, %v6700_v40  ;;  %5495 = vadd.xlane.f32.xlu1 %v5494_v59  ;;  %v14374_v40 = vadd.f32 %v14177_v61, %v18936_v50  ;;  %v6809_v38 = vsel %vm5088_vm4, %v6431_v21, 0.0  ;;  %v5497_v12 = vsel %vm5088_vm4, %v14358_v46, 0.0  ;;  %v10461_v50 = vpop.f32.mrb[224].mxu0 }
 0x3cc   : > { %v8445_v35 = vmul.f32 %v13860_v16, %v8182_v55  ;;  %v8183_v1 = vmul.f32 %v11125_v39, %v18933_v63  ;;  %v6703_v37 = vpop.xlane.xlu1 %6702  ;;  %18935 = vst [vmem:[#allocation138_spill] sm:$0xff] %v14370_v57  ;;  %10833 = vmatmul.mubr.msk.f32.gmra.mrb[222].mxu1 %vm2974_vm3, %v2930_v29  ;;  %v18939_v39 = vld [vmem:[#allocation140_spill] sm:$0xff]  ;;  %v14387_v29 = vpop.f32.mrb[169].mxu1  ;;  %v6432_v21 = vmul.f32 %v14363_v26, %v14363_v26  ;;  %v18943_v26 = vld [vmem:[#allocation46_spill] sm:$0xff] }
 0x3cd   : > { %18937 = vst [vmem:[#allocation101_spill] sm:$0xff] %v14374_v40  ;;  %v7674_v59 = vadd.f32 1e-05, %v7418_v2  ;;  %v7419_v58 = vmul.f32 0.125, %v6703_v37  ;;  %6807 = vadd.xlane.f32.xlu0 %v6806_v53  ;;  %v5922_v17 = vmul.f32 0.125, %v18939_v39  ;;  %v14396_v63 = vpop.f32.mrb[170].mxu1 }
 0x3ce   : > { %v8708_v4 = vadd.f32 %v13878_v9, %v8445_v35  ;;  %v8446_v55 = vmul.f32 %v13860_v16, %v8183_v1  ;;  %v14379_v11 = vpop.xlane.xlu0 %5390  ;;  %v18941_v37 = vld [vmem:[#allocation141_spill] sm:$0xff]  ;;  %v2580_v39 = vpop.f32.mrb[225].mxu0 }
 0x3cf   : > { %18938 = vst [vmem:[#allocation139_spill] sm:$0xff] %v14379_v11  ;;  %11130 = vrsqrt.f32 %v7674_v59  ;;  %v7675_v2 = vadd.f32 1e-05, %v7419_v58  ;;  %6810 = vadd.xlane.f32.xlu1 %v6809_v38  ;;  %v5923_v53 = vmul.f32 0.125, %v18941_v37  ;;  %v14399_v59 = vpop.f32.mrb[171].mxu1  ;;  %v18942_v58 = vld [vmem:[#allocation109_spill] sm:$0xff]  ;;  %v6433_v38 = vmul.f32 %v14370_v57, %v14370_v57 }
 0x3d0   : > { %8964 = vst.msk [vmem:[%s13898_s22 + $0xa0] sm:$0xff] %vm5088_vm4, %v8708_v4  ;;  %v8709_v16 = vadd.f32 %v13878_v9, %v8446_v55  ;;  %v14392_v35 = vpop.xlane.xlu1 %5393  ;;  %v5500_v55 = vsel %vm5088_vm4, %v14374_v40, 0.0  ;;  %v14409_v37 = vsub.f32 %v18943_v26, %v5922_v17  ;;  %v14419_v40 = vld [vmem:[#allocation7] ss:$0 sm:$0xff]  ;;  %v6812_v26 = vsel %vm5088_vm4, %v6432_v21, 0.0  ;;  %v18949_v11 = vld [vmem:[#allocation47_spill] sm:$0xff] }
 0x3d1   : > { %18940 = vst [vmem:[#allocation44_spill] sm:$0xff] %v14392_v35  ;;  %v11127_v1 = vpop.eup %11126  ;;  %11132 = vrsqrt.f32 %v7675_v2  ;;  %5498 = vadd.xlane.f32.xlu0 %v5497_v12  ;;  %v18945_v12 = vld [vmem:[#allocation14_spill] sm:$0xff]  ;;  %v2581_v17 = vadd.f32 %v14228_v43, %v2580_v39  ;;  %v14426_v18 = vsub.f32 %v18949_v11, %v5923_v53  ;;  %v6815_v21 = vsel %vm5088_vm4, %v6433_v38, 0.0 }
 0x3d2   : > { %8965 = vst.msk [vmem:[%s13898_s22 + $0xa8] sm:$0xff] %vm5088_vm4, %v8709_v16  ;;  %v8184_v4 = vmul.f32 %v11127_v1, %v18942_v58  ;;  %v6706_v9 = vpop.xlane.xlu0 %6705  ;;  %18944 = vst [vmem:[#allocation106_spill] sm:$0xff] %v14409_v37  ;;  %v14413_v2 = vadd.f32 %v14177_v61, %v18945_v12  ;;  %v14417_v16 = vadd.f32 %v14177_v61, %v13669_v48  ;;  %v10462_v58 = vpop.f32.mrb[226].mxu0  ;;  %v5924_v11 = vmul.f32 0.125, %v13672_v8 }
 0x3d3   : > { %v11129_v46 = vpop.eup %11128  ;;  %v7420_v1 = vmul.f32 0.125, %v6706_v9  ;;  %5501 = vadd.xlane.f32.xlu1 %v5500_v55  ;;  %v2583_v12 = vpop.f32.mrb[227].mxu0  ;;  %18950 = vst [vmem:[#allocation140_spill] sm:$0xff] %v14426_v18  ;;  %v2931_v39 = vmax.f32 %v2581_v17, 0.0  ;;  %v2589_v38 = vadd.f32 %v14228_v43, %v10461_v50  ;;  %v5925_v17 = vmul.f32 0.125, %v13687_v42 }
 0x3d4   : > { %18946 = vst [vmem:[#allocation45_spill] sm:$0xff] %v14413_v2  ;;  %18947 = vst [vmem:[#allocation137_spill] sm:$0xff] %v14417_v16  ;;  %v8447_v57 = vmul.f32 %v14419_v40, %v8184_v4  ;;  %v8185_v28 = vmul.f32 %v11129_v46, %v18948_v20  ;;  %v6709_v35 = vpop.xlane.xlu1 %6708  ;;  %v2584_v55 = vadd.f32 %v14228_v43, %v2583_v12  ;;  %v5506_v42 = vsel %vm5088_vm4, %v14413_v2, 0.0  ;;  %v18958_v2 = vld [vmem:[#allocation49_spill] sm:$0xff] }
 0x3d5   : > { %v7676_v48 = vadd.f32 1e-05, %v7420_v1  ;;  %v7421_v9 = vmul.f32 0.125, %v6709_v35  ;;  %6813 = vadd.xlane.f32.xlu0 %v6812_v26  ;;  %10835 = vmatprep.mubr.msk.f32.mxu1 %vm2974_vm3, %v2931_v39  ;;  %v6435_v12 = vmul.f32 %v14426_v18, %v14426_v18  ;;  %v14458_v50 = vadd.f32 %v14177_v61, %v13709_v51  ;;  %v18955_v39 = vld [vmem:[#allocation48_spill] sm:$0xff] }
 0x3d6   : > { %v8710_v4 = vadd.f32 %v14429_v52, %v8447_v57  ;;  %v8448_v20 = vmul.f32 %v14419_v40, %v8185_v28  ;;  %v14433_v46 = vpop.xlane.xlu0 %5396  ;;  %v2932_v35 = vmax.f32 %v2584_v55, 0.0  ;;  %v5503_v57 = vsel %vm5088_vm4, %v14417_v16, 0.0 }
 0x3d7   : > { %18951 = vst [vmem:[#allocation141_spill] sm:$0xff] %v14433_v46  ;;  %11134 = vrsqrt.f32 %v7676_v48  ;;  %v7677_v53 = vadd.f32 1e-05, %v7421_v9  ;;  %6816 = vadd.xlane.f32.xlu1 %v6815_v21  ;;  %v6434_v28 = vmul.f32 %v14409_v37, %v14409_v37  ;;  %v2592_v48 = vadd.f32 %v14228_v43, %v10462_v58  ;;  %v18953_v9 = vld [vmem:[#allocation113_spill] sm:$0xff]  ;;  %18954 = vst [vmem:[#allocation46_spill] sm:$0xff] %v14458_v50  ;;  %v18974_v46 = vld [vmem:[#allocation51_spill] sm:$0xff] }
 0x3d8   : > { %8966 = vst.msk [vmem:[%s13898_s22 + $0xb0] sm:$0xff] %vm5088_vm4, %v8710_v4  ;;  %v8711_v1 = vadd.f32 %v14429_v52, %v8448_v20  ;;  %v14440_v26 = vpop.xlane.xlu1 %5399  ;;  %10836 = vmatmul.mubr.msk.f32.gmra.mrb[224].mxu1 %vm2974_vm3, %v2932_v35  ;;  %v2933_v20 = vmax.f32 %v2589_v38, 0.0  ;;  %v14471_v38 = vsub.f32 %v18958_v2, %v5925_v17  ;;  %v5509_v2 = vsel %vm5088_vm4, %v14458_v50, 0.0  ;;  %v14485_v17 = vpop.f32.mrb[172].mxu1 }
 0x3d9   : > { %18952 = vst [vmem:[#allocation109_spill] sm:$0xff] %v14440_v26  ;;  %v11131_v8 = vpop.eup %11130  ;;  %11136 = vrsqrt.f32 %v7677_v53  ;;  %5504 = vadd.xlane.f32.xlu0 %v5503_v57  ;;  %v14463_v53 = vsub.f32 %v18955_v39, %v5924_v11  ;;  %v2934_v35 = vmax.f32 %v2592_v48, 0.0  ;;  %v6818_v16 = vsel %vm5088_vm4, %v6434_v28, 0.0 }
 0x3da   : > { %8967 = vst.msk [vmem:[%s13898_s22 + $0xb8] sm:$0xff] %vm5088_vm4, %v8711_v1  ;;  %v8186_v55 = vmul.f32 %v11131_v8, %v18953_v9  ;;  %v6712_v4 = vpop.xlane.xlu0 %6711  ;;  %v5926_v1 = vmul.f32 0.125, %v13694_v36  ;;  %v18957_v8 = vld [vmem:[#allocation118_spill] sm:$0xff]  ;;  %10838 = vmatprep.mubr.msk.f32.mxu1 %vm2974_vm3, %v2933_v20  ;;  %18959 = vst [vmem:[#allocation110_spill] sm:$0xff] %v14471_v38  ;;  %v6821_v48 = vsel %vm5088_vm4, %v6435_v12, 0.0  ;;  %v14479_v28 = vadd.f32 %v14177_v61, %v13697_v49 }
 0x3db   : > { %v11133_v21 = vpop.eup %11132  ;;  %18956 = vst [vmem:[#allocation14_spill] sm:$0xff] %v14463_v53  ;;  %v7422_v58 = vmul.f32 0.125, %v6712_v4  ;;  %5507 = vadd.xlane.f32.xlu1 %v5506_v42  ;;  %v6436_v12 = vmul.f32 %v14463_v53, %v14463_v53  ;;  %v14489_v42 = vpop.f32.mrb[173].mxu1  ;;  %v18969_v53 = vld [vmem:[#allocation143_spill] sm:$0xff] }
 0x3dc   : > { %v8449_v57 = vmul.f32 %v14419_v40, %v8186_v55  ;;  %v8187_v9 = vmul.f32 %v11133_v21, %v18957_v8  ;;  %v6715_v51 = vpop.xlane.xlu1 %6714  ;;  %10839 = vmatmul.mubr.msk.f32.gmra.mrb[226].mxu1 %vm2974_vm3, %v2934_v35  ;;  %18960 = vst [vmem:[#allocation47_spill] sm:$0xff] %v14479_v28  ;;  %v14496_v21 = vpop.f32.mrb[174].mxu1  ;;  %v18965_v8 = vld [vmem:[#allocation50_spill] sm:$0xff]  ;;  %v14514_v37 = vadd.f32 %v14177_v61, %v18969_v53 }
 0x3dd   : > { %v7678_v18 = vadd.f32 1e-05, %v7422_v58  ;;  %v7423_v11 = vmul.f32 0.125, %v6715_v51  ;;  %6819 = vadd.xlane.f32.xlu0 %v6818_v16  ;;  %18963 = vst [vmem:[#allocation118_spill] sm:$0xff] %v14496_v21  ;;  %v18964_v58 = vld [vmem:[#allocation142_spill] sm:$0xff]  ;;  %v18967_v51 = vld [vmem:[#allocation121_spill] sm:$0xff] }
 0x3de   : > { %v8712_v36 = vadd.f32 %v14429_v52, %v8449_v57  ;;  %v8450_v55 = vmul.f32 %v14419_v40, %v8187_v9  ;;  %v14481_v4 = vpop.xlane.xlu0 %5402  ;;  %v5927_v35 = vmul.f32 0.125, %v18964_v58  ;;  %v14499_v57 = vpop.f32.mrb[175].mxu1  ;;  %v14502_v9 = vsub.f32 %v18965_v8, %v5926_v1  ;;  %18970 = vst [vmem:[#allocation142_spill] sm:$0xff] %v14514_v37 }
 0x3df   : > { %18961 = vst [vmem:[#allocation113_spill] sm:$0xff] %v14481_v4  ;;  %11138 = vrsqrt.f32 %v7678_v18  ;;  %v7679_v16 = vadd.f32 1e-05, %v7423_v11  ;;  %6822 = vadd.xlane.f32.xlu1 %v6821_v48  ;;  %v10465_v18 = vpop.f32.mrb[228].mxu0 }
 0x3e0   : > { %8968 = vst.msk [vmem:[%s13898_s22 + $0xc0] sm:$0xff] %vm5088_vm4, %v8712_v36  ;;  %v8713_v49 = vadd.f32 %v14429_v52, %v8450_v55  ;;  %v14494_v20 = vpop.xlane.xlu1 %5405  ;;  %18966 = vst [vmem:[#allocation49_spill] sm:$0xff] %v14502_v9  ;;  %v5512_v36 = vsel %vm5088_vm4, %v14479_v28, 0.0  ;;  %v6437_v55 = vmul.f32 %v14471_v38, %v14471_v38  ;;  %v2596_v58 = vpop.f32.mrb[229].mxu0  ;;  %v14525_v53 = vsub.f32 %v18974_v46, %v5927_v35  ;;  %v18976_v35 = vld [vmem:[#allocation52_spill] sm:$0xff] }
 0x3e1   : > { %18962 = vst [vmem:[#allocation48_spill] sm:$0xff] %v14494_v20  ;;  %v11135_v39 = vpop.eup %11134  ;;  %11140 = vrsqrt.f32 %v7679_v16  ;;  %5510 = vadd.xlane.f32.xlu0 %v5509_v2  ;;  %v18968_v2 = vld [vmem:[#allocation144_spill] sm:$0xff]  ;;  %v18972_v20 = vld [vmem:[#allocation146_spill] sm:$0xff]  ;;  %v6438_v46 = vmul.f32 %v14502_v9, %v14502_v9 }
 0x3e2   : > { %8969 = vst.msk [vmem:[%s13898_s22 + $0xc8] sm:$0xff] %vm5088_vm4, %v8713_v49  ;;  %v8188_v11 = vmul.f32 %v11135_v39, %v18967_v51  ;;  %v6718_v48 = vpop.xlane.xlu0 %6717  ;;  %v5928_v50 = vmul.f32 0.125, %v18968_v2  ;;  %v6824_v49 = vsel %vm5088_vm4, %v6436_v12, 0.0  ;;  %v10466_v39 = vpop.f32.mrb[230].mxu0  ;;  %v18971_v51 = vld [vmem:[#allocation122_spill] sm:$0xff]  ;;  %v14521_v38 = vadd.f32 %v14177_v61, %v18972_v20  ;;  %18975 = vst [vmem:[#allocation121_spill] sm:$0xff] %v14525_v53 }
 0x3e3   : > { %v11137_v16 = vpop.eup %11136  ;;  %v7424_v1 = vmul.f32 0.125, %v6718_v48  ;;  %5513 = vadd.xlane.f32.xlu1 %v5512_v36  ;;  %v2597_v2 = vadd.f32 %v14228_v43, %v2596_v58  ;;  %v2599_v26 = vpop.f32.mrb[231].mxu0  ;;  %v6827_v20 = vsel %vm5088_vm4, %v6437_v55, 0.0 }
 0x3e4   : > { %v8451_v8 = vmul.f32 %v14419_v40, %v8188_v11  ;;  %v8189_v28 = vmul.f32 %v11137_v16, %v18971_v51  ;;  %18973 = vst [vmem:[#allocation50_spill] sm:$0xff] %v14521_v38  ;;  %v6721_v4 = vpop.xlane.xlu1 %6720  ;;  %v2600_v12 = vadd.f32 %v14228_v43, %v2599_v26  ;;  %v5515_v55 = vsel %vm5088_vm4, %v14521_v38, 0.0 }
 0x3e5   : > { %v7680_v48 = vadd.f32 1e-05, %v7424_v1  ;;  %v7425_v36 = vmul.f32 0.125, %v6721_v4  ;;  %6825 = vadd.xlane.f32.xlu0 %v6824_v49  ;;  %v2935_v21 = vmax.f32 %v2597_v2, 0.0  ;;  %v14536_v1 = vsub.f32 %v18976_v35, %v5928_v50 }
 0x3e6   : > { %v8714_v11 = vadd.f32 %v14429_v52, %v8451_v8  ;;  %v8452_v16 = vmul.f32 %v14419_v40, %v8189_v28  ;;  %v14530_v51 = vpop.xlane.xlu0 %5408  ;;  %v2936_v4 = vmax.f32 %v2600_v12, 0.0  ;;  %v2605_v49 = vadd.f32 %v14228_v43, %v10465_v18 }
 0x3e7   : > { %11142 = vrsqrt.f32 %v7680_v48  ;;  %v7681_v58 = vadd.f32 1e-05, %v7425_v36  ;;  %6828 = vadd.xlane.f32.xlu1 %v6827_v20  ;;  %18977 = vst [vmem:[#allocation144_spill] sm:$0xff] %v14536_v1  ;;  %10841 = vmatprep.mubr.msk.f32.mxu1 %vm2974_vm3, %v2935_v21  ;;  %v5929_v2 = vmul.f32 0.125, %v13735_v31  ;;  %v6439_v50 = vmul.f32 %v14525_v53, %v14525_v53  ;;  %v18979_v36 = vld [vmem:[#allocation125_spill] sm:$0xff]  ;;  %v18981_v20 = vld [vmem:[#allocation147_spill] sm:$0xff] }
 0x3e8   : > { %8970 = vst.msk [vmem:[%s13898_s22 + $0xd0] sm:$0xff] %vm5088_vm4, %v8714_v11  ;;  %v8715_v26 = vadd.f32 %v14429_v52, %v8452_v16  ;;  %v14541_v28 = vpop.xlane.xlu1 %5411  ;;  %v2608_v48 = vadd.f32 %v14228_v43, %v10466_v39  ;;  %10842 = vmatmul.mubr.msk.f32.gmra.mrb[228].mxu1 %vm2974_vm3, %v2936_v4  ;;  %v14557_v18 = vadd.f32 %v14177_v61, %v13795_v30  ;;  %v5518_v31 = vsel %vm5088_vm4, %v14514_v37, 0.0  ;;  %v18983_v37 = vld [vmem:[#allocation53_spill] sm:$0xff] }
 0x3e9   : > { %18978 = vst [vmem:[#allocation143_spill] sm:$0xff] %v14541_v28  ;;  %v11139_v8 = vpop.eup %11138  ;;  %11144 = vrsqrt.f32 %v7681_v58  ;;  %5516 = vadd.xlane.f32.xlu0 %v5515_v55  ;;  %v2937_v11 = vmax.f32 %v2605_v49, 0.0  ;;  %v5930_v58 = vmul.f32 0.125, %v18981_v20  ;;  %v6440_v30 = vmul.f32 %v14536_v1, %v14536_v1  ;;  %v19000_v28 = vld [vmem:[#allocation151_spill] sm:$0xff] }
 0x3ea   : > { %8971 = vst.msk [vmem:[%s13898_s22 + $0xd8] sm:$0xff] %vm5088_vm4, %v8715_v26  ;;  %v8190_v12 = vmul.f32 %v11139_v8, %v18979_v36  ;;  %18980 = vst [vmem:[#allocation122_spill] sm:$0xff] %v14557_v18  ;;  %v6724_v21 = vpop.xlane.xlu0 %6723  ;;  %v2938_v39 = vmax.f32 %v2608_v48, 0.0  ;;  %v18982_v26 = vld [vmem:[#allocation130_spill] sm:$0xff]  ;;  %v6830_v36 = vsel %vm5088_vm4, %v6438_v46, 0.0  ;;  %v14569_v49 = vsub.f32 %v18983_v37, %v5929_v2  ;;  %v14583_v2 = vpop.f32.mrb[176].mxu1 }
 0x3eb   : > { %v11141_v16 = vpop.eup %11140  ;;  %v7426_v35 = vmul.f32 0.125, %v6724_v21  ;;  %5519 = vadd.xlane.f32.xlu1 %v5518_v31  ;;  %10844 = vmatprep.mubr.msk.f32.mxu1 %vm2974_vm3, %v2937_v11  ;;  %v6833_v48 = vsel %vm5088_vm4, %v6439_v50, 0.0  ;;  %v14577_v21 = vadd.f32 %v14177_v61, %v13783_v45  ;;  %v5521_v37 = vsel %vm5088_vm4, %v14557_v18, 0.0  ;;  %v18987_v11 = vld [vmem:[#allocation54_spill] sm:$0xff]  ;;  %v18993_v18 = vld [vmem:[#allocation149_spill] sm:$0xff] }
 0x3ec   : > { %v8453_v4 = vmul.f32 %v14419_v40, %v8190_v12  ;;  %v8191_v55 = vmul.f32 %v11141_v16, %v18982_v26  ;;  %v6727_v8 = vpop.xlane.xlu1 %6726  ;;  %18984 = vst [vmem:[#allocation146_spill] sm:$0xff] %v14569_v49  ;;  %10845 = vmatmul.mubr.msk.f32.gmra.mrb[230].mxu1 %vm2974_vm3, %v2938_v39  ;;  %v14586_v16 = vsub.f32 %v18987_v11, %v5930_v58  ;;  %v5931_v50 = vmul.f32 0.125, %v13756_v44  ;;  %v14589_v39 = vpop.f32.mrb[177].mxu1 }
 0x3ed   : > { %v7682_v38 = vadd.f32 1e-05, %v7426_v35  ;;  %v7427_v20 = vmul.f32 0.125, %v6727_v8  ;;  %6831 = vadd.xlane.f32.xlu0 %v6830_v36  ;;  %18985 = vst [vmem:[#allocation51_spill] sm:$0xff] %v14577_v21  ;;  %v6441_v58 = vmul.f32 %v14569_v49, %v14569_v49  ;;  %v10469_v44 = vpop.f32.mrb[232].mxu0  ;;  %v18990_v8 = vld [vmem:[#allocation133_spill] sm:$0xff] }
 0x3ee   : > { %v8716_v12 = vadd.f32 %v14429_v52, %v8453_v4  ;;  %v8454_v46 = vmul.f32 %v14419_v40, %v8191_v55  ;;  %v14579_v31 = vpop.xlane.xlu0 %5414  ;;  %18988 = vst [vmem:[#allocation125_spill] sm:$0xff] %v14586_v16  ;;  %v14596_v26 = vpop.f32.mrb[178].mxu1  ;;  %v5932_v49 = vmul.f32 0.125, %v18993_v18 }
 0x3ef   : > { %18986 = vst [vmem:[#allocation52_spill] sm:$0xff] %v14579_v31  ;;  %11146 = vrsqrt.f32 %v7682_v38  ;;  %v7683_v35 = vadd.f32 1e-05, %v7427_v20  ;;  %6834 = vadd.xlane.f32.xlu1 %v6833_v48  ;;  %v14600_v38 = vpop.f32.mrb[179].mxu1  ;;  %v5524_v48 = vsel %vm5088_vm4, %v14577_v21, 0.0  ;;  %v18995_v21 = vld [vmem:[#allocation154_spill] sm:$0xff] }
 0x3f0   : > { %8972 = vst.msk [vmem:[%s13898_s22 + $0xe0] sm:$0xff] %vm5088_vm4, %v8716_v12  ;;  %v8717_v45 = vadd.f32 %v14429_v52, %v8454_v46  ;;  %v14594_v4 = vpop.xlane.xlu1 %5417  ;;  %v6836_v12 = vsel %vm5088_vm4, %v6440_v30, 0.0  ;;  %v2612_v46 = vpop.f32.mrb[233].mxu0  ;;  %v14618_v30 = vadd.f32 %v14177_v61, %v18995_v21 }
 0x3f1   : > { %18989 = vst [vmem:[#allocation147_spill] sm:$0xff] %v14594_v4  ;;  %v11143_v55 = vpop.eup %11142  ;;  %11148 = vrsqrt.f32 %v7683_v35  ;;  %5522 = vadd.xlane.f32.xlu0 %v5521_v37  ;;  %v18991_v35 = vld [vmem:[#allocation55_spill] sm:$0xff]  ;;  %v10470_v53 = vpop.f32.mrb[234].mxu0 }
 0x3f2   : > { %8973 = vst.msk [vmem:[%s13898_s22 + $0xe8] sm:$0xff] %vm5088_vm4, %v8717_v45  ;;  %v8192_v36 = vmul.f32 %v11143_v55, %v18990_v8  ;;  %v6730_v20 = vpop.xlane.xlu0 %6729  ;;  %v14609_v37 = vsub.f32 %v18991_v35, %v5931_v50  ;;  %v6442_v45 = vmul.f32 %v14586_v16, %v14586_v16  ;;  %v18994_v8 = vld [vmem:[#allocation13_spill] sm:$0xff]  ;;  %18996 = vst [vmem:[#allocation53_spill] sm:$0xff] %v14618_v30  ;;  %v2615_v35 = vpop.f32.mrb[235].mxu0 }
 0x3f3   : > { %v11145_v11 = vpop.eup %11144  ;;  %v7428_v1 = vmul.f32 0.125, %v6730_v20  ;;  %5525 = vadd.xlane.f32.xlu1 %v5524_v48  ;;  %v2613_v50 = vadd.f32 %v14228_v43, %v2612_v46  ;;  %v6839_v20 = vsel %vm5088_vm4, %v6441_v58, 0.0  ;;  %v2616_v48 = vadd.f32 %v14228_v43, %v2615_v35 }
 0x3f4   : > { %18992 = vst [vmem:[#allocation130_spill] sm:$0xff] %v14609_v37  ;;  %v8455_v55 = vmul.f32 %v14419_v40, %v8192_v36  ;;  %v8193_v9 = vmul.f32 %v11145_v11, %v18994_v8  ;;  %v6733_v4 = vpop.xlane.xlu1 %6732  ;;  %v18997_v8 = vld [vmem:[#allocation153_spill] sm:$0xff] }
 0x3f5   : > { %v7684_v31 = vadd.f32 1e-05, %v7428_v1  ;;  %v7429_v18 = vmul.f32 0.125, %v6733_v4  ;;  %6837 = vadd.xlane.f32.xlu0 %v6836_v12  ;;  %v14627_v21 = vadd.f32 %v14177_v61, %v18997_v8  ;;  %v2939_v46 = vmax.f32 %v2613_v50, 0.0  ;;  %v19001_v12 = vld [vmem:[#allocation56_spill] sm:$0xff] }
 0x3f6   : > { %v8718_v36 = vadd.f32 %v14429_v52, %v8455_v55  ;;  %v8456_v11 = vmul.f32 %v14419_v40, %v8193_v9  ;;  %v14629_v16 = vpop.xlane.xlu0 %5420  ;;  %v5933_v1 = vmul.f32 0.125, %v19000_v28  ;;  %v2940_v58 = vmax.f32 %v2616_v48, 0.0 }
 0x3f7   : > { %18998 = vst [vmem:[#allocation54_spill] sm:$0xff] %v14627_v21  ;;  %18999 = vst [vmem:[#allocation133_spill] sm:$0xff] %v14629_v16  ;;  %11150 = vrsqrt.f32 %v7684_v31  ;;  %v7685_v4 = vadd.f32 1e-05, %v7429_v18  ;;  %6840 = vadd.xlane.f32.xlu1 %v6839_v20  ;;  %v14633_v35 = vsub.f32 %v19001_v12, %v5932_v49  ;;  %v5527_v8 = vsel %vm5088_vm4, %v14618_v30, 0.0  ;;  %10847 = vmatprep.mubr.msk.f32.mxu1 %vm2974_vm3, %v2939_v46  ;;  %v19004_v18 = vld [vmem:[#allocation91_spill] sm:$0xff] }
 0x3f8   : > { %8974 = vst.msk [vmem:[%s13898_s22 + $0xf0] sm:$0xff] %vm5088_vm4, %v8718_v36  ;;  %v8719_v9 = vadd.f32 %v14429_v52, %v8456_v11  ;;  %v14638_v55 = vpop.xlane.xlu1 %5423  ;;  %v2621_v50 = vadd.f32 %v14228_v43, %v10469_v44  ;;  %v6443_v49 = vmul.f32 %v14609_v37, %v14609_v37  ;;  %v2624_v31 = vadd.f32 %v14228_v43, %v10470_v53  ;;  %v19023_v16 = vld [vmem:[#allocation159_spill] sm:$0xff] }
 0x3f9   : > { %19002 = vst [vmem:[#allocation55_spill] sm:$0xff] %v14633_v35  ;;  %19003 = vst [vmem:[#allocation149_spill] sm:$0xff] %v14638_v55  ;;  %v11147_v28 = vpop.eup %11146  ;;  %11152 = vrsqrt.f32 %v7685_v4  ;;  %5528 = vadd.xlane.f32.xlu0 %v5527_v8  ;;  %10848 = vmatmul.mubr.msk.f32.gmra.mrb[232].mxu1 %vm2974_vm3, %v2940_v58  ;;  %v14653_v48 = vadd.f32 %v14177_v61, %v13880_v25  ;;  %v5530_v36 = vsel %vm5088_vm4, %v14627_v21, 0.0  ;;  %v19006_v4 = vld [vmem:[#allocation58_spill] sm:$0xff]  ;;  %v19008_v8 = vld [vmem:[#allocation15_spill] sm:$0xff]  ;;  %v6842_v25 = vsel %vm5088_vm4, %v6442_v45, 0.0 }
 0x3fa   : > { %8975 = vst.msk [vmem:[%s13898_s22 + $0xf8] sm:$0xff] %vm5088_vm4, %v8719_v9  ;;  %v8194_v20 = vmul.f32 %v11147_v28, %v19004_v18  ;;  %v6736_v44 = vpop.xlane.xlu0 %6735  ;;  %v2941_v11 = vmax.f32 %v2621_v50, 0.0  ;;  %v14658_v12 = vsub.f32 %v19006_v4, %v5933_v1  ;;  %v2942_v58 = vmax.f32 %v2624_v31, 0.0  ;;  %v19009_v50 = vld [vmem:[#allocation156_spill] sm:$0xff]  ;;  %v19012_v4 = vld [vmem:[#allocation157_spill] sm:$0xff] }
 0x3fb   : > { %19005 = vst [vmem:[#allocation13_spill] sm:$0xff] %v14653_v48  ;;  %v11149_v46 = vpop.eup %11148  ;;  %v7430_v53 = vmul.f32 0.125, %v6736_v44  ;;  %5531 = vadd.xlane.f32.xlu1 %v5530_v36  ;;  %v6444_v30 = vmul.f32 %v14633_v35, %v14633_v35  ;;  %v5934_v21 = vmul.f32 0.125, %v19009_v50  ;;  %v6845_v31 = vsel %vm5088_vm4, %v6443_v49, 0.0  ;;  %v19016_v50 = vld [vmem:[#allocation60_spill] sm:$0xff] }
 0x3fc   : > { %19007 = vst [vmem:[#allocation154_spill] sm:$0xff] %v14658_v12  ;;  %v8457_v9 = vmul.f32 %v14419_v40, %v8194_v20  ;;  %v8195_v28 = vmul.f32 %v11149_v46, %v19008_v8  ;;  %v6739_v18 = vpop.xlane.xlu1 %6738  ;;  %10850 = vmatprep.mubr.msk.f32.mxu1 %vm2974_vm3, %v2941_v11  ;;  %v14673_v45 = vadd.f32 %v14177_v61, %v13873_v10  ;;  %v5533_v11 = vsel %vm5088_vm4, %v14653_v48, 0.0  ;;  %v14679_v46 = vpop.f32.mrb[180].mxu1 }
 0x3fd   : > { %v7686_v37 = vadd.f32 1e-05, %v7430_v53  ;;  %v7431_v1 = vmul.f32 0.125, %v6739_v18  ;;  %6843 = vadd.xlane.f32.xlu0 %v6842_v25  ;;  %10851 = vmatmul.mubr.msk.f32.gmra.mrb[234].mxu1 %vm2974_vm3, %v2942_v58  ;;  %v5935_v53 = vmul.f32 0.125, %v19012_v4  ;;  %v6445_v58 = vmul.f32 %v14658_v12, %v14658_v12  ;;  %v10473_v25 = vpop.f32.mrb[236].mxu0 }
 0x3fe   : > { %v8720_v20 = vadd.f32 %v14429_v52, %v8457_v9  ;;  %v8458_v44 = vmul.f32 %v14419_v40, %v8195_v28  ;;  %19010 = vst [vmem:[#allocation153_spill] sm:$0xff] %v14673_v45  ;;  %v14675_v36 = vpop.xlane.xlu0 %5426  ;;  %v14684_v9 = vpop.f32.mrb[181].mxu1  ;;  %v6848_v48 = vsel %vm5088_vm4, %v6444_v30, 0.0 }
 0x3ff   : > { %19011 = vst [vmem:[#allocation151_spill] sm:$0xff] %v14675_v36  ;;  %11154 = vrsqrt.f32 %v7686_v37  ;;  %v7687_v49 = vadd.f32 1e-05, %v7431_v1  ;;  %6846 = vadd.xlane.f32.xlu1 %v6845_v31  ;;  %v14691_v28 = vpop.f32.mrb[182].mxu1  ;;  %v14696_v1 = vsub.f32 %v19016_v50, %v5934_v21  ;;  %v19018_v31 = vld [vmem:[#allocation16_spill] sm:$0xff]  ;;  %v2628_v12 = vpop.f32.mrb[237].mxu0 }
 0x400   : > { %8976 = vst.msk [vmem:[%s13898_s22 + $0x100] sm:$0xff] %vm5088_vm4, %v8720_v20  ;;  %v8721_v10 = vadd.f32 %v14429_v52, %v8458_v44  ;;  %v14689_v8 = vpop.xlane.xlu1 %5429  ;;  %19014 = vst [vmem:[#allocation91_spill] sm:$0xff] %v14691_v28  ;;  %v14693_v37 = vpop.f32.mrb[183].mxu1  ;;  %v5536_v44 = vsel %vm5088_vm4, %v14673_v45, 0.0  ;;  %v6851_v21 = vsel %vm5088_vm4, %v6445_v58, 0.0  ;;  %v19022_v50 = vld [vmem:[#allocation17_spill] sm:$0xff]  ;;  %v14713_v45 = vadd.f32 %v14177_v61, %v19023_v16 }
 0x401   : > { %19013 = vst [vmem:[#allocation56_spill] sm:$0xff] %v14689_v8  ;;  %v11151_v18 = vpop.eup %11150  ;;  %11156 = vrsqrt.f32 %v7687_v49  ;;  %5534 = vadd.xlane.f32.xlu0 %v5533_v11  ;;  %19015 = vst [vmem:[#allocation58_spill] sm:$0xff] %v14693_v37  ;;  %v19019_v49 = vld [vmem:[#allocation63_spill] sm:$0xff]  ;;  %v19021_v8 = vld [vmem:[#allocation100_spill] sm:$0xff]  ;;  %v2629_v28 = vadd.f32 %v14228_v43, %v2628_v12 }
 0x402   : > { %19017 = vst [vmem:[#allocation15_spill] sm:$0xff] %v14696_v1  ;;  %8977 = vst.msk [vmem:[%s13898_s22 + $0x108] sm:$0xff] %vm5088_vm4, %v8721_v10  ;;  %v8196_v4 = vmul.f32 %v11151_v18, %v19018_v31  ;;  %v6742_v20 = vpop.xlane.xlu0 %6741  ;;  %v14705_v11 = vsub.f32 %v19019_v49, %v5935_v53  ;;  %v5936_v36 = vmul.f32 0.125, %v19021_v8  ;;  %v10474_v10 = vpop.f32.mrb[238].mxu0  ;;  %v19025_v49 = vld [vmem:[#allocation105_spill] sm:$0xff]  ;;  %v19026_v61 = vld [vmem:[#allocation158_spill] sm:$0xff] }
 0x403   : > { %v11153_v35 = vpop.eup %11152  ;;  %v7432_v55 = vmul.f32 0.125, %v6742_v20  ;;  %5537 = vadd.xlane.f32.xlu1 %v5536_v44  ;;  %19024 = vst [vmem:[#allocation157_spill] sm:$0xff] %v14713_v45  ;;  %v2631_v53 = vpop.f32.mrb[239].mxu0  ;;  %v5937_v37 = vmul.f32 0.125, %v19025_v49  ;;  %v14720_v44 = vld [vmem:[#allocation6] ss:$0 sm:$0xff] }
 0x404   : > { %19020 = vst [vmem:[#allocation156_spill] sm:$0xff] %v14705_v11  ;;  %v8459_v18 = vmul.f32 %v14419_v40, %v8196_v4  ;;  %v8197_v31 = vmul.f32 %v11153_v35, %v19022_v50  ;;  %v6745_v30 = vpop.xlane.xlu1 %6744  ;;  %v2632_v58 = vadd.f32 %v14228_v43, %v2631_v53  ;;  %v14724_v16 = vadd.f32 %v14720_v44, %v19026_v61  ;;  %v19034_v61 = vld [vmem:[#allocation18_spill] sm:$0xff] }
 0x405   : > { %v7688_v8 = vadd.f32 1e-05, %v7432_v55  ;;  %v7433_v20 = vmul.f32 0.125, %v6745_v30  ;;  %6849 = vadd.xlane.f32.xlu0 %v6848_v48  ;;  %v2943_v50 = vmax.f32 %v2629_v28, 0.0  ;;  %v6446_v55 = vmul.f32 %v14696_v1, %v14696_v1 }
 0x406   : > { %v8722_v4 = vadd.f32 %v14429_v52, %v8459_v18  ;;  %v8460_v35 = vmul.f32 %v14419_v40, %v8197_v31  ;;  %19027 = vst [vmem:[#allocation60_spill] sm:$0xff] %v14724_v16  ;;  %v14726_v12 = vpop.xlane.xlu0 %5432  ;;  %v2944_v48 = vmax.f32 %v2632_v58, 0.0  ;;  %v5539_v30 = vsel %vm5088_vm4, %v14713_v45, 0.0  ;;  %v19032_v58 = vld [vmem:[#allocation66_spill] sm:$0xff] }
 0x407   : > { %19028 = vst [vmem:[#allocation16_spill] sm:$0xff] %v14726_v12  ;;  %11158 = vrsqrt.f32 %v7688_v8  ;;  %v7689_v49 = vadd.f32 1e-05, %v7433_v20  ;;  %6852 = vadd.xlane.f32.xlu1 %v6851_v21  ;;  %v6447_v28 = vmul.f32 %v14705_v11, %v14705_v11  ;;  %v2637_v53 = vadd.f32 %v14228_v43, %v10473_v25  ;;  %10853 = vmatprep.mubr.msk.f32.mxu1 %vm2974_vm3, %v2943_v50  ;;  %v19030_v8 = vld [vmem:[#allocation65_spill] sm:$0xff]  ;;  %v19052_v12 = vld [vmem:[#allocation162_spill] sm:$0xff] }
 0x408   : > { %8978 = vst.msk [vmem:[%s13898_s22 + $0x110] sm:$0xff] %vm5088_vm4, %v8722_v4  ;;  %v8723_v18 = vadd.f32 %v14429_v52, %v8460_v35  ;;  %v14733_v31 = vpop.xlane.xlu1 %5435  ;;  %v14742_v20 = vsub.f32 %v19030_v8, %v5936_v36  ;;  %v14745_v4 = vsub.f32 %v19032_v58, %v5937_v37  ;;  %v2640_v35 = vadd.f32 %v14228_v43, %v10474_v10 }
 0x409   : > { %19029 = vst [vmem:[#allocation63_spill] sm:$0xff] %v14733_v31  ;;  %v11155_v21 = vpop.eup %11154  ;;  %11160 = vrsqrt.f32 %v7689_v49  ;;  %5540 = vadd.xlane.f32.xlu0 %v5539_v30  ;;  %10854 = vmatmul.mubr.msk.f32.gmra.mrb[236].mxu1 %vm2974_vm3, %v2944_v48  ;;  %v14754_v25 = vadd.f32 %v14720_v44, %v13988_v14  ;;  %v5542_v36 = vsel %vm5088_vm4, %v14724_v16, 0.0  ;;  %v2945_v37 = vmax.f32 %v2637_v53, 0.0  ;;  %v19036_v49 = vld [vmem:[#allocation160_spill] sm:$0xff]  ;;  %v19037_v48 = vld [vmem:[#allocation19_spill] sm:$0xff] }
 0x40a   : > { %19031 = vst [vmem:[#allocation100_spill] sm:$0xff] %v14742_v20  ;;  %19033 = vst [vmem:[#allocation17_spill] sm:$0xff] %v14745_v4  ;;  %v8198_v45 = vmul.f32 %v11155_v21, %v19034_v61  ;;  %v6748_v50 = vpop.xlane.xlu0 %6747  ;;  %v5938_v30 = vmul.f32 0.125, %v19036_v49  ;;  %v2946_v43 = vmax.f32 %v2640_v35, 0.0  ;;  %v6854_v61 = vsel %vm5088_vm4, %v6446_v55, 0.0 }
 0x40b   : > { %8979 = vst.msk [vmem:[%s13898_s22 + $0x118] sm:$0xff] %vm5088_vm4, %v8723_v18  ;;  %19035 = vst [vmem:[#allocation159_spill] sm:$0xff] %v14754_v25  ;;  %v11157_v8 = vpop.eup %11156  ;;  %v7434_v58 = vmul.f32 0.125, %v6748_v50  ;;  %5543 = vadd.xlane.f32.xlu1 %v5542_v36  ;;  %v6857_v14 = vsel %vm5088_vm4, %v6447_v28, 0.0  ;;  %10856 = vmatprep.mubr.msk.f32.mxu1 %vm2974_vm3, %v2945_v37  ;;  %v6448_v53 = vmul.f32 %v14742_v20, %v14742_v20  ;;  %v5545_v36 = vsel %vm5088_vm4, %v14754_v25, 0.0  ;;  %v14779_v37 = vpop.f32.mrb[184].mxu1 }
 0x40c   : > { %v8461_v10 = vmul.f32 %v14419_v40, %v8198_v45  ;;  %v8199_v18 = vmul.f32 %v11157_v8, %v19037_v48  ;;  %v6751_v21 = vpop.xlane.xlu1 %6750  ;;  %v6449_v35 = vmul.f32 %v14745_v4, %v14745_v4  ;;  %v14773_v28 = vadd.f32 %v14720_v44, %v13979_v19  ;;  %v19040_v8 = vld [vmem:[#allocation68_spill] sm:$0xff]  ;;  %v14785_v48 = vpop.f32.mrb[185].mxu1  ;;  %v19046_v4 = vld [vmem:[#allocation71_spill] sm:$0xff] }
 0x40d   : > { %v7690_v11 = vadd.f32 1e-05, %v7434_v58  ;;  %v7435_v16 = vmul.f32 0.125, %v6751_v21  ;;  %6855 = vadd.xlane.f32.xlu0 %v6854_v61  ;;  %10857 = vmatmul.mubr.msk.f32.gmra.mrb[238].mxu1 %vm2974_vm3, %v2946_v43  ;;  %v14782_v49 = vsub.f32 %v19040_v8, %v5938_v30  ;;  %v19042_v58 = vld [vmem:[#allocation161_spill] sm:$0xff]  ;;  %v10477_v30 = vpop.f32.mrb[240].mxu0 }
 0x40e   : > { %v8724_v45 = vadd.f32 %v14429_v52, %v8461_v10  ;;  %v8462_v55 = vmul.f32 %v14419_v40, %v8199_v18  ;;  %19038 = vst [vmem:[#allocation105_spill] sm:$0xff] %v14773_v28  ;;  %v14775_v50 = vpop.xlane.xlu0 %5438  ;;  %v5939_v43 = vmul.f32 0.125, %v19042_v58  ;;  %v14792_v21 = vpop.f32.mrb[186].mxu1 }
 0x40f   : > { %19039 = vst [vmem:[#allocation158_spill] sm:$0xff] %v14775_v50  ;;  %19041 = vst [vmem:[#allocation65_spill] sm:$0xff] %v14782_v49  ;;  %11162 = vrsqrt.f32 %v7690_v11  ;;  %v7691_v10 = vadd.f32 1e-05, %v7435_v16  ;;  %6858 = vadd.xlane.f32.xlu1 %v6857_v14  ;;  %v14794_v8 = vpop.f32.mrb[187].mxu1  ;;  %v19045_v11 = vld [vmem:[#allocation20_spill] sm:$0xff] }
 0x410   : > { %8980 = vst.msk [vmem:[%s13898_s22 + $0x120] sm:$0xff] %vm5088_vm4, %v8724_v45  ;;  %v8725_v19 = vadd.f32 %v14429_v52, %v8462_v55  ;;  %v14790_v18 = vpop.xlane.xlu1 %5441  ;;  %19044 = vst [vmem:[#allocation18_spill] sm:$0xff] %v14792_v21  ;;  %v5548_v45 = vsel %vm5088_vm4, %v14773_v28, 0.0  ;;  %v6860_v55 = vsel %vm5088_vm4, %v6448_v53, 0.0  ;;  %v2644_v58 = vpop.f32.mrb[241].mxu0  ;;  %v14803_v20 = vsub.f32 %v19046_v4, %v5939_v43 }
 0x411   : > { %19043 = vst [vmem:[#allocation66_spill] sm:$0xff] %v14790_v18  ;;  %v11159_v61 = vpop.eup %11158  ;;  %11164 = vrsqrt.f32 %v7691_v10  ;;  %5546 = vadd.xlane.f32.xlu0 %v5545_v36  ;;  %v6863_v36 = vsel %vm5088_vm4, %v6449_v35, 0.0  ;;  %v10478_v1 = vpop.f32.mrb[242].mxu0  ;;  %v14812_v53 = vadd.f32 %v14720_v44, %v14005_v32  ;;  %v14814_v50 = vld [vmem:[#allocation4] ss:$0 sm:$0xff]  ;;  %v5940_v35 = vmul.f32 0.125, %v13949_v60 }
 0x412   : > { %8981 = vst.msk [vmem:[%s13898_s22 + $0x128] sm:$0xff] %vm5088_vm4, %v8725_v19  ;;  %v8200_v16 = vmul.f32 %v11159_v61, %v19045_v11  ;;  %v6754_v14 = vpop.xlane.xlu0 %6753  ;;  %19047 = vst [vmem:[#allocation160_spill] sm:$0xff] %v14803_v20  ;;  %v6450_v19 = vmul.f32 %v14782_v49, %v14782_v49  ;;  %v19048_v11 = vld [vmem:[#allocation21_spill] sm:$0xff]  ;;  %v2645_v4 = vadd.f32 %v14814_v50, %v2644_v58  ;;  %v2647_v43 = vpop.f32.mrb[243].mxu0  ;;  %v19050_v32 = vld [vmem:[#allocation163_spill] sm:$0xff]  ;;  %v5941_v21 = vmul.f32 0.125, %v19052_v12 }
 0x413   : > { %v11161_v25 = vpop.eup %11160  ;;  %v7436_v10 = vmul.f32 0.125, %v6754_v14  ;;  %5549 = vadd.xlane.f32.xlu1 %v5548_v45  ;;  %19049 = vst [vmem:[#allocation19_spill] sm:$0xff] %v14812_v53  ;;  %v14823_v49 = vadd.f32 %v14720_v44, %v19050_v32 }
 0x414   : > { %v8463_v61 = vmul.f32 %v14419_v40, %v8200_v16  ;;  %v8201_v18 = vmul.f32 %v11161_v25, %v19048_v11  ;;  %v6757_v28 = vpop.xlane.xlu1 %6756  ;;  %v2648_v16 = vadd.f32 %v14814_v50, %v2647_v43  ;;  %v2947_v58 = vmax.f32 %v2645_v4, 0.0  ;;  %v19053_v43 = vld [vmem:[#allocation73_spill] sm:$0xff] }
 0x415   : > { %v7692_v14 = vadd.f32 1e-05, %v7436_v10  ;;  %v7437_v45 = vmul.f32 0.125, %v6757_v28  ;;  %6861 = vadd.xlane.f32.xlu0 %v6860_v55  ;;  %19051 = vst [vmem:[#allocation68_spill] sm:$0xff] %v14823_v49  ;;  %v2653_v4 = vadd.f32 %v14814_v50, %v10477_v30 }
 0x416   : > { %v8726_v25 = vadd.f32 %v14429_v52, %v8463_v61  ;;  %v8464_v11 = vmul.f32 %v14419_v40, %v8201_v18  ;;  %v14825_v31 = vpop.xlane.xlu0 %5444  ;;  %v2948_v28 = vmax.f32 %v2648_v16, 0.0  ;;  %v5551_v18 = vsel %vm5088_vm4, %v14812_v53, 0.0  ;;  %10859 = vmatprep.mubr.msk.f32.mxu1 %vm2974_vm3, %v2947_v58  ;;  %v19057_v58 = vld [vmem:[#allocation75_spill] sm:$0xff] }
 0x417   : > { %11166 = vrsqrt.f32 %v7692_v14  ;;  %v7693_v60 = vadd.f32 1e-05, %v7437_v45  ;;  %6864 = vadd.xlane.f32.xlu1 %v6863_v36  ;;  %v6451_v61 = vmul.f32 %v14803_v20, %v14803_v20  ;;  %v14840_v36 = vsub.f32 %v19053_v43, %v5940_v35  ;;  %v19055_v45 = vld [vmem:[#allocation103_spill] sm:$0xff] }
 0x418   : > { %8982 = vst.msk [vmem:[%s13898_s22 + $0x130] sm:$0xff] %vm5088_vm4, %v8726_v25  ;;  %v8727_v55 = vadd.f32 %v14429_v52, %v8464_v11  ;;  %v14831_v10 = vpop.xlane.xlu1 %5447  ;;  %v2656_v14 = vadd.f32 %v14814_v50, %v10478_v1  ;;  %10860 = vmatmul.mubr.msk.f32.gmra.mrb[240].mxu1 %vm2974_vm3, %v2948_v28  ;;  %v14849_v25 = vadd.f32 %v14720_v44, %v14095_v47  ;;  %v5554_v11 = vsel %vm5088_vm4, %v14823_v49, 0.0  ;;  %v19060_v49 = vld [vmem:[#allocation164_spill] sm:$0xff] }
 0x419   : > { %v11163_v12 = vpop.eup %11162  ;;  %19054 = vst [vmem:[#allocation161_spill] sm:$0xff] %v14840_v36  ;;  %11168 = vrsqrt.f32 %v7693_v60  ;;  %5552 = vadd.xlane.f32.xlu0 %v5551_v18  ;;  %v2949_v35 = vmax.f32 %v2653_v4, 0.0  ;;  %v14854_v60 = vsub.f32 %v19057_v58, %v5941_v21  ;;  %v19059_v18 = vld [vmem:[#allocation104_spill] sm:$0xff]  ;;  %v6866_v47 = vsel %vm5088_vm4, %v6450_v19, 0.0 }
 0x41a   : > { %8983 = vst.msk [vmem:[%s13898_s22 + $0x138] sm:$0xff] %vm5088_vm4, %v8727_v55  ;;  %v8202_v16 = vmul.f32 %v11163_v12, %v19055_v45  ;;  %19056 = vst [vmem:[#allocation20_spill] sm:$0xff] %v14849_v25  ;;  %v6760_v30 = vpop.xlane.xlu0 %6759  ;;  %v2950_v28 = vmax.f32 %v2656_v14, 0.0  ;;  %v6869_v45 = vsel %vm5088_vm4, %v6451_v61, 0.0  ;;  %v5942_v4 = vmul.f32 0.125, %v19060_v49 }
 0x41b   : > { %v11165_v32 = vpop.eup %11164  ;;  %19058 = vst [vmem:[#allocation71_spill] sm:$0xff] %v14854_v60  ;;  %v7438_v1 = vmul.f32 0.125, %v6760_v30  ;;  %5555 = vadd.xlane.f32.xlu1 %v5554_v11  ;;  %10862 = vmatprep.mubr.msk.f32.mxu1 %vm2974_vm3, %v2949_v35  ;;  %v6452_v21 = vmul.f32 %v14840_v36, %v14840_v36  ;;  %v14869_v19 = vadd.f32 %v14720_v44, %v14086_v22  ;;  %v5557_v49 = vsel %vm5088_vm4, %v14849_v25, 0.0  ;;  %v14875_v30 = vpop.f32.mrb[188].mxu1  ;;  %v19063_v11 = vld [vmem:[#allocation165_spill] sm:$0xff] }
 0x41c   : > { %v8465_v55 = vmul.f32 %v14419_v40, %v8202_v16  ;;  %v8203_v12 = vmul.f32 %v11165_v32, %v19059_v18  ;;  %v6763_v43 = vpop.xlane.xlu1 %6762  ;;  %10863 = vmatmul.mubr.msk.f32.gmra.mrb[242].mxu1 %vm2974_vm3, %v2950_v28  ;;  %v5943_v35 = vmul.f32 0.125, %v19063_v11  ;;  %v6453_v58 = vmul.f32 %v14854_v60, %v14854_v60 }
 0x41d   : > { %v7694_v53 = vadd.f32 1e-05, %v7438_v1  ;;  %v7439_v20 = vmul.f32 0.125, %v6763_v43  ;;  %6867 = vadd.xlane.f32.xlu0 %v6866_v47  ;;  %19061 = vst [vmem:[#allocation21_spill] sm:$0xff] %v14869_v19  ;;  %v14880_v1 = vpop.f32.mrb[189].mxu1  ;;  %v19067_v47 = vld [vmem:[#allocation24_spill] sm:$0xff] }
 0x41e   : > { %v8728_v14 = vadd.f32 %v14429_v52, %v8465_v55  ;;  %v8466_v16 = vmul.f32 %v14419_v40, %v8203_v12  ;;  %v14871_v61 = vpop.xlane.xlu0 %5450  ;;  %v14887_v55 = vpop.f32.mrb[190].mxu1  ;;  %v6872_v11 = vsel %vm5088_vm4, %v6452_v21, 0.0  ;;  %v5944_v36 = vmul.f32 0.125, %v14043_v13 }
 0x41f   : > { %19062 = vst [vmem:[#allocation163_spill] sm:$0xff] %v14871_v61  ;;  %11170 = vrsqrt.f32 %v7694_v53  ;;  %v7695_v32 = vadd.f32 1e-05, %v7439_v20  ;;  %6870 = vadd.xlane.f32.xlu1 %v6869_v45  ;;  %v10481_v12 = vpop.f32.mrb[244].mxu0  ;;  %v14889_v53 = vpop.f32.mrb[191].mxu1  ;;  %v19065_v20 = vld [vmem:[#allocation76_spill] sm:$0xff] }
 0x420   : > { %8984 = vst.msk [vmem:[%s13898_s22 + $0x140] sm:$0xff] %vm5088_vm4, %v8728_v14  ;;  %v8729_v22 = vadd.f32 %v14429_v52, %v8466_v16  ;;  %v14885_v28 = vpop.xlane.xlu1 %5453  ;;  %v14892_v43 = vsub.f32 %v19065_v20, %v5942_v4  ;;  %v5560_v16 = vsel %vm5088_vm4, %v14869_v19, 0.0  ;;  %v2660_v25 = vpop.f32.mrb[245].mxu0  ;;  %v6875_v4 = vsel %vm5088_vm4, %v6453_v58, 0.0  ;;  %v19070_v20 = vld [vmem:[#allocation25_spill] sm:$0xff] }
 0x421   : > { %19064 = vst [vmem:[#allocation162_spill] sm:$0xff] %v14885_v28  ;;  %v11167_v18 = vpop.eup %11166  ;;  %11172 = vrsqrt.f32 %v7695_v32  ;;  %5558 = vadd.xlane.f32.xlu0 %v5557_v49  ;;  %v19068_v32 = vld [vmem:[#allocation79_spill] sm:$0xff]  ;;  %v14909_v19 = vadd.f32 %v14720_v44, %v14107_v23  ;;  %v2661_v61 = vadd.f32 %v14814_v50, %v2660_v25  ;;  %v5945_v13 = vmul.f32 0.125, %v14052_v34 }
 0x422   : > { %19066 = vst [vmem:[#allocation73_spill] sm:$0xff] %v14892_v43  ;;  %8985 = vst.msk [vmem:[%s13898_s22 + $0x148] sm:$0xff] %vm5088_vm4, %v8729_v22  ;;  %v8204_v45 = vmul.f32 %v11167_v18, %v19067_v47  ;;  %v6766_v14 = vpop.xlane.xlu0 %6765  ;;  %v14901_v49 = vsub.f32 %v19068_v32, %v5943_v35  ;;  %v10482_v22 = vpop.f32.mrb[246].mxu0  ;;  %v14918_v23 = vadd.f32 %v14720_v44, %v14099_v0 }
 0x423   : > { %v11169_v60 = vpop.eup %11168  ;;  %v7440_v28 = vmul.f32 0.125, %v6766_v14  ;;  %5561 = vadd.xlane.f32.xlu1 %v5560_v16  ;;  %19071 = vst [vmem:[#allocation75_spill] sm:$0xff] %v14909_v19  ;;  %v2663_v35 = vpop.f32.mrb[247].mxu0  ;;  %v2951_v25 = vmax.f32 %v2661_v61, 0.0  ;;  %v6454_v34 = vmul.f32 %v14892_v43, %v14892_v43  ;;  %v5563_v0 = vsel %vm5088_vm4, %v14909_v19, 0.0 }
 0x424   : > { %19069 = vst [vmem:[#allocation103_spill] sm:$0xff] %v14901_v49  ;;  %v8467_v18 = vmul.f32 %v14419_v40, %v8204_v45  ;;  %v8205_v47 = vmul.f32 %v11169_v60, %v19070_v20  ;;  %v6769_v21 = vpop.xlane.xlu1 %6768  ;;  %v2664_v58 = vadd.f32 %v14814_v50, %v2663_v35  ;;  %19072 = vst [vmem:[#allocation104_spill] sm:$0xff] %v14918_v23 }
 0x425   : > { %v7696_v14 = vadd.f32 1e-05, %v7440_v28  ;;  %v7441_v16 = vmul.f32 0.125, %v6769_v21  ;;  %6873 = vadd.xlane.f32.xlu0 %v6872_v11  ;;  %v6455_v61 = vmul.f32 %v14901_v49, %v14901_v49  ;;  %10865 = vmatprep.mubr.msk.f32.mxu1 %vm2974_vm3, %v2951_v25  ;;  %v19074_v21 = vld [vmem:[#allocation81_spill] sm:$0xff] }
 0x426   : > { %v8730_v45 = vadd.f32 %v14429_v52, %v8467_v18  ;;  %v8468_v60 = vmul.f32 %v14419_v40, %v8205_v47  ;;  %v14920_v32 = vpop.xlane.xlu0 %5456  ;;  %v2952_v28 = vmax.f32 %v2664_v58, 0.0  ;;  %v2669_v47 = vadd.f32 %v14814_v50, %v10481_v12 }
 0x427   : > { %11174 = vrsqrt.f32 %v7696_v14  ;;  %v7697_v20 = vadd.f32 1e-05, %v7441_v16  ;;  %6876 = vadd.xlane.f32.xlu1 %v6875_v4  ;;  %v14936_v35 = vsub.f32 %v19074_v21, %v5944_v36  ;;  %v19076_v14 = vld [vmem:[#allocation83_spill] sm:$0xff]  ;;  %v2672_v58 = vadd.f32 %v14814_v50, %v10482_v22 }
 0x428   : > { %8986 = vst.msk [vmem:[%s13898_s22 + $0x150] sm:$0xff] %vm5088_vm4, %v8730_v45  ;;  %v8731_v11 = vadd.f32 %v14429_v52, %v8468_v60  ;;  %v14927_v18 = vpop.xlane.xlu1 %5459  ;;  %v14939_v16 = vsub.f32 %v19076_v14, %v5945_v13  ;;  %10866 = vmatmul.mubr.msk.f32.gmra.mrb[244].mxu1 %vm2974_vm3, %v2952_v28  ;;  %v19078_v45 = vld [vmem:[#allocation26_spill] sm:$0xff]  ;;  %v14948_v12 = vadd.f32 %v14720_v44, %v14195_v7  ;;  %v5566_v36 = vsel %vm5088_vm4, %v14918_v23, 0.0  ;;  %v19080_v28 = vld [vmem:[#allocation27_spill] sm:$0xff] }
 0x429   : > { %19073 = vst [vmem:[#allocation164_spill] sm:$0xff] %v14927_v18  ;;  %v11171_v4 = vpop.eup %11170  ;;  %19075 = vst [vmem:[#allocation165_spill] sm:$0xff] %v14936_v35  ;;  %11176 = vrsqrt.f32 %v7697_v20  ;;  %5564 = vadd.xlane.f32.xlu0 %v5563_v0  ;;  %v2953_v13 = vmax.f32 %v2669_v47, 0.0  ;;  %v2954_v0 = vmax.f32 %v2672_v58, 0.0  ;;  %v6456_v47 = vmul.f32 %v14936_v35, %v14936_v35 }
 0x42a   : > { %19077 = vst [vmem:[#allocation76_spill] sm:$0xff] %v14939_v16  ;;  %8987 = vst.msk [vmem:[%s13898_s22 + $0x158] sm:$0xff] %vm5088_vm4, %v8731_v11  ;;  %v8206_v60 = vmul.f32 %v11171_v4, %v19078_v45  ;;  %v6772_v25 = vpop.xlane.xlu0 %6771  ;;  %v6878_v4 = vsel %vm5088_vm4, %v6454_v34, 0.0  ;;  %v6881_v45 = vsel %vm5088_vm4, %v6455_v61, 0.0  ;;  %v6457_v58 = vmul.f32 %v14939_v16, %v14939_v16  ;;  %v19086_v16 = vld [vmem:[#allocation84_spill] sm:$0xff] }
 0x42b   : > { %19079 = vst [vmem:[#allocation24_spill] sm:$0xff] %v14948_v12  ;;  %v11173_v21 = vpop.eup %11172  ;;  %v7442_v20 = vmul.f32 0.125, %v6772_v25  ;;  %5567 = vadd.xlane.f32.xlu1 %v5566_v36  ;;  %10868 = vmatprep.mubr.msk.f32.mxu1 %vm2974_vm3, %v2953_v13  ;;  %v14968_v61 = vadd.f32 %v14720_v44, %v14190_v41  ;;  %v5569_v36 = vsel %vm5088_vm4, %v14948_v12, 0.0  ;;  %v14974_v13 = vpop.f32.mrb[192].mxu1  ;;  %v14982_v41 = vld [vmem:[#allocation9] ss:$0 sm:$0xff] }
 0x42c   : > { %v8469_v22 = vmul.f32 %v14419_v40, %v8206_v60  ;;  %v8207_v14 = vmul.f32 %v11173_v21, %v19080_v28  ;;  %v6775_v11 = vpop.xlane.xlu1 %6774  ;;  %10869 = vmatmul.mubr.msk.f32.gmra.mrb[246].mxu1 %vm2974_vm3, %v2954_v0  ;;  %v14963_v60 = vld [vmem:[#allocation7] ss:$0 sm:$0xff]  ;;  %v5946_v21 = vmul.f32 0.125, %v14090_v56  ;;  %v10485_v56 = vpop.f32.mrb[248].mxu0 }
 0x42d   : > { %v7698_v7 = vadd.f32 1e-05, %v7442_v20  ;;  %v7443_v19 = vmul.f32 0.125, %v6775_v11  ;;  %6879 = vadd.xlane.f32.xlu0 %v6878_v4  ;;  %19081 = vst [vmem:[#allocation79_spill] sm:$0xff] %v14968_v61  ;;  %v19083_v20 = vld [vmem:[#allocation72_spill] sm:$0xff]  ;;  %v2676_v12 = vpop.f32.mrb[249].mxu0 }
 0x42e   : > { %v8732_v40 = vadd.f32 %v14429_v52, %v8469_v22  ;;  %v8470_v34 = vmul.f32 %v14963_v60, %v8207_v14  ;;  %v14970_v25 = vpop.xlane.xlu0 %5462  ;;  %v5947_v52 = vmul.f32 0.125, %v19083_v20  ;;  %v14978_v22 = vpop.f32.mrb[193].mxu1  ;;  %v14998_v35 = vsub.f32 %v19086_v16, %v5946_v21 }
 0x42f   : > { %19082 = vst [vmem:[#allocation25_spill] sm:$0xff] %v14970_v25  ;;  %11178 = vrsqrt.f32 %v7698_v7  ;;  %v7699_v0 = vadd.f32 1e-05, %v7443_v19  ;;  %6882 = vadd.xlane.f32.xlu1 %v6881_v45  ;;  %v14987_v11 = vpop.f32.mrb[194].mxu1  ;;  %v19085_v19 = vld [vmem:[#allocation28_spill] sm:$0xff]  ;;  %v10486_v43 = vpop.f32.mrb[250].mxu0  ;;  %v2677_v16 = vadd.f32 %v14814_v50, %v2676_v12 }
 0x430   : > { %8988 = vst.msk [vmem:[%s13898_s22 + $0x160] sm:$0xff] %vm5088_vm4, %v8732_v40  ;;  %v8733_v28 = vadd.f32 %v14982_v41, %v8470_v34  ;;  %v14985_v14 = vpop.xlane.xlu1 %5465  ;;  %v14989_v20 = vpop.f32.mrb[195].mxu1  ;;  %v5572_v40 = vsel %vm5088_vm4, %v14968_v61, 0.0  ;;  %v6884_v34 = vsel %vm5088_vm4, %v6456_v47, 0.0  ;;  %19087 = vst [vmem:[#allocation83_spill] sm:$0xff] %v14998_v35  ;;  %v15008_v47 = vadd.f32 %v14720_v44, %v14205_v3  ;;  %v19094_v25 = vld [vmem:[#allocation77_spill] sm:$0xff] }
 0x431   : > { %19084 = vst [vmem:[#allocation81_spill] sm:$0xff] %v14985_v14  ;;  %v11175_v4 = vpop.eup %11174  ;;  %11180 = vrsqrt.f32 %v7699_v0  ;;  %5570 = vadd.xlane.f32.xlu0 %v5569_v36  ;;  %v19088_v0 = vld [vmem:[#allocation87_spill] sm:$0xff]  ;;  %v2679_v21 = vpop.f32.mrb[251].mxu0  ;;  %v2955_v12 = vmax.f32 %v2677_v16, 0.0  ;;  %v5949_v18 = vmul.f32 0.125, %v19094_v25  ;;  %v2685_v16 = vadd.f32 %v14814_v50, %v10485_v56 }
 0x432   : > { %8989 = vst.msk [vmem:[%s13898_s22 + $0x168] sm:$0xff] %vm5088_vm4, %v8733_v28  ;;  %v8208_v45 = vmul.f32 %v11175_v4, %v19085_v19  ;;  %v6778_v7 = vpop.xlane.xlu0 %6777  ;;  %v15001_v36 = vsub.f32 %v19088_v0, %v5947_v52  ;;  %v6887_v28 = vsel %vm5088_vm4, %v6457_v58, 0.0  ;;  %v19090_v19 = vld [vmem:[#allocation29_spill] sm:$0xff]  ;;  %19091 = vst [vmem:[#allocation27_spill] sm:$0xff] %v15008_v47  ;;  %v5948_v52 = vmul.f32 0.125, %v14137_v62  ;;  %v19092_v0 = vld [vmem:[#allocation166_spill] sm:$0xff] }
 0x433   : > { %v11177_v23 = vpop.eup %11176  ;;  %v7444_v49 = vmul.f32 0.125, %v6778_v7  ;;  %5573 = vadd.xlane.f32.xlu1 %v5572_v40  ;;  %v2680_v58 = vadd.f32 %v14814_v50, %v2679_v21  ;;  %v15017_v3 = vadd.f32 %v14720_v44, %v19092_v0  ;;  %10871 = vmatprep.mubr.msk.f32.mxu1 %vm2974_vm3, %v2955_v12  ;;  %v15045_v56 = vadd.f32 %v14720_v44, %v14293_v27 }
 0x434   : > { %19089 = vst [vmem:[#allocation26_spill] sm:$0xff] %v15001_v36  ;;  %v8471_v4 = vmul.f32 %v14963_v60, %v8208_v45  ;;  %v8209_v14 = vmul.f32 %v11177_v23, %v19090_v19  ;;  %v6781_v61 = vpop.xlane.xlu1 %6780  ;;  %v2957_v0 = vmax.f32 %v2685_v16, 0.0 }
 0x435   : > { %v7700_v7 = vadd.f32 1e-05, %v7444_v49  ;;  %v7445_v40 = vmul.f32 0.125, %v6781_v61  ;;  %6885 = vadd.xlane.f32.xlu0 %v6884_v34  ;;  %19093 = vst [vmem:[#allocation72_spill] sm:$0xff] %v15017_v3  ;;  %v2956_v49 = vmax.f32 %v2680_v58, 0.0  ;;  %v19098_v58 = vld [vmem:[#allocation115_spill] sm:$0xff] }
 0x436   : > { %v8734_v45 = vadd.f32 %v14982_v41, %v8471_v4  ;;  %v8472_v23 = vmul.f32 %v14963_v60, %v8209_v14  ;;  %v15019_v19 = vpop.xlane.xlu0 %5468  ;;  %v5575_v14 = vsel %vm5088_vm4, %v15008_v47, 0.0  ;;  %v6458_v4 = vmul.f32 %v14998_v35, %v14998_v35  ;;  %19099 = vst [vmem:[#allocation87_spill] sm:$0xff] %v15045_v56 }
 0x437   : > { %11182 = vrsqrt.f32 %v7700_v7  ;;  %v7701_v62 = vadd.f32 1e-05, %v7445_v40  ;;  %6888 = vadd.xlane.f32.xlu1 %v6887_v28  ;;  %v19096_v28 = vld [vmem:[#allocation90_spill] sm:$0xff]  ;;  %v6459_v7 = vmul.f32 %v15001_v36, %v15001_v36  ;;  %v2688_v40 = vadd.f32 %v14814_v50, %v10486_v43  ;;  %10872 = vmatmul.mubr.msk.f32.gmra.mrb[248].mxu1 %vm2974_vm3, %v2956_v49 }
 0x438   : > { %8990 = vst.msk [vmem:[%s13898_s22 + $0x170] sm:$0xff] %vm5088_vm4, %v8734_v45  ;;  %v8735_v61 = vadd.f32 %v14982_v41, %v8472_v23  ;;  %v15025_v34 = vpop.xlane.xlu1 %5471  ;;  %v15034_v21 = vsub.f32 %v19096_v28, %v5948_v52  ;;  %v5578_v52 = vsel %vm5088_vm4, %v15017_v3, 0.0  ;;  %v19102_v28 = vld [vmem:[#allocation112_spill] sm:$0xff]  ;;  %v6890_v27 = vsel %vm5088_vm4, %v6458_v4, 0.0  ;;  %10874 = vmatprep.mubr.msk.f32.mxu1 %vm2974_vm3, %v2957_v0  ;;  %v15070_v0 = vpop.f32.mrb[196].mxu1 }
 0x439   : > { %19095 = vst [vmem:[#allocation28_spill] sm:$0xff] %v15025_v34  ;;  %v11179_v25 = vpop.eup %11178  ;;  %11184 = vrsqrt.f32 %v7701_v62  ;;  %5576 = vadd.xlane.f32.xlu0 %v5575_v14  ;;  %v19100_v62 = vld [vmem:[#allocation95_spill] sm:$0xff]  ;;  %v2958_v49 = vmax.f32 %v2688_v40, 0.0  ;;  %v6893_v16 = vsel %vm5088_vm4, %v6459_v7, 0.0  ;;  %v15064_v4 = vadd.f32 %v14720_v44, %v14288_v33  ;;  %v19105_v7 = vld [vmem:[#allocation82_spill] sm:$0xff] }
 0x43a   : > { %19097 = vst [vmem:[#allocation84_spill] sm:$0xff] %v15034_v21  ;;  %8991 = vst.msk [vmem:[%s13898_s22 + $0x178] sm:$0xff] %vm5088_vm4, %v8735_v61  ;;  %v8210_v45 = vmul.f32 %v11179_v25, %v19098_v58  ;;  %v6784_v23 = vpop.xlane.xlu0 %6783  ;;  %v15050_v14 = vsub.f32 %v19100_v62, %v5949_v18  ;;  %v6460_v18 = vmul.f32 %v15034_v21, %v15034_v21  ;;  %v5952_v34 = vmul.f32 0.125, %v14237_v24 }
 0x43b   : > { %v11181_v12 = vpop.eup %11180  ;;  %v7446_v43 = vmul.f32 0.125, %v6784_v23  ;;  %5579 = vadd.xlane.f32.xlu1 %v5578_v52  ;;  %10875 = vmatmul.mubr.msk.f32.gmra.mrb[250].mxu1 %vm2974_vm3, %v2958_v49  ;;  %19103 = vst [vmem:[#allocation166_spill] sm:$0xff] %v15064_v4  ;;  %v5581_v52 = vsel %vm5088_vm4, %v15045_v56, 0.0  ;;  %v15075_v49 = vpop.f32.mrb[197].mxu1 }
 0x43c   : > { %19101 = vst [vmem:[#allocation29_spill] sm:$0xff] %v15050_v14  ;;  %v8473_v61 = vmul.f32 %v14963_v60, %v8210_v45  ;;  %v8211_v25 = vmul.f32 %v11181_v12, %v19102_v28  ;;  %v6787_v58 = vpop.xlane.xlu1 %6786  ;;  %v5950_v12 = vmul.f32 0.125, %v19105_v7  ;;  %v15082_v28 = vpop.f32.mrb[198].mxu1 }
 0x43d   : > { %v7702_v47 = vadd.f32 1e-05, %v7446_v43  ;;  %v7447_v36 = vmul.f32 0.125, %v6787_v58  ;;  %6891 = vadd.xlane.f32.xlu0 %v6890_v27  ;;  %v6461_v43 = vmul.f32 %v15050_v14, %v15050_v14  ;;  %v19107_v58 = vld [vmem:[#allocation37_spill] sm:$0xff]  ;;  %v19109_v14 = vld [vmem:[#allocation96_spill] sm:$0xff] }
 0x43e   : > { %v8736_v40 = vadd.f32 %v14982_v41, %v8473_v61  ;;  %v8474_v45 = vmul.f32 %v14963_v60, %v8211_v25  ;;  %v15066_v23 = vpop.xlane.xlu0 %5474  ;;  %v5951_v27 = vmul.f32 0.125, %v19107_v58  ;;  %v15093_v21 = vsub.f32 %v19109_v14, %v5950_v12  ;;  %v19113_v12 = vld [vmem:[#allocation99_spill] sm:$0xff] }
 0x43f   : > { %19104 = vst [vmem:[#allocation77_spill] sm:$0xff] %v15066_v23  ;;  %11186 = vrsqrt.f32 %v7702_v47  ;;  %v7703_v62 = vadd.f32 1e-05, %v7447_v36  ;;  %6894 = vadd.xlane.f32.xlu1 %v6893_v16  ;;  %v10489_v36 = vpop.f32.mrb[252].mxu0  ;;  %v15085_v47 = vpop.f32.mrb[199].mxu1  ;;  %v19108_v16 = vld [vmem:[#allocation116_spill] sm:$0xff] }
 0x440   : > { %8992 = vst.msk [vmem:[%s13898_s22 + $0x180] sm:$0xff] %vm5088_vm4, %v8736_v40  ;;  %v8737_v33 = vadd.f32 %v14982_v41, %v8474_v45  ;;  %v15080_v61 = vpop.xlane.xlu1 %5477  ;;  %v5584_v40 = vsel %vm5088_vm4, %v15064_v4, 0.0  ;;  %v2692_v45 = vpop.f32.mrb[253].mxu0  ;;  %19110 = vst [vmem:[#allocation115_spill] sm:$0xff] %v15093_v21 }
 0x441   : > { %19106 = vst [vmem:[#allocation90_spill] sm:$0xff] %v15080_v61  ;;  %v11183_v25 = vpop.eup %11182  ;;  %11188 = vrsqrt.f32 %v7703_v62  ;;  %5582 = vadd.xlane.f32.xlu0 %v5581_v52  ;;  %v6896_v52 = vsel %vm5088_vm4, %v6460_v18, 0.0  ;;  %v6899_v62 = vsel %vm5088_vm4, %v6461_v43, 0.0  ;;  %v10490_v58 = vpop.f32.mrb[254].mxu0  ;;  %v19111_v61 = vld [vmem:[#allocation117_spill] sm:$0xff]  ;;  %v2693_v23 = vadd.f32 %v14814_v50, %v2692_v45 }
 0x442   : > { %8993 = vst.msk [vmem:[%s13898_s22 + $0x188] sm:$0xff] %vm5088_vm4, %v8737_v33  ;;  %v8212_v7 = vmul.f32 %v11183_v25, %v19108_v16  ;;  %v6790_v56 = vpop.xlane.xlu0 %6789  ;;  %v15101_v16 = vadd.f32 %v14720_v44, %v14303_v6  ;;  %v2695_v14 = vpop.f32.mrb[255].mxu0  ;;  %v15112_v6 = vadd.f32 %v14720_v44, %v14300_v5 }
 0x443   : > { %v11185_v3 = vpop.eup %11184  ;;  %v7448_v35 = vmul.f32 0.125, %v6790_v56  ;;  %5585 = vadd.xlane.f32.xlu1 %v5584_v40  ;;  %v15105_v56 = vsub.f32 %v19113_v12, %v5951_v27  ;;  %v2696_v43 = vadd.f32 %v14814_v50, %v2695_v14  ;;  %v2959_v45 = vmax.f32 %v2693_v23, 0.0  ;;  %v19116_v12 = vld [vmem:[#allocation32_spill] sm:$0xff] }
 0x444   : > { %v8475_v33 = vmul.f32 %v14963_v60, %v8212_v7  ;;  %v8213_v25 = vmul.f32 %v11185_v3, %v19111_v61  ;;  %19112 = vst [vmem:[#allocation95_spill] sm:$0xff] %v15101_v16  ;;  %v6793_v4 = vpop.xlane.xlu1 %6792  ;;  %19115 = vst [vmem:[#allocation82_spill] sm:$0xff] %v15112_v6  ;;  %v5587_v5 = vsel %vm5088_vm4, %v15101_v16, 0.0  ;;  %v2701_v23 = vadd.f32 %v14814_v50, %v10489_v36 }
 0x445   : > { %19114 = vst [vmem:[#allocation112_spill] sm:$0xff] %v15105_v56  ;;  %v7704_v18 = vadd.f32 1e-05, %v7448_v35  ;;  %v7449_v40 = vmul.f32 0.125, %v6793_v4  ;;  %6897 = vadd.xlane.f32.xlu0 %v6896_v52  ;;  %v2960_v35 = vmax.f32 %v2696_v43, 0.0  ;;  %10877 = vmatprep.mubr.msk.f32.mxu1 %vm2974_vm3, %v2959_v45  ;;  %v2704_v14 = vadd.f32 %v14814_v50, %v10490_v58 }
 0x446   : > { %v8738_v7 = vadd.f32 %v14982_v41, %v8475_v33  ;;  %v8476_v3 = vmul.f32 %v14963_v60, %v8213_v25  ;;  %v15114_v61 = vpop.xlane.xlu0 %5480  ;;  %v6462_v33 = vmul.f32 %v15093_v21, %v15093_v21  ;;  %v6463_v25 = vmul.f32 %v15105_v56, %v15105_v56 }
 0x447   : > { %11190 = vrsqrt.f32 %v7704_v18  ;;  %v7705_v27 = vadd.f32 1e-05, %v7449_v40  ;;  %6900 = vadd.xlane.f32.xlu1 %v6899_v62  ;;  %v5953_v62 = vmul.f32 0.125, %v14244_v15  ;;  %10878 = vmatmul.mubr.msk.f32.gmra.mrb[252].mxu1 %vm2974_vm3, %v2960_v35  ;;  %v15138_v36 = vadd.f32 %v14720_v44, %v14387_v29  ;;  %v19120_v35 = vld [vmem:[#allocation34_spill] sm:$0xff] }
 0x448   : > { %8994 = vst.msk [vmem:[%s13898_s22 + $0x190] sm:$0xff] %vm5088_vm4, %v8738_v7  ;;  %v8739_v4 = vadd.f32 %v14982_v41, %v8476_v3  ;;  %v15120_v52 = vpop.xlane.xlu1 %5483  ;;  %v5590_v15 = vsel %vm5088_vm4, %v15112_v6, 0.0  ;;  %v2961_v43 = vmax.f32 %v2701_v23, 0.0  ;;  %v19118_v3 = vld [vmem:[#allocation102_spill] sm:$0xff]  ;;  %v2962_v58 = vmax.f32 %v2704_v14, 0.0 }
 0x449   : > { %v11187_v24 = vpop.eup %11186  ;;  %11192 = vrsqrt.f32 %v7705_v27  ;;  %5588 = vadd.xlane.f32.xlu0 %v5587_v5  ;;  %19117 = vst [vmem:[#allocation37_spill] sm:$0xff] %v15138_v36  ;;  %v15143_v45 = vsub.f32 %v19118_v3, %v5952_v34  ;;  %v6902_v29 = vsel %vm5088_vm4, %v6462_v33, 0.0  ;;  %v6905_v34 = vsel %vm5088_vm4, %v6463_v25, 0.0  ;;  %v19124_v3 = vld [vmem:[#allocation89_spill] sm:$0xff] }
 0x44a   : > { %8995 = vst.msk [vmem:[%s13898_s22 + $0x198] sm:$0xff] %vm5088_vm4, %v8739_v4  ;;  %v8214_v18 = vmul.f32 %v11187_v24, %v19116_v12  ;;  %v6796_v40 = vpop.xlane.xlu0 %6795  ;;  %10880 = vmatprep.mubr.msk.f32.mxu1 %vm2974_vm3, %v2961_v43  ;;  %v19121_v24 = vld [vmem:[#allocation107_spill] sm:$0xff]  ;;  %v15158_v33 = vadd.f32 %v14720_v44, %v14384_v54 }
 0x44b   : > { %v11189_v7 = vpop.eup %11188  ;;  %19119 = vst [vmem:[#allocation116_spill] sm:$0xff] %v15143_v45  ;;  %v7450_v50 = vmul.f32 0.125, %v6796_v40  ;;  %5591 = vadd.xlane.f32.xlu1 %v5590_v15  ;;  %v15150_v12 = vsub.f32 %v19121_v24, %v5953_v62  ;;  %10881 = vmatmul.mubr.msk.f32.gmra.mrb[254].mxu1 %vm2974_vm3, %v2962_v58  ;;  %v5593_v62 = vsel %vm5088_vm4, %v15138_v36, 0.0  ;;  %v15164_v15 = vpop.f32.mrb[200].mxu1  ;;  %v6464_v43 = vmul.f32 %v15143_v45, %v15143_v45 }
 0x44c   : > { %v8477_v27 = vmul.f32 %v14963_v60, %v8214_v18  ;;  %v8215_v4 = vmul.f32 %v11189_v7, %v19120_v35  ;;  %v6799_v5 = vpop.xlane.xlu1 %6798  ;;  %19123 = vst [vmem:[#allocation117_spill] sm:$0xff] %v15158_v33  ;;  %v15168_v7 = vpop.f32.mrb[201].mxu1 }
 0x44d   : > { %19122 = vst [vmem:[#allocation96_spill] sm:$0xff] %v15150_v12  ;;  %v7706_v23 = vadd.f32 1e-05, %v7450_v50  ;;  %v7451_v6 = vmul.f32 0.125, %v6799_v5  ;;  %6903 = vadd.xlane.f32.xlu0 %v6902_v29  ;;  %v5954_v50 = vmul.f32 0.125, %v19124_v3  ;;  %v19126_v29 = vld [vmem:[#allocation35_spill] sm:$0xff] }
 0x44e   : > { %v8740_v14 = vadd.f32 %v14982_v41, %v8477_v27  ;;  %v8478_v18 = vmul.f32 %v14963_v60, %v8215_v4  ;;  %v15160_v40 = vpop.xlane.xlu0 %5486  ;;  %v15176_v27 = vpop.f32.mrb[202].mxu1  ;;  %v19125_v4 = vld [vmem:[#allocation40_spill] sm:$0xff] }
 0x44f   : > { %11194 = vrsqrt.f32 %v7706_v23  ;;  %v7707_v25 = vadd.f32 1e-05, %v7451_v6  ;;  %6906 = vadd.xlane.f32.xlu1 %v6905_v34  ;;  %v5955_v5 = vmul.f32 0.125, %v19125_v4  ;;  %v15179_v6 = vpop.f32.mrb[203].mxu1  ;;  %v5596_v34 = vsel %vm5088_vm4, %v15158_v33, 0.0  ;;  %v19131_v33 = vld [vmem:[#allocation111_spill] sm:$0xff] }
 0x450   : > { %8996 = vst.msk [vmem:[%s13898_s22 + $0x1a0] sm:$0xff] %vm5088_vm4, %v8740_v14  ;;  %v8741_v54 = vadd.f32 %v14982_v41, %v8478_v18  ;;  %v15174_v58 = vpop.xlane.xlu1 %5489  ;;  %v6465_v14 = vmul.f32 %v15150_v12, %v15150_v12  ;;  %v6908_v4 = vsel %vm5088_vm4, %v6464_v43, 0.0 }
 0x451   : > { %v11191_v35 = vpop.eup %11190  ;;  %11196 = vrsqrt.f32 %v7707_v25  ;;  %5594 = vadd.xlane.f32.xlu0 %v5593_v62  ;;  %v19127_v25 = vld [vmem:[#allocation108_spill] sm:$0xff]  ;;  %v15199_v12 = vsub.f32 %v19131_v33, %v5955_v5 }
 0x452   : > { %8997 = vst.msk [vmem:[%s13898_s22 + $0x1a8] sm:$0xff] %vm5088_vm4, %v8741_v54  ;;  %v8216_v24 = vmul.f32 %v11191_v35, %v19126_v29  ;;  %v6802_v23 = vpop.xlane.xlu0 %6801  ;;  %v15190_v62 = vsub.f32 %v19127_v25, %v5954_v50  ;;  %v19129_v54 = vld [vmem:[#allocation80_spill] sm:$0xff]  ;;  %v15196_v35 = vadd.f32 %v14720_v44, %v14399_v59  ;;  %v6911_v59 = vsel %vm5088_vm4, %v6465_v14, 0.0  ;;  %v19134_v25 = vld [vmem:[#allocation98_spill] sm:$0xff] }
 0x453   : > { %v11193_v18 = vpop.eup %11192  ;;  %v7452_v3 = vmul.f32 0.125, %v6802_v23  ;;  %5597 = vadd.xlane.f32.xlu1 %v5596_v34  ;;  %19132 = vst [vmem:[#allocation102_spill] sm:$0xff] %v15199_v12 }
 0x454   : > { %19128 = vst [vmem:[#allocation99_spill] sm:$0xff] %v15190_v62  ;;  %v8479_v36 = vmul.f32 %v14963_v60, %v8216_v24  ;;  %v8217_v16 = vmul.f32 %v11193_v18, %v19129_v54  ;;  %19130 = vst [vmem:[#allocation32_spill] sm:$0xff] %v15196_v35  ;;  %v6805_v29 = vpop.xlane.xlu1 %6804  ;;  %v15205_v24 = vadd.f32 %v14720_v44, %v14396_v63  ;;  %v5956_v54 = vmul.f32 0.125, %v19134_v25 }
 0x455   : > { %v7708_v23 = vadd.f32 1e-05, %v7452_v3  ;;  %v7453_v34 = vmul.f32 0.125, %v6805_v29  ;;  %6909 = vadd.xlane.f32.xlu0 %v6908_v4  ;;  %v5599_v63 = vsel %vm5088_vm4, %v15196_v35, 0.0  ;;  %v19135_v4 = vld [vmem:[#allocation134_spill] sm:$0xff]  ;;  %v6467_v29 = vmul.f32 %v15199_v12, %v15199_v12  ;;  %v19140_v12 = vld [vmem:[#allocation124_spill] sm:$0xff] }
 0x456   : > { %v8742_v43 = vadd.f32 %v14982_v41, %v8479_v36  ;;  %v8480_v50 = vmul.f32 %v14963_v60, %v8217_v16  ;;  %19133 = vst [vmem:[#allocation34_spill] sm:$0xff] %v15205_v24  ;;  %v15207_v18 = vpop.xlane.xlu0 %5492  ;;  %v6466_v16 = vmul.f32 %v15190_v62, %v15190_v62  ;;  %v5957_v14 = vmul.f32 0.125, %v19135_v4  ;;  %v19138_v35 = vld [vmem:[#allocation114_spill] sm:$0xff] }
 0x457   : > { %11198 = vrsqrt.f32 %v7708_v23  ;;  %v7709_v33 = vadd.f32 1e-05, %v7453_v34  ;;  %6912 = vadd.xlane.f32.xlu1 %v6911_v59  ;;  %v19136_v23 = vld [vmem:[#allocation127_spill] sm:$0xff]  ;;  %v5602_v59 = vsel %vm5088_vm4, %v15205_v24, 0.0  ;;  %v15233_v4 = vsub.f32 %v19138_v35, %v5956_v54 }
 0x458   : > { %8998 = vst.msk [vmem:[%s13898_s22 + $0x1b0] sm:$0xff] %vm5088_vm4, %v8742_v43  ;;  %v8743_v36 = vadd.f32 %v14982_v41, %v8480_v50  ;;  %v15214_v5 = vpop.xlane.xlu1 %5495  ;;  %v15228_v43 = vadd.f32 %v14720_v44, %v14489_v42  ;;  %v6917_v24 = vsel %vm5088_vm4, %v6467_v29, 0.0 }
 0x459   : > { %v11195_v3 = vpop.eup %11194  ;;  %11200 = vrsqrt.f32 %v7709_v33  ;;  %5600 = vadd.xlane.f32.xlu0 %v5599_v63  ;;  %19139 = vst [vmem:[#allocation89_spill] sm:$0xff] %v15233_v4  ;;  %v6468_v29 = vmul.f32 %v15233_v4, %v15233_v4 }
 0x45a   : > { %8999 = vst.msk [vmem:[%s13898_s22 + $0x1b8] sm:$0xff] %vm5088_vm4, %v8743_v36  ;;  %v8218_v34 = vmul.f32 %v11195_v3, %v19136_v23  ;;  %19137 = vst [vmem:[#allocation107_spill] sm:$0xff] %v15228_v43  ;;  %v6808_v50 = vpop.xlane.xlu0 %6807  ;;  %v6914_v3 = vsel %vm5088_vm4, %v6466_v16, 0.0  ;;  %v19141_v23 = vld [vmem:[#allocation119_spill] sm:$0xff]  ;;  %v5605_v16 = vsel %vm5088_vm4, %v15228_v43, 0.0 }
 0x45b   : > { %v11197_v25 = vpop.eup %11196  ;;  %v7454_v33 = vmul.f32 0.125, %v6808_v50  ;;  %5603 = vadd.xlane.f32.xlu1 %v5602_v59  ;;  %v15239_v42 = vsub.f32 %v19141_v23, %v5957_v14  ;;  %v15252_v14 = vpop.f32.mrb[204].mxu1  ;;  %v19145_v59 = vld [vmem:[#allocation139_spill] sm:$0xff] }
 0x45c   : > { %v8481_v63 = vmul.f32 %v14963_v60, %v8218_v34  ;;  %v8219_v36 = vmul.f32 %v11197_v25, %v19140_v12  ;;  %v6811_v62 = vpop.xlane.xlu1 %6810  ;;  %v15246_v34 = vadd.f32 %v14720_v44, %v14485_v17  ;;  %v15256_v50 = vpop.f32.mrb[205].mxu1  ;;  %v5958_v25 = vmul.f32 0.125, %v19145_v59 }
 0x45d   : > { %19142 = vst [vmem:[#allocation40_spill] sm:$0xff] %v15239_v42  ;;  %v7710_v45 = vadd.f32 1e-05, %v7454_v33  ;;  %v7455_v56 = vmul.f32 0.125, %v6811_v62  ;;  %6915 = vadd.xlane.f32.xlu0 %v6914_v3  ;;  %v15264_v33 = vpop.f32.mrb[206].mxu1 }
 0x45e   : > { %v8744_v35 = vadd.f32 %v14982_v41, %v8481_v63  ;;  %v8482_v54 = vmul.f32 %v14963_v60, %v8219_v36  ;;  %19143 = vst [vmem:[#allocation35_spill] sm:$0xff] %v15246_v34  ;;  %v15248_v12 = vpop.xlane.xlu0 %5498  ;;  %v19147_v36 = vld [vmem:[#allocation44_spill] sm:$0xff] }
 0x45f   : > { %19144 = vst [vmem:[#allocation108_spill] sm:$0xff] %v15248_v12  ;;  %11202 = vrsqrt.f32 %v7710_v45  ;;  %v7711_v62 = vadd.f32 1e-05, %v7455_v56  ;;  %6918 = vadd.xlane.f32.xlu1 %v6917_v24  ;;  %v5959_v45 = vmul.f32 0.125, %v19147_v36  ;;  %v15267_v56 = vpop.f32.mrb[207].mxu1  ;;  %v19148_v24 = vld [vmem:[#allocation128_spill] sm:$0xff] }
 0x460   : > { %9000 = vst.msk [vmem:[%s13898_s22 + $0x1c0] sm:$0xff] %vm5088_vm4, %v8744_v35  ;;  %v8745_v17 = vadd.f32 %v14982_v41, %v8482_v54  ;;  %v15262_v44 = vpop.xlane.xlu1 %5501  ;;  %v5608_v35 = vsel %vm5088_vm4, %v15246_v34, 0.0  ;;  %v6469_v54 = vmul.f32 %v15239_v42, %v15239_v42  ;;  %v6920_v36 = vsel %vm5088_vm4, %v6468_v29, 0.0  ;;  %v19153_v42 = vld [vmem:[#allocation123_spill] sm:$0xff]  ;;  %v19158_v12 = vld [vmem:[#allocation141_spill] sm:$0xff] }
 0x461   : > { %19146 = vst [vmem:[#allocation80_spill] sm:$0xff] %v15262_v44  ;;  %v11199_v63 = vpop.eup %11198  ;;  %11204 = vrsqrt.f32 %v7711_v62  ;;  %5606 = vadd.xlane.f32.xlu0 %v5605_v16  ;;  %v19149_v62 = vld [vmem:[#allocation120_spill] sm:$0xff]  ;;  %v5960_v21 = vmul.f32 0.125, %v19158_v12 }
 0x462   : > { %9001 = vst.msk [vmem:[%s13898_s22 + $0x1c8] sm:$0xff] %vm5088_vm4, %v8745_v17  ;;  %v8220_v3 = vmul.f32 %v11199_v63, %v19148_v24  ;;  %v6814_v23 = vpop.xlane.xlu0 %6813  ;;  %v15278_v16 = vsub.f32 %v19149_v62, %v5958_v25  ;;  %v19151_v17 = vld [vmem:[#allocation39_spill] sm:$0xff]  ;;  %v15282_v63 = vld [vmem:[#allocation6] ss:$0 sm:$0xff]  ;;  %v19155_v62 = vld [vmem:[#allocation118_spill] sm:$0xff] }
 0x463   : > { %v11201_v59 = vpop.eup %11200  ;;  %v7456_v43 = vmul.f32 0.125, %v6814_v23  ;;  %5609 = vadd.xlane.f32.xlu1 %v5608_v35  ;;  %v15286_v24 = vadd.f32 %v15282_v63, %v14499_v57  ;;  %v15289_v23 = vsub.f32 %v19153_v42, %v5959_v45  ;;  %v6923_v57 = vsel %vm5088_vm4, %v6469_v54, 0.0 }
 0x464   : > { %19150 = vst [vmem:[#allocation111_spill] sm:$0xff] %v15278_v16  ;;  %v8483_v4 = vmul.f32 %v14963_v60, %v8220_v3  ;;  %v8221_v44 = vmul.f32 %v11201_v59, %v19151_v17  ;;  %v6817_v34 = vpop.xlane.xlu1 %6816  ;;  %v15295_v59 = vadd.f32 %v15282_v63, %v19155_v62 }
 0x465   : > { %19152 = vst [vmem:[#allocation98_spill] sm:$0xff] %v15286_v24  ;;  %19154 = vst [vmem:[#allocation134_spill] sm:$0xff] %v15289_v23  ;;  %v7712_v35 = vadd.f32 1e-05, %v7456_v43  ;;  %v7457_v29 = vmul.f32 0.125, %v6817_v34  ;;  %6921 = vadd.xlane.f32.xlu0 %v6920_v36  ;;  %v5611_v34 = vsel %vm5088_vm4, %v15286_v24, 0.0  ;;  %v6471_v12 = vmul.f32 %v15289_v23, %v15289_v23 }
 0x466   : > { %v8746_v25 = vadd.f32 %v14982_v41, %v8483_v4  ;;  %v8484_v3 = vmul.f32 %v14963_v60, %v8221_v44  ;;  %19156 = vst [vmem:[#allocation127_spill] sm:$0xff] %v15295_v59  ;;  %v15297_v17 = vpop.xlane.xlu0 %5504  ;;  %v6470_v44 = vmul.f32 %v15278_v16, %v15278_v16  ;;  %v19160_v36 = vld [vmem:[#allocation109_spill] sm:$0xff]  ;;  %v5614_v62 = vsel %vm5088_vm4, %v15295_v59, 0.0  ;;  %v19163_v24 = vld [vmem:[#allocation126_spill] sm:$0xff] }
 0x467   : > { %19157 = vst [vmem:[#allocation114_spill] sm:$0xff] %v15297_v17  ;;  %11206 = vrsqrt.f32 %v7712_v35  ;;  %v7713_v42 = vadd.f32 1e-05, %v7457_v29  ;;  %6924 = vadd.xlane.f32.xlu1 %v6923_v57  ;;  %v5961_v54 = vmul.f32 0.125, %v19160_v36  ;;  %v19161_v35 = vld [vmem:[#allocation94_spill] sm:$0xff]  ;;  %v15323_v36 = vsub.f32 %v19163_v24, %v5960_v21 }
 0x468   : > { %9002 = vst.msk [vmem:[%s13898_s22 + $0x1d0] sm:$0xff] %vm5088_vm4, %v8746_v25  ;;  %v8747_v43 = vadd.f32 %v14982_v41, %v8484_v3  ;;  %v15304_v4 = vpop.xlane.xlu1 %5507  ;;  %v15318_v25 = vadd.f32 %v15282_v63, %v14589_v39  ;;  %v19165_v23 = vld [vmem:[#allocation42_spill] sm:$0xff]  ;;  %v6929_v59 = vsel %vm5088_vm4, %v6471_v12, 0.0 }
 0x469   : > { %19159 = vst [vmem:[#allocation124_spill] sm:$0xff] %v15304_v4  ;;  %v11203_v45 = vpop.eup %11202  ;;  %11208 = vrsqrt.f32 %v7713_v42  ;;  %5612 = vadd.xlane.f32.xlu0 %v5611_v34  ;;  %19164 = vst [vmem:[#allocation139_spill] sm:$0xff] %v15323_v36  ;;  %v6472_v12 = vmul.f32 %v15323_v36, %v15323_v36 }
 0x46a   : > { %9003 = vst.msk [vmem:[%s13898_s22 + $0x1d8] sm:$0xff] %vm5088_vm4, %v8747_v43  ;;  %v8222_v29 = vmul.f32 %v11203_v45, %v19161_v35  ;;  %19162 = vst [vmem:[#allocation119_spill] sm:$0xff] %v15318_v25  ;;  %v6820_v3 = vpop.xlane.xlu0 %6819  ;;  %v6926_v45 = vsel %vm5088_vm4, %v6470_v44, 0.0  ;;  %v19166_v35 = vld [vmem:[#allocation131_spill] sm:$0xff]  ;;  %v5617_v44 = vsel %vm5088_vm4, %v15318_v25, 0.0 }
 0x46b   : > { %v11205_v57 = vpop.eup %11204  ;;  %v7458_v42 = vmul.f32 0.125, %v6820_v3  ;;  %5615 = vadd.xlane.f32.xlu1 %v5614_v62  ;;  %v15329_v39 = vsub.f32 %v19166_v35, %v5961_v54  ;;  %v15342_v54 = vpop.f32.mrb[208].mxu1  ;;  %v19170_v62 = vld [vmem:[#allocation113_spill] sm:$0xff] }
 0x46c   : > { %v8485_v34 = vmul.f32 %v14963_v60, %v8222_v29  ;;  %v8223_v43 = vmul.f32 %v11205_v57, %v19165_v23  ;;  %v6823_v16 = vpop.xlane.xlu1 %6822  ;;  %v15336_v29 = vadd.f32 %v15282_v63, %v14583_v2  ;;  %v15346_v3 = vpop.f32.mrb[209].mxu1  ;;  %v5962_v57 = vmul.f32 0.125, %v19170_v62 }
 0x46d   : > { %19167 = vst [vmem:[#allocation44_spill] sm:$0xff] %v15329_v39  ;;  %v7714_v4 = vadd.f32 1e-05, %v7458_v42  ;;  %v7459_v17 = vmul.f32 0.125, %v6823_v16  ;;  %6927 = vadd.xlane.f32.xlu0 %v6926_v45  ;;  %v19172_v45 = vld [vmem:[#allocation48_spill] sm:$0xff] }
 0x46e   : > { %v8748_v21 = vadd.f32 %v14982_v41, %v8485_v34  ;;  %v8486_v24 = vmul.f32 %v14963_v60, %v8223_v43  ;;  %19168 = vst [vmem:[#allocation128_spill] sm:$0xff] %v15336_v29  ;;  %v15338_v23 = vpop.xlane.xlu0 %5510  ;;  %v15354_v34 = vpop.f32.mrb[210].mxu1 }
 0x46f   : > { %19169 = vst [vmem:[#allocation120_spill] sm:$0xff] %v15338_v23  ;;  %11210 = vrsqrt.f32 %v7714_v4  ;;  %v7715_v16 = vadd.f32 1e-05, %v7459_v17  ;;  %6930 = vadd.xlane.f32.xlu1 %v6929_v59  ;;  %v5963_v4 = vmul.f32 0.125, %v19172_v45  ;;  %v15357_v59 = vpop.f32.mrb[211].mxu1  ;;  %v19173_v17 = vld [vmem:[#allocation135_spill] sm:$0xff] }
 0x470   : > { %9004 = vst.msk [vmem:[%s13898_s22 + $0x1e0] sm:$0xff] %vm5088_vm4, %v8748_v21  ;;  %v8749_v2 = vadd.f32 %v14982_v41, %v8486_v24  ;;  %v15352_v42 = vpop.xlane.xlu1 %5513  ;;  %v5620_v21 = vsel %vm5088_vm4, %v15336_v29, 0.0  ;;  %v6473_v24 = vmul.f32 %v15329_v39, %v15329_v39  ;;  %v6932_v45 = vsel %vm5088_vm4, %v6472_v12, 0.0  ;;  %v19178_v29 = vld [vmem:[#allocation136_spill] sm:$0xff] }
 0x471   : > { %19171 = vst [vmem:[#allocation39_spill] sm:$0xff] %v15352_v42  ;;  %v11207_v43 = vpop.eup %11206  ;;  %11212 = vrsqrt.f32 %v7715_v16  ;;  %5618 = vadd.xlane.f32.xlu0 %v5617_v44  ;;  %v19174_v16 = vld [vmem:[#allocation132_spill] sm:$0xff]  ;;  %v15377_v39 = vsub.f32 %v19178_v29, %v5963_v4 }
 0x472   : > { %9005 = vst.msk [vmem:[%s13898_s22 + $0x1e8] sm:$0xff] %vm5088_vm4, %v8749_v2  ;;  %v8224_v35 = vmul.f32 %v11207_v43, %v19173_v17  ;;  %v6826_v62 = vpop.xlane.xlu0 %6825  ;;  %v15368_v44 = vsub.f32 %v19174_v16, %v5962_v57  ;;  %v19176_v2 = vld [vmem:[#allocation138_spill] sm:$0xff]  ;;  %v15374_v43 = vadd.f32 %v15282_v63, %v14600_v38  ;;  %v6935_v38 = vsel %vm5088_vm4, %v6473_v24, 0.0 }
 0x473   : > { %v11209_v25 = vpop.eup %11208  ;;  %v7460_v36 = vmul.f32 0.125, %v6826_v62  ;;  %5621 = vadd.xlane.f32.xlu1 %v5620_v21  ;;  %19179 = vst [vmem:[#allocation141_spill] sm:$0xff] %v15377_v39  ;;  %v5964_v16 = vmul.f32 0.125, %v14530_v51  ;;  %v6475_v51 = vmul.f32 %v15377_v39, %v15377_v39 }
 0x474   : > { %19175 = vst [vmem:[#allocation123_spill] sm:$0xff] %v15368_v44  ;;  %v8487_v42 = vmul.f32 %v14963_v60, %v8224_v35  ;;  %v8225_v23 = vmul.f32 %v11209_v25, %v19176_v2  ;;  %19177 = vst [vmem:[#allocation118_spill] sm:$0xff] %v15374_v43  ;;  %v6829_v17 = vpop.xlane.xlu1 %6828  ;;  %v15383_v35 = vadd.f32 %v15282_v63, %v14596_v26  ;;  %v5623_v26 = vsel %vm5088_vm4, %v15374_v43, 0.0  ;;  %v19184_v2 = vld [vmem:[#allocation106_spill] sm:$0xff]  ;;  %v19188_v43 = vld [vmem:[#allocation140_spill] sm:$0xff] }
 0x475   : > { %v7716_v62 = vadd.f32 1e-05, %v7460_v36  ;;  %v7461_v21 = vmul.f32 0.125, %v6829_v17  ;;  %6933 = vadd.xlane.f32.xlu0 %v6932_v45  ;;  %v19183_v45 = vld [vmem:[#allocation143_spill] sm:$0xff] }
 0x476   : > { %v8750_v12 = vadd.f32 %v14982_v41, %v8487_v42  ;;  %v8488_v57 = vmul.f32 %v14963_v60, %v8225_v23  ;;  %19180 = vst [vmem:[#allocation109_spill] sm:$0xff] %v15383_v35  ;;  %v15385_v25 = vpop.xlane.xlu0 %5516  ;;  %v6474_v23 = vmul.f32 %v15368_v44, %v15368_v44  ;;  %v5965_v24 = vmul.f32 0.125, %v19183_v45 }
 0x477   : > { %19181 = vst [vmem:[#allocation94_spill] sm:$0xff] %v15385_v25  ;;  %11214 = vrsqrt.f32 %v7716_v62  ;;  %v7717_v29 = vadd.f32 1e-05, %v7461_v21  ;;  %6936 = vadd.xlane.f32.xlu1 %v6935_v38  ;;  %v15406_v62 = vadd.f32 %v15282_v63, %v14684_v9  ;;  %v19186_v38 = vld [vmem:[#allocation92_spill] sm:$0xff]  ;;  %v19203_v25 = vld [vmem:[#allocation145_spill] sm:$0xff] }
 0x478   : > { %9006 = vst.msk [vmem:[%s13898_s22 + $0x1f0] sm:$0xff] %vm5088_vm4, %v8750_v12  ;;  %v8751_v36 = vadd.f32 %v14982_v41, %v8488_v57  ;;  %v15392_v42 = vpop.xlane.xlu1 %5519  ;;  %v5626_v12 = vsel %vm5088_vm4, %v15383_v35, 0.0  ;;  %v15411_v45 = vsub.f32 %v19186_v38, %v5964_v16  ;;  %v6941_v35 = vsel %vm5088_vm4, %v6475_v51, 0.0 }
 0x479   : > { %19182 = vst [vmem:[#allocation126_spill] sm:$0xff] %v15392_v42  ;;  %v11211_v4 = vpop.eup %11210  ;;  %11216 = vrsqrt.f32 %v7717_v29  ;;  %5624 = vadd.xlane.f32.xlu0 %v5623_v26  ;;  %19185 = vst [vmem:[#allocation42_spill] sm:$0xff] %v15406_v62 }
 0x47a   : > { %9007 = vst.msk [vmem:[%s13898_s22 + $0x1f8] sm:$0xff] %vm5088_vm4, %v8751_v36  ;;  %v8226_v17 = vmul.f32 %v11211_v4, %v19184_v2  ;;  %v6832_v21 = vpop.xlane.xlu0 %6831  ;;  %19187 = vst [vmem:[#allocation131_spill] sm:$0xff] %v15411_v45  ;;  %v6938_v4 = vsel %vm5088_vm4, %v6474_v23, 0.0  ;;  %v19189_v2 = vld [vmem:[#allocation88_spill] sm:$0xff]  ;;  %v5629_v23 = vsel %vm5088_vm4, %v15406_v62, 0.0  ;;  %v6476_v51 = vmul.f32 %v15411_v45, %v15411_v45 }
 0x47b   : > { %v11213_v57 = vpop.eup %11212  ;;  %v7462_v29 = vmul.f32 0.125, %v6832_v21  ;;  %5627 = vadd.xlane.f32.xlu1 %v5626_v12  ;;  %v15417_v9 = vsub.f32 %v19189_v2, %v5965_v24  ;;  %v15430_v24 = vpop.f32.mrb[212].mxu1 }
 0x47c   : > { %v8489_v26 = vmul.f32 %v14963_v60, %v8226_v17  ;;  %v8227_v36 = vmul.f32 %v11213_v57, %v19188_v43  ;;  %v6835_v39 = vpop.xlane.xlu1 %6834  ;;  %v15424_v17 = vadd.f32 %v15282_v63, %v14679_v46  ;;  %v15434_v12 = vpop.f32.mrb[213].mxu1  ;;  %v19193_v57 = vld [vmem:[#allocation52_spill] sm:$0xff] }
 0x47d   : > { %19190 = vst [vmem:[#allocation113_spill] sm:$0xff] %v15417_v9  ;;  %v7718_v44 = vadd.f32 1e-05, %v7462_v29  ;;  %v7463_v42 = vmul.f32 0.125, %v6835_v39  ;;  %6939 = vadd.xlane.f32.xlu0 %v6938_v4  ;;  %v5966_v38 = vmul.f32 0.125, %v19193_v57  ;;  %v19196_v4 = vld [vmem:[#allocation147_spill] sm:$0xff] }
 0x47e   : > { %v8752_v16 = vadd.f32 %v14982_v41, %v8489_v26  ;;  %v8490_v21 = vmul.f32 %v14963_v60, %v8227_v36  ;;  %19191 = vst [vmem:[#allocation48_spill] sm:$0xff] %v15424_v17  ;;  %v15426_v43 = vpop.xlane.xlu0 %5522  ;;  %v15442_v26 = vpop.f32.mrb[214].mxu1 }
 0x47f   : > { %19192 = vst [vmem:[#allocation135_spill] sm:$0xff] %v15426_v43  ;;  %11218 = vrsqrt.f32 %v7718_v44  ;;  %v7719_v39 = vadd.f32 1e-05, %v7463_v42  ;;  %6942 = vadd.xlane.f32.xlu1 %v6941_v35  ;;  %19195 = vst [vmem:[#allocation138_spill] sm:$0xff] %v15442_v26  ;;  %v5967_v44 = vmul.f32 0.125, %v19196_v4  ;;  %v15445_v35 = vpop.f32.mrb[215].mxu1 }
 0x480   : > { %9008 = vst.msk [vmem:[%s13898_s22 + $0x200] sm:$0xff] %vm5088_vm4, %v8752_v16  ;;  %v8753_v46 = vadd.f32 %v14982_v41, %v8490_v21  ;;  %v15440_v29 = vpop.xlane.xlu1 %5525  ;;  %v19197_v42 = vld [vmem:[#allocation14_spill] sm:$0xff]  ;;  %v5632_v16 = vsel %vm5088_vm4, %v15424_v17, 0.0  ;;  %v6477_v21 = vmul.f32 %v15417_v9, %v15417_v9  ;;  %v6944_v4 = vsel %vm5088_vm4, %v6476_v51, 0.0 }
 0x481   : > { %19194 = vst [vmem:[#allocation132_spill] sm:$0xff] %v15440_v29  ;;  %v11215_v36 = vpop.eup %11214  ;;  %11220 = vrsqrt.f32 %v7719_v39  ;;  %5630 = vadd.xlane.f32.xlu0 %v5629_v23  ;;  %v19198_v39 = vld [vmem:[#allocation93_spill] sm:$0xff]  ;;  %v15465_v9 = vsub.f32 %v19203_v25, %v5967_v44 }
 0x482   : > { %9009 = vst.msk [vmem:[%s13898_s22 + $0x208] sm:$0xff] %vm5088_vm4, %v8753_v46  ;;  %v8228_v2 = vmul.f32 %v11215_v36, %v19197_v42  ;;  %v6838_v57 = vpop.xlane.xlu0 %6837  ;;  %v15456_v23 = vsub.f32 %v19198_v39, %v5966_v38  ;;  %v19200_v46 = vld [vmem:[#allocation110_spill] sm:$0xff]  ;;  %v19205_v39 = vld [vmem:[#allocation91_spill] sm:$0xff] }
 0x483   : > { %v11217_v62 = vpop.eup %11216  ;;  %v7464_v45 = vmul.f32 0.125, %v6838_v57  ;;  %5633 = vadd.xlane.f32.xlu1 %v5632_v16  ;;  %v19201_v36 = vld [vmem:[#allocation58_spill] sm:$0xff]  ;;  %19204 = vst [vmem:[#allocation106_spill] sm:$0xff] %v15465_v9 }
 0x484   : > { %19199 = vst [vmem:[#allocation136_spill] sm:$0xff] %v15456_v23  ;;  %v8491_v29 = vmul.f32 %v14963_v60, %v8228_v2  ;;  %v8229_v43 = vmul.f32 %v11217_v62, %v19200_v46  ;;  %v15462_v42 = vadd.f32 %v15282_v63, %v19201_v36  ;;  %v6841_v17 = vpop.xlane.xlu1 %6840  ;;  %v15471_v2 = vadd.f32 %v15282_v63, %v19205_v39  ;;  %v19208_v36 = vld [vmem:[#allocation133_spill] sm:$0xff] }
 0x485   : > { %v7720_v57 = vadd.f32 1e-05, %v7464_v45  ;;  %v7465_v16 = vmul.f32 0.125, %v6841_v17  ;;  %6945 = vadd.xlane.f32.xlu0 %v6944_v4  ;;  %v6947_v46 = vsel %vm5088_vm4, %v6477_v21, 0.0  ;;  %v5968_v26 = vmul.f32 0.125, %v19208_v36  ;;  %v19210_v4 = vld [vmem:[#allocation149_spill] sm:$0xff] }
 0x486   : > { %19202 = vst [vmem:[#allocation143_spill] sm:$0xff] %v15462_v42  ;;  %v8754_v51 = vadd.f32 %v14982_v41, %v8491_v29  ;;  %v8492_v38 = vmul.f32 %v14963_v60, %v8229_v43  ;;  %19206 = vst [vmem:[#allocation92_spill] sm:$0xff] %v15471_v2  ;;  %v15473_v62 = vpop.xlane.xlu0 %5528  ;;  %v5635_v43 = vsel %vm5088_vm4, %v15462_v42, 0.0  ;;  %v6478_v29 = vmul.f32 %v15456_v23, %v15456_v23  ;;  %v19213_v42 = vld [vmem:[#allocation148_spill] sm:$0xff] }
 0x487   : > { %19207 = vst [vmem:[#allocation140_spill] sm:$0xff] %v15473_v62  ;;  %11222 = vrsqrt.f32 %v7720_v57  ;;  %v7721_v25 = vadd.f32 1e-05, %v7465_v16  ;;  %6948 = vadd.xlane.f32.xlu1 %v6947_v46  ;;  %v5969_v21 = vmul.f32 0.125, %v19210_v4  ;;  %v6479_v57 = vmul.f32 %v15465_v9, %v15465_v9  ;;  %v19211_v16 = vld [vmem:[#allocation49_spill] sm:$0xff] }
 0x488   : > { %9010 = vst.msk [vmem:[%s13898_s22 + $0x210] sm:$0xff] %vm5088_vm4, %v8754_v51  ;;  %v8755_v45 = vadd.f32 %v14982_v41, %v8492_v38  ;;  %v15480_v17 = vpop.xlane.xlu1 %5531  ;;  %v15494_v38 = vadd.f32 %v15282_v63, %v14785_v48  ;;  %v5638_v46 = vsel %vm5088_vm4, %v15471_v2, 0.0  ;;  %v15499_v4 = vsub.f32 %v19213_v42, %v5968_v26  ;;  %v19215_v9 = vld [vmem:[#allocation121_spill] sm:$0xff] }
 0x489   : > { %19209 = vst [vmem:[#allocation88_spill] sm:$0xff] %v15480_v17  ;;  %v11219_v44 = vpop.eup %11218  ;;  %11224 = vrsqrt.f32 %v7721_v25  ;;  %5636 = vadd.xlane.f32.xlu0 %v5635_v43  ;;  %v6953_v2 = vsel %vm5088_vm4, %v6479_v57, 0.0 }
 0x48a   : > { %9011 = vst.msk [vmem:[%s13898_s22 + $0x218] sm:$0xff] %vm5088_vm4, %v8755_v45  ;;  %v8230_v51 = vmul.f32 %v11219_v44, %v19211_v16  ;;  %19212 = vst [vmem:[#allocation52_spill] sm:$0xff] %v15494_v38  ;;  %v6844_v39 = vpop.xlane.xlu0 %6843  ;;  %v6950_v44 = vsel %vm5088_vm4, %v6478_v29, 0.0  ;;  %v19216_v16 = vld [vmem:[#allocation150_spill] sm:$0xff]  ;;  %v5641_v29 = vsel %vm5088_vm4, %v15494_v38, 0.0  ;;  %v6480_v57 = vmul.f32 %v15499_v4, %v15499_v4 }
 0x48b   : > { %v11221_v36 = vpop.eup %11220  ;;  %19214 = vst [vmem:[#allocation147_spill] sm:$0xff] %v15499_v4  ;;  %v7466_v25 = vmul.f32 0.125, %v6844_v39  ;;  %5639 = vadd.xlane.f32.xlu1 %v5638_v46  ;;  %v15505_v48 = vsub.f32 %v19216_v16, %v5969_v21  ;;  %v15518_v21 = vpop.f32.mrb[216].mxu1  ;;  %v15546_v38 = vld [vmem:[#allocation7] ss:$0 sm:$0xff]  ;;  %v19229_v4 = vld [vmem:[#allocation155_spill] sm:$0xff] }
 0x48c   : > { %v8493_v43 = vmul.f32 %v14963_v60, %v8230_v51  ;;  %v8231_v45 = vmul.f32 %v11221_v36, %v19215_v9  ;;  %v6847_v23 = vpop.xlane.xlu1 %6846  ;;  %v15512_v51 = vadd.f32 %v15282_v63, %v14779_v37  ;;  %v15522_v39 = vpop.f32.mrb[217].mxu1 }
 0x48d   : > { %19217 = vst [vmem:[#allocation14_spill] sm:$0xff] %v15505_v48  ;;  %v7722_v17 = vadd.f32 1e-05, %v7466_v25  ;;  %v7467_v62 = vmul.f32 0.125, %v6847_v23  ;;  %6951 = vadd.xlane.f32.xlu0 %v6950_v44 }
 0x48e   : > { %v8756_v26 = vadd.f32 %v14982_v41, %v8493_v43  ;;  %v8494_v42 = vmul.f32 %v14963_v60, %v8231_v45  ;;  %19218 = vst [vmem:[#allocation93_spill] sm:$0xff] %v15512_v51  ;;  %v15514_v9 = vpop.xlane.xlu0 %5534  ;;  %v19220_v60 = vld [vmem:[#allocation151_spill] sm:$0xff]  ;;  %v19223_v45 = vld [vmem:[#allocation56_spill] sm:$0xff] }
 0x48f   : > { %19219 = vst [vmem:[#allocation110_spill] sm:$0xff] %v15514_v9  ;;  %11226 = vrsqrt.f32 %v7722_v17  ;;  %v7723_v23 = vadd.f32 1e-05, %v7467_v62  ;;  %6954 = vadd.xlane.f32.xlu1 %v6953_v2  ;;  %v5970_v46 = vmul.f32 0.125, %v19220_v60  ;;  %v15530_v25 = vpop.f32.mrb[218].mxu1  ;;  %v5971_v17 = vmul.f32 0.125, %v19223_v45 }
 0x490   : > { %9012 = vst.msk [vmem:[%s13898_s22 + $0x220] sm:$0xff] %vm5088_vm4, %v8756_v26  ;;  %v8757_v37 = vadd.f32 %v14982_v41, %v8494_v42  ;;  %v15528_v36 = vpop.xlane.xlu1 %5537  ;;  %19222 = vst [vmem:[#allocation145_spill] sm:$0xff] %v15530_v25  ;;  %v15533_v2 = vpop.f32.mrb[219].mxu1  ;;  %v19224_v62 = vld [vmem:[#allocation144_spill] sm:$0xff]  ;;  %v5644_v26 = vsel %vm5088_vm4, %v15512_v51, 0.0  ;;  %v6481_v41 = vmul.f32 %v15505_v48, %v15505_v48  ;;  %v6956_v45 = vsel %vm5088_vm4, %v6480_v57, 0.0 }
 0x491   : > { %19221 = vst [vmem:[#allocation58_spill] sm:$0xff] %v15528_v36  ;;  %v11223_v43 = vpop.eup %11222  ;;  %11228 = vrsqrt.f32 %v7723_v23  ;;  %5642 = vadd.xlane.f32.xlu0 %v5641_v29  ;;  %v19225_v23 = vld [vmem:[#allocation152_spill] sm:$0xff]  ;;  %v15552_v51 = vadd.f32 %v15282_v63, %v14794_v8  ;;  %v19231_v36 = vld [vmem:[#allocation18_spill] sm:$0xff] }
 0x492   : > { %9013 = vst.msk [vmem:[%s13898_s22 + $0x228] sm:$0xff] %vm5088_vm4, %v8757_v37  ;;  %v8232_v44 = vmul.f32 %v11223_v43, %v19224_v62  ;;  %v6850_v16 = vpop.xlane.xlu0 %6849  ;;  %v15544_v29 = vsub.f32 %v19225_v23, %v5970_v46  ;;  %v19227_v43 = vld [vmem:[#allocation146_spill] sm:$0xff]  ;;  %v15557_v46 = vld [vmem:[#allocation9] ss:$0 sm:$0xff] }
 0x493   : > { %v11225_v42 = vpop.eup %11224  ;;  %v7468_v60 = vmul.f32 0.125, %v6850_v16  ;;  %5645 = vadd.xlane.f32.xlu1 %v5644_v26  ;;  %19228 = vst [vmem:[#allocation133_spill] sm:$0xff] %v15552_v51  ;;  %v15555_v16 = vsub.f32 %v19229_v4, %v5971_v17  ;;  %v19234_v4 = vld [vmem:[#allocation16_spill] sm:$0xff] }
 0x494   : > { %19226 = vst [vmem:[#allocation91_spill] sm:$0xff] %v15544_v29  ;;  %v8495_v37 = vmul.f32 %v15546_v38, %v8232_v44  ;;  %v8233_v62 = vmul.f32 %v11225_v42, %v19227_v43  ;;  %v6853_v48 = vpop.xlane.xlu1 %6852  ;;  %v15563_v42 = vadd.f32 %v15282_v63, %v19231_v36  ;;  %v6959_v43 = vsel %vm5088_vm4, %v6481_v41, 0.0 }
 0x495   : > { %19230 = vst [vmem:[#allocation149_spill] sm:$0xff] %v15555_v16  ;;  %v7724_v26 = vadd.f32 1e-05, %v7468_v60  ;;  %v7469_v57 = vmul.f32 0.125, %v6853_v48  ;;  %6957 = vadd.xlane.f32.xlu0 %v6956_v45  ;;  %v5972_v17 = vmul.f32 0.125, %v19234_v4  ;;  %v5647_v36 = vsel %vm5088_vm4, %v15552_v51, 0.0 }
 0x496   : > { %v8758_v23 = vadd.f32 %v15557_v46, %v8495_v37  ;;  %v8496_v44 = vmul.f32 %v15546_v38, %v8233_v62  ;;  %19232 = vst [vmem:[#allocation49_spill] sm:$0xff] %v15563_v42  ;;  %v15565_v8 = vpop.xlane.xlu0 %5540  ;;  %v6482_v37 = vmul.f32 %v15544_v29, %v15544_v29  ;;  %v5650_v4 = vsel %vm5088_vm4, %v15563_v42, 0.0  ;;  %v19239_v29 = vld [vmem:[#allocation22_spill] sm:$0xff] }
 0x497   : > { %19233 = vst [vmem:[#allocation148_spill] sm:$0xff] %v15565_v8  ;;  %11230 = vrsqrt.f32 %v7724_v26  ;;  %v7725_v48 = vadd.f32 1e-05, %v7469_v57  ;;  %6960 = vadd.xlane.f32.xlu1 %v6959_v43  ;;  %v19236_v8 = vld [vmem:[#allocation63_spill] sm:$0xff]  ;;  %v6483_v26 = vmul.f32 %v15555_v16, %v15555_v16  ;;  %v19237_v57 = vld [vmem:[#allocation125_spill] sm:$0xff]  ;;  %v19241_v16 = vld [vmem:[#allocation130_spill] sm:$0xff] }
 0x498   : > { %9014 = vst.msk [vmem:[%s13898_s22 + $0x230] sm:$0xff] %vm5088_vm4, %v8758_v23  ;;  %v8759_v60 = vadd.f32 %v15557_v46, %v8496_v44  ;;  %v15572_v45 = vpop.xlane.xlu1 %5543  ;;  %v5973_v41 = vmul.f32 0.125, %v19236_v8  ;;  %v15586_v44 = vadd.f32 %v15282_v63, %v14880_v1  ;;  %v15591_v8 = vsub.f32 %v19239_v29, %v5972_v17 }
 0x499   : > { %19235 = vst [vmem:[#allocation121_spill] sm:$0xff] %v15572_v45  ;;  %v11227_v62 = vpop.eup %11226  ;;  %11232 = vrsqrt.f32 %v7725_v48  ;;  %5648 = vadd.xlane.f32.xlu0 %v5647_v36  ;;  %v6965_v42 = vsel %vm5088_vm4, %v6483_v26, 0.0 }
 0x49a   : > { %9015 = vst.msk [vmem:[%s13898_s22 + $0x238] sm:$0xff] %vm5088_vm4, %v8759_v60  ;;  %v8234_v23 = vmul.f32 %v11227_v62, %v19237_v57  ;;  %19238 = vst [vmem:[#allocation150_spill] sm:$0xff] %v15586_v44  ;;  %v6856_v43 = vpop.xlane.xlu0 %6855  ;;  %v6962_v62 = vsel %vm5088_vm4, %v6482_v37, 0.0  ;;  %v19242_v57 = vld [vmem:[#allocation23_spill] sm:$0xff] }
 0x49b   : > { %v11229_v51 = vpop.eup %11228  ;;  %19240 = vst [vmem:[#allocation151_spill] sm:$0xff] %v15591_v8  ;;  %v7470_v48 = vmul.f32 0.125, %v6856_v43  ;;  %5651 = vadd.xlane.f32.xlu1 %v5650_v4  ;;  %v15597_v1 = vsub.f32 %v19242_v57, %v5973_v41  ;;  %v15610_v37 = vpop.f32.mrb[220].mxu1  ;;  %v6484_v41 = vmul.f32 %v15591_v8, %v15591_v8  ;;  %v19246_v43 = vld [vmem:[#allocation158_spill] sm:$0xff] }
 0x49c   : > { %v8497_v36 = vmul.f32 %v15546_v38, %v8234_v23  ;;  %v8235_v60 = vmul.f32 %v11229_v51, %v19241_v16  ;;  %v6859_v45 = vpop.xlane.xlu1 %6858  ;;  %v15604_v23 = vadd.f32 %v15282_v63, %v14875_v30  ;;  %v5653_v16 = vsel %vm5088_vm4, %v15586_v44, 0.0  ;;  %v15614_v26 = vpop.f32.mrb[221].mxu1 }
 0x49d   : > { %19243 = vst [vmem:[#allocation56_spill] sm:$0xff] %v15597_v1  ;;  %v7726_v9 = vadd.f32 1e-05, %v7470_v48  ;;  %v7471_v25 = vmul.f32 0.125, %v6859_v45  ;;  %6963 = vadd.xlane.f32.xlu0 %v6962_v62  ;;  %v5974_v4 = vmul.f32 0.125, %v19246_v43  ;;  %v19248_v62 = vld [vmem:[#allocation66_spill] sm:$0xff] }
 0x49e   : > { %v8760_v29 = vadd.f32 %v15557_v46, %v8497_v36  ;;  %v8498_v17 = vmul.f32 %v15546_v38, %v8235_v60  ;;  %19244 = vst [vmem:[#allocation144_spill] sm:$0xff] %v15604_v23  ;;  %v15606_v51 = vpop.xlane.xlu0 %5546 }
 0x49f   : > { %19245 = vst [vmem:[#allocation152_spill] sm:$0xff] %v15606_v51  ;;  %11234 = vrsqrt.f32 %v7726_v9  ;;  %v7727_v45 = vadd.f32 1e-05, %v7471_v25  ;;  %6966 = vadd.xlane.f32.xlu1 %v6965_v42  ;;  %v15622_v36 = vpop.f32.mrb[222].mxu1  ;;  %v5975_v9 = vmul.f32 0.125, %v19248_v62  ;;  %v19249_v42 = vld [vmem:[#allocation55_spill] sm:$0xff] }
 0x4a0   : > { %9016 = vst.msk [vmem:[%s13898_s22 + $0x240] sm:$0xff] %vm5088_vm4, %v8760_v29  ;;  %v8761_v30 = vadd.f32 %v15557_v46, %v8498_v17  ;;  %v15620_v48 = vpop.xlane.xlu1 %5549  ;;  %v15625_v25 = vpop.f32.mrb[223].mxu1  ;;  %v5656_v29 = vsel %vm5088_vm4, %v15604_v23, 0.0  ;;  %v6485_v17 = vmul.f32 %v15597_v1, %v15597_v1  ;;  %v6968_v62 = vsel %vm5088_vm4, %v6484_v41, 0.0  ;;  %v19254_v23 = vld [vmem:[#allocation57_spill] sm:$0xff] }
 0x4a1   : > { %19247 = vst [vmem:[#allocation146_spill] sm:$0xff] %v15620_v48  ;;  %v11231_v60 = vpop.eup %11230  ;;  %11236 = vrsqrt.f32 %v7727_v45  ;;  %5654 = vadd.xlane.f32.xlu0 %v5653_v16  ;;  %v19250_v45 = vld [vmem:[#allocation59_spill] sm:$0xff]  ;;  %v15645_v1 = vsub.f32 %v19254_v23, %v5975_v9 }
 0x4a2   : > { %9017 = vst.msk [vmem:[%s13898_s22 + $0x248] sm:$0xff] %vm5088_vm4, %v8761_v30  ;;  %v8236_v57 = vmul.f32 %v11231_v60, %v19249_v42  ;;  %v6862_v43 = vpop.xlane.xlu0 %6861  ;;  %v15636_v16 = vsub.f32 %v19250_v45, %v5974_v4  ;;  %v19252_v30 = vld [vmem:[#allocation154_spill] sm:$0xff]  ;;  %v15642_v60 = vadd.f32 %v15282_v63, %v14889_v53  ;;  %v6971_v53 = vsel %vm5088_vm4, %v6485_v17, 0.0 }
 0x4a3   : > { %v11233_v44 = vpop.eup %11232  ;;  %v7472_v8 = vmul.f32 0.125, %v6862_v43  ;;  %5657 = vadd.xlane.f32.xlu1 %v5656_v29  ;;  %19255 = vst [vmem:[#allocation16_spill] sm:$0xff] %v15645_v1  ;;  %v5976_v45 = vmul.f32 0.125, %v14825_v31  ;;  %v5977_v17 = vmul.f32 0.125, %v14831_v10  ;;  %v6487_v31 = vmul.f32 %v15645_v1, %v15645_v1 }
 0x4a4   : > { %19251 = vst [vmem:[#allocation155_spill] sm:$0xff] %v15636_v16  ;;  %v8499_v48 = vmul.f32 %v15546_v38, %v8236_v57  ;;  %v8237_v51 = vmul.f32 %v11233_v44, %v19252_v30  ;;  %19253 = vst [vmem:[#allocation18_spill] sm:$0xff] %v15642_v60  ;;  %v6865_v42 = vpop.xlane.xlu1 %6864  ;;  %v15651_v57 = vadd.f32 %v15282_v63, %v14887_v55  ;;  %v5659_v55 = vsel %vm5088_vm4, %v15642_v60, 0.0 }
 0x4a5   : > { %v7728_v43 = vadd.f32 1e-05, %v7472_v8  ;;  %v7473_v29 = vmul.f32 0.125, %v6865_v42  ;;  %6969 = vadd.xlane.f32.xlu0 %v6968_v62  ;;  %v19257_v62 = vld [vmem:[#allocation15_spill] sm:$0xff]  ;;  %v15674_v42 = vadd.f32 %v15282_v63, %v14978_v22 }
 0x4a6   : > { %v8762_v41 = vadd.f32 %v15557_v46, %v8499_v48  ;;  %v8500_v4 = vmul.f32 %v15546_v38, %v8237_v51  ;;  %19256 = vst [vmem:[#allocation63_spill] sm:$0xff] %v15651_v57  ;;  %v15653_v44 = vpop.xlane.xlu0 %5552  ;;  %v6486_v51 = vmul.f32 %v15636_v16, %v15636_v16 }
 0x4a7   : > { %11238 = vrsqrt.f32 %v7728_v43  ;;  %v7729_v23 = vadd.f32 1e-05, %v7473_v29  ;;  %6972 = vadd.xlane.f32.xlu1 %v6971_v53  ;;  %19258 = vst [vmem:[#allocation125_spill] sm:$0xff] %v15674_v42  ;;  %v5662_v29 = vsel %vm5088_vm4, %v15651_v57, 0.0  ;;  %v6977_v57 = vsel %vm5088_vm4, %v6487_v31, 0.0 }
 0x4a8   : > { %9018 = vst.msk [vmem:[%s13898_s22 + $0x250] sm:$0xff] %vm5088_vm4, %v8762_v41  ;;  %v8763_v8 = vadd.f32 %v15557_v46, %v8500_v4  ;;  %v15660_v48 = vpop.xlane.xlu1 %5555  ;;  %v19259_v4 = vld [vmem:[#allocation62_spill] sm:$0xff] }
 0x4a9   : > { %v11235_v9 = vpop.eup %11234  ;;  %11240 = vrsqrt.f32 %v7729_v23  ;;  %5660 = vadd.xlane.f32.xlu0 %v5659_v55  ;;  %v15679_v10 = vsub.f32 %v19259_v4, %v5976_v45  ;;  %v19261_v55 = vld [vmem:[#allocation156_spill] sm:$0xff]  ;;  %v19266_v4 = vld [vmem:[#allocation163_spill] sm:$0xff] }
 0x4aa   : > { %9019 = vst.msk [vmem:[%s13898_s22 + $0x258] sm:$0xff] %vm5088_vm4, %v8763_v8  ;;  %v8238_v30 = vmul.f32 %v11235_v9, %v19257_v62  ;;  %v6868_v43 = vpop.xlane.xlu0 %6867  ;;  %v6974_v9 = vsel %vm5088_vm4, %v6486_v51, 0.0  ;;  %v19262_v62 = vld [vmem:[#allocation61_spill] sm:$0xff]  ;;  %v5665_v51 = vsel %vm5088_vm4, %v15674_v42, 0.0 }
 0x4ab   : > { %v11237_v41 = vpop.eup %11236  ;;  %19260 = vst [vmem:[#allocation22_spill] sm:$0xff] %v15679_v10  ;;  %v7474_v53 = vmul.f32 0.125, %v6868_v43  ;;  %5663 = vadd.xlane.f32.xlu1 %v5662_v29  ;;  %v15685_v22 = vsub.f32 %v19262_v62, %v5977_v17  ;;  %v15698_v17 = vpop.f32.mrb[224].mxu1  ;;  %v6488_v31 = vmul.f32 %v15679_v10, %v15679_v10 }
 0x4ac   : > { %v8501_v23 = vmul.f32 %v15546_v38, %v8238_v30  ;;  %v8239_v8 = vmul.f32 %v11237_v41, %v19261_v55  ;;  %v6871_v60 = vpop.xlane.xlu1 %6870  ;;  %v15692_v30 = vadd.f32 %v15282_v63, %v14974_v13  ;;  %v15702_v41 = vpop.f32.mrb[225].mxu1 }
 0x4ad   : > { %19263 = vst [vmem:[#allocation130_spill] sm:$0xff] %v15685_v22  ;;  %v7730_v1 = vadd.f32 1e-05, %v7474_v53  ;;  %v7475_v16 = vmul.f32 0.125, %v6871_v60  ;;  %6975 = vadd.xlane.f32.xlu0 %v6974_v9  ;;  %v5978_v53 = vmul.f32 0.125, %v19266_v4  ;;  %v19268_v9 = vld [vmem:[#allocation162_spill] sm:$0xff] }
 0x4ae   : > { %v8764_v45 = vadd.f32 %v15557_v46, %v8501_v23  ;;  %v8502_v43 = vmul.f32 %v15546_v38, %v8239_v8  ;;  %19264 = vst [vmem:[#allocation23_spill] sm:$0xff] %v15692_v30  ;;  %v15694_v29 = vpop.xlane.xlu0 %5558 }
 0x4af   : > { %19265 = vst [vmem:[#allocation158_spill] sm:$0xff] %v15694_v29  ;;  %11242 = vrsqrt.f32 %v7730_v1  ;;  %v7731_v60 = vadd.f32 1e-05, %v7475_v16  ;;  %6978 = vadd.xlane.f32.xlu1 %v6977_v57  ;;  %v15710_v55 = vpop.f32.mrb[226].mxu1  ;;  %v5979_v1 = vmul.f32 0.125, %v19268_v9  ;;  %v19269_v57 = vld [vmem:[#allocation100_spill] sm:$0xff] }
 0x4b0   : > { %9020 = vst.msk [vmem:[%s13898_s22 + $0x260] sm:$0xff] %vm5088_vm4, %v8764_v45  ;;  %v8765_v13 = vadd.f32 %v15557_v46, %v8502_v43  ;;  %v15708_v23 = vpop.xlane.xlu1 %5561  ;;  %v15713_v16 = vpop.f32.mrb[227].mxu1  ;;  %v5668_v45 = vsel %vm5088_vm4, %v15692_v30, 0.0  ;;  %v6489_v43 = vmul.f32 %v15685_v22, %v15685_v22  ;;  %v6980_v9 = vsel %vm5088_vm4, %v6488_v31, 0.0  ;;  %v19274_v30 = vld [vmem:[#allocation67_spill] sm:$0xff] }
 0x4b1   : > { %19267 = vst [vmem:[#allocation66_spill] sm:$0xff] %v15708_v23  ;;  %v11239_v8 = vpop.eup %11238  ;;  %11244 = vrsqrt.f32 %v7731_v60  ;;  %5666 = vadd.xlane.f32.xlu0 %v5665_v51  ;;  %v19270_v60 = vld [vmem:[#allocation64_spill] sm:$0xff]  ;;  %v15733_v22 = vsub.f32 %v19274_v30, %v5979_v1 }
 0x4b2   : > { %9021 = vst.msk [vmem:[%s13898_s22 + $0x268] sm:$0xff] %vm5088_vm4, %v8765_v13  ;;  %v8240_v62 = vmul.f32 %v11239_v8, %v19269_v57  ;;  %v6874_v4 = vpop.xlane.xlu0 %6873  ;;  %v15724_v51 = vsub.f32 %v19270_v60, %v5978_v53  ;;  %v19272_v13 = vld [vmem:[#allocation17_spill] sm:$0xff]  ;;  %v15730_v8 = vadd.f32 %v15282_v63, %v14989_v20  ;;  %v6983_v20 = vsel %vm5088_vm4, %v6489_v43, 0.0 }
 0x4b3   : > { %v11241_v42 = vpop.eup %11240  ;;  %v7476_v10 = vmul.f32 0.125, %v6874_v4  ;;  %5669 = vadd.xlane.f32.xlu1 %v5668_v45  ;;  %19275 = vst [vmem:[#allocation154_spill] sm:$0xff] %v15733_v22  ;;  %v5980_v60 = vmul.f32 0.125, %v14920_v32  ;;  %v6491_v32 = vmul.f32 %v15733_v22, %v15733_v22 }
 0x4b4   : > { %19271 = vst [vmem:[#allocation55_spill] sm:$0xff] %v15724_v51  ;;  %v8503_v23 = vmul.f32 %v15546_v38, %v8240_v62  ;;  %v8241_v29 = vmul.f32 %v11241_v42, %v19272_v13  ;;  %19273 = vst [vmem:[#allocation59_spill] sm:$0xff] %v15730_v8  ;;  %v6877_v57 = vpop.xlane.xlu1 %6876  ;;  %v15739_v62 = vadd.f32 %v15282_v63, %v14987_v11  ;;  %v5671_v11 = vsel %vm5088_vm4, %v15730_v8, 0.0  ;;  %v19279_v13 = vld [vmem:[#allocation65_spill] sm:$0xff]  ;;  %v19283_v8 = vld [vmem:[#allocation160_spill] sm:$0xff] }
 0x4b5   : > { %v7732_v4 = vadd.f32 1e-05, %v7476_v10  ;;  %v7477_v45 = vmul.f32 0.125, %v6877_v57  ;;  %6981 = vadd.xlane.f32.xlu0 %v6980_v9  ;;  %v19278_v9 = vld [vmem:[#allocation164_spill] sm:$0xff] }
 0x4b6   : > { %v8766_v31 = vadd.f32 %v15557_v46, %v8503_v23  ;;  %v8504_v53 = vmul.f32 %v15546_v38, %v8241_v29  ;;  %19276 = vst [vmem:[#allocation57_spill] sm:$0xff] %v15739_v62  ;;  %v15741_v42 = vpop.xlane.xlu0 %5564  ;;  %v6490_v29 = vmul.f32 %v15724_v51, %v15724_v51  ;;  %v5981_v43 = vmul.f32 0.125, %v19278_v9 }
 0x4b7   : > { %11246 = vrsqrt.f32 %v7732_v4  ;;  %v7733_v30 = vadd.f32 1e-05, %v7477_v45  ;;  %6984 = vadd.xlane.f32.xlu1 %v6983_v20  ;;  %v15762_v4 = vadd.f32 %v15282_v63, %v15075_v49  ;;  %v19281_v20 = vld [vmem:[#allocation69_spill] sm:$0xff] }
 0x4b8   : > { %9022 = vst.msk [vmem:[%s13898_s22 + $0x270] sm:$0xff] %vm5088_vm4, %v8766_v31  ;;  %v8767_v10 = vadd.f32 %v15557_v46, %v8504_v53  ;;  %v15748_v23 = vpop.xlane.xlu1 %5567  ;;  %v5674_v31 = vsel %vm5088_vm4, %v15739_v62, 0.0  ;;  %v15767_v9 = vsub.f32 %v19281_v20, %v5980_v60  ;;  %v6989_v62 = vsel %vm5088_vm4, %v6491_v32, 0.0 }
 0x4b9   : > { %19277 = vst [vmem:[#allocation15_spill] sm:$0xff] %v15748_v23  ;;  %v11243_v1 = vpop.eup %11242  ;;  %11248 = vrsqrt.f32 %v7733_v30  ;;  %5672 = vadd.xlane.f32.xlu0 %v5671_v11  ;;  %19280 = vst [vmem:[#allocation62_spill] sm:$0xff] %v15762_v4 }
 0x4ba   : > { %9023 = vst.msk [vmem:[%s13898_s22 + $0x278] sm:$0xff] %vm5088_vm4, %v8767_v10  ;;  %v8242_v57 = vmul.f32 %v11243_v1, %v19279_v13  ;;  %v6880_v45 = vpop.xlane.xlu0 %6879  ;;  %19282 = vst [vmem:[#allocation156_spill] sm:$0xff] %v15767_v9  ;;  %v6986_v1 = vsel %vm5088_vm4, %v6490_v29, 0.0  ;;  %v19284_v13 = vld [vmem:[#allocation30_spill] sm:$0xff]  ;;  %v5677_v29 = vsel %vm5088_vm4, %v15762_v4, 0.0  ;;  %v6492_v32 = vmul.f32 %v15767_v9, %v15767_v9 }
 0x4bb   : > { %v11245_v53 = vpop.eup %11244  ;;  %v7478_v30 = vmul.f32 0.125, %v6880_v45  ;;  %5675 = vadd.xlane.f32.xlu1 %v5674_v31  ;;  %v15773_v49 = vsub.f32 %v19284_v13, %v5981_v43  ;;  %v15786_v43 = vpop.f32.mrb[228].mxu1 }
 0x4bc   : > { %v8505_v11 = vmul.f32 %v15546_v38, %v8242_v57  ;;  %v8243_v10 = vmul.f32 %v11245_v53, %v19283_v8  ;;  %v6883_v22 = vpop.xlane.xlu1 %6882  ;;  %v15780_v57 = vadd.f32 %v15282_v63, %v15070_v0  ;;  %v15790_v31 = vpop.f32.mrb[229].mxu1  ;;  %v19288_v53 = vld [vmem:[#allocation25_spill] sm:$0xff] }
 0x4bd   : > { %19285 = vst [vmem:[#allocation61_spill] sm:$0xff] %v15773_v49  ;;  %v7734_v51 = vadd.f32 1e-05, %v7478_v30  ;;  %v7479_v23 = vmul.f32 0.125, %v6883_v22  ;;  %6987 = vadd.xlane.f32.xlu0 %v6986_v1  ;;  %v5982_v20 = vmul.f32 0.125, %v19288_v53  ;;  %v19290_v1 = vld [vmem:[#allocation81_spill] sm:$0xff] }
 0x4be   : > { %v8768_v60 = vadd.f32 %v15557_v46, %v8505_v11  ;;  %v8506_v45 = vmul.f32 %v15546_v38, %v8243_v10  ;;  %19286 = vst [vmem:[#allocation163_spill] sm:$0xff] %v15780_v57  ;;  %v15782_v8 = vpop.xlane.xlu0 %5570 }
 0x4bf   : > { %19287 = vst [vmem:[#allocation162_spill] sm:$0xff] %v15782_v8  ;;  %11250 = vrsqrt.f32 %v7734_v51  ;;  %v7735_v22 = vadd.f32 1e-05, %v7479_v23  ;;  %6990 = vadd.xlane.f32.xlu1 %v6989_v62  ;;  %v15798_v11 = vpop.f32.mrb[230].mxu1  ;;  %v5983_v51 = vmul.f32 0.125, %v19290_v1  ;;  %v19291_v23 = vld [vmem:[#allocation161_spill] sm:$0xff] }
 0x4c0   : > { %9024 = vst.msk [vmem:[%s13898_s22 + $0x280] sm:$0xff] %vm5088_vm4, %v8768_v60  ;;  %v8769_v0 = vadd.f32 %v15557_v46, %v8506_v45  ;;  %v15796_v30 = vpop.xlane.xlu1 %5573  ;;  %v15801_v62 = vpop.f32.mrb[231].mxu1  ;;  %v5680_v60 = vsel %vm5088_vm4, %v15780_v57, 0.0  ;;  %v6493_v45 = vmul.f32 %v15773_v49, %v15773_v49  ;;  %v6992_v1 = vsel %vm5088_vm4, %v6492_v32, 0.0  ;;  %v19296_v57 = vld [vmem:[#allocation31_spill] sm:$0xff] }
 0x4c1   : > { %19289 = vst [vmem:[#allocation100_spill] sm:$0xff] %v15796_v30  ;;  %v11247_v10 = vpop.eup %11246  ;;  %11252 = vrsqrt.f32 %v7735_v22  ;;  %5678 = vadd.xlane.f32.xlu0 %v5677_v29  ;;  %v19292_v22 = vld [vmem:[#allocation70_spill] sm:$0xff]  ;;  %v15821_v49 = vsub.f32 %v19296_v57, %v5983_v51 }
 0x4c2   : > { %9025 = vst.msk [vmem:[%s13898_s22 + $0x288] sm:$0xff] %vm5088_vm4, %v8769_v0  ;;  %v8244_v13 = vmul.f32 %v11247_v10, %v19291_v23  ;;  %v6886_v53 = vpop.xlane.xlu0 %6885  ;;  %v15812_v29 = vsub.f32 %v19292_v22, %v5982_v20  ;;  %v19294_v0 = vld [vmem:[#allocation71_spill] sm:$0xff]  ;;  %v15818_v10 = vadd.f32 %v15282_v63, %v15085_v47  ;;  %v6995_v47 = vsel %vm5088_vm4, %v6493_v45, 0.0 }
 0x4c3   : > { %v11249_v4 = vpop.eup %11248  ;;  %v7480_v9 = vmul.f32 0.125, %v6886_v53  ;;  %5681 = vadd.xlane.f32.xlu1 %v5680_v60  ;;  %19297 = vst [vmem:[#allocation67_spill] sm:$0xff] %v15821_v49  ;;  %v5984_v22 = vmul.f32 0.125, %v15019_v19  ;;  %v6495_v19 = vmul.f32 %v15821_v49, %v15821_v49 }
 0x4c4   : > { %19293 = vst [vmem:[#allocation64_spill] sm:$0xff] %v15812_v29  ;;  %v8507_v30 = vmul.f32 %v15546_v38, %v8244_v13  ;;  %v8245_v8 = vmul.f32 %v11249_v4, %v19294_v0  ;;  %19295 = vst [vmem:[#allocation17_spill] sm:$0xff] %v15818_v10  ;;  %v6889_v23 = vpop.xlane.xlu1 %6888  ;;  %v15827_v13 = vadd.f32 %v15282_v63, %v15082_v28  ;;  %v5683_v28 = vsel %vm5088_vm4, %v15818_v10, 0.0  ;;  %v19301_v0 = vld [vmem:[#allocation73_spill] sm:$0xff]  ;;  %v19305_v10 = vld [vmem:[#allocation103_spill] sm:$0xff] }
 0x4c5   : > { %v7736_v53 = vadd.f32 1e-05, %v7480_v9  ;;  %v7481_v60 = vmul.f32 0.125, %v6889_v23  ;;  %6993 = vadd.xlane.f32.xlu0 %v6992_v1  ;;  %v19300_v1 = vld [vmem:[#allocation28_spill] sm:$0xff] }
 0x4c6   : > { %v8770_v32 = vadd.f32 %v15557_v46, %v8507_v30  ;;  %v8508_v20 = vmul.f32 %v15546_v38, %v8245_v8  ;;  %19298 = vst [vmem:[#allocation164_spill] sm:$0xff] %v15827_v13  ;;  %v15829_v4 = vpop.xlane.xlu0 %5576  ;;  %v6494_v8 = vmul.f32 %v15812_v29, %v15812_v29  ;;  %v5985_v45 = vmul.f32 0.125, %v19300_v1 }
 0x4c7   : > { %11254 = vrsqrt.f32 %v7736_v53  ;;  %v7737_v57 = vadd.f32 1e-05, %v7481_v60  ;;  %6996 = vadd.xlane.f32.xlu1 %v6995_v47  ;;  %v15850_v53 = vadd.f32 %v15282_v63, %v15168_v7  ;;  %v19303_v47 = vld [vmem:[#allocation33_spill] sm:$0xff] }
 0x4c8   : > { %9026 = vst.msk [vmem:[%s13898_s22 + $0x290] sm:$0xff] %vm5088_vm4, %v8770_v32  ;;  %v8771_v9 = vadd.f32 %v15557_v46, %v8508_v20  ;;  %v15836_v30 = vpop.xlane.xlu1 %5579  ;;  %v5686_v32 = vsel %vm5088_vm4, %v15827_v13, 0.0  ;;  %v15855_v1 = vsub.f32 %v19303_v47, %v5984_v22  ;;  %v7001_v13 = vsel %vm5088_vm4, %v6495_v19, 0.0 }
 0x4c9   : > { %19299 = vst [vmem:[#allocation65_spill] sm:$0xff] %v15836_v30  ;;  %v11251_v51 = vpop.eup %11250  ;;  %11256 = vrsqrt.f32 %v7737_v57  ;;  %5684 = vadd.xlane.f32.xlu0 %v5683_v28  ;;  %19302 = vst [vmem:[#allocation69_spill] sm:$0xff] %v15850_v53 }
 0x4ca   : > { %9027 = vst.msk [vmem:[%s13898_s22 + $0x298] sm:$0xff] %vm5088_vm4, %v8771_v9  ;;  %v8246_v23 = vmul.f32 %v11251_v51, %v19301_v0  ;;  %v6892_v60 = vpop.xlane.xlu0 %6891  ;;  %19304 = vst [vmem:[#allocation160_spill] sm:$0xff] %v15855_v1  ;;  %v6998_v51 = vsel %vm5088_vm4, %v6494_v8, 0.0  ;;  %v19306_v0 = vld [vmem:[#allocation74_spill] sm:$0xff]  ;;  %v5689_v8 = vsel %vm5088_vm4, %v15850_v53, 0.0  ;;  %v6496_v19 = vmul.f32 %v15855_v1, %v15855_v1 }
 0x4cb   : > { %v11253_v20 = vpop.eup %11252  ;;  %v7482_v57 = vmul.f32 0.125, %v6892_v60  ;;  %5687 = vadd.xlane.f32.xlu1 %v5686_v32  ;;  %v15861_v7 = vsub.f32 %v19306_v0, %v5985_v45 }
 0x4cc   : > { %v8509_v28 = vmul.f32 %v15546_v38, %v8246_v23  ;;  %v8247_v9 = vmul.f32 %v11253_v20, %v19305_v10  ;;  %v6895_v49 = vpop.xlane.xlu1 %6894  ;;  %v15868_v23 = vadd.f32 %v15282_v63, %v15164_v15  ;;  %v15874_v45 = vpop.f32.mrb[232].mxu1  ;;  %v19309_v20 = vld [vmem:[#allocation77_spill] sm:$0xff] }
 0x4cd   : > { %19307 = vst [vmem:[#allocation30_spill] sm:$0xff] %v15861_v7  ;;  %v7738_v29 = vadd.f32 1e-05, %v7482_v57  ;;  %v7483_v30 = vmul.f32 0.125, %v6895_v49  ;;  %6999 = vadd.xlane.f32.xlu0 %v6998_v51  ;;  %v15878_v32 = vpop.f32.mrb[233].mxu1  ;;  %v5986_v47 = vmul.f32 0.125, %v19309_v20 }
 0x4ce   : > { %v8772_v22 = vadd.f32 %v15557_v46, %v8509_v28  ;;  %v8510_v60 = vmul.f32 %v15546_v38, %v8247_v9  ;;  %19308 = vst [vmem:[#allocation25_spill] sm:$0xff] %v15868_v23  ;;  %v15870_v10 = vpop.xlane.xlu0 %5582  ;;  %v19311_v9 = vld [vmem:[#allocation90_spill] sm:$0xff] }
 0x4cf   : > { %11258 = vrsqrt.f32 %v7738_v29  ;;  %v7739_v49 = vadd.f32 1e-05, %v7483_v30  ;;  %7002 = vadd.xlane.f32.xlu1 %v7001_v13  ;;  %v5987_v29 = vmul.f32 0.125, %v19311_v9  ;;  %v19312_v30 = vld [vmem:[#allocation165_spill] sm:$0xff]  ;;  %v7004_v9 = vsel %vm5088_vm4, %v6496_v19, 0.0 }
 0x4d0   : > { %9028 = vst.msk [vmem:[%s13898_s22 + $0x2a0] sm:$0xff] %vm5088_vm4, %v8772_v22  ;;  %v8773_v15 = vadd.f32 %v15557_v46, %v8510_v60  ;;  %v15884_v63 = vpop.xlane.xlu1 %5585  ;;  %v15886_v57 = vpop.f32.mrb[234].mxu1  ;;  %v5692_v22 = vsel %vm5088_vm4, %v15868_v23, 0.0  ;;  %v6497_v60 = vmul.f32 %v15861_v7, %v15861_v7  ;;  %v19317_v7 = vld [vmem:[#allocation36_spill] sm:$0xff] }
 0x4d1   : > { %19310 = vst [vmem:[#allocation81_spill] sm:$0xff] %v15884_v63  ;;  %v11255_v28 = vpop.eup %11254  ;;  %11260 = vrsqrt.f32 %v7739_v49  ;;  %5690 = vadd.xlane.f32.xlu0 %v5689_v8  ;;  %v15889_v13 = vpop.f32.mrb[235].mxu1  ;;  %v19313_v49 = vld [vmem:[#allocation78_spill] sm:$0xff] }
 0x4d2   : > { %9029 = vst.msk [vmem:[%s13898_s22 + $0x2a8] sm:$0xff] %vm5088_vm4, %v8773_v15  ;;  %v8248_v51 = vmul.f32 %v11255_v28, %v19312_v30  ;;  %v6898_v0 = vpop.xlane.xlu0 %6897  ;;  %v15900_v8 = vsub.f32 %v19313_v49, %v5986_v47  ;;  %v19315_v15 = vld [vmem:[#allocation76_spill] sm:$0xff] }
 0x4d3   : > { %v11257_v20 = vpop.eup %11256  ;;  %v7484_v53 = vmul.f32 0.125, %v6898_v0  ;;  %5693 = vadd.xlane.f32.xlu1 %v5692_v22  ;;  %v15904_v28 = vld [vmem:[#allocation6] ss:$0 sm:$0xff]  ;;  %v15911_v0 = vsub.f32 %v19317_v7, %v5987_v29  ;;  %v5989_v29 = vmul.f32 0.125, %v15120_v52 }
 0x4d4   : > { %19314 = vst [vmem:[#allocation161_spill] sm:$0xff] %v15900_v8  ;;  %v8511_v1 = vmul.f32 %v15546_v38, %v8248_v51  ;;  %v8249_v63 = vmul.f32 %v11257_v20, %v19315_v15  ;;  %v15908_v30 = vadd.f32 %v15904_v28, %v15179_v6  ;;  %v6901_v23 = vpop.xlane.xlu1 %6900  ;;  %v15917_v20 = vadd.f32 %v15904_v28, %v15176_v27 }
 0x4d5   : > { %19318 = vst [vmem:[#allocation71_spill] sm:$0xff] %v15911_v0  ;;  %v7740_v22 = vadd.f32 1e-05, %v7484_v53  ;;  %v7485_v19 = vmul.f32 0.125, %v6901_v23  ;;  %7005 = vadd.xlane.f32.xlu0 %v7004_v9  ;;  %v7007_v6 = vsel %vm5088_vm4, %v6497_v60, 0.0  ;;  %v5988_v15 = vmul.f32 0.125, %v15114_v61 }
 0x4d6   : > { %19316 = vst [vmem:[#allocation70_spill] sm:$0xff] %v15908_v30  ;;  %v8774_v47 = vadd.f32 %v15557_v46, %v8511_v1  ;;  %v8512_v51 = vmul.f32 %v15546_v38, %v8249_v63  ;;  %19319 = vst [vmem:[#allocation31_spill] sm:$0xff] %v15917_v20  ;;  %v15919_v49 = vpop.xlane.xlu0 %5588  ;;  %v5695_v27 = vsel %vm5088_vm4, %v15908_v30, 0.0  ;;  %v6498_v23 = vmul.f32 %v15900_v8, %v15900_v8  ;;  %v19321_v60 = vld [vmem:[#allocation83_spill] sm:$0xff]  ;;  %v19325_v30 = vld [vmem:[#allocation26_spill] sm:$0xff] }
 0x4d7   : > { %11262 = vrsqrt.f32 %v7740_v22  ;;  %v7741_v7 = vadd.f32 1e-05, %v7485_v19  ;;  %7008 = vadd.xlane.f32.xlu1 %v7007_v6  ;;  %v6499_v61 = vmul.f32 %v15911_v0, %v15911_v0  ;;  %v15940_v22 = vadd.f32 %v15904_v28, %v15256_v50  ;;  %v19323_v6 = vld [vmem:[#allocation38_spill] sm:$0xff] }
 0x4d8   : > { %9030 = vst.msk [vmem:[%s13898_s22 + $0x2b0] sm:$0xff] %vm5088_vm4, %v8774_v47  ;;  %v8775_v53 = vadd.f32 %v15557_v46, %v8512_v51  ;;  %v15926_v1 = vpop.xlane.xlu1 %5591  ;;  %v5698_v47 = vsel %vm5088_vm4, %v15917_v20, 0.0  ;;  %v15945_v52 = vsub.f32 %v19323_v6, %v5988_v15 }
 0x4d9   : > { %19320 = vst [vmem:[#allocation28_spill] sm:$0xff] %v15926_v1  ;;  %v11259_v63 = vpop.eup %11258  ;;  %11264 = vrsqrt.f32 %v7741_v7  ;;  %5696 = vadd.xlane.f32.xlu0 %v5695_v27  ;;  %19322 = vst [vmem:[#allocation73_spill] sm:$0xff] %v15940_v22  ;;  %v7013_v20 = vsel %vm5088_vm4, %v6499_v61, 0.0 }
 0x4da   : > { %9031 = vst.msk [vmem:[%s13898_s22 + $0x2b8] sm:$0xff] %vm5088_vm4, %v8775_v53  ;;  %v8250_v9 = vmul.f32 %v11259_v63, %v19321_v60  ;;  %v6904_v19 = vpop.xlane.xlu0 %6903  ;;  %19324 = vst [vmem:[#allocation33_spill] sm:$0xff] %v15945_v52  ;;  %v7010_v63 = vsel %vm5088_vm4, %v6498_v23, 0.0  ;;  %v19326_v60 = vld [vmem:[#allocation85_spill] sm:$0xff]  ;;  %v5701_v23 = vsel %vm5088_vm4, %v15940_v22, 0.0  ;;  %v6500_v61 = vmul.f32 %v15945_v52, %v15945_v52 }
 0x4db   : > { %v11261_v51 = vpop.eup %11260  ;;  %v7486_v7 = vmul.f32 0.125, %v6904_v19  ;;  %5699 = vadd.xlane.f32.xlu1 %v5698_v47  ;;  %v15951_v50 = vsub.f32 %v19326_v60, %v5989_v29 }
 0x4dc   : > { %v8513_v27 = vmul.f32 %v15546_v38, %v8250_v9  ;;  %v8251_v53 = vmul.f32 %v11261_v51, %v19325_v30  ;;  %v6907_v0 = vpop.xlane.xlu1 %6906  ;;  %v15958_v9 = vadd.f32 %v15904_v28, %v15252_v14  ;;  %v15964_v29 = vpop.f32.mrb[236].mxu1  ;;  %v5990_v51 = vmul.f32 0.125, %v15160_v40 }
 0x4dd   : > { %19327 = vst [vmem:[#allocation103_spill] sm:$0xff] %v15951_v50  ;;  %v7742_v8 = vadd.f32 1e-05, %v7486_v7  ;;  %v7487_v1 = vmul.f32 0.125, %v6907_v0  ;;  %7011 = vadd.xlane.f32.xlu0 %v7010_v63  ;;  %v15968_v47 = vpop.f32.mrb[237].mxu1  ;;  %v6501_v60 = vmul.f32 %v15951_v50, %v15951_v50 }
 0x4de   : > { %v8776_v15 = vadd.f32 %v15557_v46, %v8513_v27  ;;  %v8514_v19 = vmul.f32 %v15546_v38, %v8251_v53  ;;  %19328 = vst [vmem:[#allocation74_spill] sm:$0xff] %v15958_v9  ;;  %v15960_v30 = vpop.xlane.xlu0 %5594  ;;  %v5704_v63 = vsel %vm5088_vm4, %v15958_v9, 0.0  ;;  %v19334_v9 = vld [vmem:[#allocation129_spill] sm:$0xff] }
 0x4df   : > { %11266 = vrsqrt.f32 %v7742_v8  ;;  %v7743_v0 = vadd.f32 1e-05, %v7487_v1  ;;  %7014 = vadd.xlane.f32.xlu1 %v7013_v20  ;;  %v5991_v8 = vmul.f32 0.125, %v15174_v58  ;;  %v19329_v1 = vld [vmem:[#allocation84_spill] sm:$0xff]  ;;  %v7016_v58 = vsel %vm5088_vm4, %v6500_v61, 0.0 }
 0x4e0   : > { %9032 = vst.msk [vmem:[%s13898_s22 + $0x2c0] sm:$0xff] %vm5088_vm4, %v8776_v15  ;;  %v8777_v14 = vadd.f32 %v15557_v46, %v8514_v19  ;;  %v15974_v6 = vpop.xlane.xlu1 %5597  ;;  %v15976_v7 = vpop.f32.mrb[238].mxu1 }
 0x4e1   : > { %v11263_v27 = vpop.eup %11262  ;;  %11268 = vrsqrt.f32 %v7743_v0  ;;  %5702 = vadd.xlane.f32.xlu0 %v5701_v23  ;;  %v15979_v20 = vpop.f32.mrb[239].mxu1  ;;  %v19330_v0 = vld [vmem:[#allocation86_spill] sm:$0xff]  ;;  %v15999_v50 = vsub.f32 %v19334_v9, %v5991_v8 }
 0x4e2   : > { %9033 = vst.msk [vmem:[%s13898_s22 + $0x2c8] sm:$0xff] %vm5088_vm4, %v8777_v14  ;;  %v8252_v53 = vmul.f32 %v11263_v27, %v19329_v1  ;;  %v6910_v40 = vpop.xlane.xlu0 %6909  ;;  %v15990_v23 = vsub.f32 %v19330_v0, %v5990_v51  ;;  %v19332_v14 = vld [vmem:[#allocation29_spill] sm:$0xff]  ;;  %v15996_v27 = vadd.f32 %v15904_v28, %v15267_v56  ;;  %v7019_v56 = vsel %vm5088_vm4, %v6501_v60, 0.0 }
 0x4e3   : > { %v11265_v15 = vpop.eup %11264  ;;  %v7488_v19 = vmul.f32 0.125, %v6910_v40  ;;  %5705 = vadd.xlane.f32.xlu1 %v5704_v63  ;;  %19335 = vst [vmem:[#allocation165_spill] sm:$0xff] %v15999_v50  ;;  %v5992_v0 = vmul.f32 0.125, %v15207_v18  ;;  %v5993_v60 = vmul.f32 0.125, %v15214_v5  ;;  %v6503_v18 = vmul.f32 %v15999_v50, %v15999_v50 }
 0x4e4   : > { %19331 = vst [vmem:[#allocation77_spill] sm:$0xff] %v15990_v23  ;;  %v8515_v22 = vmul.f32 %v15546_v38, %v8252_v53  ;;  %v8253_v52 = vmul.f32 %v11265_v15, %v19332_v14  ;;  %19333 = vst [vmem:[#allocation90_spill] sm:$0xff] %v15996_v27  ;;  %v6913_v1 = vpop.xlane.xlu1 %6912  ;;  %v16005_v53 = vadd.f32 %v15904_v28, %v15264_v33  ;;  %v5707_v33 = vsel %vm5088_vm4, %v15996_v27, 0.0 }
 0x4e5   : > { %v7744_v40 = vadd.f32 1e-05, %v7488_v19  ;;  %v7489_v63 = vmul.f32 0.125, %v6913_v1  ;;  %7017 = vadd.xlane.f32.xlu0 %v7016_v58  ;;  %v19337_v58 = vld [vmem:[#allocation115_spill] sm:$0xff]  ;;  %v16028_v1 = vadd.f32 %v15904_v28, %v15346_v3 }
 0x4e6   : > { %v8778_v61 = vadd.f32 %v15557_v46, %v8515_v22  ;;  %v8516_v51 = vmul.f32 %v15546_v38, %v8253_v52  ;;  %19336 = vst [vmem:[#allocation78_spill] sm:$0xff] %v16005_v53  ;;  %v16007_v15 = vpop.xlane.xlu0 %5600  ;;  %v6502_v52 = vmul.f32 %v15990_v23, %v15990_v23 }
 0x4e7   : > { %11270 = vrsqrt.f32 %v7744_v40  ;;  %v7745_v9 = vadd.f32 1e-05, %v7489_v63  ;;  %7020 = vadd.xlane.f32.xlu1 %v7019_v56  ;;  %19338 = vst [vmem:[#allocation76_spill] sm:$0xff] %v16028_v1  ;;  %v5710_v63 = vsel %vm5088_vm4, %v16005_v53, 0.0  ;;  %v7025_v53 = vsel %vm5088_vm4, %v6503_v18, 0.0 }
 0x4e8   : > { %9034 = vst.msk [vmem:[%s13898_s22 + $0x2d0] sm:$0xff] %vm5088_vm4, %v8778_v61  ;;  %v8779_v22 = vadd.f32 %v15557_v46, %v8516_v51  ;;  %v16014_v8 = vpop.xlane.xlu1 %5603  ;;  %v19339_v51 = vld [vmem:[#allocation97_spill] sm:$0xff] }
 0x4e9   : > { %v11267_v19 = vpop.eup %11266  ;;  %11272 = vrsqrt.f32 %v7745_v9  ;;  %5708 = vadd.xlane.f32.xlu0 %v5707_v33  ;;  %v16033_v5 = vsub.f32 %v19339_v51, %v5992_v0  ;;  %v19341_v33 = vld [vmem:[#allocation112_spill] sm:$0xff] }
 0x4ea   : > { %9035 = vst.msk [vmem:[%s13898_s22 + $0x2d8] sm:$0xff] %vm5088_vm4, %v8779_v22  ;;  %v8254_v14 = vmul.f32 %v11267_v19, %v19337_v58  ;;  %v6916_v40 = vpop.xlane.xlu0 %6915  ;;  %v7022_v19 = vsel %vm5088_vm4, %v6502_v52, 0.0  ;;  %v19342_v58 = vld [vmem:[#allocation41_spill] sm:$0xff]  ;;  %v5713_v52 = vsel %vm5088_vm4, %v16028_v1, 0.0  ;;  %v19346_v51 = vld [vmem:[#allocation108_spill] sm:$0xff] }
 0x4eb   : > { %v11269_v61 = vpop.eup %11268  ;;  %19340 = vst [vmem:[#allocation36_spill] sm:$0xff] %v16033_v5  ;;  %v7490_v56 = vmul.f32 0.125, %v6916_v40  ;;  %5711 = vadd.xlane.f32.xlu1 %v5710_v63  ;;  %v16039_v3 = vsub.f32 %v19342_v58, %v5993_v60  ;;  %v16052_v60 = vpop.f32.mrb[240].mxu1  ;;  %v6504_v18 = vmul.f32 %v16033_v5, %v16033_v5 }
 0x4ec   : > { %v8517_v9 = vmul.f32 %v15546_v38, %v8254_v14  ;;  %v8255_v22 = vmul.f32 %v11269_v61, %v19341_v33  ;;  %v6919_v27 = vpop.xlane.xlu1 %6918  ;;  %v16046_v14 = vadd.f32 %v15904_v28, %v15342_v54  ;;  %v16056_v61 = vpop.f32.mrb[241].mxu1 }
 0x4ed   : > { %19343 = vst [vmem:[#allocation83_spill] sm:$0xff] %v16039_v3  ;;  %v7746_v50 = vadd.f32 1e-05, %v7490_v56  ;;  %v7491_v23 = vmul.f32 0.125, %v6919_v27  ;;  %7023 = vadd.xlane.f32.xlu0 %v7022_v19  ;;  %v5994_v56 = vmul.f32 0.125, %v19346_v51  ;;  %v19348_v19 = vld [vmem:[#allocation80_spill] sm:$0xff] }
 0x4ee   : > { %v8780_v0 = vadd.f32 %v15557_v46, %v8517_v9  ;;  %v8518_v40 = vmul.f32 %v15546_v38, %v8255_v22  ;;  %19344 = vst [vmem:[#allocation38_spill] sm:$0xff] %v16046_v14  ;;  %v16048_v63 = vpop.xlane.xlu0 %5606 }
 0x4ef   : > { %19345 = vst [vmem:[#allocation26_spill] sm:$0xff] %v16048_v63  ;;  %11274 = vrsqrt.f32 %v7746_v50  ;;  %v7747_v27 = vadd.f32 1e-05, %v7491_v23  ;;  %7026 = vadd.xlane.f32.xlu1 %v7025_v53  ;;  %v16064_v33 = vpop.f32.mrb[242].mxu1  ;;  %v5995_v50 = vmul.f32 0.125, %v19348_v19  ;;  %v19349_v53 = vld [vmem:[#allocation116_spill] sm:$0xff] }
 0x4f0   : > { %9036 = vst.msk [vmem:[%s13898_s22 + $0x2e0] sm:$0xff] %vm5088_vm4, %v8780_v0  ;;  %v8781_v54 = vadd.f32 %v15557_v46, %v8518_v40  ;;  %v16062_v9 = vpop.xlane.xlu1 %5609  ;;  %v16067_v23 = vpop.f32.mrb[243].mxu1  ;;  %v5716_v0 = vsel %vm5088_vm4, %v16046_v14, 0.0  ;;  %v6505_v40 = vmul.f32 %v16039_v3, %v16039_v3  ;;  %v7028_v19 = vsel %vm5088_vm4, %v6504_v18, 0.0  ;;  %v19354_v14 = vld [vmem:[#allocation101_spill] sm:$0xff] }
 0x4f1   : > { %19347 = vst [vmem:[#allocation85_spill] sm:$0xff] %v16062_v9  ;;  %v11271_v22 = vpop.eup %11270  ;;  %11276 = vrsqrt.f32 %v7747_v27  ;;  %5714 = vadd.xlane.f32.xlu0 %v5713_v52  ;;  %v19350_v27 = vld [vmem:[#allocation43_spill] sm:$0xff]  ;;  %v16087_v3 = vsub.f32 %v19354_v14, %v5995_v50 }
 0x4f2   : > { %9037 = vst.msk [vmem:[%s13898_s22 + $0x2e8] sm:$0xff] %vm5088_vm4, %v8781_v54  ;;  %v8256_v58 = vmul.f32 %v11271_v22, %v19349_v53  ;;  %v6922_v51 = vpop.xlane.xlu0 %6921  ;;  %v16078_v52 = vsub.f32 %v19350_v27, %v5994_v56  ;;  %v19352_v54 = vld [vmem:[#allocation96_spill] sm:$0xff]  ;;  %v16084_v22 = vadd.f32 %v15904_v28, %v15357_v59  ;;  %v7031_v59 = vsel %vm5088_vm4, %v6505_v40, 0.0  ;;  %v19358_v27 = vld [vmem:[#allocation114_spill] sm:$0xff] }
 0x4f3   : > { %v11273_v1 = vpop.eup %11272  ;;  %v7492_v5 = vmul.f32 0.125, %v6922_v51  ;;  %5717 = vadd.xlane.f32.xlu1 %v5716_v0  ;;  %19355 = vst [vmem:[#allocation29_spill] sm:$0xff] %v16087_v3 }
 0x4f4   : > { %19351 = vst [vmem:[#allocation84_spill] sm:$0xff] %v16078_v52  ;;  %v8519_v9 = vmul.f32 %v15546_v38, %v8256_v58  ;;  %v8257_v63 = vmul.f32 %v11273_v1, %v19352_v54  ;;  %19353 = vst [vmem:[#allocation86_spill] sm:$0xff] %v16084_v22  ;;  %v6925_v53 = vpop.xlane.xlu1 %6924  ;;  %v16093_v58 = vadd.f32 %v15904_v28, %v15354_v34  ;;  %v5996_v54 = vmul.f32 0.125, %v19358_v27 }
 0x4f5   : > { %v7748_v51 = vadd.f32 1e-05, %v7492_v5  ;;  %v7493_v0 = vmul.f32 0.125, %v6925_v53  ;;  %7029 = vadd.xlane.f32.xlu0 %v7028_v19  ;;  %v5719_v34 = vsel %vm5088_vm4, %v16084_v22, 0.0  ;;  %v19360_v19 = vld [vmem:[#allocation124_spill] sm:$0xff]  ;;  %v6507_v53 = vmul.f32 %v16087_v3, %v16087_v3  ;;  %v19363_v22 = vld [vmem:[#allocation137_spill] sm:$0xff] }
 0x4f6   : > { %v8782_v18 = vadd.f32 %v15557_v46, %v8519_v9  ;;  %v8520_v56 = vmul.f32 %v15546_v38, %v8257_v63  ;;  %19356 = vst [vmem:[#allocation129_spill] sm:$0xff] %v16093_v58  ;;  %v16095_v1 = vpop.xlane.xlu0 %5612  ;;  %v6506_v63 = vmul.f32 %v16078_v52, %v16078_v52  ;;  %v5997_v40 = vmul.f32 0.125, %v19360_v19  ;;  %v19365_v3 = vld [vmem:[#allocation102_spill] sm:$0xff] }
 0x4f7   : > { %19357 = vst [vmem:[#allocation115_spill] sm:$0xff] %v16095_v1  ;;  %11278 = vrsqrt.f32 %v7748_v51  ;;  %v7749_v14 = vadd.f32 1e-05, %v7493_v0  ;;  %7032 = vadd.xlane.f32.xlu1 %v7031_v59  ;;  %v19361_v51 = vld [vmem:[#allocation99_spill] sm:$0xff]  ;;  %v5722_v59 = vsel %vm5088_vm4, %v16093_v58, 0.0  ;;  %v16121_v19 = vsub.f32 %v19363_v22, %v5996_v54 }
 0x4f8   : > { %9038 = vst.msk [vmem:[%s13898_s22 + $0x2f0] sm:$0xff] %vm5088_vm4, %v8782_v18  ;;  %v8783_v5 = vadd.f32 %v15557_v46, %v8520_v56  ;;  %v16102_v9 = vpop.xlane.xlu1 %5615  ;;  %v16116_v18 = vadd.f32 %v15904_v28, %v15434_v12  ;;  %v7037_v58 = vsel %vm5088_vm4, %v6507_v53, 0.0 }
 0x4f9   : > { %19359 = vst [vmem:[#allocation97_spill] sm:$0xff] %v16102_v9  ;;  %v11275_v50 = vpop.eup %11274  ;;  %11280 = vrsqrt.f32 %v7749_v14  ;;  %5720 = vadd.xlane.f32.xlu0 %v5719_v34  ;;  %19364 = vst [vmem:[#allocation41_spill] sm:$0xff] %v16121_v19  ;;  %v6508_v53 = vmul.f32 %v16121_v19, %v16121_v19  ;;  %v19379_v19 = vld [vmem:[#allocation47_spill] sm:$0xff] }
 0x4fa   : > { %9039 = vst.msk [vmem:[%s13898_s22 + $0x2f8] sm:$0xff] %vm5088_vm4, %v8783_v5  ;;  %v8258_v0 = vmul.f32 %v11275_v50, %v19361_v51  ;;  %19362 = vst [vmem:[#allocation112_spill] sm:$0xff] %v16116_v18  ;;  %v6928_v56 = vpop.xlane.xlu0 %6927  ;;  %v7034_v50 = vsel %vm5088_vm4, %v6506_v63, 0.0  ;;  %v19366_v51 = vld [vmem:[#allocation45_spill] sm:$0xff]  ;;  %v5725_v63 = vsel %vm5088_vm4, %v16116_v18, 0.0 }
 0x4fb   : > { %v11277_v27 = vpop.eup %11276  ;;  %v7494_v14 = vmul.f32 0.125, %v6928_v56  ;;  %5723 = vadd.xlane.f32.xlu1 %v5722_v59  ;;  %v16127_v12 = vsub.f32 %v19366_v51, %v5997_v40  ;;  %v16140_v40 = vpop.f32.mrb[244].mxu1  ;;  %v16168_v18 = vld [vmem:[#allocation7] ss:$0 sm:$0xff] }
 0x4fc   : > { %v8521_v34 = vmul.f32 %v15546_v38, %v8258_v0  ;;  %v8259_v5 = vmul.f32 %v11277_v27, %v19365_v3  ;;  %v6931_v52 = vpop.xlane.xlu1 %6930  ;;  %v16134_v0 = vadd.f32 %v15904_v28, %v15430_v24  ;;  %v16144_v56 = vpop.f32.mrb[245].mxu1 }
 0x4fd   : > { %19367 = vst [vmem:[#allocation108_spill] sm:$0xff] %v16127_v12  ;;  %v7750_v9 = vadd.f32 1e-05, %v7494_v14  ;;  %v7495_v1 = vmul.f32 0.125, %v6931_v52  ;;  %7035 = vadd.xlane.f32.xlu0 %v7034_v50 }
 0x4fe   : > { %v8784_v22 = vadd.f32 %v15557_v46, %v8521_v34  ;;  %v8522_v54 = vmul.f32 %v15546_v38, %v8259_v5  ;;  %19368 = vst [vmem:[#allocation80_spill] sm:$0xff] %v16134_v0  ;;  %v16136_v3 = vpop.xlane.xlu0 %5618  ;;  %v19370_v38 = vld [vmem:[#allocation120_spill] sm:$0xff]  ;;  %v19373_v5 = vld [vmem:[#allocation39_spill] sm:$0xff] }
 0x4ff   : > { %19369 = vst [vmem:[#allocation116_spill] sm:$0xff] %v16136_v3  ;;  %11282 = vrsqrt.f32 %v7750_v9  ;;  %v7751_v52 = vadd.f32 1e-05, %v7495_v1  ;;  %7038 = vadd.xlane.f32.xlu1 %v7037_v58  ;;  %v5998_v59 = vmul.f32 0.125, %v19370_v38  ;;  %v16152_v14 = vpop.f32.mrb[246].mxu1  ;;  %v5999_v9 = vmul.f32 0.125, %v19373_v5 }
 0x500   : > { %9040 = vst.msk [vmem:[%s13898_s22 + $0x300] sm:$0xff] %vm5088_vm4, %v8784_v22  ;;  %v8785_v24 = vadd.f32 %v15557_v46, %v8522_v54  ;;  %v16150_v27 = vpop.xlane.xlu1 %5621  ;;  %19372 = vst [vmem:[#allocation96_spill] sm:$0xff] %v16152_v14  ;;  %v16155_v58 = vpop.f32.mrb[247].mxu1  ;;  %v19374_v1 = vld [vmem:[#allocation89_spill] sm:$0xff]  ;;  %v5728_v22 = vsel %vm5088_vm4, %v16134_v0, 0.0  ;;  %v6509_v46 = vmul.f32 %v16127_v12, %v16127_v12  ;;  %v7040_v5 = vsel %vm5088_vm4, %v6508_v53, 0.0 }
 0x501   : > { %19371 = vst [vmem:[#allocation43_spill] sm:$0xff] %v16150_v27  ;;  %v11279_v34 = vpop.eup %11278  ;;  %11284 = vrsqrt.f32 %v7751_v52  ;;  %5726 = vadd.xlane.f32.xlu0 %v5725_v63  ;;  %v19375_v52 = vld [vmem:[#allocation46_spill] sm:$0xff]  ;;  %v16174_v0 = vadd.f32 %v15904_v28, %v15445_v35 }
 0x502   : > { %9041 = vst.msk [vmem:[%s13898_s22 + $0x308] sm:$0xff] %vm5088_vm4, %v8785_v24  ;;  %v8260_v50 = vmul.f32 %v11279_v34, %v19374_v1  ;;  %v6934_v51 = vpop.xlane.xlu0 %6933  ;;  %v16166_v63 = vsub.f32 %v19375_v52, %v5998_v59  ;;  %v19377_v34 = vld [vmem:[#allocation40_spill] sm:$0xff]  ;;  %v19381_v27 = vld [vmem:[#allocation138_spill] sm:$0xff] }
 0x503   : > { %v11281_v54 = vpop.eup %11280  ;;  %v7496_v38 = vmul.f32 0.125, %v6934_v51  ;;  %5729 = vadd.xlane.f32.xlu1 %v5728_v22  ;;  %19378 = vst [vmem:[#allocation114_spill] sm:$0xff] %v16174_v0  ;;  %v16177_v51 = vsub.f32 %v19379_v19, %v5999_v9  ;;  %v16179_v59 = vld [vmem:[#allocation9] ss:$0 sm:$0xff]  ;;  %v19384_v19 = vld [vmem:[#allocation94_spill] sm:$0xff] }
 0x504   : > { %19376 = vst [vmem:[#allocation101_spill] sm:$0xff] %v16166_v63  ;;  %v8523_v24 = vmul.f32 %v16168_v18, %v8260_v50  ;;  %v8261_v1 = vmul.f32 %v11281_v54, %v19377_v34  ;;  %v6937_v12 = vpop.xlane.xlu1 %6936  ;;  %v16185_v54 = vadd.f32 %v15904_v28, %v19381_v27  ;;  %v7043_v34 = vsel %vm5088_vm4, %v6509_v46, 0.0 }
 0x505   : > { %19380 = vst [vmem:[#allocation124_spill] sm:$0xff] %v16177_v51  ;;  %v7752_v22 = vadd.f32 1e-05, %v7496_v38  ;;  %v7497_v53 = vmul.f32 0.125, %v6937_v12  ;;  %7041 = vadd.xlane.f32.xlu0 %v7040_v5  ;;  %v6000_v9 = vmul.f32 0.125, %v19384_v19  ;;  %v5731_v27 = vsel %vm5088_vm4, %v16174_v0, 0.0 }
 0x506   : > { %v8786_v52 = vadd.f32 %v16179_v59, %v8523_v24  ;;  %v8524_v50 = vmul.f32 %v16168_v18, %v8261_v1  ;;  %19382 = vst [vmem:[#allocation99_spill] sm:$0xff] %v16185_v54  ;;  %v16187_v35 = vpop.xlane.xlu0 %5624  ;;  %v6510_v24 = vmul.f32 %v16166_v63, %v16166_v63  ;;  %v5734_v19 = vsel %vm5088_vm4, %v16185_v54, 0.0  ;;  %v19389_v63 = vld [vmem:[#allocation50_spill] sm:$0xff] }
 0x507   : > { %19383 = vst [vmem:[#allocation137_spill] sm:$0xff] %v16187_v35  ;;  %11286 = vrsqrt.f32 %v7752_v22  ;;  %v7753_v12 = vadd.f32 1e-05, %v7497_v53  ;;  %7044 = vadd.xlane.f32.xlu1 %v7043_v34  ;;  %v19386_v35 = vld [vmem:[#allocation126_spill] sm:$0xff]  ;;  %v6511_v22 = vmul.f32 %v16177_v51, %v16177_v51  ;;  %v19387_v53 = vld [vmem:[#allocation111_spill] sm:$0xff] }
 0x508   : > { %9042 = vst.msk [vmem:[%s13898_s22 + $0x310] sm:$0xff] %vm5088_vm4, %v8786_v52  ;;  %v8787_v38 = vadd.f32 %v16179_v59, %v8524_v50  ;;  %v16194_v5 = vpop.xlane.xlu1 %5627  ;;  %v6001_v46 = vmul.f32 0.125, %v19386_v35  ;;  %v16208_v50 = vadd.f32 %v15904_v28, %v15522_v39  ;;  %v16213_v35 = vsub.f32 %v19389_v63, %v6000_v9  ;;  %v19391_v51 = vld [vmem:[#allocation134_spill] sm:$0xff] }
 0x509   : > { %19385 = vst [vmem:[#allocation102_spill] sm:$0xff] %v16194_v5  ;;  %v11283_v1 = vpop.eup %11282  ;;  %11288 = vrsqrt.f32 %v7753_v12  ;;  %5732 = vadd.xlane.f32.xlu0 %v5731_v27  ;;  %v7049_v54 = vsel %vm5088_vm4, %v6511_v22, 0.0 }
 0x50a   : > { %9043 = vst.msk [vmem:[%s13898_s22 + $0x318] sm:$0xff] %vm5088_vm4, %v8787_v38  ;;  %v8262_v52 = vmul.f32 %v11283_v1, %v19387_v53  ;;  %19388 = vst [vmem:[#allocation45_spill] sm:$0xff] %v16208_v50  ;;  %v6940_v34 = vpop.xlane.xlu0 %6939  ;;  %v7046_v1 = vsel %vm5088_vm4, %v6510_v24, 0.0  ;;  %v19392_v53 = vld [vmem:[#allocation142_spill] sm:$0xff]  ;;  %v16232_v24 = vpop.f32.mrb[248].mxu1 }
 0x50b   : > { %v11285_v0 = vpop.eup %11284  ;;  %19390 = vst [vmem:[#allocation120_spill] sm:$0xff] %v16213_v35  ;;  %v7498_v12 = vmul.f32 0.125, %v6940_v34  ;;  %5735 = vadd.xlane.f32.xlu1 %v5734_v19  ;;  %v16219_v39 = vsub.f32 %v19392_v53, %v6001_v46  ;;  %v6512_v46 = vmul.f32 %v16213_v35, %v16213_v35  ;;  %v16236_v22 = vpop.f32.mrb[249].mxu1  ;;  %v19396_v34 = vld [vmem:[#allocation135_spill] sm:$0xff] }
 0x50c   : > { %v8525_v27 = vmul.f32 %v16168_v18, %v8262_v52  ;;  %v8263_v38 = vmul.f32 %v11285_v0, %v19391_v51  ;;  %v6943_v5 = vpop.xlane.xlu1 %6942  ;;  %v16226_v52 = vadd.f32 %v15904_v28, %v15518_v21  ;;  %v5737_v51 = vsel %vm5088_vm4, %v16208_v50, 0.0 }
 0x50d   : > { %19393 = vst [vmem:[#allocation39_spill] sm:$0xff] %v16219_v39  ;;  %v7754_v3 = vadd.f32 1e-05, %v7498_v12  ;;  %v7499_v14 = vmul.f32 0.125, %v6943_v5  ;;  %7047 = vadd.xlane.f32.xlu0 %v7046_v1  ;;  %v6002_v19 = vmul.f32 0.125, %v19396_v34  ;;  %v19399_v1 = vld [vmem:[#allocation132_spill] sm:$0xff] }
 0x50e   : > { %v8788_v63 = vadd.f32 %v16179_v59, %v8525_v27  ;;  %v8526_v9 = vmul.f32 %v16168_v18, %v8263_v38  ;;  %19394 = vst [vmem:[#allocation89_spill] sm:$0xff] %v16226_v52  ;;  %v16228_v0 = vpop.xlane.xlu0 %5630  ;;  %v16244_v27 = vpop.f32.mrb[250].mxu1 }
 0x50f   : > { %19395 = vst [vmem:[#allocation46_spill] sm:$0xff] %v16228_v0  ;;  %11290 = vrsqrt.f32 %v7754_v3  ;;  %v7755_v5 = vadd.f32 1e-05, %v7499_v14  ;;  %7050 = vadd.xlane.f32.xlu1 %v7049_v54  ;;  %19398 = vst [vmem:[#allocation47_spill] sm:$0xff] %v16244_v27  ;;  %v6003_v3 = vmul.f32 0.125, %v19399_v1  ;;  %v16247_v14 = vpop.f32.mrb[251].mxu1 }
 0x510   : > { %9044 = vst.msk [vmem:[%s13898_s22 + $0x320] sm:$0xff] %vm5088_vm4, %v8788_v63  ;;  %v8789_v21 = vadd.f32 %v16179_v59, %v8526_v9  ;;  %v16242_v12 = vpop.xlane.xlu1 %5633  ;;  %v19400_v54 = vld [vmem:[#allocation139_spill] sm:$0xff]  ;;  %v5740_v63 = vsel %vm5088_vm4, %v16226_v52, 0.0  ;;  %v6513_v9 = vmul.f32 %v16219_v39, %v16219_v39  ;;  %v7052_v1 = vsel %vm5088_vm4, %v6512_v46, 0.0 }
 0x511   : > { %19397 = vst [vmem:[#allocation40_spill] sm:$0xff] %v16242_v12  ;;  %v11287_v38 = vpop.eup %11286  ;;  %11292 = vrsqrt.f32 %v7755_v5  ;;  %5738 = vadd.xlane.f32.xlu0 %v5737_v51  ;;  %v19401_v5 = vld [vmem:[#allocation122_spill] sm:$0xff]  ;;  %v19405_v52 = vld [vmem:[#allocation51_spill] sm:$0xff] }
 0x512   : > { %9045 = vst.msk [vmem:[%s13898_s22 + $0x328] sm:$0xff] %vm5088_vm4, %v8789_v21  ;;  %v8264_v53 = vmul.f32 %v11287_v38, %v19400_v54  ;;  %v6946_v34 = vpop.xlane.xlu0 %6945  ;;  %v16258_v51 = vsub.f32 %v19401_v5, %v6002_v19  ;;  %v19403_v21 = vld [vmem:[#allocation44_spill] sm:$0xff]  ;;  %v16264_v38 = vadd.f32 %v15904_v28, %v15533_v2  ;;  %v16267_v39 = vsub.f32 %v19405_v52, %v6003_v3  ;;  %v19407_v5 = vld [vmem:[#allocation145_spill] sm:$0xff] }
 0x513   : > { %v11289_v50 = vpop.eup %11288  ;;  %v7500_v35 = vmul.f32 0.125, %v6946_v34  ;;  %5741 = vadd.xlane.f32.xlu1 %v5740_v63  ;;  %v7055_v2 = vsel %vm5088_vm4, %v6513_v9, 0.0 }
 0x514   : > { %19402 = vst [vmem:[#allocation138_spill] sm:$0xff] %v16258_v51  ;;  %v8527_v12 = vmul.f32 %v16168_v18, %v8264_v53  ;;  %v8265_v0 = vmul.f32 %v11289_v50, %v19403_v21  ;;  %19404 = vst [vmem:[#allocation94_spill] sm:$0xff] %v16264_v38  ;;  %v6949_v54 = vpop.xlane.xlu1 %6948  ;;  %v16273_v53 = vadd.f32 %v15904_v28, %v19407_v5  ;;  %v19410_v21 = vld [vmem:[#allocation140_spill] sm:$0xff] }
 0x515   : > { %19406 = vst [vmem:[#allocation126_spill] sm:$0xff] %v16267_v39  ;;  %v7756_v34 = vadd.f32 1e-05, %v7500_v35  ;;  %v7501_v63 = vmul.f32 0.125, %v6949_v54  ;;  %7053 = vadd.xlane.f32.xlu0 %v7052_v1  ;;  %v6004_v27 = vmul.f32 0.125, %v19410_v21  ;;  %v6514_v3 = vmul.f32 %v16258_v51, %v16258_v51  ;;  %v19412_v54 = vld [vmem:[#allocation88_spill] sm:$0xff] }
 0x516   : > { %v8790_v46 = vadd.f32 %v16179_v59, %v8527_v12  ;;  %v8528_v19 = vmul.f32 %v16168_v18, %v8265_v0  ;;  %19408 = vst [vmem:[#allocation111_spill] sm:$0xff] %v16273_v53  ;;  %v16275_v50 = vpop.xlane.xlu0 %5636  ;;  %v5743_v0 = vsel %vm5088_vm4, %v16264_v38, 0.0  ;;  %v6005_v9 = vmul.f32 0.125, %v19412_v54  ;;  %v19415_v38 = vld [vmem:[#allocation53_spill] sm:$0xff] }
 0x517   : > { %19409 = vst [vmem:[#allocation50_spill] sm:$0xff] %v16275_v50  ;;  %11294 = vrsqrt.f32 %v7756_v34  ;;  %v7757_v52 = vadd.f32 1e-05, %v7501_v63  ;;  %7056 = vadd.xlane.f32.xlu1 %v7055_v2  ;;  %v6515_v34 = vmul.f32 %v16267_v39, %v16267_v39  ;;  %v19413_v63 = vld [vmem:[#allocation123_spill] sm:$0xff]  ;;  %v5746_v2 = vsel %vm5088_vm4, %v16273_v53, 0.0  ;;  %v19417_v39 = vld [vmem:[#allocation141_spill] sm:$0xff] }
 0x518   : > { %9046 = vst.msk [vmem:[%s13898_s22 + $0x330] sm:$0xff] %vm5088_vm4, %v8790_v46  ;;  %v8791_v35 = vadd.f32 %v16179_v59, %v8528_v19  ;;  %v16282_v12 = vpop.xlane.xlu1 %5639  ;;  %v16296_v19 = vadd.f32 %v15904_v28, %v15614_v26  ;;  %v16301_v54 = vsub.f32 %v19415_v38, %v6004_v27 }
 0x519   : > { %19411 = vst [vmem:[#allocation134_spill] sm:$0xff] %v16282_v12  ;;  %v11291_v1 = vpop.eup %11290  ;;  %11296 = vrsqrt.f32 %v7757_v52  ;;  %5744 = vadd.xlane.f32.xlu0 %v5743_v0  ;;  %v7061_v53 = vsel %vm5088_vm4, %v6515_v34, 0.0 }
 0x51a   : > { %9047 = vst.msk [vmem:[%s13898_s22 + $0x338] sm:$0xff] %vm5088_vm4, %v8791_v35  ;;  %v8266_v46 = vmul.f32 %v11291_v1, %v19413_v63  ;;  %19414 = vst [vmem:[#allocation142_spill] sm:$0xff] %v16296_v19  ;;  %v6952_v5 = vpop.xlane.xlu0 %6951  ;;  %v7058_v1 = vsel %vm5088_vm4, %v6514_v3, 0.0  ;;  %v19418_v63 = vld [vmem:[#allocation54_spill] sm:$0xff]  ;;  %v5749_v3 = vsel %vm5088_vm4, %v16296_v19, 0.0  ;;  %v6516_v34 = vmul.f32 %v16301_v54, %v16301_v54 }
 0x51b   : > { %v11293_v21 = vpop.eup %11292  ;;  %19416 = vst [vmem:[#allocation135_spill] sm:$0xff] %v16301_v54  ;;  %v7502_v52 = vmul.f32 0.125, %v6952_v5  ;;  %5747 = vadd.xlane.f32.xlu1 %v5746_v2  ;;  %v16307_v26 = vsub.f32 %v19418_v63, %v6005_v9  ;;  %v16320_v9 = vpop.f32.mrb[252].mxu1  ;;  %v19422_v2 = vld [vmem:[#allocation110_spill] sm:$0xff] }
 0x51c   : > { %v8529_v0 = vmul.f32 %v16168_v18, %v8266_v46  ;;  %v8267_v35 = vmul.f32 %v11293_v21, %v19417_v39  ;;  %v6955_v51 = vpop.xlane.xlu1 %6954  ;;  %v16314_v46 = vadd.f32 %v15904_v28, %v15610_v37  ;;  %v16324_v5 = vpop.f32.mrb[253].mxu1  ;;  %v6006_v21 = vmul.f32 0.125, %v19422_v2 }
 0x51d   : > { %19419 = vst [vmem:[#allocation132_spill] sm:$0xff] %v16307_v26  ;;  %v7758_v12 = vadd.f32 1e-05, %v7502_v52  ;;  %v7503_v50 = vmul.f32 0.125, %v6955_v51  ;;  %7059 = vadd.xlane.f32.xlu0 %v7058_v1  ;;  %v19424_v1 = vld [vmem:[#allocation58_spill] sm:$0xff] }
 0x51e   : > { %v8792_v27 = vadd.f32 %v16179_v59, %v8529_v0  ;;  %v8530_v38 = vmul.f32 %v16168_v18, %v8267_v35  ;;  %19420 = vst [vmem:[#allocation139_spill] sm:$0xff] %v16314_v46  ;;  %v16316_v39 = vpop.xlane.xlu0 %5642  ;;  %v16332_v0 = vpop.f32.mrb[254].mxu1 }
 0x51f   : > { %19421 = vst [vmem:[#allocation122_spill] sm:$0xff] %v16316_v39  ;;  %11298 = vrsqrt.f32 %v7758_v12  ;;  %v7759_v51 = vadd.f32 1e-05, %v7503_v50  ;;  %7062 = vadd.xlane.f32.xlu1 %v7061_v53  ;;  %v6007_v12 = vmul.f32 0.125, %v19424_v1  ;;  %v16335_v53 = vpop.f32.mrb[255].mxu1  ;;  %v19425_v50 = vld [vmem:[#allocation131_spill] sm:$0xff] }
 0x520   : > { %9048 = vst.msk [vmem:[%s13898_s22 + $0x340] sm:$0xff] %vm5088_vm4, %v8792_v27  ;;  %v8793_v37 = vadd.f32 %v16179_v59, %v8530_v38  ;;  %v16330_v52 = vpop.xlane.xlu1 %5645  ;;  %v5752_v27 = vsel %vm5088_vm4, %v16314_v46, 0.0  ;;  %v6517_v38 = vmul.f32 %v16307_v26, %v16307_v26  ;;  %v7064_v1 = vsel %vm5088_vm4, %v6516_v34, 0.0  ;;  %v19430_v46 = vld [vmem:[#allocation153_spill] sm:$0xff] }
 0x521   : > { %19423 = vst [vmem:[#allocation44_spill] sm:$0xff] %v16330_v52  ;;  %v11295_v35 = vpop.eup %11294  ;;  %11300 = vrsqrt.f32 %v7759_v51  ;;  %5750 = vadd.xlane.f32.xlu0 %v5749_v3  ;;  %v19426_v51 = vld [vmem:[#allocation13_spill] sm:$0xff]  ;;  %v16355_v26 = vsub.f32 %v19430_v46, %v6007_v12 }
 0x522   : > { %9049 = vst.msk [vmem:[%s13898_s22 + $0x348] sm:$0xff] %vm5088_vm4, %v8793_v37  ;;  %v8268_v63 = vmul.f32 %v11295_v35, %v19425_v50  ;;  %v6958_v2 = vpop.xlane.xlu0 %6957  ;;  %v16346_v3 = vsub.f32 %v19426_v51, %v6006_v21  ;;  %v19428_v37 = vld [vmem:[#allocation113_spill] sm:$0xff]  ;;  %v16352_v35 = vadd.f32 %v15904_v28, %v15625_v25  ;;  %v7067_v25 = vsel %vm5088_vm4, %v6517_v38, 0.0  ;;  %v19434_v51 = vld [vmem:[#allocation148_spill] sm:$0xff] }
 0x523   : > { %v11297_v19 = vpop.eup %11296  ;;  %v7504_v54 = vmul.f32 0.125, %v6958_v2  ;;  %5753 = vadd.xlane.f32.xlu1 %v5752_v27  ;;  %19431 = vst [vmem:[#allocation140_spill] sm:$0xff] %v16355_v26 }
 0x524   : > { %19427 = vst [vmem:[#allocation51_spill] sm:$0xff] %v16346_v3  ;;  %v8531_v52 = vmul.f32 %v16168_v18, %v8268_v63  ;;  %v8269_v39 = vmul.f32 %v11297_v19, %v19428_v37  ;;  %19429 = vst [vmem:[#allocation145_spill] sm:$0xff] %v16352_v35  ;;  %v6961_v50 = vpop.xlane.xlu1 %6960  ;;  %v16361_v63 = vadd.f32 %v15904_v28, %v15622_v36  ;;  %v6008_v37 = vmul.f32 0.125, %v19434_v51 }
 0x525   : > { %v7760_v2 = vadd.f32 1e-05, %v7504_v54  ;;  %v7505_v27 = vmul.f32 0.125, %v6961_v50  ;;  %7065 = vadd.xlane.f32.xlu0 %v7064_v1  ;;  %v5755_v36 = vsel %vm5088_vm4, %v16352_v35, 0.0  ;;  %v19436_v1 = vld [vmem:[#allocation121_spill] sm:$0xff]  ;;  %v6519_v50 = vmul.f32 %v16355_v26, %v16355_v26  ;;  %v19440_v26 = vld [vmem:[#allocation106_spill] sm:$0xff] }
 0x526   : > { %v8794_v34 = vadd.f32 %v16179_v59, %v8531_v52  ;;  %v8532_v21 = vmul.f32 %v16168_v18, %v8269_v39  ;;  %19432 = vst [vmem:[#allocation88_spill] sm:$0xff] %v16361_v63  ;;  %v16363_v19 = vpop.xlane.xlu0 %5648  ;;  %v6518_v39 = vmul.f32 %v16346_v3, %v16346_v3  ;;  %v6009_v38 = vmul.f32 0.125, %v19436_v1  ;;  %v19439_v35 = vld [vmem:[#allocation157_spill] sm:$0xff] }
 0x527   : > { %19433 = vst [vmem:[#allocation123_spill] sm:$0xff] %v16363_v19  ;;  %11302 = vrsqrt.f32 %v7760_v2  ;;  %v7761_v46 = vadd.f32 1e-05, %v7505_v27  ;;  %7068 = vadd.xlane.f32.xlu1 %v7067_v25  ;;  %v19437_v2 = vld [vmem:[#allocation136_spill] sm:$0xff]  ;;  %v5758_v25 = vsel %vm5088_vm4, %v16361_v63, 0.0  ;;  %v16389_v1 = vsub.f32 %v19439_v35, %v6008_v37 }
 0x528   : > { %9050 = vst.msk [vmem:[%s13898_s22 + $0x350] sm:$0xff] %vm5088_vm4, %v8794_v34  ;;  %v8795_v54 = vadd.f32 %v16179_v59, %v8532_v21  ;;  %v16370_v52 = vpop.xlane.xlu1 %5651  ;;  %v16384_v34 = vadd.f32 %v15904_v28, %v15702_v41  ;;  %v7073_v63 = vsel %vm5088_vm4, %v6519_v50, 0.0  ;;  %v19443_v50 = vld [vmem:[#allocation152_spill] sm:$0xff] }
 0x529   : > { %19435 = vst [vmem:[#allocation53_spill] sm:$0xff] %v16370_v52  ;;  %v11299_v12 = vpop.eup %11298  ;;  %11304 = vrsqrt.f32 %v7761_v46  ;;  %5756 = vadd.xlane.f32.xlu0 %v5755_v36 }
 0x52a   : > { %9051 = vst.msk [vmem:[%s13898_s22 + $0x358] sm:$0xff] %vm5088_vm4, %v8795_v54  ;;  %v8270_v27 = vmul.f32 %v11299_v12, %v19437_v2  ;;  %19438 = vst [vmem:[#allocation141_spill] sm:$0xff] %v16384_v34  ;;  %v6964_v21 = vpop.xlane.xlu0 %6963  ;;  %v7070_v12 = vsel %vm5088_vm4, %v6518_v39, 0.0  ;;  %v19441_v2 = vld [vmem:[#allocation60_spill] sm:$0xff]  ;;  %v5761_v39 = vsel %vm5088_vm4, %v16384_v34, 0.0 }
 0x52b   : > { %v11301_v51 = vpop.eup %11300  ;;  %v7506_v46 = vmul.f32 0.125, %v6964_v21  ;;  %5759 = vadd.xlane.f32.xlu1 %v5758_v25  ;;  %v16395_v41 = vsub.f32 %v19441_v2, %v6009_v38  ;;  %v6010_v21 = vmul.f32 0.125, %v19443_v50  ;;  %v19446_v50 = vld [vmem:[#allocation159_spill] sm:$0xff] }
 0x52c   : > { %v8533_v36 = vmul.f32 %v16168_v18, %v8270_v27  ;;  %v8271_v54 = vmul.f32 %v11301_v51, %v19440_v26  ;;  %v6967_v3 = vpop.xlane.xlu1 %6966  ;;  %v16402_v26 = vadd.f32 %v15904_v28, %v15698_v17 }
 0x52d   : > { %v7762_v52 = vadd.f32 1e-05, %v7506_v46  ;;  %v7507_v19 = vmul.f32 0.125, %v6967_v3  ;;  %7071 = vadd.xlane.f32.xlu0 %v7070_v12  ;;  %v6520_v3 = vmul.f32 %v16389_v1, %v16389_v1  ;;  %v19444_v46 = vld [vmem:[#allocation146_spill] sm:$0xff]  ;;  %v6521_v12 = vmul.f32 %v16395_v41, %v16395_v41 }
 0x52e   : > { %v8796_v35 = vadd.f32 %v16179_v59, %v8533_v36  ;;  %v8534_v37 = vmul.f32 %v16168_v18, %v8271_v54  ;;  %19442 = vst [vmem:[#allocation54_spill] sm:$0xff] %v16402_v26  ;;  %v16404_v27 = vpop.xlane.xlu0 %5654  ;;  %v6011_v36 = vmul.f32 0.125, %v19444_v46  ;;  %v5764_v54 = vsel %vm5088_vm4, %v16402_v26, 0.0  ;;  %v19450_v26 = vld [vmem:[#allocation105_spill] sm:$0xff] }
 0x52f   : > { %11306 = vrsqrt.f32 %v7762_v52  ;;  %v7763_v38 = vadd.f32 1e-05, %v7507_v19  ;;  %7074 = vadd.xlane.f32.xlu1 %v7073_v63  ;;  %v19445_v19 = vld [vmem:[#allocation147_spill] sm:$0xff]  ;;  %v16426_v46 = vsub.f32 %v19446_v50, %v6010_v21  ;;  %v6012_v50 = vmul.f32 0.125, %v15653_v44 }
 0x530   : > { %9052 = vst.msk [vmem:[%s13898_s22 + $0x360] sm:$0xff] %vm5088_vm4, %v8796_v35  ;;  %v8797_v25 = vadd.f32 %v16179_v59, %v8534_v37  ;;  %v16414_v51 = vpop.xlane.xlu1 %5657  ;;  %v7076_v37 = vsel %vm5088_vm4, %v6520_v3, 0.0  ;;  %v16435_v34 = vsub.f32 %v19450_v26, %v6011_v36 }
 0x531   : > { %v11303_v17 = vpop.eup %11302  ;;  %11308 = vrsqrt.f32 %v7763_v38  ;;  %5762 = vadd.xlane.f32.xlu0 %v5761_v39  ;;  %19447 = vst [vmem:[#allocation110_spill] sm:$0xff] %v16426_v46  ;;  %v19448_v38 = vld [vmem:[#allocation14_spill] sm:$0xff] }
 0x532   : > { %9053 = vst.msk [vmem:[%s13898_s22 + $0x368] sm:$0xff] %vm5088_vm4, %v8797_v25  ;;  %v8272_v63 = vmul.f32 %v11303_v17, %v19445_v19  ;;  %v6970_v52 = vpop.xlane.xlu0 %6969  ;;  %v16432_v17 = vadd.f32 %v15904_v28, %v15713_v16  ;;  %19451 = vst [vmem:[#allocation131_spill] sm:$0xff] %v16435_v34  ;;  %v7079_v16 = vsel %vm5088_vm4, %v6521_v12, 0.0  ;;  %v6013_v12 = vmul.f32 0.125, %v15660_v48 }
 0x533   : > { %v11305_v2 = vpop.eup %11304  ;;  %v7508_v35 = vmul.f32 0.125, %v6970_v52  ;;  %5765 = vadd.xlane.f32.xlu1 %v5764_v54  ;;  %v6523_v44 = vmul.f32 %v16435_v34, %v16435_v34 }
 0x534   : > { %v8535_v39 = vmul.f32 %v16168_v18, %v8272_v63  ;;  %v8273_v25 = vmul.f32 %v11305_v2, %v19448_v38  ;;  %19449 = vst [vmem:[#allocation58_spill] sm:$0xff] %v16432_v17  ;;  %v6973_v19 = vpop.xlane.xlu1 %6972  ;;  %v16441_v63 = vadd.f32 %v15904_v28, %v15710_v55  ;;  %v5767_v55 = vsel %vm5088_vm4, %v16432_v17, 0.0  ;;  %v19453_v38 = vld [vmem:[#allocation91_spill] sm:$0xff] }
 0x535   : > { %v7764_v52 = vadd.f32 1e-05, %v7508_v35  ;;  %v7509_v54 = vmul.f32 0.125, %v6973_v19  ;;  %7077 = vadd.xlane.f32.xlu0 %v7076_v37  ;;  %v6522_v37 = vmul.f32 %v16426_v46, %v16426_v46  ;;  %v16464_v19 = vadd.f32 %v15904_v28, %v15790_v31 }
 0x536   : > { %v8798_v3 = vadd.f32 %v16179_v59, %v8535_v39  ;;  %v8536_v21 = vmul.f32 %v16168_v18, %v8273_v25  ;;  %19452 = vst [vmem:[#allocation13_spill] sm:$0xff] %v16441_v63  ;;  %v16443_v2 = vpop.xlane.xlu0 %5660 }
 0x537   : > { %11310 = vrsqrt.f32 %v7764_v52  ;;  %v7765_v26 = vadd.f32 1e-05, %v7509_v54  ;;  %7080 = vadd.xlane.f32.xlu1 %v7079_v16  ;;  %19454 = vst [vmem:[#allocation113_spill] sm:$0xff] %v16464_v19  ;;  %v5770_v54 = vsel %vm5088_vm4, %v16441_v63, 0.0  ;;  %v7085_v63 = vsel %vm5088_vm4, %v6523_v44, 0.0  ;;  %v19460_v44 = vld [vmem:[#allocation158_spill] sm:$0xff] }
 0x538   : > { %9054 = vst.msk [vmem:[%s13898_s22 + $0x370] sm:$0xff] %vm5088_vm4, %v8798_v3  ;;  %v8799_v36 = vadd.f32 %v16179_v59, %v8536_v21  ;;  %v16450_v35 = vpop.xlane.xlu1 %5663  ;;  %v19455_v21 = vld [vmem:[#allocation19_spill] sm:$0xff] }
 0x539   : > { %v11307_v39 = vpop.eup %11306  ;;  %11312 = vrsqrt.f32 %v7765_v26  ;;  %5768 = vadd.xlane.f32.xlu0 %v5767_v55  ;;  %v16469_v48 = vsub.f32 %v19455_v21, %v6012_v50  ;;  %v19456_v55 = vld [vmem:[#allocation149_spill] sm:$0xff] }
 0x53a   : > { %9055 = vst.msk [vmem:[%s13898_s22 + $0x378] sm:$0xff] %vm5088_vm4, %v8799_v36  ;;  %v8274_v25 = vmul.f32 %v11307_v39, %v19453_v38  ;;  %v6976_v52 = vpop.xlane.xlu0 %6975  ;;  %v7082_v39 = vsel %vm5088_vm4, %v6522_v37, 0.0  ;;  %v19457_v38 = vld [vmem:[#allocation68_spill] sm:$0xff]  ;;  %v5773_v37 = vsel %vm5088_vm4, %v16464_v19, 0.0 }
 0x53b   : > { %v11309_v3 = vpop.eup %11308  ;;  %v7510_v16 = vmul.f32 0.125, %v6976_v52  ;;  %5771 = vadd.xlane.f32.xlu1 %v5770_v54  ;;  %v16475_v31 = vsub.f32 %v19457_v38, %v6013_v12  ;;  %v19474_v19 = vld [vmem:[#allocation16_spill] sm:$0xff] }
 0x53c   : > { %v8537_v26 = vmul.f32 %v16168_v18, %v8274_v25  ;;  %v8275_v36 = vmul.f32 %v11309_v3, %v19456_v55  ;;  %v6979_v17 = vpop.xlane.xlu1 %6978  ;;  %v16482_v25 = vadd.f32 %v15904_v28, %v15786_v43  ;;  %v6014_v3 = vmul.f32 0.125, %v19460_v44  ;;  %v19461_v28 = vld [vmem:[#allocation66_spill] sm:$0xff] }
 0x53d   : > { %19458 = vst [vmem:[#allocation153_spill] sm:$0xff] %v16475_v31  ;;  %v7766_v34 = vadd.f32 1e-05, %v7510_v16  ;;  %v7511_v46 = vmul.f32 0.125, %v6979_v17  ;;  %7083 = vadd.xlane.f32.xlu0 %v7082_v39  ;;  %v6524_v17 = vmul.f32 %v16469_v48, %v16469_v48 }
 0x53e   : > { %v8800_v50 = vadd.f32 %v16179_v59, %v8537_v26  ;;  %v8538_v52 = vmul.f32 %v16168_v18, %v8275_v36  ;;  %19459 = vst [vmem:[#allocation148_spill] sm:$0xff] %v16482_v25  ;;  %v16484_v54 = vpop.xlane.xlu0 %5666  ;;  %v6015_v26 = vmul.f32 0.125, %v19461_v28  ;;  %v5776_v55 = vsel %vm5088_vm4, %v16482_v25, 0.0  ;;  %v19467_v25 = vld [vmem:[#allocation21_spill] sm:$0xff] }
 0x53f   : > { %11314 = vrsqrt.f32 %v7766_v34  ;;  %v7767_v12 = vadd.f32 1e-05, %v7511_v46  ;;  %7086 = vadd.xlane.f32.xlu1 %v7085_v63  ;;  %v19462_v34 = vld [vmem:[#allocation151_spill] sm:$0xff]  ;;  %v6525_v36 = vmul.f32 %v16475_v31, %v16475_v31 }
 0x540   : > { %9056 = vst.msk [vmem:[%s13898_s22 + $0x380] sm:$0xff] %vm5088_vm4, %v8800_v50  ;;  %v8801_v21 = vadd.f32 %v16179_v59, %v8538_v52  ;;  %v16494_v16 = vpop.xlane.xlu1 %5669  ;;  %v7088_v50 = vsel %vm5088_vm4, %v6524_v17, 0.0  ;;  %v19463_v52 = vld [vmem:[#allocation20_spill] sm:$0xff] }
 0x541   : > { %v11311_v43 = vpop.eup %11310  ;;  %11316 = vrsqrt.f32 %v7767_v12  ;;  %5774 = vadd.xlane.f32.xlu0 %v5773_v37  ;;  %v16506_v44 = vsub.f32 %v19463_v52, %v6014_v3  ;;  %v19465_v12 = vld [vmem:[#allocation56_spill] sm:$0xff] }
 0x542   : > { %9057 = vst.msk [vmem:[%s13898_s22 + $0x388] sm:$0xff] %vm5088_vm4, %v8801_v21  ;;  %v8276_v46 = vmul.f32 %v11311_v43, %v19462_v34  ;;  %v6982_v63 = vpop.xlane.xlu0 %6981  ;;  %v16510_v43 = vld [vmem:[#allocation6] ss:$0 sm:$0xff] }
 0x543   : > { %v11313_v39 = vpop.eup %11312  ;;  %v7512_v38 = vmul.f32 0.125, %v6982_v63  ;;  %5777 = vadd.xlane.f32.xlu1 %v5776_v55  ;;  %19464 = vst [vmem:[#allocation121_spill] sm:$0xff] %v16506_v44  ;;  %v16514_v28 = vadd.f32 %v16510_v43, %v15801_v62  ;;  %v16517_v63 = vsub.f32 %v19467_v25, %v6015_v26  ;;  %v7091_v62 = vsel %vm5088_vm4, %v6525_v36, 0.0 }
 0x544   : > { %v8539_v37 = vmul.f32 %v16168_v18, %v8276_v46  ;;  %v8277_v21 = vmul.f32 %v11313_v39, %v19465_v12  ;;  %v6985_v34 = vpop.xlane.xlu1 %6984  ;;  %v16523_v39 = vadd.f32 %v16510_v43, %v15798_v11  ;;  %v6016_v12 = vmul.f32 0.125, %v15741_v42 }
 0x545   : > { %19466 = vst [vmem:[#allocation136_spill] sm:$0xff] %v16514_v28  ;;  %19468 = vst [vmem:[#allocation157_spill] sm:$0xff] %v16517_v63  ;;  %v7768_v55 = vadd.f32 1e-05, %v7512_v38  ;;  %v7513_v17 = vmul.f32 0.125, %v6985_v34  ;;  %7089 = vadd.xlane.f32.xlu0 %v7088_v50  ;;  %v5779_v11 = vsel %vm5088_vm4, %v16514_v28, 0.0  ;;  %v6526_v50 = vmul.f32 %v16506_v44, %v16506_v44 }
 0x546   : > { %v8802_v3 = vadd.f32 %v16179_v59, %v8539_v37  ;;  %v8540_v46 = vmul.f32 %v16168_v18, %v8277_v21  ;;  %19469 = vst [vmem:[#allocation106_spill] sm:$0xff] %v16523_v39  ;;  %v16525_v52 = vpop.xlane.xlu0 %5672  ;;  %v19470_v21 = vld [vmem:[#allocation15_spill] sm:$0xff]  ;;  %v6527_v42 = vmul.f32 %v16517_v63, %v16517_v63 }
 0x547   : > { %11318 = vrsqrt.f32 %v7768_v55  ;;  %v7769_v25 = vadd.f32 1e-05, %v7513_v17  ;;  %7092 = vadd.xlane.f32.xlu1 %v7091_v62  ;;  %v6017_v36 = vmul.f32 0.125, %v19470_v21  ;;  %v19471_v34 = vld [vmem:[#allocation155_spill] sm:$0xff]  ;;  %v16546_v17 = vadd.f32 %v16510_v43, %v15878_v32 }
 0x548   : > { %9058 = vst.msk [vmem:[%s13898_s22 + $0x390] sm:$0xff] %vm5088_vm4, %v8802_v3  ;;  %v8803_v26 = vadd.f32 %v16179_v59, %v8540_v46  ;;  %v16532_v38 = vpop.xlane.xlu1 %5675  ;;  %v5782_v46 = vsel %vm5088_vm4, %v16523_v39, 0.0  ;;  %v19473_v28 = vld [vmem:[#allocation75_spill] sm:$0xff]  ;;  %v7097_v39 = vsel %vm5088_vm4, %v6527_v42, 0.0  ;;  %v19478_v42 = vld [vmem:[#allocation162_spill] sm:$0xff] }
 0x549   : > { %v11315_v37 = vpop.eup %11314  ;;  %11320 = vrsqrt.f32 %v7769_v25  ;;  %5780 = vadd.xlane.f32.xlu0 %v5779_v11  ;;  %19472 = vst [vmem:[#allocation60_spill] sm:$0xff] %v16546_v17  ;;  %v16551_v21 = vsub.f32 %v19473_v28, %v6016_v12 }
 0x54a   : > { %9059 = vst.msk [vmem:[%s13898_s22 + $0x398] sm:$0xff] %vm5088_vm4, %v8803_v26  ;;  %v8278_v55 = vmul.f32 %v11315_v37, %v19471_v34  ;;  %v6988_v3 = vpop.xlane.xlu0 %6987  ;;  %v7094_v37 = vsel %vm5088_vm4, %v6526_v50, 0.0  ;;  %v19475_v34 = vld [vmem:[#allocation104_spill] sm:$0xff]  ;;  %v5785_v50 = vsel %vm5088_vm4, %v16546_v17, 0.0 }
 0x54b   : > { %v11317_v62 = vpop.eup %11316  ;;  %v7514_v25 = vmul.f32 0.125, %v6988_v3  ;;  %5783 = vadd.xlane.f32.xlu1 %v5782_v46  ;;  %v16557_v32 = vsub.f32 %v19475_v34, %v6017_v36  ;;  %v6018_v3 = vmul.f32 0.125, %v19478_v42  ;;  %v19481_v42 = vld [vmem:[#allocation24_spill] sm:$0xff] }
 0x54c   : > { %v8541_v11 = vmul.f32 %v16168_v18, %v8278_v55  ;;  %v8279_v26 = vmul.f32 %v11317_v62, %v19474_v19  ;;  %v6991_v63 = vpop.xlane.xlu1 %6990  ;;  %v16564_v19 = vadd.f32 %v16510_v43, %v15874_v45 }
 0x54d   : > { %19476 = vst [vmem:[#allocation152_spill] sm:$0xff] %v16557_v32  ;;  %v7770_v44 = vadd.f32 1e-05, %v7514_v25  ;;  %v7515_v31 = vmul.f32 0.125, %v6991_v63  ;;  %7095 = vadd.xlane.f32.xlu0 %v7094_v37  ;;  %v6528_v63 = vmul.f32 %v16551_v21, %v16551_v21  ;;  %v19479_v25 = vld [vmem:[#allocation100_spill] sm:$0xff]  ;;  %v6529_v37 = vmul.f32 %v16557_v32, %v16557_v32 }
 0x54e   : > { %v8804_v28 = vadd.f32 %v16179_v59, %v8541_v11  ;;  %v8542_v12 = vmul.f32 %v16168_v18, %v8279_v26  ;;  %19477 = vst [vmem:[#allocation146_spill] sm:$0xff] %v16564_v19  ;;  %v16566_v55 = vpop.xlane.xlu0 %5678  ;;  %v6019_v11 = vmul.f32 0.125, %v19479_v25  ;;  %v5788_v26 = vsel %vm5088_vm4, %v16564_v19, 0.0  ;;  %v19485_v19 = vld [vmem:[#allocation79_spill] sm:$0xff] }
 0x54f   : > { %11322 = vrsqrt.f32 %v7770_v44  ;;  %v7771_v36 = vadd.f32 1e-05, %v7515_v31  ;;  %7098 = vadd.xlane.f32.xlu1 %v7097_v39  ;;  %v19480_v31 = vld [vmem:[#allocation22_spill] sm:$0xff]  ;;  %v16588_v25 = vsub.f32 %v19481_v42, %v6018_v3  ;;  %v6020_v42 = vmul.f32 0.125, %v15829_v4 }
 0x550   : > { %9060 = vst.msk [vmem:[%s13898_s22 + $0x3a0] sm:$0xff] %vm5088_vm4, %v8804_v28  ;;  %v8805_v46 = vadd.f32 %v16179_v59, %v8542_v12  ;;  %v16576_v62 = vpop.xlane.xlu1 %5681  ;;  %v7100_v12 = vsel %vm5088_vm4, %v6528_v63, 0.0  ;;  %v16597_v17 = vsub.f32 %v19485_v19, %v6019_v11 }
 0x551   : > { %v11319_v45 = vpop.eup %11318  ;;  %11324 = vrsqrt.f32 %v7771_v36  ;;  %5786 = vadd.xlane.f32.xlu0 %v5785_v50  ;;  %19482 = vst [vmem:[#allocation147_spill] sm:$0xff] %v16588_v25  ;;  %v19483_v36 = vld [vmem:[#allocation130_spill] sm:$0xff] }
 0x552   : > { %9061 = vst.msk [vmem:[%s13898_s22 + $0x3a8] sm:$0xff] %vm5088_vm4, %v8805_v46  ;;  %v8280_v44 = vmul.f32 %v11319_v45, %v19480_v31  ;;  %v6994_v39 = vpop.xlane.xlu0 %6993  ;;  %v16594_v45 = vadd.f32 %v16510_v43, %v15889_v13  ;;  %19486 = vst [vmem:[#allocation14_spill] sm:$0xff] %v16597_v17  ;;  %v7103_v13 = vsel %vm5088_vm4, %v6529_v37, 0.0  ;;  %v6531_v4 = vmul.f32 %v16597_v17, %v16597_v17 }
 0x553   : > { %v11321_v34 = vpop.eup %11320  ;;  %v7516_v28 = vmul.f32 0.125, %v6994_v39  ;;  %5789 = vadd.xlane.f32.xlu1 %v5788_v26 }
 0x554   : > { %v8543_v50 = vmul.f32 %v16168_v18, %v8280_v44  ;;  %v8281_v46 = vmul.f32 %v11321_v34, %v19483_v36  ;;  %19484 = vst [vmem:[#allocation159_spill] sm:$0xff] %v16594_v45  ;;  %v6997_v31 = vpop.xlane.xlu1 %6996  ;;  %v16603_v44 = vadd.f32 %v16510_v43, %v15886_v57  ;;  %v5791_v57 = vsel %vm5088_vm4, %v16594_v45, 0.0  ;;  %v19488_v36 = vld [vmem:[#allocation65_spill] sm:$0xff]  ;;  %v19492_v45 = vld [vmem:[#allocation154_spill] sm:$0xff] }
 0x555   : > { %v7772_v39 = vadd.f32 1e-05, %v7516_v28  ;;  %v7517_v26 = vmul.f32 0.125, %v6997_v31  ;;  %7101 = vadd.xlane.f32.xlu0 %v7100_v12  ;;  %v6530_v12 = vmul.f32 %v16588_v25, %v16588_v25  ;;  %v6021_v37 = vmul.f32 0.125, %v19488_v36 }
 0x556   : > { %v8806_v63 = vadd.f32 %v16179_v59, %v8543_v50  ;;  %v8544_v3 = vmul.f32 %v16168_v18, %v8281_v46  ;;  %19487 = vst [vmem:[#allocation105_spill] sm:$0xff] %v16603_v44  ;;  %v16605_v34 = vpop.xlane.xlu0 %5684  ;;  %v19489_v46 = vld [vmem:[#allocation55_spill] sm:$0xff] }
 0x557   : > { %11326 = vrsqrt.f32 %v7772_v39  ;;  %v7773_v19 = vadd.f32 1e-05, %v7517_v26  ;;  %7104 = vadd.xlane.f32.xlu1 %v7103_v13  ;;  %v16626_v39 = vadd.f32 %v16510_v43, %v15968_v47  ;;  %v19491_v13 = vld [vmem:[#allocation27_spill] sm:$0xff] }
 0x558   : > { %9062 = vst.msk [vmem:[%s13898_s22 + $0x3b0] sm:$0xff] %vm5088_vm4, %v8806_v63  ;;  %v8807_v11 = vadd.f32 %v16179_v59, %v8544_v3  ;;  %v16612_v28 = vpop.xlane.xlu1 %5687  ;;  %v5794_v63 = vsel %vm5088_vm4, %v16603_v44, 0.0  ;;  %v16631_v36 = vsub.f32 %v19491_v13, %v6020_v42  ;;  %v7109_v44 = vsel %vm5088_vm4, %v6531_v4, 0.0  ;;  %v19495_v13 = vld [vmem:[#allocation81_spill] sm:$0xff] }
 0x559   : > { %v11323_v50 = vpop.eup %11322  ;;  %11328 = vrsqrt.f32 %v7773_v19  ;;  %5792 = vadd.xlane.f32.xlu0 %v5791_v57  ;;  %19490 = vst [vmem:[#allocation91_spill] sm:$0xff] %v16626_v39  ;;  %v6022_v4 = vmul.f32 0.125, %v15870_v10 }
 0x55a   : > { %9063 = vst.msk [vmem:[%s13898_s22 + $0x3b8] sm:$0xff] %vm5088_vm4, %v8807_v11  ;;  %v8282_v31 = vmul.f32 %v11323_v50, %v19489_v46  ;;  %v7000_v26 = vpop.xlane.xlu0 %6999  ;;  %v7106_v50 = vsel %vm5088_vm4, %v6530_v12, 0.0  ;;  %v19493_v46 = vld [vmem:[#allocation72_spill] sm:$0xff]  ;;  %v5797_v12 = vsel %vm5088_vm4, %v16626_v39, 0.0 }
 0x55b   : > { %v11325_v3 = vpop.eup %11324  ;;  %v7518_v19 = vmul.f32 0.125, %v7000_v26  ;;  %5795 = vadd.xlane.f32.xlu1 %v5794_v63  ;;  %v16637_v47 = vsub.f32 %v19493_v46, %v6021_v37 }
 0x55c   : > { %v8545_v57 = vmul.f32 %v16168_v18, %v8282_v31  ;;  %v8283_v11 = vmul.f32 %v11325_v3, %v19492_v45  ;;  %v7003_v17 = vpop.xlane.xlu1 %7002  ;;  %v16644_v45 = vadd.f32 %v16510_v43, %v15964_v29 }
 0x55d   : > { %v7774_v25 = vadd.f32 1e-05, %v7518_v19  ;;  %v7519_v32 = vmul.f32 0.125, %v7003_v17  ;;  %7107 = vadd.xlane.f32.xlu0 %v7106_v50  ;;  %v6532_v17 = vmul.f32 %v16631_v36, %v16631_v36  ;;  %v6023_v19 = vmul.f32 0.125, %v19495_v13 }
 0x55e   : > { %v8808_v42 = vadd.f32 %v16179_v59, %v8545_v57  ;;  %v8546_v26 = vmul.f32 %v16168_v18, %v8283_v11  ;;  %19494 = vst [vmem:[#allocation19_spill] sm:$0xff] %v16644_v45  ;;  %v16646_v31 = vpop.xlane.xlu0 %5690  ;;  %v5800_v57 = vsel %vm5088_vm4, %v16644_v45, 0.0  ;;  %v6533_v10 = vmul.f32 %v16637_v47, %v16637_v47 }
 0x55f   : > { %11330 = vrsqrt.f32 %v7774_v25  ;;  %v7775_v37 = vadd.f32 1e-05, %v7519_v32  ;;  %7110 = vadd.xlane.f32.xlu1 %v7109_v44  ;;  %v19496_v32 = vld [vmem:[#allocation156_spill] sm:$0xff]  ;;  %v7112_v46 = vsel %vm5088_vm4, %v6532_v17, 0.0 }
 0x560   : > { %9064 = vst.msk [vmem:[%s13898_s22 + $0x3c0] sm:$0xff] %vm5088_vm4, %v8808_v42  ;;  %v8809_v63 = vadd.f32 %v16179_v59, %v8546_v26  ;;  %v16656_v3 = vpop.xlane.xlu1 %5693  ;;  %v19497_v42 = vld [vmem:[#allocation87_spill] sm:$0xff] }
 0x561   : > { %v11327_v29 = vpop.eup %11326  ;;  %11332 = vrsqrt.f32 %v7775_v37  ;;  %5798 = vadd.xlane.f32.xlu0 %v5797_v12  ;;  %v16668_v26 = vsub.f32 %v19497_v42, %v6022_v4  ;;  %v19499_v37 = vld [vmem:[#allocation61_spill] sm:$0xff]  ;;  %v6024_v42 = vmul.f32 0.125, %v15919_v49 }
 0x562   : > { %9065 = vst.msk [vmem:[%s13898_s22 + $0x3c8] sm:$0xff] %vm5088_vm4, %v8809_v63  ;;  %v8284_v25 = vmul.f32 %v11327_v29, %v19496_v32  ;;  %v7006_v44 = vpop.xlane.xlu0 %7005  ;;  %v16674_v29 = vadd.f32 %v16510_v43, %v15979_v20  ;;  %v19501_v32 = vld [vmem:[#allocation166_spill] sm:$0xff]  ;;  %v7115_v20 = vsel %vm5088_vm4, %v6533_v10, 0.0 }
 0x563   : > { %v11329_v11 = vpop.eup %11328  ;;  %v7520_v50 = vmul.f32 0.125, %v7006_v44  ;;  %5801 = vadd.xlane.f32.xlu1 %v5800_v57  ;;  %19498 = vst [vmem:[#allocation149_spill] sm:$0xff] %v16668_v26  ;;  %v16677_v45 = vsub.f32 %v19501_v32, %v6023_v19 }
 0x564   : > { %v8547_v12 = vmul.f32 %v16168_v18, %v8284_v25  ;;  %v8285_v63 = vmul.f32 %v11329_v11, %v19499_v37  ;;  %19500 = vst [vmem:[#allocation68_spill] sm:$0xff] %v16674_v29  ;;  %v7009_v13 = vpop.xlane.xlu1 %7008  ;;  %v16683_v25 = vadd.f32 %v16510_v43, %v15976_v7  ;;  %v5803_v7 = vsel %vm5088_vm4, %v16674_v29, 0.0  ;;  %v19508_v29 = vld [vmem:[#allocation67_spill] sm:$0xff] }
 0x565   : > { %19502 = vst [vmem:[#allocation158_spill] sm:$0xff] %v16677_v45  ;;  %v7776_v44 = vadd.f32 1e-05, %v7520_v50  ;;  %v7521_v57 = vmul.f32 0.125, %v7009_v13  ;;  %7113 = vadd.xlane.f32.xlu0 %v7112_v46  ;;  %v6535_v49 = vmul.f32 %v16677_v45, %v16677_v45  ;;  %v19505_v13 = vld [vmem:[#allocation64_spill] sm:$0xff] }
 0x566   : > { %v8810_v17 = vadd.f32 %v16179_v59, %v8547_v12  ;;  %v8548_v4 = vmul.f32 %v16168_v18, %v8285_v63  ;;  %19503 = vst [vmem:[#allocation66_spill] sm:$0xff] %v16683_v25  ;;  %v16685_v11 = vpop.xlane.xlu0 %5696  ;;  %v6534_v12 = vmul.f32 %v16668_v26, %v16668_v26  ;;  %v19504_v63 = vld [vmem:[#allocation28_spill] sm:$0xff] }
 0x567   : > { %11334 = vrsqrt.f32 %v7776_v44  ;;  %v7777_v19 = vadd.f32 1e-05, %v7521_v57  ;;  %7116 = vadd.xlane.f32.xlu1 %v7115_v20  ;;  %v6025_v10 = vmul.f32 0.125, %v19504_v63  ;;  %v16706_v44 = vadd.f32 %v16510_v43, %v16056_v61  ;;  %v19507_v20 = vld [vmem:[#allocation95_spill] sm:$0xff] }
 0x568   : > { %9066 = vst.msk [vmem:[%s13898_s22 + $0x3d0] sm:$0xff] %vm5088_vm4, %v8810_v17  ;;  %v8811_v50 = vadd.f32 %v16179_v59, %v8548_v4  ;;  %v16692_v46 = vpop.xlane.xlu1 %5699  ;;  %v5806_v17 = vsel %vm5088_vm4, %v16683_v25, 0.0  ;;  %v16711_v63 = vsub.f32 %v19507_v20, %v6024_v42  ;;  %v7121_v25 = vsel %vm5088_vm4, %v6535_v49, 0.0 }
 0x569   : > { %v11331_v37 = vpop.eup %11330  ;;  %11336 = vrsqrt.f32 %v7777_v19  ;;  %5804 = vadd.xlane.f32.xlu0 %v5803_v7  ;;  %19506 = vst [vmem:[#allocation151_spill] sm:$0xff] %v16706_v44  ;;  %v6026_v49 = vmul.f32 0.125, %v15960_v30 }
 0x56a   : > { %9067 = vst.msk [vmem:[%s13898_s22 + $0x3d8] sm:$0xff] %vm5088_vm4, %v8811_v50  ;;  %v8286_v32 = vmul.f32 %v11331_v37, %v19505_v13  ;;  %v7012_v57 = vpop.xlane.xlu0 %7011  ;;  %v7118_v37 = vsel %vm5088_vm4, %v6534_v12, 0.0  ;;  %v19509_v13 = vld [vmem:[#allocation82_spill] sm:$0xff]  ;;  %v5809_v12 = vsel %vm5088_vm4, %v16706_v44, 0.0 }
 0x56b   : > { %v11333_v4 = vpop.eup %11332  ;;  %v7522_v19 = vmul.f32 0.125, %v7012_v57  ;;  %5807 = vadd.xlane.f32.xlu1 %v5806_v17  ;;  %v16717_v61 = vsub.f32 %v19509_v13, %v6025_v10 }
 0x56c   : > { %v8549_v7 = vmul.f32 %v16168_v18, %v8286_v32  ;;  %v8287_v50 = vmul.f32 %v11333_v4, %v19508_v29  ;;  %v7015_v39 = vpop.xlane.xlu1 %7014  ;;  %v16724_v29 = vadd.f32 %v16510_v43, %v16052_v60  ;;  %v6027_v4 = vmul.f32 0.125, %v15974_v6 }
 0x56d   : > { %19510 = vst [vmem:[#allocation20_spill] sm:$0xff] %v16717_v61  ;;  %v7778_v45 = vadd.f32 1e-05, %v7522_v19  ;;  %v7523_v26 = vmul.f32 0.125, %v7015_v39  ;;  %7119 = vadd.xlane.f32.xlu0 %v7118_v37  ;;  %v6536_v39 = vmul.f32 %v16711_v63, %v16711_v63  ;;  %v6537_v30 = vmul.f32 %v16717_v61, %v16717_v61  ;;  %v16750_v37 = vld [vmem:[#allocation7] ss:$0 sm:$0xff] }
 0x56e   : > { %v8812_v42 = vadd.f32 %v16179_v59, %v8549_v7  ;;  %v8550_v57 = vmul.f32 %v16168_v18, %v8287_v50  ;;  %19511 = vst [vmem:[#allocation56_spill] sm:$0xff] %v16724_v29  ;;  %v16726_v32 = vpop.xlane.xlu0 %5702  ;;  %v5812_v20 = vsel %vm5088_vm4, %v16724_v29, 0.0  ;;  %v19513_v50 = vld [vmem:[#allocation37_spill] sm:$0xff] }
 0x56f   : > { %11338 = vrsqrt.f32 %v7778_v45  ;;  %v7779_v10 = vadd.f32 1e-05, %v7523_v26  ;;  %7122 = vadd.xlane.f32.xlu1 %v7121_v25  ;;  %v19512_v45 = vld [vmem:[#allocation160_spill] sm:$0xff]  ;;  %v7124_v7 = vsel %vm5088_vm4, %v6536_v39, 0.0  ;;  %v16748_v6 = vsub.f32 %v19513_v50, %v6026_v49 }
 0x570   : > { %9068 = vst.msk [vmem:[%s13898_s22 + $0x3e0] sm:$0xff] %vm5088_vm4, %v8812_v42  ;;  %v8813_v18 = vadd.f32 %v16179_v59, %v8550_v57  ;;  %v16736_v17 = vpop.xlane.xlu1 %5705  ;;  %v19515_v42 = vld [vmem:[#allocation30_spill] sm:$0xff]  ;;  %v16761_v49 = vld [vmem:[#allocation9] ss:$0 sm:$0xff] }
 0x571   : > { %v11335_v60 = vpop.eup %11334  ;;  %11340 = vrsqrt.f32 %v7779_v10  ;;  %5810 = vadd.xlane.f32.xlu0 %v5809_v12  ;;  %19514 = vst [vmem:[#allocation21_spill] sm:$0xff] %v16748_v6  ;;  %v16756_v12 = vadd.f32 %v16510_v43, %v16067_v23 }
 0x572   : > { %9069 = vst.msk [vmem:[%s13898_s22 + $0x3e8] sm:$0xff] %vm5088_vm4, %v8813_v18  ;;  %v8288_v26 = vmul.f32 %v11335_v60, %v19512_v45  ;;  %v7018_v25 = vpop.xlane.xlu0 %7017  ;;  %v19517_v18 = vld [vmem:[#allocation117_spill] sm:$0xff] }
 0x573   : > { %v11337_v19 = vpop.eup %11336  ;;  %v7524_v59 = vmul.f32 0.125, %v7018_v25  ;;  %5813 = vadd.xlane.f32.xlu1 %v5812_v20  ;;  %19516 = vst [vmem:[#allocation15_spill] sm:$0xff] %v16756_v12  ;;  %v16759_v60 = vsub.f32 %v19517_v18, %v6027_v4  ;;  %v16767_v20 = vadd.f32 %v16510_v43, %v16064_v33  ;;  %v6028_v4 = vmul.f32 0.125, %v16007_v15 }
 0x574   : > { %v8551_v13 = vmul.f32 %v16750_v37, %v8288_v26  ;;  %v8289_v57 = vmul.f32 %v11337_v19, %v19515_v42  ;;  %v7021_v10 = vpop.xlane.xlu1 %7020  ;;  %v7127_v19 = vsel %vm5088_vm4, %v6537_v30, 0.0  ;;  %v5815_v33 = vsel %vm5088_vm4, %v16756_v12, 0.0 }
 0x575   : > { %19518 = vst [vmem:[#allocation155_spill] sm:$0xff] %v16759_v60  ;;  %v7780_v45 = vadd.f32 1e-05, %v7524_v59  ;;  %v7525_v39 = vmul.f32 0.125, %v7021_v10  ;;  %7125 = vadd.xlane.f32.xlu0 %v7124_v7  ;;  %19519 = vst [vmem:[#allocation75_spill] sm:$0xff] %v16767_v20  ;;  %v6029_v30 = vmul.f32 0.125, %v16014_v8  ;;  %v6539_v15 = vmul.f32 %v16759_v60, %v16759_v60 }
 0x576   : > { %v8814_v25 = vadd.f32 %v16761_v49, %v8551_v13  ;;  %v8552_v26 = vmul.f32 %v16750_v37, %v8289_v57  ;;  %v16769_v23 = vpop.xlane.xlu0 %5708  ;;  %v6538_v13 = vmul.f32 %v16748_v6, %v16748_v6  ;;  %v19520_v57 = vld [vmem:[#allocation161_spill] sm:$0xff]  ;;  %v16790_v18 = vadd.f32 %v16510_v43, %v16144_v56 }
 0x577   : > { %11342 = vrsqrt.f32 %v7780_v45  ;;  %v7781_v59 = vadd.f32 1e-05, %v7525_v39  ;;  %7128 = vadd.xlane.f32.xlu1 %v7127_v19  ;;  %v5818_v39 = vsel %vm5088_vm4, %v16767_v20, 0.0  ;;  %v7133_v20 = vsel %vm5088_vm4, %v6539_v15, 0.0  ;;  %v19528_v15 = vld [vmem:[#allocation26_spill] sm:$0xff] }
 0x578   : > { %9070 = vst.msk [vmem:[%s13898_s22 + $0x3f0] sm:$0xff] %vm5088_vm4, %v8814_v25  ;;  %v8815_v7 = vadd.f32 %v16761_v49, %v8552_v26  ;;  %v16776_v50 = vpop.xlane.xlu1 %5711  ;;  %19521 = vst [vmem:[#allocation16_spill] sm:$0xff] %v16790_v18  ;;  %v19522_v26 = vld [vmem:[#allocation32_spill] sm:$0xff] }
 0x579   : > { %v11339_v42 = vpop.eup %11338  ;;  %11344 = vrsqrt.f32 %v7781_v59  ;;  %5816 = vadd.xlane.f32.xlu0 %v5815_v33  ;;  %v16795_v8 = vsub.f32 %v19522_v26, %v6028_v4  ;;  %v19524_v33 = vld [vmem:[#allocation71_spill] sm:$0xff] }
 0x57a   : > { %9071 = vst.msk [vmem:[%s13898_s22 + $0x3f8] sm:$0xff] %vm5088_vm4, %v8815_v7  ;;  %v8290_v10 = vmul.f32 %v11339_v42, %v19520_v57  ;;  %v7024_v45 = vpop.xlane.xlu0 %7023  ;;  %v7130_v42 = vsel %vm5088_vm4, %v6538_v13, 0.0  ;;  %v19525_v57 = vld [vmem:[#allocation34_spill] sm:$0xff]  ;;  %v5821_v13 = vsel %vm5088_vm4, %v16790_v18, 0.0 }
 0x57b   : > { %v11341_v25 = vpop.eup %11340  ;;  %19523 = vst [vmem:[#allocation104_spill] sm:$0xff] %v16795_v8  ;;  %v7526_v19 = vmul.f32 0.125, %v7024_v45  ;;  %5819 = vadd.xlane.f32.xlu1 %v5818_v39  ;;  %v16801_v56 = vsub.f32 %v19525_v57, %v6029_v30 }
 0x57c   : > { %v8553_v59 = vmul.f32 %v16750_v37, %v8290_v10  ;;  %v8291_v7 = vmul.f32 %v11341_v25, %v19524_v33  ;;  %v7027_v12 = vpop.xlane.xlu1 %7026  ;;  %v16808_v10 = vadd.f32 %v16510_v43, %v16140_v40  ;;  %v6030_v25 = vmul.f32 0.125, %v19528_v15  ;;  %v19531_v15 = vld [vmem:[#allocation107_spill] sm:$0xff] }
 0x57d   : > { %19526 = vst [vmem:[#allocation162_spill] sm:$0xff] %v16801_v56  ;;  %v7782_v29 = vadd.f32 1e-05, %v7526_v19  ;;  %v7527_v60 = vmul.f32 0.125, %v7027_v12  ;;  %7131 = vadd.xlane.f32.xlu0 %v7130_v42  ;;  %v6540_v12 = vmul.f32 %v16795_v8, %v16795_v8  ;;  %v6541_v42 = vmul.f32 %v16801_v56, %v16801_v56 }
 0x57e   : > { %v8816_v4 = vadd.f32 %v16761_v49, %v8553_v59  ;;  %v8554_v45 = vmul.f32 %v16750_v37, %v8291_v7  ;;  %19527 = vst [vmem:[#allocation100_spill] sm:$0xff] %v16808_v10  ;;  %v16810_v39 = vpop.xlane.xlu0 %5714  ;;  %v19529_v59 = vld [vmem:[#allocation85_spill] sm:$0xff]  ;;  %v5824_v7 = vsel %vm5088_vm4, %v16808_v10, 0.0  ;;  %v19535_v10 = vld [vmem:[#allocation35_spill] sm:$0xff] }
 0x57f   : > { %11346 = vrsqrt.f32 %v7782_v29  ;;  %v7783_v30 = vadd.f32 1e-05, %v7527_v60  ;;  %7134 = vadd.xlane.f32.xlu1 %v7133_v20  ;;  %v6031_v33 = vmul.f32 0.125, %v19529_v59  ;;  %v19530_v29 = vld [vmem:[#allocation33_spill] sm:$0xff]  ;;  %v16832_v59 = vsub.f32 %v19531_v15, %v6030_v25  ;;  %v19537_v15 = vld [vmem:[#allocation96_spill] sm:$0xff] }
 0x580   : > { %9072 = vst.msk [vmem:[%s13898_s22 + $0x400] sm:$0xff] %vm5088_vm4, %v8816_v4  ;;  %v8817_v26 = vadd.f32 %v16761_v49, %v8554_v45  ;;  %v16820_v19 = vpop.xlane.xlu1 %5717  ;;  %v7136_v45 = vsel %vm5088_vm4, %v6540_v12, 0.0 }
 0x581   : > { %v11343_v40 = vpop.eup %11342  ;;  %11348 = vrsqrt.f32 %v7783_v30  ;;  %5822 = vadd.xlane.f32.xlu0 %v5821_v13  ;;  %19532 = vst [vmem:[#allocation22_spill] sm:$0xff] %v16832_v59  ;;  %v19533_v30 = vld [vmem:[#allocation103_spill] sm:$0xff]  ;;  %v16841_v56 = vsub.f32 %v19535_v10, %v6031_v33 }
 0x582   : > { %9073 = vst.msk [vmem:[%s13898_s22 + $0x408] sm:$0xff] %vm5088_vm4, %v8817_v26  ;;  %v8292_v60 = vmul.f32 %v11343_v40, %v19530_v29  ;;  %v7030_v20 = vpop.xlane.xlu0 %7029  ;;  %v16838_v40 = vadd.f32 %v16510_v43, %v16155_v58  ;;  %v7139_v58 = vsel %vm5088_vm4, %v6541_v42, 0.0 }
 0x583   : > { %v11345_v57 = vpop.eup %11344  ;;  %v7528_v4 = vmul.f32 0.125, %v7030_v20  ;;  %5825 = vadd.xlane.f32.xlu1 %v5824_v7  ;;  %19536 = vst [vmem:[#allocation130_spill] sm:$0xff] %v16841_v56 }
 0x584   : > { %v8555_v13 = vmul.f32 %v16750_v37, %v8292_v60  ;;  %v8293_v26 = vmul.f32 %v11345_v57, %v19533_v30  ;;  %19534 = vst [vmem:[#allocation24_spill] sm:$0xff] %v16838_v40  ;;  %v7033_v29 = vpop.xlane.xlu1 %7032  ;;  %v16847_v60 = vadd.f32 %v16510_v43, %v19537_v15  ;;  %v19539_v30 = vld [vmem:[#allocation115_spill] sm:$0xff] }
 0x585   : > { %v7784_v20 = vadd.f32 1e-05, %v7528_v4  ;;  %v7529_v7 = vmul.f32 0.125, %v7033_v29  ;;  %7137 = vadd.xlane.f32.xlu0 %v7136_v45  ;;  %v6032_v18 = vmul.f32 0.125, %v19539_v30  ;;  %v5827_v45 = vsel %vm5088_vm4, %v16838_v40, 0.0  ;;  %v19540_v29 = vld [vmem:[#allocation97_spill] sm:$0xff] }
 0x586   : > { %v8818_v12 = vadd.f32 %v16761_v49, %v8555_v13  ;;  %v8556_v25 = vmul.f32 %v16750_v37, %v8293_v26  ;;  %19538 = vst [vmem:[#allocation79_spill] sm:$0xff] %v16847_v60  ;;  %v16849_v57 = vpop.xlane.xlu0 %5720  ;;  %v6542_v13 = vmul.f32 %v16832_v59, %v16832_v59  ;;  %v6033_v42 = vmul.f32 0.125, %v19540_v29  ;;  %v19543_v59 = vld [vmem:[#allocation98_spill] sm:$0xff] }
 0x587   : > { %11350 = vrsqrt.f32 %v7784_v20  ;;  %v7785_v10 = vadd.f32 1e-05, %v7529_v7  ;;  %7140 = vadd.xlane.f32.xlu1 %v7139_v58  ;;  %v6543_v20 = vmul.f32 %v16841_v56, %v16841_v56  ;;  %v19541_v7 = vld [vmem:[#allocation77_spill] sm:$0xff]  ;;  %v5830_v58 = vsel %vm5088_vm4, %v16847_v60, 0.0 }
 0x588   : > { %9074 = vst.msk [vmem:[%s13898_s22 + $0x410] sm:$0xff] %vm5088_vm4, %v8818_v12  ;;  %v8819_v33 = vadd.f32 %v16761_v49, %v8556_v25  ;;  %v16856_v4 = vpop.xlane.xlu1 %5723  ;;  %v16870_v25 = vadd.f32 %v16510_v43, %v16236_v22  ;;  %v16875_v29 = vsub.f32 %v19543_v59, %v6032_v18  ;;  %v19545_v56 = vld [vmem:[#allocation165_spill] sm:$0xff] }
 0x589   : > { %v11347_v26 = vpop.eup %11346  ;;  %11352 = vrsqrt.f32 %v7785_v10  ;;  %5828 = vadd.xlane.f32.xlu0 %v5827_v45  ;;  %v7145_v60 = vsel %vm5088_vm4, %v6543_v20, 0.0  ;;  %v19549_v20 = vld [vmem:[#allocation116_spill] sm:$0xff] }
 0x58a   : > { %9075 = vst.msk [vmem:[%s13898_s22 + $0x418] sm:$0xff] %vm5088_vm4, %v8819_v33  ;;  %v8294_v12 = vmul.f32 %v11347_v26, %v19541_v7  ;;  %19542 = vst [vmem:[#allocation65_spill] sm:$0xff] %v16870_v25  ;;  %v7036_v15 = vpop.xlane.xlu0 %7035  ;;  %v7142_v26 = vsel %vm5088_vm4, %v6542_v13, 0.0  ;;  %v19546_v7 = vld [vmem:[#allocation127_spill] sm:$0xff]  ;;  %v5833_v13 = vsel %vm5088_vm4, %v16870_v25, 0.0 }
 0x58b   : > { %v11349_v30 = vpop.eup %11348  ;;  %19544 = vst [vmem:[#allocation55_spill] sm:$0xff] %v16875_v29  ;;  %v7530_v10 = vmul.f32 0.125, %v7036_v15  ;;  %5831 = vadd.xlane.f32.xlu1 %v5830_v58  ;;  %v16881_v22 = vsub.f32 %v19546_v7, %v6033_v42  ;;  %v6034_v15 = vmul.f32 0.125, %v19549_v20  ;;  %v19552_v20 = vld [vmem:[#allocation119_spill] sm:$0xff] }
 0x58c   : > { %v8557_v45 = vmul.f32 %v16750_v37, %v8294_v12  ;;  %v8295_v33 = vmul.f32 %v11349_v30, %v19545_v56  ;;  %v7039_v40 = vpop.xlane.xlu1 %7038  ;;  %v16888_v56 = vadd.f32 %v16510_v43, %v16232_v24 }
 0x58d   : > { %19547 = vst [vmem:[#allocation27_spill] sm:$0xff] %v16881_v22  ;;  %v7786_v8 = vadd.f32 1e-05, %v7530_v10  ;;  %v7531_v44 = vmul.f32 0.125, %v7039_v40  ;;  %7143 = vadd.xlane.f32.xlu0 %v7142_v26  ;;  %v6544_v40 = vmul.f32 %v16875_v29, %v16875_v29  ;;  %v19550_v10 = vld [vmem:[#allocation43_spill] sm:$0xff]  ;;  %v6545_v26 = vmul.f32 %v16881_v22, %v16881_v22  ;;  %v19556_v29 = vld [vmem:[#allocation128_spill] sm:$0xff] }
 0x58e   : > { %v8820_v18 = vadd.f32 %v16761_v49, %v8557_v45  ;;  %v8558_v59 = vmul.f32 %v16750_v37, %v8295_v33  ;;  %19548 = vst [vmem:[#allocation154_spill] sm:$0xff] %v16888_v56  ;;  %v16890_v12 = vpop.xlane.xlu0 %5726  ;;  %v6035_v45 = vmul.f32 0.125, %v19550_v10  ;;  %v5836_v33 = vsel %vm5088_vm4, %v16888_v56, 0.0 }
 0x58f   : > { %11354 = vrsqrt.f32 %v7786_v8  ;;  %v7787_v42 = vadd.f32 1e-05, %v7531_v44  ;;  %7146 = vadd.xlane.f32.xlu1 %v7145_v60  ;;  %v19551_v44 = vld [vmem:[#allocation36_spill] sm:$0xff]  ;;  %v16912_v10 = vsub.f32 %v19552_v20, %v6034_v15  ;;  %v19558_v20 = vld [vmem:[#allocation47_spill] sm:$0xff] }
 0x590   : > { %9076 = vst.msk [vmem:[%s13898_s22 + $0x420] sm:$0xff] %vm5088_vm4, %v8820_v18  ;;  %v8821_v58 = vadd.f32 %v16761_v49, %v8558_v59  ;;  %v16900_v30 = vpop.xlane.xlu1 %5729  ;;  %v7148_v59 = vsel %vm5088_vm4, %v6544_v40, 0.0  ;;  %v16921_v22 = vsub.f32 %v19556_v29, %v6035_v45 }
 0x591   : > { %v11351_v24 = vpop.eup %11350  ;;  %11356 = vrsqrt.f32 %v7787_v42  ;;  %5834 = vadd.xlane.f32.xlu0 %v5833_v13  ;;  %19553 = vst [vmem:[#allocation72_spill] sm:$0xff] %v16912_v10  ;;  %v19554_v42 = vld [vmem:[#allocation83_spill] sm:$0xff] }
 0x592   : > { %9077 = vst.msk [vmem:[%s13898_s22 + $0x428] sm:$0xff] %vm5088_vm4, %v8821_v58  ;;  %v8296_v8 = vmul.f32 %v11351_v24, %v19551_v44  ;;  %v7042_v60 = vpop.xlane.xlu0 %7041  ;;  %v16918_v24 = vadd.f32 %v16510_v43, %v16247_v14  ;;  %19557 = vst [vmem:[#allocation156_spill] sm:$0xff] %v16921_v22  ;;  %v7151_v14 = vsel %vm5088_vm4, %v6545_v26, 0.0 }
 0x593   : > { %v11353_v7 = vpop.eup %11352  ;;  %v7532_v18 = vmul.f32 0.125, %v7042_v60  ;;  %5837 = vadd.xlane.f32.xlu1 %v5836_v33 }
 0x594   : > { %v8559_v13 = vmul.f32 %v16750_v37, %v8296_v8  ;;  %v8297_v58 = vmul.f32 %v11353_v7, %v19554_v42  ;;  %19555 = vst [vmem:[#allocation81_spill] sm:$0xff] %v16918_v24  ;;  %v7045_v44 = vpop.xlane.xlu1 %7044  ;;  %v16927_v8 = vadd.f32 %v16510_v43, %v19558_v20  ;;  %v19560_v42 = vld [vmem:[#allocation137_spill] sm:$0xff] }
 0x595   : > { %v7788_v60 = vadd.f32 1e-05, %v7532_v18  ;;  %v7533_v33 = vmul.f32 0.125, %v7045_v44  ;;  %7149 = vadd.xlane.f32.xlu0 %v7148_v59  ;;  %v6036_v56 = vmul.f32 0.125, %v19560_v42  ;;  %v5839_v59 = vsel %vm5088_vm4, %v16918_v24, 0.0  ;;  %v19561_v44 = vld [vmem:[#allocation102_spill] sm:$0xff] }
 0x596   : > { %v8822_v40 = vadd.f32 %v16761_v49, %v8559_v13  ;;  %v8560_v15 = vmul.f32 %v16750_v37, %v8297_v58  ;;  %19559 = vst [vmem:[#allocation87_spill] sm:$0xff] %v16927_v8  ;;  %v16929_v7 = vpop.xlane.xlu0 %5732  ;;  %v6546_v13 = vmul.f32 %v16912_v10, %v16912_v10  ;;  %v6037_v26 = vmul.f32 0.125, %v19561_v44  ;;  %v19564_v10 = vld [vmem:[#allocation118_spill] sm:$0xff] }
 0x597   : > { %11358 = vrsqrt.f32 %v7788_v60  ;;  %v7789_v29 = vadd.f32 1e-05, %v7533_v33  ;;  %7152 = vadd.xlane.f32.xlu1 %v7151_v14  ;;  %v6547_v60 = vmul.f32 %v16921_v22, %v16921_v22  ;;  %v19562_v33 = vld [vmem:[#allocation84_spill] sm:$0xff]  ;;  %v5842_v14 = vsel %vm5088_vm4, %v16927_v8, 0.0  ;;  %v19566_v22 = vld [vmem:[#allocation29_spill] sm:$0xff] }
 0x598   : > { %9078 = vst.msk [vmem:[%s13898_s22 + $0x430] sm:$0xff] %vm5088_vm4, %v8822_v40  ;;  %v8823_v45 = vadd.f32 %v16761_v49, %v8560_v15  ;;  %v16936_v18 = vpop.xlane.xlu1 %5735  ;;  %v16950_v15 = vadd.f32 %v16510_v43, %v16324_v5  ;;  %v16955_v44 = vsub.f32 %v19564_v10, %v6036_v56 }
 0x599   : > { %v11355_v58 = vpop.eup %11354  ;;  %11360 = vrsqrt.f32 %v7789_v29  ;;  %5840 = vadd.xlane.f32.xlu0 %v5839_v59  ;;  %v7157_v8 = vsel %vm5088_vm4, %v6547_v60, 0.0 }
 0x59a   : > { %9079 = vst.msk [vmem:[%s13898_s22 + $0x438] sm:$0xff] %vm5088_vm4, %v8823_v45  ;;  %v8298_v40 = vmul.f32 %v11355_v58, %v19562_v33  ;;  %19563 = vst [vmem:[#allocation61_spill] sm:$0xff] %v16950_v15  ;;  %v7048_v20 = vpop.xlane.xlu0 %7047  ;;  %v7154_v58 = vsel %vm5088_vm4, %v6546_v13, 0.0  ;;  %v19567_v33 = vld [vmem:[#allocation109_spill] sm:$0xff]  ;;  %v5845_v13 = vsel %vm5088_vm4, %v16950_v15, 0.0  ;;  %v6548_v60 = vmul.f32 %v16955_v44, %v16955_v44 }
 0x59b   : > { %v11357_v42 = vpop.eup %11356  ;;  %19565 = vst [vmem:[#allocation166_spill] sm:$0xff] %v16955_v44  ;;  %v7534_v29 = vmul.f32 0.125, %v7048_v20  ;;  %5843 = vadd.xlane.f32.xlu1 %v5842_v14  ;;  %v16961_v5 = vsub.f32 %v19567_v33, %v6037_v26  ;;  %v19570_v26 = vld [vmem:[#allocation46_spill] sm:$0xff]  ;;  %v19576_v44 = vld [vmem:[#allocation108_spill] sm:$0xff] }
 0x59c   : > { %v8561_v59 = vmul.f32 %v16750_v37, %v8298_v40  ;;  %v8299_v45 = vmul.f32 %v11357_v42, %v19566_v22  ;;  %v7051_v24 = vpop.xlane.xlu1 %7050  ;;  %v16968_v40 = vadd.f32 %v16510_v43, %v16320_v9  ;;  %v6038_v20 = vmul.f32 0.125, %v19570_v26 }
 0x59d   : > { %19568 = vst [vmem:[#allocation28_spill] sm:$0xff] %v16961_v5  ;;  %v7790_v25 = vadd.f32 1e-05, %v7534_v29  ;;  %v7535_v6 = vmul.f32 0.125, %v7051_v24  ;;  %7155 = vadd.xlane.f32.xlu0 %v7154_v58  ;;  %v19571_v29 = vld [vmem:[#allocation40_spill] sm:$0xff] }
 0x59e   : > { %v8824_v56 = vadd.f32 %v16761_v49, %v8561_v59  ;;  %v8562_v10 = vmul.f32 %v16750_v37, %v8299_v45  ;;  %19569 = vst [vmem:[#allocation64_spill] sm:$0xff] %v16968_v40  ;;  %v16970_v22 = vpop.xlane.xlu0 %5738  ;;  %v6039_v59 = vmul.f32 0.125, %v19571_v29  ;;  %v6549_v45 = vmul.f32 %v16961_v5, %v16961_v5 }
 0x59f   : > { %11362 = vrsqrt.f32 %v7790_v25  ;;  %v7791_v24 = vadd.f32 1e-05, %v7535_v6  ;;  %7158 = vadd.xlane.f32.xlu1 %v7157_v8  ;;  %v19572_v6 = vld [vmem:[#allocation41_spill] sm:$0xff]  ;;  %v5848_v58 = vsel %vm5088_vm4, %v16968_v40, 0.0  ;;  %v19578_v40 = vld [vmem:[#allocation48_spill] sm:$0xff] }
 0x5a0   : > { %9080 = vst.msk [vmem:[%s13898_s22 + $0x440] sm:$0xff] %vm5088_vm4, %v8824_v56  ;;  %v8825_v14 = vadd.f32 %v16761_v49, %v8562_v10  ;;  %v16980_v9 = vpop.xlane.xlu1 %5741  ;;  %v19573_v56 = vld [vmem:[#allocation42_spill] sm:$0xff]  ;;  %v17002_v15 = vsub.f32 %v19578_v40, %v6039_v59 }
 0x5a1   : > { %v11359_v42 = vpop.eup %11358  ;;  %11364 = vrsqrt.f32 %v7791_v24  ;;  %5846 = vadd.xlane.f32.xlu0 %v5845_v13  ;;  %v16991_v10 = vsub.f32 %v19573_v56, %v6038_v20  ;;  %v7160_v24 = vsel %vm5088_vm4, %v6548_v60, 0.0  ;;  %v19575_v13 = vld [vmem:[#allocation50_spill] sm:$0xff]  ;;  %v7163_v60 = vsel %vm5088_vm4, %v6549_v45, 0.0 }
 0x5a2   : > { %9081 = vst.msk [vmem:[%s13898_s22 + $0x448] sm:$0xff] %vm5088_vm4, %v8825_v14  ;;  %v8300_v25 = vmul.f32 %v11359_v42, %v19572_v6  ;;  %v7054_v8 = vpop.xlane.xlu0 %7053  ;;  %v6040_v29 = vmul.f32 0.125, %v19575_v13  ;;  %v16999_v42 = vadd.f32 %v16510_v43, %v16335_v53  ;;  %19579 = vst [vmem:[#allocation82_spill] sm:$0xff] %v17002_v15  ;;  %v17010_v53 = vadd.f32 %v16510_v43, %v16332_v0  ;;  %v19582_v40 = vld [vmem:[#allocation122_spill] sm:$0xff] }
 0x5a3   : > { %v11361_v33 = vpop.eup %11360  ;;  %19574 = vst [vmem:[#allocation95_spill] sm:$0xff] %v16991_v10  ;;  %v7536_v26 = vmul.f32 0.125, %v7054_v8  ;;  %5849 = vadd.xlane.f32.xlu1 %v5848_v58  ;;  %v19580_v58 = vld [vmem:[#allocation134_spill] sm:$0xff]  ;;  %v6042_v59 = vmul.f32 0.125, %v19582_v40  ;;  %v6550_v45 = vmul.f32 %v16991_v10, %v16991_v10  ;;  %v19588_v10 = vld [vmem:[#allocation52_spill] sm:$0xff] }
 0x5a4   : > { %v8563_v5 = vmul.f32 %v16750_v37, %v8300_v25  ;;  %v8301_v14 = vmul.f32 %v11361_v33, %v19576_v44  ;;  %19577 = vst [vmem:[#allocation67_spill] sm:$0xff] %v16999_v42  ;;  %v7057_v6 = vpop.xlane.xlu1 %7056  ;;  %v6041_v56 = vmul.f32 0.125, %v19580_v58  ;;  %19581 = vst [vmem:[#allocation160_spill] sm:$0xff] %v17010_v53  ;;  %v5851_v43 = vsel %vm5088_vm4, %v16999_v42, 0.0  ;;  %v19587_v58 = vld [vmem:[#allocation101_spill] sm:$0xff] }
 0x5a5   : > { %v7792_v20 = vadd.f32 1e-05, %v7536_v26  ;;  %v7537_v8 = vmul.f32 0.125, %v7057_v6  ;;  %7161 = vadd.xlane.f32.xlu0 %v7160_v24  ;;  %v19583_v24 = vld [vmem:[#allocation143_spill] sm:$0xff]  ;;  %v19584_v6 = vld [vmem:[#allocation44_spill] sm:$0xff]  ;;  %v5854_v40 = vsel %vm5088_vm4, %v17010_v53, 0.0  ;;  %v17039_v42 = vsub.f32 %v19588_v10, %v6042_v59 }
 0x5a6   : > { %v8826_v25 = vadd.f32 %v16761_v49, %v8563_v5  ;;  %v8564_v44 = vmul.f32 %v16750_v37, %v8301_v14  ;;  %v17012_v33 = vpop.xlane.xlu0 %5744  ;;  %v17018_v13 = vsub.f32 %v19583_v24, %v6040_v29 }
 0x5a7   : > { %11366 = vrsqrt.f32 %v7792_v20  ;;  %v7793_v26 = vadd.f32 1e-05, %v7537_v8  ;;  %7164 = vadd.xlane.f32.xlu1 %v7163_v60  ;;  %v6043_v20 = vmul.f32 0.125, %v19584_v6  ;;  %v6551_v8 = vmul.f32 %v17002_v15, %v17002_v15  ;;  %v19585_v60 = vld [vmem:[#allocation92_spill] sm:$0xff]  ;;  %19589 = vst [vmem:[#allocation30_spill] sm:$0xff] %v17039_v42  ;;  %v19590_v6 = vld [vmem:[#allocation123_spill] sm:$0xff] }
 0x5a8   : > { %9082 = vst.msk [vmem:[%s13898_s22 + $0x450] sm:$0xff] %vm5088_vm4, %v8826_v25  ;;  %v8827_v5 = vadd.f32 %v16761_v49, %v8564_v44  ;;  %v17023_v0 = vpop.xlane.xlu1 %5747  ;;  %v17031_v29 = vsub.f32 %v19585_v60, %v6041_v56  ;;  %v6044_v15 = vmul.f32 0.125, %v19590_v6  ;;  %v19591_v60 = vld [vmem:[#allocation124_spill] sm:$0xff] }
 0x5a9   : > { %v11363_v14 = vpop.eup %11362  ;;  %11368 = vrsqrt.f32 %v7793_v26  ;;  %5852 = vadd.xlane.f32.xlu0 %v5851_v43  ;;  %v7166_v43 = vsel %vm5088_vm4, %v6550_v45, 0.0  ;;  %v19594_v45 = vld [vmem:[#allocation53_spill] sm:$0xff] }
 0x5aa   : > { %19586 = vst [vmem:[#allocation37_spill] sm:$0xff] %v17031_v29  ;;  %9083 = vst.msk [vmem:[%s13898_s22 + $0x458] sm:$0xff] %vm5088_vm4, %v8827_v5  ;;  %v8302_v25 = vmul.f32 %v11363_v14, %v19587_v58  ;;  %v7060_v44 = vpop.xlane.xlu0 %7059  ;;  %v6552_v14 = vmul.f32 %v17018_v13, %v17018_v13  ;;  %v19592_v58 = vld [vmem:[#allocation93_spill] sm:$0xff] }
 0x5ab   : > { %v11365_v24 = vpop.eup %11364  ;;  %v7538_v26 = vmul.f32 0.125, %v7060_v44  ;;  %5855 = vadd.xlane.f32.xlu1 %v5854_v40  ;;  %v17048_v53 = vsub.f32 %v19592_v58, %v6043_v20  ;;  %v7169_v44 = vsel %vm5088_vm4, %v6551_v8, 0.0  ;;  %v6045_v40 = vmul.f32 0.125, %v19594_v45  ;;  %v19595_v8 = vld [vmem:[#allocation133_spill] sm:$0xff] }
 0x5ac   : > { %v8565_v56 = vmul.f32 %v16750_v37, %v8302_v25  ;;  %v8303_v5 = vmul.f32 %v11365_v24, %v19591_v60  ;;  %v7063_v61 = vpop.xlane.xlu1 %7062  ;;  %v6553_v60 = vmul.f32 %v17031_v29, %v17031_v29  ;;  %v6046_v20 = vmul.f32 0.125, %v16404_v27 }
 0x5ad   : > { %19593 = vst [vmem:[#allocation117_spill] sm:$0xff] %v17048_v53  ;;  %v7794_v10 = vadd.f32 1e-05, %v7538_v26  ;;  %v7539_v59 = vmul.f32 0.125, %v7063_v61  ;;  %7167 = vadd.xlane.f32.xlu0 %v7166_v43  ;;  %v6554_v61 = vmul.f32 %v17039_v42, %v17039_v42  ;;  %v17062_v43 = vsub.f32 %v19595_v8, %v6044_v15  ;;  %v19597_v15 = vld [vmem:[#allocation120_spill] sm:$0xff] }
 0x5ae   : > { %v8828_v6 = vadd.f32 %v16761_v49, %v8565_v56  ;;  %v8566_v25 = vmul.f32 %v16750_v37, %v8303_v5  ;;  %v17054_v24 = vpop.xlane.xlu0 %5750  ;;  %v7172_v58 = vsel %vm5088_vm4, %v6552_v14, 0.0  ;;  %v6047_v27 = vmul.f32 0.125, %v16414_v51  ;;  %v19598_v14 = vld [vmem:[#allocation150_spill] sm:$0xff] }
 0x5af   : > { %11370 = vrsqrt.f32 %v7794_v10  ;;  %v7795_v26 = vadd.f32 1e-05, %v7539_v59  ;;  %7170 = vadd.xlane.f32.xlu1 %v7169_v44  ;;  %v6555_v10 = vmul.f32 %v17048_v53, %v17048_v53  ;;  %v19596_v59 = vld [vmem:[#allocation49_spill] sm:$0xff]  ;;  %v7175_v8 = vsel %vm5088_vm4, %v6553_v60, 0.0 }
 0x5b0   : > { %9084 = vst.msk [vmem:[%s13898_s22 + $0x460] sm:$0xff] %vm5088_vm4, %v8828_v6  ;;  %v8829_v56 = vadd.f32 %v16761_v49, %v8566_v25  ;;  %v17067_v5 = vpop.xlane.xlu1 %5753  ;;  %v17074_v44 = vsub.f32 %v19596_v59, %v6045_v40  ;;  %v17081_v29 = vsub.f32 %v19598_v14, %v6046_v20  ;;  %v19600_v59 = vld [vmem:[#allocation39_spill] sm:$0xff] }
 0x5b1   : > { %v11367_v45 = vpop.eup %11366  ;;  %11372 = vrsqrt.f32 %v7795_v26  ;;  %7173 = vadd.xlane.f32.xlu0 %v7172_v58  ;;  %v7178_v26 = vsel %vm5088_vm4, %v6554_v61, 0.0  ;;  %v6048_v58 = vmul.f32 0.125, %v16443_v2  ;;  %v6049_v61 = vmul.f32 0.125, %v16450_v35 }
 0x5b2   : > { %9085 = vst.msk [vmem:[%s13898_s22 + $0x468] sm:$0xff] %vm5088_vm4, %v8829_v56  ;;  %v8304_v6 = vmul.f32 %v11367_v45, %v19597_v15  ;;  %v7066_v25 = vpop.xlane.xlu0 %7065  ;;  %19599 = vst [vmem:[#allocation161_spill] sm:$0xff] %v17081_v29  ;;  %v6556_v45 = vmul.f32 %v17062_v43, %v17062_v43  ;;  %v19601_v15 = vld [vmem:[#allocation144_spill] sm:$0xff] }
 0x5b3   : > { %v11369_v42 = vpop.eup %11368  ;;  %v7540_v51 = vmul.f32 0.125, %v7066_v25  ;;  %7176 = vadd.xlane.f32.xlu1 %v7175_v8  ;;  %v17090_v60 = vsub.f32 %v19601_v15, %v6047_v27  ;;  %v7181_v25 = vsel %vm5088_vm4, %v6555_v10, 0.0  ;;  %v6557_v8 = vmul.f32 %v17074_v44, %v17074_v44 }
 0x5b4   : > { %v8567_v40 = vmul.f32 %v16750_v37, %v8304_v6  ;;  %v8305_v53 = vmul.f32 %v11369_v42, %v19600_v59  ;;  %v7069_v56 = vpop.xlane.xlu1 %7068  ;;  %v6050_v27 = vmul.f32 0.125, %v16484_v54  ;;  %v6558_v10 = vmul.f32 %v17081_v29, %v17081_v29 }
 0x5b5   : > { %19602 = vst [vmem:[#allocation32_spill] sm:$0xff] %v17090_v60  ;;  %v7796_v20 = vadd.f32 1e-05, %v7540_v51  ;;  %v7541_v14 = vmul.f32 0.125, %v7069_v56  ;;  %7179 = vadd.xlane.f32.xlu0 %v7178_v26  ;;  %v19603_v26 = vld [vmem:[#allocation18_spill] sm:$0xff]  ;;  %v7184_v59 = vsel %vm5088_vm4, %v6556_v45, 0.0  ;;  %v6559_v15 = vmul.f32 %v17090_v60, %v17090_v60 }
 0x5b6   : > { %v8830_v2 = vadd.f32 %v16761_v49, %v8567_v40  ;;  %v8568_v6 = vmul.f32 %v16750_v37, %v8305_v53  ;;  %v17096_v42 = vpop.xlane.xlu0 %5756  ;;  %v17104_v35 = vsub.f32 %v19603_v26, %v6048_v58  ;;  %v6051_v54 = vmul.f32 0.125, %v16494_v16  ;;  %v19605_v58 = vld [vmem:[#allocation138_spill] sm:$0xff]  ;;  %v19606_v45 = vld [vmem:[#allocation125_spill] sm:$0xff] }
 0x5b7   : > { %11374 = vrsqrt.f32 %v7796_v20  ;;  %v7797_v51 = vadd.f32 1e-05, %v7541_v14  ;;  %7182 = vadd.xlane.f32.xlu1 %v7181_v25  ;;  %v19604_v20 = vld [vmem:[#allocation63_spill] sm:$0xff]  ;;  %v17123_v29 = vsub.f32 %v19606_v45, %v6050_v27 }
 0x5b8   : > { %9086 = vst.msk [vmem:[%s13898_s22 + $0x470] sm:$0xff] %vm5088_vm4, %v8830_v2  ;;  %v8831_v53 = vadd.f32 %v16761_v49, %v8568_v6  ;;  %v17109_v40 = vpop.xlane.xlu1 %5759  ;;  %v17116_v14 = vsub.f32 %v19604_v20, %v6049_v61  ;;  %v7187_v6 = vsel %vm5088_vm4, %v6557_v8, 0.0  ;;  %v19608_v20 = vld [vmem:[#allocation126_spill] sm:$0xff] }
 0x5b9   : > { %v11371_v56 = vpop.eup %11370  ;;  %11376 = vrsqrt.f32 %v7797_v51  ;;  %7185 = vadd.xlane.f32.xlu0 %v7184_v59  ;;  %19607 = vst [vmem:[#allocation71_spill] sm:$0xff] %v17123_v29  ;;  %v7190_v51 = vsel %vm5088_vm4, %v6558_v10, 0.0  ;;  %v6052_v59 = vmul.f32 0.125, %v16525_v52  ;;  %v6053_v10 = vmul.f32 0.125, %v16532_v38 }
 0x5ba   : > { %9087 = vst.msk [vmem:[%s13898_s22 + $0x478] sm:$0xff] %vm5088_vm4, %v8831_v53  ;;  %v8306_v25 = vmul.f32 %v11371_v56, %v19605_v58  ;;  %v7072_v2 = vpop.xlane.xlu0 %7071  ;;  %v6560_v56 = vmul.f32 %v17104_v35, %v17104_v35  ;;  %v19609_v58 = vld [vmem:[#allocation23_spill] sm:$0xff] }
 0x5bb   : > { %v11373_v26 = vpop.eup %11372  ;;  %v7542_v16 = vmul.f32 0.125, %v7072_v2  ;;  %7188 = vadd.xlane.f32.xlu1 %v7187_v6  ;;  %v17132_v8 = vsub.f32 %v19609_v58, %v6051_v54  ;;  %v7193_v2 = vsel %vm5088_vm4, %v6559_v15, 0.0  ;;  %v6054_v54 = vmul.f32 0.125, %v16566_v55 }
 0x5bc   : > { %v8569_v61 = vmul.f32 %v16750_v37, %v8306_v25  ;;  %v8307_v60 = vmul.f32 %v11373_v26, %v19608_v20  ;;  %v7075_v53 = vpop.xlane.xlu1 %7074  ;;  %v6561_v26 = vmul.f32 %v17116_v14, %v17116_v14  ;;  %v6562_v15 = vmul.f32 %v17123_v29, %v17123_v29 }
 0x5bd   : > { %19610 = vst [vmem:[#allocation34_spill] sm:$0xff] %v17132_v8  ;;  %v7798_v27 = vadd.f32 1e-05, %v7542_v16  ;;  %v7543_v45 = vmul.f32 0.125, %v7075_v53  ;;  %7191 = vadd.xlane.f32.xlu0 %v7190_v51  ;;  %v19611_v51 = vld [vmem:[#allocation59_spill] sm:$0xff]  ;;  %v7196_v20 = vsel %vm5088_vm4, %v6560_v56, 0.0  ;;  %v6563_v58 = vmul.f32 %v17132_v8, %v17132_v8 }
 0x5be   : > { %v8832_v52 = vadd.f32 %v16761_v49, %v8569_v61  ;;  %v8570_v25 = vmul.f32 %v16750_v37, %v8307_v60  ;;  %v17138_v6 = vpop.xlane.xlu0 %5762  ;;  %v17146_v38 = vsub.f32 %v19611_v51, %v6052_v59  ;;  %v6055_v55 = vmul.f32 0.125, %v16576_v62  ;;  %v19613_v59 = vld [vmem:[#allocation135_spill] sm:$0xff]  ;;  %v19614_v56 = vld [vmem:[#allocation62_spill] sm:$0xff] }
 0x5bf   : > { %11378 = vrsqrt.f32 %v7798_v27  ;;  %v7799_v16 = vadd.f32 1e-05, %v7543_v45  ;;  %7194 = vadd.xlane.f32.xlu1 %v7193_v2  ;;  %v19612_v27 = vld [vmem:[#allocation57_spill] sm:$0xff]  ;;  %v17165_v29 = vsub.f32 %v19614_v56, %v6054_v54 }
 0x5c0   : > { %9088 = vst.msk [vmem:[%s13898_s22 + $0x480] sm:$0xff] %vm5088_vm4, %v8832_v52  ;;  %v8833_v60 = vadd.f32 %v16761_v49, %v8570_v25  ;;  %v17151_v61 = vpop.xlane.xlu1 %5765  ;;  %v17158_v45 = vsub.f32 %v19612_v27, %v6053_v10  ;;  %v7199_v25 = vsel %vm5088_vm4, %v6561_v26, 0.0  ;;  %v19616_v27 = vld [vmem:[#allocation132_spill] sm:$0xff] }
 0x5c1   : > { %v11375_v53 = vpop.eup %11374  ;;  %11380 = vrsqrt.f32 %v7799_v16  ;;  %7197 = vadd.xlane.f32.xlu0 %v7196_v20  ;;  %19615 = vst [vmem:[#allocation26_spill] sm:$0xff] %v17165_v29  ;;  %v7202_v16 = vsel %vm5088_vm4, %v6562_v15, 0.0  ;;  %v6056_v20 = vmul.f32 0.125, %v16605_v34  ;;  %v6057_v15 = vmul.f32 0.125, %v16612_v28 }
 0x5c2   : > { %9089 = vst.msk [vmem:[%s13898_s22 + $0x488] sm:$0xff] %vm5088_vm4, %v8833_v60  ;;  %v8308_v2 = vmul.f32 %v11375_v53, %v19613_v59  ;;  %v7078_v52 = vpop.xlane.xlu0 %7077  ;;  %v6564_v53 = vmul.f32 %v17146_v38, %v17146_v38  ;;  %v19617_v59 = vld [vmem:[#allocation163_spill] sm:$0xff] }
 0x5c3   : > { %v11377_v51 = vpop.eup %11376  ;;  %v7544_v62 = vmul.f32 0.125, %v7078_v52  ;;  %7200 = vadd.xlane.f32.xlu1 %v7199_v25  ;;  %v17174_v26 = vsub.f32 %v19617_v59, %v6055_v55  ;;  %v7205_v52 = vsel %vm5088_vm4, %v6563_v58, 0.0  ;;  %v6058_v55 = vmul.f32 0.125, %v16646_v31 }
 0x5c4   : > { %v8571_v10 = vmul.f32 %v16750_v37, %v8308_v2  ;;  %v8309_v8 = vmul.f32 %v11377_v51, %v19616_v27  ;;  %v7081_v60 = vpop.xlane.xlu1 %7080  ;;  %v6565_v51 = vmul.f32 %v17158_v45, %v17158_v45  ;;  %v6566_v58 = vmul.f32 %v17165_v29, %v17165_v29 }
 0x5c5   : > { %19618 = vst [vmem:[#allocation85_spill] sm:$0xff] %v17174_v26  ;;  %v7800_v54 = vadd.f32 1e-05, %v7544_v62  ;;  %v7545_v56 = vmul.f32 0.125, %v7081_v60  ;;  %7203 = vadd.xlane.f32.xlu0 %v7202_v16  ;;  %v19619_v16 = vld [vmem:[#allocation17_spill] sm:$0xff]  ;;  %v7208_v27 = vsel %vm5088_vm4, %v6564_v53, 0.0  ;;  %v6567_v59 = vmul.f32 %v17174_v26, %v17174_v26 }
 0x5c6   : > { %v8834_v34 = vadd.f32 %v16761_v49, %v8571_v10  ;;  %v8572_v2 = vmul.f32 %v16750_v37, %v8309_v8  ;;  %v17180_v25 = vpop.xlane.xlu0 %5768  ;;  %v17188_v28 = vsub.f32 %v19619_v16, %v6056_v20  ;;  %v6059_v31 = vmul.f32 0.125, %v16656_v3  ;;  %v19621_v20 = vld [vmem:[#allocation51_spill] sm:$0xff]  ;;  %v19622_v53 = vld [vmem:[#allocation69_spill] sm:$0xff] }
 0x5c7   : > { %11382 = vrsqrt.f32 %v7800_v54  ;;  %v7801_v62 = vadd.f32 1e-05, %v7545_v56  ;;  %7206 = vadd.xlane.f32.xlu1 %v7205_v52  ;;  %v19620_v54 = vld [vmem:[#allocation164_spill] sm:$0xff]  ;;  %v17207_v29 = vsub.f32 %v19622_v53, %v6058_v55 }
 0x5c8   : > { %9090 = vst.msk [vmem:[%s13898_s22 + $0x490] sm:$0xff] %vm5088_vm4, %v8834_v34  ;;  %v8835_v8 = vadd.f32 %v16761_v49, %v8572_v2  ;;  %v17193_v10 = vpop.xlane.xlu1 %5771  ;;  %v17200_v56 = vsub.f32 %v19620_v54, %v6057_v15  ;;  %v7211_v2 = vsel %vm5088_vm4, %v6565_v51, 0.0  ;;  %v19623_v54 = vld [vmem:[#allocation140_spill] sm:$0xff] }
 0x5c9   : > { %v11379_v60 = vpop.eup %11378  ;;  %11384 = vrsqrt.f32 %v7801_v62  ;;  %7209 = vadd.xlane.f32.xlu0 %v7208_v27  ;;  %v7214_v62 = vsel %vm5088_vm4, %v6566_v58, 0.0  ;;  %v6060_v27 = vmul.f32 0.125, %v16685_v11  ;;  %v6061_v58 = vmul.f32 0.125, %v16692_v46 }
 0x5ca   : > { %9091 = vst.msk [vmem:[%s13898_s22 + $0x498] sm:$0xff] %vm5088_vm4, %v8835_v8  ;;  %v8310_v52 = vmul.f32 %v11379_v60, %v19621_v20  ;;  %v7084_v34 = vpop.xlane.xlu0 %7083  ;;  %v6568_v60 = vmul.f32 %v17188_v28, %v17188_v28  ;;  %v19624_v20 = vld [vmem:[#allocation25_spill] sm:$0xff] }
 0x5cb   : > { %v11381_v16 = vpop.eup %11380  ;;  %v7546_v3 = vmul.f32 0.125, %v7084_v34  ;;  %7212 = vadd.xlane.f32.xlu1 %v7211_v2  ;;  %v17216_v51 = vsub.f32 %v19624_v20, %v6059_v31  ;;  %v7217_v34 = vsel %vm5088_vm4, %v6567_v59, 0.0  ;;  %v6062_v31 = vmul.f32 0.125, %v16726_v32 }
 0x5cc   : > { %v8573_v15 = vmul.f32 %v16750_v37, %v8310_v52  ;;  %v8311_v26 = vmul.f32 %v11381_v16, %v19623_v54  ;;  %v7087_v8 = vpop.xlane.xlu1 %7086  ;;  %v6569_v16 = vmul.f32 %v17200_v56, %v17200_v56  ;;  %v6570_v59 = vmul.f32 %v17207_v29, %v17207_v29 }
 0x5cd   : > { %v7802_v55 = vadd.f32 1e-05, %v7546_v3  ;;  %v7547_v53 = vmul.f32 0.125, %v7087_v8  ;;  %7215 = vadd.xlane.f32.xlu0 %v7214_v62  ;;  %v19625_v62 = vld [vmem:[#allocation70_spill] sm:$0xff]  ;;  %v7220_v54 = vsel %vm5088_vm4, %v6568_v60, 0.0  ;;  %v6063_v32 = vmul.f32 0.125, %v16736_v17 }
 0x5ce   : > { %v8836_v11 = vadd.f32 %v16761_v49, %v8573_v15  ;;  %v8574_v52 = vmul.f32 %v16750_v37, %v8311_v26  ;;  %v17222_v2 = vpop.xlane.xlu0 %5774  ;;  %v17230_v46 = vsub.f32 %v19625_v62, %v6060_v27  ;;  %v6571_v20 = vmul.f32 %v17216_v51, %v17216_v51  ;;  %v19627_v60 = vld [vmem:[#allocation73_spill] sm:$0xff] }
 0x5cf   : > { %11386 = vrsqrt.f32 %v7802_v55  ;;  %v7803_v3 = vadd.f32 1e-05, %v7547_v53  ;;  %7218 = vadd.xlane.f32.xlu1 %v7217_v34  ;;  %v19626_v55 = vld [vmem:[#allocation31_spill] sm:$0xff]  ;;  %v17249_v62 = vsub.f32 %v19627_v60, %v6062_v31 }
 0x5d0   : > { %9092 = vst.msk [vmem:[%s13898_s22 + $0x4a0] sm:$0xff] %vm5088_vm4, %v8836_v11  ;;  %v8837_v26 = vadd.f32 %v16761_v49, %v8574_v52  ;;  %v17235_v15 = vpop.xlane.xlu1 %5777  ;;  %v17242_v53 = vsub.f32 %v19626_v55, %v6061_v58  ;;  %v7223_v11 = vsel %vm5088_vm4, %v6569_v16, 0.0 }
 0x5d1   : > { %v11383_v8 = vpop.eup %11382  ;;  %11388 = vrsqrt.f32 %v7803_v3  ;;  %7221 = vadd.xlane.f32.xlu0 %v7220_v54  ;;  %19628 = vst [vmem:[#allocation33_spill] sm:$0xff] %v17249_v62  ;;  %v7226_v3 = vsel %vm5088_vm4, %v6570_v59, 0.0  ;;  %v6064_v54 = vmul.f32 0.125, %v16769_v23  ;;  %v6065_v59 = vmul.f32 0.125, %v16776_v50 }
 0x5d2   : > { %9093 = vst.msk [vmem:[%s13898_s22 + $0x4a8] sm:$0xff] %vm5088_vm4, %v8837_v26  ;;  %v8312_v27 = vmul.f32 %v11383_v8, %v16389_v1  ;;  %v7090_v34 = vpop.xlane.xlu0 %7089  ;;  %v6572_v1 = vmul.f32 %v17230_v46, %v17230_v46  ;;  %v19629_v8 = vld [vmem:[#allocation74_spill] sm:$0xff] }
 0x5d3   : > { %v11385_v52 = vpop.eup %11384  ;;  %v7548_v17 = vmul.f32 0.125, %v7090_v34  ;;  %7224 = vadd.xlane.f32.xlu1 %v7223_v11  ;;  %v17258_v16 = vsub.f32 %v19629_v8, %v6063_v32  ;;  %v7229_v34 = vsel %vm5088_vm4, %v6571_v20, 0.0  ;;  %v6573_v11 = vmul.f32 %v17242_v53, %v17242_v53 }
 0x5d4   : > { %v8575_v58 = vmul.f32 %v16750_v37, %v8312_v27  ;;  %v8313_v55 = vmul.f32 %v11385_v52, %v16395_v41  ;;  %v7093_v26 = vpop.xlane.xlu1 %7092  ;;  %v6066_v32 = vmul.f32 0.125, %v16810_v39  ;;  %v6574_v20 = vmul.f32 %v17249_v62, %v17249_v62 }
 0x5d5   : > { %19630 = vst [vmem:[#allocation107_spill] sm:$0xff] %v17258_v16  ;;  %v7804_v31 = vadd.f32 1e-05, %v7548_v17  ;;  %v7549_v60 = vmul.f32 0.125, %v7093_v26  ;;  %7227 = vadd.xlane.f32.xlu0 %v7226_v3  ;;  %v19631_v17 = vld [vmem:[#allocation90_spill] sm:$0xff]  ;;  %v6067_v39 = vmul.f32 0.125, %v16820_v19  ;;  %v6575_v8 = vmul.f32 %v17258_v16, %v17258_v16 }
 0x5d6   : > { %v8838_v23 = vadd.f32 %v16761_v49, %v8575_v58  ;;  %v8576_v27 = vmul.f32 %v16750_v37, %v8313_v55  ;;  %v17264_v41 = vpop.xlane.xlu0 %5780  ;;  %v17272_v50 = vsub.f32 %v19631_v17, %v6064_v54  ;;  %v7232_v55 = vsel %vm5088_vm4, %v6572_v1, 0.0  ;;  %v19633_v54 = vld [vmem:[#allocation110_spill] sm:$0xff]  ;;  %v19634_v1 = vld [vmem:[#allocation76_spill] sm:$0xff] }
 0x5d7   : > { %11390 = vrsqrt.f32 %v7804_v31  ;;  %v7805_v52 = vadd.f32 1e-05, %v7549_v60  ;;  %7230 = vadd.xlane.f32.xlu1 %v7229_v34  ;;  %v19632_v31 = vld [vmem:[#allocation78_spill] sm:$0xff]  ;;  %v17291_v62 = vsub.f32 %v19634_v1, %v6066_v32 }
 0x5d8   : > { %9094 = vst.msk [vmem:[%s13898_s22 + $0x4b0] sm:$0xff] %vm5088_vm4, %v8838_v23  ;;  %v8839_v3 = vadd.f32 %v16761_v49, %v8576_v27  ;;  %v17277_v58 = vpop.xlane.xlu1 %5783  ;;  %v17284_v60 = vsub.f32 %v19632_v31, %v6065_v59  ;;  %v7235_v27 = vsel %vm5088_vm4, %v6573_v11, 0.0  ;;  %v19635_v31 = vld [vmem:[#allocation131_spill] sm:$0xff] }
 0x5d9   : > { %v11387_v26 = vpop.eup %11386  ;;  %11392 = vrsqrt.f32 %v7805_v52  ;;  %7233 = vadd.xlane.f32.xlu0 %v7232_v55  ;;  %v7238_v52 = vsel %vm5088_vm4, %v6574_v20, 0.0  ;;  %v6068_v55 = vmul.f32 0.125, %v16849_v57  ;;  %v6069_v20 = vmul.f32 0.125, %v16856_v4 }
 0x5da   : > { %9095 = vst.msk [vmem:[%s13898_s22 + $0x4b8] sm:$0xff] %vm5088_vm4, %v8839_v3  ;;  %v8314_v34 = vmul.f32 %v11387_v26, %v19633_v54  ;;  %v7096_v23 = vpop.xlane.xlu0 %7095  ;;  %v6576_v26 = vmul.f32 %v17272_v50, %v17272_v50  ;;  %v19636_v54 = vld [vmem:[#allocation38_spill] sm:$0xff] }
 0x5db   : > { %v11389_v17 = vpop.eup %11388  ;;  %v7550_v19 = vmul.f32 0.125, %v7096_v23  ;;  %7236 = vadd.xlane.f32.xlu1 %v7235_v27  ;;  %v17300_v11 = vsub.f32 %v19636_v54, %v6067_v39  ;;  %v7241_v23 = vsel %vm5088_vm4, %v6575_v8, 0.0  ;;  %v6070_v39 = vmul.f32 0.125, %v16890_v12  ;;  %v19638_v54 = vld [vmem:[#allocation129_spill] sm:$0xff] }
 0x5dc   : > { %v8577_v59 = vmul.f32 %v16750_v37, %v8314_v34  ;;  %v8315_v16 = vmul.f32 %v11389_v17, %v19635_v31  ;;  %v7099_v3 = vpop.xlane.xlu1 %7098  ;;  %v6577_v17 = vmul.f32 %v17284_v60, %v17284_v60  ;;  %v6578_v8 = vmul.f32 %v17291_v62, %v17291_v62 }
 0x5dd   : > { %v7806_v32 = vadd.f32 1e-05, %v7550_v19  ;;  %v7551_v1 = vmul.f32 0.125, %v7099_v3  ;;  %7239 = vadd.xlane.f32.xlu0 %v7238_v52  ;;  %v19637_v52 = vld [vmem:[#allocation86_spill] sm:$0xff]  ;;  %v6071_v12 = vmul.f32 0.125, %v16900_v30  ;;  %v6579_v3 = vmul.f32 %v17300_v11, %v17300_v11 }
 0x5de   : > { %v8840_v57 = vadd.f32 %v16761_v49, %v8577_v59  ;;  %v8578_v34 = vmul.f32 %v16750_v37, %v8315_v16  ;;  %v17306_v27 = vpop.xlane.xlu0 %5786  ;;  %v17314_v4 = vsub.f32 %v19637_v52, %v6068_v55  ;;  %v7244_v59 = vsel %vm5088_vm4, %v6576_v26, 0.0  ;;  %v19640_v26 = vld [vmem:[#allocation112_spill] sm:$0xff] }
 0x5df   : > { %11394 = vrsqrt.f32 %v7806_v32  ;;  %v7807_v19 = vadd.f32 1e-05, %v7551_v1  ;;  %7242 = vadd.xlane.f32.xlu1 %v7241_v23  ;;  %v17326_v32 = vsub.f32 %v19638_v54, %v6069_v20  ;;  %v7247_v1 = vsel %vm5088_vm4, %v6577_v17, 0.0  ;;  %v17337_v52 = vld [vmem:[#allocation7] ss:$0 sm:$0xff] }
 0x5e0   : > { %9096 = vst.msk [vmem:[%s13898_s22 + $0x4c0] sm:$0xff] %vm5088_vm4, %v8840_v57  ;;  %v8841_v37 = vadd.f32 %v16761_v49, %v8578_v34  ;;  %v17319_v16 = vpop.xlane.xlu1 %5789  ;;  %v17333_v57 = vsub.f32 %v19640_v26, %v6070_v39  ;;  %v7250_v34 = vsel %vm5088_vm4, %v6578_v8, 0.0  ;;  %v6580_v17 = vmul.f32 %v17314_v4, %v17314_v4 }
 0x5e1   : > { %v11391_v31 = vpop.eup %11390  ;;  %11396 = vrsqrt.f32 %v7807_v19  ;;  %7245 = vadd.xlane.f32.xlu0 %v7244_v59  ;;  %19639 = vst [vmem:[#allocation103_spill] sm:$0xff] %v17326_v32  ;;  %v6072_v19 = vmul.f32 0.125, %v16929_v7  ;;  %v7253_v8 = vsel %vm5088_vm4, %v6579_v3, 0.0  ;;  %v6073_v7 = vmul.f32 0.125, %v16936_v18  ;;  %v19645_v3 = vld [vmem:[#allocation114_spill] sm:$0xff] }
 0x5e2   : > { %9097 = vst.msk [vmem:[%s13898_s22 + $0x4c8] sm:$0xff] %vm5088_vm4, %v8841_v37  ;;  %v8316_v55 = vmul.f32 %v11391_v31, %v16469_v48  ;;  %v7102_v49 = vpop.xlane.xlu0 %7101  ;;  %19641 = vst [vmem:[#allocation35_spill] sm:$0xff] %v17333_v57  ;;  %v19642_v37 = vld [vmem:[#allocation153_spill] sm:$0xff]  ;;  %v19643_v31 = vld [vmem:[#allocation80_spill] sm:$0xff]  ;;  %v6582_v18 = vmul.f32 %v17333_v57, %v17333_v57 }
 0x5e3   : > { %v11393_v23 = vpop.eup %11392  ;;  %v7552_v30 = vmul.f32 0.125, %v7102_v49  ;;  %7248 = vadd.xlane.f32.xlu1 %v7247_v1  ;;  %v17344_v54 = vsub.f32 %v19643_v31, %v6071_v12  ;;  %v17348_v1 = vld [vmem:[#allocation9] ss:$0 sm:$0xff]  ;;  %v6581_v12 = vmul.f32 %v17326_v32, %v17326_v32 }
 0x5e4   : > { %v8579_v20 = vmul.f32 %v17337_v52, %v8316_v55  ;;  %v8317_v59 = vmul.f32 %v11393_v23, %v19642_v37  ;;  %v7105_v48 = vpop.xlane.xlu1 %7104  ;;  %v17360_v37 = vsub.f32 %v19645_v3, %v6072_v19  ;;  %v19647_v19 = vld [vmem:[#allocation121_spill] sm:$0xff] }
 0x5e5   : > { %19644 = vst [vmem:[#allocation96_spill] sm:$0xff] %v17344_v54  ;;  %v7808_v39 = vadd.f32 1e-05, %v7552_v30  ;;  %v7553_v49 = vmul.f32 0.125, %v7105_v48  ;;  %7251 = vadd.xlane.f32.xlu0 %v7250_v34  ;;  %v6074_v30 = vmul.f32 0.125, %v16970_v22  ;;  %v7256_v48 = vsel %vm5088_vm4, %v6580_v17, 0.0 }
 0x5e6   : > { %v8842_v55 = vadd.f32 %v17348_v1, %v8579_v20  ;;  %v8580_v23 = vmul.f32 %v17337_v52, %v8317_v59  ;;  %v17352_v26 = vpop.xlane.xlu0 %5792  ;;  %v6075_v22 = vmul.f32 0.125, %v16980_v9  ;;  %v7259_v3 = vsel %vm5088_vm4, %v6581_v12, 0.0  ;;  %v19648_v17 = vld [vmem:[#allocation45_spill] sm:$0xff] }
 0x5e7   : > { %11398 = vrsqrt.f32 %v7808_v39  ;;  %v7809_v34 = vadd.f32 1e-05, %v7553_v49  ;;  %7254 = vadd.xlane.f32.xlu1 %v7253_v8  ;;  %v6583_v39 = vmul.f32 %v17344_v54, %v17344_v54  ;;  %v19646_v49 = vld [vmem:[#allocation99_spill] sm:$0xff]  ;;  %v17379_v32 = vsub.f32 %v19648_v17, %v6074_v30 }
 0x5e8   : > { %9098 = vst.msk [vmem:[%s13898_s22 + $0x4d0] sm:$0xff] %vm5088_vm4, %v8842_v55  ;;  %v8843_v20 = vadd.f32 %v17348_v1, %v8580_v23  ;;  %v17365_v59 = vpop.xlane.xlu1 %5795  ;;  %v17372_v8 = vsub.f32 %v19646_v49, %v6073_v7  ;;  %v19649_v49 = vld [vmem:[#allocation157_spill] sm:$0xff] }
 0x5e9   : > { %v11395_v31 = vpop.eup %11394  ;;  %11400 = vrsqrt.f32 %v7809_v34  ;;  %7257 = vadd.xlane.f32.xlu0 %v7256_v48  ;;  %v7262_v34 = vsel %vm5088_vm4, %v6582_v18, 0.0  ;;  %v6076_v48 = vmul.f32 0.125, %v17012_v33  ;;  %v6077_v18 = vmul.f32 0.125, %v17023_v0 }
 0x5ea   : > { %9099 = vst.msk [vmem:[%s13898_s22 + $0x4d8] sm:$0xff] %vm5088_vm4, %v8843_v20  ;;  %v8318_v55 = vmul.f32 %v11395_v31, %v19647_v19  ;;  %v7108_v23 = vpop.xlane.xlu0 %7107  ;;  %v6584_v31 = vmul.f32 %v17360_v37, %v17360_v37  ;;  %v19650_v19 = vld [vmem:[#allocation89_spill] sm:$0xff] }
 0x5eb   : > { %v11397_v57 = vpop.eup %11396  ;;  %v7554_v9 = vmul.f32 0.125, %v7108_v23  ;;  %7260 = vadd.xlane.f32.xlu1 %v7259_v3  ;;  %v17388_v12 = vsub.f32 %v19650_v19, %v6075_v22  ;;  %v7265_v23 = vsel %vm5088_vm4, %v6583_v39, 0.0  ;;  %v6585_v3 = vmul.f32 %v17372_v8, %v17372_v8 }
 0x5ec   : > { %v8581_v7 = vmul.f32 %v17337_v52, %v8318_v55  ;;  %v8319_v54 = vmul.f32 %v11397_v57, %v19649_v49  ;;  %v7111_v20 = vpop.xlane.xlu1 %7110  ;;  %v6078_v22 = vmul.f32 0.125, %v17054_v24  ;;  %v6586_v39 = vmul.f32 %v17379_v32, %v17379_v32 }
 0x5ed   : > { %19651 = vst [vmem:[#allocation115_spill] sm:$0xff] %v17388_v12  ;;  %v7810_v30 = vadd.f32 1e-05, %v7554_v9  ;;  %v7555_v17 = vmul.f32 0.125, %v7111_v20  ;;  %7263 = vadd.xlane.f32.xlu0 %v7262_v34  ;;  %v19652_v34 = vld [vmem:[#allocation94_spill] sm:$0xff]  ;;  %v7268_v49 = vsel %vm5088_vm4, %v6584_v31, 0.0  ;;  %v6587_v19 = vmul.f32 %v17388_v12, %v17388_v12 }
 0x5ee   : > { %v8844_v33 = vadd.f32 %v17348_v1, %v8581_v7  ;;  %v8582_v55 = vmul.f32 %v17337_v52, %v8319_v54  ;;  %v17394_v57 = vpop.xlane.xlu0 %5798  ;;  %v17402_v0 = vsub.f32 %v19652_v34, %v6076_v48  ;;  %v6079_v24 = vmul.f32 0.125, %v17067_v5  ;;  %v19654_v31 = vld [vmem:[#allocation142_spill] sm:$0xff] }
 0x5ef   : > { %11402 = vrsqrt.f32 %v7810_v30  ;;  %v7811_v9 = vadd.f32 1e-05, %v7555_v17  ;;  %7266 = vadd.xlane.f32.xlu1 %v7265_v23  ;;  %v19653_v30 = vld [vmem:[#allocation111_spill] sm:$0xff]  ;;  %v17421_v34 = vsub.f32 %v19654_v31, %v6078_v22 }
 0x5f0   : > { %9100 = vst.msk [vmem:[%s13898_s22 + $0x4e0] sm:$0xff] %vm5088_vm4, %v8844_v33  ;;  %v8845_v54 = vadd.f32 %v17348_v1, %v8582_v55  ;;  %v17407_v7 = vpop.xlane.xlu1 %5801  ;;  %v17414_v17 = vsub.f32 %v19653_v30, %v6077_v18  ;;  %v7271_v33 = vsel %vm5088_vm4, %v6585_v3, 0.0  ;;  %v19656_v30 = vld [vmem:[#allocation152_spill] sm:$0xff] }
 0x5f1   : > { %v11399_v20 = vpop.eup %11398  ;;  %11404 = vrsqrt.f32 %v7811_v9  ;;  %7269 = vadd.xlane.f32.xlu0 %v7268_v49  ;;  %19655 = vst [vmem:[#allocation97_spill] sm:$0xff] %v17421_v34  ;;  %v7274_v9 = vsel %vm5088_vm4, %v6586_v39, 0.0  ;;  %v6080_v49 = vmul.f32 0.125, %v17096_v42  ;;  %v6081_v39 = vmul.f32 0.125, %v17109_v40 }
 0x5f2   : > { %9101 = vst.msk [vmem:[%s13898_s22 + $0x4e8] sm:$0xff] %vm5088_vm4, %v8845_v54  ;;  %v8320_v48 = vmul.f32 %v11399_v20, %v16551_v21  ;;  %v7114_v23 = vpop.xlane.xlu0 %7113  ;;  %v6588_v21 = vmul.f32 %v17402_v0, %v17402_v0  ;;  %v19657_v20 = vld [vmem:[#allocation139_spill] sm:$0xff] }
 0x5f3   : > { %v11401_v55 = vpop.eup %11400  ;;  %v7556_v5 = vmul.f32 0.125, %v7114_v23  ;;  %7272 = vadd.xlane.f32.xlu1 %v7271_v33  ;;  %v17430_v3 = vsub.f32 %v19657_v20, %v6079_v24  ;;  %v7277_v23 = vsel %vm5088_vm4, %v6587_v19, 0.0  ;;  %v6082_v24 = vmul.f32 0.125, %v17138_v6 }
 0x5f4   : > { %v8583_v18 = vmul.f32 %v17337_v52, %v8320_v48  ;;  %v8321_v12 = vmul.f32 %v11401_v55, %v19656_v30  ;;  %v7117_v54 = vpop.xlane.xlu1 %7116  ;;  %v6589_v55 = vmul.f32 %v17414_v17, %v17414_v17  ;;  %v6590_v19 = vmul.f32 %v17421_v34, %v17421_v34 }
 0x5f5   : > { %19658 = vst [vmem:[#allocation77_spill] sm:$0xff] %v17430_v3  ;;  %v7812_v22 = vadd.f32 1e-05, %v7556_v5  ;;  %v7557_v31 = vmul.f32 0.125, %v7117_v54  ;;  %7275 = vadd.xlane.f32.xlu0 %v7274_v9  ;;  %v19659_v9 = vld [vmem:[#allocation145_spill] sm:$0xff]  ;;  %v7280_v30 = vsel %vm5088_vm4, %v6588_v21, 0.0  ;;  %v6591_v20 = vmul.f32 %v17430_v3, %v17430_v3 }
 0x5f6   : > { %v8846_v42 = vadd.f32 %v17348_v1, %v8583_v18  ;;  %v8584_v48 = vmul.f32 %v17337_v52, %v8321_v12  ;;  %v17436_v33 = vpop.xlane.xlu0 %5804  ;;  %v17444_v40 = vsub.f32 %v19659_v9, %v6080_v49  ;;  %v6083_v6 = vmul.f32 0.125, %v17151_v61  ;;  %v19661_v49 = vld [vmem:[#allocation147_spill] sm:$0xff]  ;;  %v19662_v21 = vld [vmem:[#allocation141_spill] sm:$0xff] }
 0x5f7   : > { %11406 = vrsqrt.f32 %v7812_v22  ;;  %v7813_v5 = vadd.f32 1e-05, %v7557_v31  ;;  %7278 = vadd.xlane.f32.xlu1 %v7277_v23  ;;  %v19660_v22 = vld [vmem:[#allocation88_spill] sm:$0xff]  ;;  %v17463_v34 = vsub.f32 %v19662_v21, %v6082_v24 }
 0x5f8   : > { %9102 = vst.msk [vmem:[%s13898_s22 + $0x4f0] sm:$0xff] %vm5088_vm4, %v8846_v42  ;;  %v8847_v12 = vadd.f32 %v17348_v1, %v8584_v48  ;;  %v17449_v18 = vpop.xlane.xlu1 %5807  ;;  %v17456_v31 = vsub.f32 %v19660_v22, %v6081_v39  ;;  %v7283_v48 = vsel %vm5088_vm4, %v6589_v55, 0.0  ;;  %v19663_v22 = vld [vmem:[#allocation14_spill] sm:$0xff] }
 0x5f9   : > { %v11403_v54 = vpop.eup %11402  ;;  %11408 = vrsqrt.f32 %v7813_v5  ;;  %7281 = vadd.xlane.f32.xlu0 %v7280_v30  ;;  %v7286_v5 = vsel %vm5088_vm4, %v6590_v19, 0.0  ;;  %v6084_v30 = vmul.f32 0.125, %v17180_v25  ;;  %v6085_v19 = vmul.f32 0.125, %v17193_v10 }
 0x5fa   : > { %9103 = vst.msk [vmem:[%s13898_s22 + $0x4f8] sm:$0xff] %vm5088_vm4, %v8847_v12  ;;  %v8322_v23 = vmul.f32 %v11403_v54, %v19661_v49  ;;  %v7120_v42 = vpop.xlane.xlu0 %7119  ;;  %v6592_v54 = vmul.f32 %v17444_v40, %v17444_v40  ;;  %v19664_v49 = vld [vmem:[#allocation54_spill] sm:$0xff] }
 0x5fb   : > { %v11405_v9 = vpop.eup %11404  ;;  %v7558_v61 = vmul.f32 0.125, %v7120_v42  ;;  %7284 = vadd.xlane.f32.xlu1 %v7283_v48  ;;  %v17472_v55 = vsub.f32 %v19664_v49, %v6083_v6  ;;  %v7289_v42 = vsel %vm5088_vm4, %v6591_v20, 0.0  ;;  %v6086_v6 = vmul.f32 0.125, %v17222_v2 }
 0x5fc   : > { %v8585_v39 = vmul.f32 %v17337_v52, %v8322_v23  ;;  %v8323_v3 = vmul.f32 %v11405_v9, %v19663_v22  ;;  %v7123_v12 = vpop.xlane.xlu1 %7122  ;;  %v6593_v9 = vmul.f32 %v17456_v31, %v17456_v31  ;;  %v6594_v20 = vmul.f32 %v17463_v34, %v17463_v34 }
 0x5fd   : > { %v7814_v24 = vadd.f32 1e-05, %v7558_v61  ;;  %v7559_v21 = vmul.f32 0.125, %v7123_v12  ;;  %7287 = vadd.xlane.f32.xlu0 %v7286_v5  ;;  %v19665_v5 = vld [vmem:[#allocation58_spill] sm:$0xff]  ;;  %v7292_v22 = vsel %vm5088_vm4, %v6592_v54, 0.0  ;;  %v6087_v2 = vmul.f32 0.125, %v17235_v15 }
 0x5fe   : > { %v8848_v25 = vadd.f32 %v17348_v1, %v8585_v39  ;;  %v8586_v23 = vmul.f32 %v17337_v52, %v8323_v3  ;;  %v17478_v48 = vpop.xlane.xlu0 %5810  ;;  %v17486_v10 = vsub.f32 %v19665_v5, %v6084_v30  ;;  %v6595_v49 = vmul.f32 %v17472_v55, %v17472_v55  ;;  %v19667_v54 = vld [vmem:[#allocation113_spill] sm:$0xff] }
 0x5ff   : > { %11410 = vrsqrt.f32 %v7814_v24  ;;  %v7815_v61 = vadd.f32 1e-05, %v7559_v21  ;;  %7290 = vadd.xlane.f32.xlu1 %v7289_v42  ;;  %v19666_v24 = vld [vmem:[#allocation13_spill] sm:$0xff]  ;;  %v17505_v5 = vsub.f32 %v19667_v54, %v6086_v6 }
 0x600   : > { %9104 = vst.msk [vmem:[%s13898_s22 + $0x500] sm:$0xff] %vm5088_vm4, %v8848_v25  ;;  %v8849_v3 = vadd.f32 %v17348_v1, %v8586_v23  ;;  %v17491_v39 = vpop.xlane.xlu1 %5813  ;;  %v17498_v21 = vsub.f32 %v19666_v24, %v6085_v19  ;;  %v7295_v25 = vsel %vm5088_vm4, %v6593_v9, 0.0 }
 0x601   : > { %v11407_v12 = vpop.eup %11406  ;;  %11412 = vrsqrt.f32 %v7815_v61  ;;  %7293 = vadd.xlane.f32.xlu0 %v7292_v22  ;;  %19668 = vst [vmem:[#allocation98_spill] sm:$0xff] %v17505_v5  ;;  %v7298_v61 = vsel %vm5088_vm4, %v6594_v20, 0.0  ;;  %v6088_v22 = vmul.f32 0.125, %v17264_v41  ;;  %v6089_v20 = vmul.f32 0.125, %v17277_v58 }
 0x602   : > { %9105 = vst.msk [vmem:[%s13898_s22 + $0x508] sm:$0xff] %vm5088_vm4, %v8849_v3  ;;  %v8324_v30 = vmul.f32 %v11407_v12, %v16631_v36  ;;  %v7126_v42 = vpop.xlane.xlu0 %7125  ;;  %v6596_v36 = vmul.f32 %v17486_v10, %v17486_v10  ;;  %v19669_v12 = vld [vmem:[#allocation148_spill] sm:$0xff] }
 0x603   : > { %v11409_v23 = vpop.eup %11408  ;;  %v7560_v15 = vmul.f32 0.125, %v7126_v42  ;;  %7296 = vadd.xlane.f32.xlu1 %v7295_v25  ;;  %v17514_v9 = vsub.f32 %v19669_v12, %v6087_v2  ;;  %v7301_v42 = vsel %vm5088_vm4, %v6595_v49, 0.0  ;;  %v6597_v25 = vmul.f32 %v17498_v21, %v17498_v21 }
 0x604   : > { %v8587_v19 = vmul.f32 %v17337_v52, %v8324_v30  ;;  %v8325_v24 = vmul.f32 %v11409_v23, %v16637_v47  ;;  %v7129_v3 = vpop.xlane.xlu1 %7128  ;;  %v6090_v2 = vmul.f32 0.125, %v17306_v27  ;;  %v6598_v49 = vmul.f32 %v17505_v5, %v17505_v5 }
 0x605   : > { %19670 = vst [vmem:[#allocation165_spill] sm:$0xff] %v17514_v9  ;;  %v7816_v6 = vadd.f32 1e-05, %v7560_v15  ;;  %v7561_v54 = vmul.f32 0.125, %v7129_v3  ;;  %7299 = vadd.xlane.f32.xlu0 %v7298_v61  ;;  %v19671_v15 = vld [vmem:[#allocation136_spill] sm:$0xff]  ;;  %v6091_v27 = vmul.f32 0.125, %v17319_v16  ;;  %v6599_v12 = vmul.f32 %v17514_v9, %v17514_v9 }
 0x606   : > { %v8850_v41 = vadd.f32 %v17348_v1, %v8587_v19  ;;  %v8588_v30 = vmul.f32 %v17337_v52, %v8325_v24  ;;  %v17520_v47 = vpop.xlane.xlu0 %5816  ;;  %v17528_v58 = vsub.f32 %v19671_v15, %v6088_v22  ;;  %v7304_v24 = vsel %vm5088_vm4, %v6596_v36, 0.0  ;;  %v19673_v22 = vld [vmem:[#allocation149_spill] sm:$0xff]  ;;  %v19674_v36 = vld [vmem:[#allocation60_spill] sm:$0xff] }
 0x607   : > { %11414 = vrsqrt.f32 %v7816_v6  ;;  %v7817_v23 = vadd.f32 1e-05, %v7561_v54  ;;  %7302 = vadd.xlane.f32.xlu1 %v7301_v42  ;;  %v19672_v6 = vld [vmem:[#allocation106_spill] sm:$0xff]  ;;  %v17547_v5 = vsub.f32 %v19674_v36, %v6090_v2 }
 0x608   : > { %9106 = vst.msk [vmem:[%s13898_s22 + $0x510] sm:$0xff] %vm5088_vm4, %v8850_v41  ;;  %v8851_v61 = vadd.f32 %v17348_v1, %v8588_v30  ;;  %v17533_v19 = vpop.xlane.xlu1 %5819  ;;  %v17540_v54 = vsub.f32 %v19672_v6, %v6089_v20  ;;  %v7307_v30 = vsel %vm5088_vm4, %v6597_v25, 0.0  ;;  %v19675_v6 = vld [vmem:[#allocation158_spill] sm:$0xff] }
 0x609   : > { %v11411_v3 = vpop.eup %11410  ;;  %11416 = vrsqrt.f32 %v7817_v23  ;;  %7305 = vadd.xlane.f32.xlu0 %v7304_v24  ;;  %v7310_v23 = vsel %vm5088_vm4, %v6598_v49, 0.0  ;;  %v6092_v24 = vmul.f32 0.125, %v17352_v26  ;;  %v6093_v49 = vmul.f32 0.125, %v17365_v59 }
 0x60a   : > { %9107 = vst.msk [vmem:[%s13898_s22 + $0x518] sm:$0xff] %vm5088_vm4, %v8851_v61  ;;  %v8326_v42 = vmul.f32 %v11411_v3, %v19673_v22  ;;  %v7132_v41 = vpop.xlane.xlu0 %7131  ;;  %v6600_v3 = vmul.f32 %v17528_v58, %v17528_v58  ;;  %v19676_v22 = vld [vmem:[#allocation146_spill] sm:$0xff] }
 0x60b   : > { %v11413_v15 = vpop.eup %11412  ;;  %v7562_v16 = vmul.f32 0.125, %v7132_v41  ;;  %7308 = vadd.xlane.f32.xlu1 %v7307_v30  ;;  %v17556_v25 = vsub.f32 %v19676_v22, %v6091_v27  ;;  %v7313_v41 = vsel %vm5088_vm4, %v6599_v12, 0.0  ;;  %v6094_v27 = vmul.f32 0.125, %v17394_v57 }
 0x60c   : > { %v8589_v20 = vmul.f32 %v17337_v52, %v8326_v42  ;;  %v8327_v9 = vmul.f32 %v11413_v15, %v19675_v6  ;;  %v7135_v61 = vpop.xlane.xlu1 %7134  ;;  %v6601_v15 = vmul.f32 %v17540_v54, %v17540_v54  ;;  %v6602_v12 = vmul.f32 %v17547_v5, %v17547_v5 }
 0x60d   : > { %19677 = vst [vmem:[#allocation127_spill] sm:$0xff] %v17556_v25  ;;  %v7818_v2 = vadd.f32 1e-05, %v7562_v16  ;;  %v7563_v36 = vmul.f32 0.125, %v7135_v61  ;;  %7311 = vadd.xlane.f32.xlu0 %v7310_v23  ;;  %v19678_v23 = vld [vmem:[#allocation159_spill] sm:$0xff]  ;;  %v7316_v6 = vsel %vm5088_vm4, %v6600_v3, 0.0  ;;  %v6603_v22 = vmul.f32 %v17556_v25, %v17556_v25 }
 0x60e   : > { %v8852_v26 = vadd.f32 %v17348_v1, %v8589_v20  ;;  %v8590_v42 = vmul.f32 %v17337_v52, %v8327_v9  ;;  %v17562_v30 = vpop.xlane.xlu0 %5822  ;;  %v17570_v59 = vsub.f32 %v19678_v23, %v6092_v24  ;;  %v6095_v57 = vmul.f32 0.125, %v17407_v7  ;;  %v19680_v3 = vld [vmem:[#allocation91_spill] sm:$0xff] }
 0x60f   : > { %11418 = vrsqrt.f32 %v7818_v2  ;;  %v7819_v16 = vadd.f32 1e-05, %v7563_v36  ;;  %7314 = vadd.xlane.f32.xlu1 %v7313_v41  ;;  %v19679_v2 = vld [vmem:[#allocation105_spill] sm:$0xff]  ;;  %v17589_v23 = vsub.f32 %v19680_v3, %v6094_v27 }
 0x610   : > { %9108 = vst.msk [vmem:[%s13898_s22 + $0x520] sm:$0xff] %vm5088_vm4, %v8852_v26  ;;  %v8853_v9 = vadd.f32 %v17348_v1, %v8590_v42  ;;  %v17575_v20 = vpop.xlane.xlu1 %5825  ;;  %v17582_v36 = vsub.f32 %v19679_v2, %v6093_v49  ;;  %v7319_v26 = vsel %vm5088_vm4, %v6601_v15, 0.0  ;;  %v19682_v2 = vld [vmem:[#allocation20_spill] sm:$0xff] }
 0x611   : > { %v11415_v61 = vpop.eup %11414  ;;  %11420 = vrsqrt.f32 %v7819_v16  ;;  %7317 = vadd.xlane.f32.xlu0 %v7316_v6  ;;  %19681 = vst [vmem:[#allocation116_spill] sm:$0xff] %v17589_v23  ;;  %v7322_v16 = vsel %vm5088_vm4, %v6602_v12, 0.0  ;;  %v6096_v6 = vmul.f32 0.125, %v17436_v33  ;;  %v6097_v12 = vmul.f32 0.125, %v17449_v18 }
 0x612   : > { %9109 = vst.msk [vmem:[%s13898_s22 + $0x528] sm:$0xff] %vm5088_vm4, %v8853_v9  ;;  %v8328_v24 = vmul.f32 %v11415_v61, %v16711_v63  ;;  %v7138_v41 = vpop.xlane.xlu0 %7137  ;;  %v6604_v63 = vmul.f32 %v17570_v59, %v17570_v59  ;;  %v19683_v61 = vld [vmem:[#allocation19_spill] sm:$0xff] }
 0x613   : > { %v11417_v42 = vpop.eup %11416  ;;  %v7564_v7 = vmul.f32 0.125, %v7138_v41  ;;  %7320 = vadd.xlane.f32.xlu1 %v7319_v26  ;;  %v17598_v15 = vsub.f32 %v19683_v61, %v6095_v57  ;;  %v7325_v41 = vsel %vm5088_vm4, %v6603_v22, 0.0  ;;  %v6098_v57 = vmul.f32 0.125, %v17478_v48 }
 0x614   : > { %v8591_v49 = vmul.f32 %v17337_v52, %v8328_v24  ;;  %v8329_v25 = vmul.f32 %v11417_v42, %v19682_v2  ;;  %v7141_v9 = vpop.xlane.xlu1 %7140  ;;  %v6605_v42 = vmul.f32 %v17582_v36, %v17582_v36  ;;  %v6606_v22 = vmul.f32 %v17589_v23, %v17589_v23 }
 0x615   : > { %19684 = vst [vmem:[#allocation43_spill] sm:$0xff] %v17598_v15  ;;  %v7820_v27 = vadd.f32 1e-05, %v7564_v7  ;;  %v7565_v3 = vmul.f32 0.125, %v7141_v9  ;;  %7323 = vadd.xlane.f32.xlu0 %v7322_v16  ;;  %v19685_v16 = vld [vmem:[#allocation68_spill] sm:$0xff]  ;;  %v7328_v2 = vsel %vm5088_vm4, %v6604_v63, 0.0  ;;  %v6607_v61 = vmul.f32 %v17598_v15, %v17598_v15 }
 0x616   : > { %v8854_v33 = vadd.f32 %v17348_v1, %v8591_v49  ;;  %v8592_v24 = vmul.f32 %v17337_v52, %v8329_v25  ;;  %v17604_v26 = vpop.xlane.xlu0 %5828  ;;  %v17612_v18 = vsub.f32 %v19685_v16, %v6096_v6  ;;  %v6099_v48 = vmul.f32 0.125, %v17491_v39  ;;  %v19687_v6 = vld [vmem:[#allocation21_spill] sm:$0xff]  ;;  %v19688_v63 = vld [vmem:[#allocation151_spill] sm:$0xff] }
 0x617   : > { %11422 = vrsqrt.f32 %v7820_v27  ;;  %v7821_v7 = vadd.f32 1e-05, %v7565_v3  ;;  %7326 = vadd.xlane.f32.xlu1 %v7325_v41  ;;  %v19686_v27 = vld [vmem:[#allocation66_spill] sm:$0xff]  ;;  %v17631_v23 = vsub.f32 %v19688_v63, %v6098_v57 }
 0x618   : > { %9110 = vst.msk [vmem:[%s13898_s22 + $0x530] sm:$0xff] %vm5088_vm4, %v8854_v33  ;;  %v8855_v25 = vadd.f32 %v17348_v1, %v8592_v24  ;;  %v17617_v49 = vpop.xlane.xlu1 %5831  ;;  %v17624_v3 = vsub.f32 %v19686_v27, %v6097_v12  ;;  %v7331_v24 = vsel %vm5088_vm4, %v6605_v42, 0.0  ;;  %v19690_v27 = vld [vmem:[#allocation155_spill] sm:$0xff] }
 0x619   : > { %v11419_v9 = vpop.eup %11418  ;;  %11424 = vrsqrt.f32 %v7821_v7  ;;  %7329 = vadd.xlane.f32.xlu0 %v7328_v2  ;;  %19689 = vst [vmem:[#allocation36_spill] sm:$0xff] %v17631_v23  ;;  %v7334_v7 = vsel %vm5088_vm4, %v6606_v22, 0.0  ;;  %v6100_v2 = vmul.f32 0.125, %v17520_v47  ;;  %v6101_v22 = vmul.f32 0.125, %v17533_v19 }
 0x61a   : > { %9111 = vst.msk [vmem:[%s13898_s22 + $0x538] sm:$0xff] %vm5088_vm4, %v8855_v25  ;;  %v8330_v41 = vmul.f32 %v11419_v9, %v19687_v6  ;;  %v7144_v33 = vpop.xlane.xlu0 %7143  ;;  %v6608_v9 = vmul.f32 %v17612_v18, %v17612_v18  ;;  %v19691_v6 = vld [vmem:[#allocation56_spill] sm:$0xff] }
 0x61b   : > { %v11421_v16 = vpop.eup %11420  ;;  %v7566_v39 = vmul.f32 0.125, %v7144_v33  ;;  %7332 = vadd.xlane.f32.xlu1 %v7331_v24  ;;  %v17640_v42 = vsub.f32 %v19691_v6, %v6099_v48  ;;  %v7337_v33 = vsel %vm5088_vm4, %v6607_v61, 0.0  ;;  %v19693_v61 = vld [vmem:[#allocation15_spill] sm:$0xff] }
 0x61c   : > { %v8593_v12 = vmul.f32 %v17337_v52, %v8330_v41  ;;  %v8331_v15 = vmul.f32 %v11421_v16, %v19690_v27  ;;  %v7147_v25 = vpop.xlane.xlu1 %7146  ;;  %v6609_v16 = vmul.f32 %v17624_v3, %v17624_v3  ;;  %v6102_v27 = vmul.f32 0.125, %v17562_v30 }
 0x61d   : > { %19692 = vst [vmem:[#allocation119_spill] sm:$0xff] %v17640_v42  ;;  %v7822_v57 = vadd.f32 1e-05, %v7566_v39  ;;  %v7567_v63 = vmul.f32 0.125, %v7147_v25  ;;  %7335 = vadd.xlane.f32.xlu0 %v7334_v7  ;;  %v6610_v39 = vmul.f32 %v17631_v23, %v17631_v23  ;;  %v17652_v7 = vsub.f32 %v19693_v61, %v6100_v2  ;;  %v19696_v2 = vld [vmem:[#allocation104_spill] sm:$0xff] }
 0x61e   : > { %v8856_v47 = vadd.f32 %v17348_v1, %v8593_v12  ;;  %v8594_v41 = vmul.f32 %v17337_v52, %v8331_v15  ;;  %v5835_v24 = vpop.xlane.xlu0 %5834  ;;  %v7340_v12 = vsel %vm5088_vm4, %v6608_v9, 0.0  ;;  %v6103_v30 = vmul.f32 0.125, %v17575_v20  ;;  %v19697_v9 = vld [vmem:[#allocation16_spill] sm:$0xff] }
 0x61f   : > { %11426 = vrsqrt.f32 %v7822_v57  ;;  %v7823_v48 = vadd.f32 1e-05, %v7567_v63  ;;  %7338 = vadd.xlane.f32.xlu1 %v7337_v33  ;;  %v6611_v6 = vmul.f32 %v17640_v42, %v17640_v42  ;;  %v19694_v57 = vld [vmem:[#allocation75_spill] sm:$0xff]  ;;  %v17669_v23 = vsub.f32 %v19697_v9, %v6102_v27  ;;  %v19699_v42 = vld [vmem:[#allocation162_spill] sm:$0xff] }
 0x620   : > { %9112 = vst.msk [vmem:[%s13898_s22 + $0x540] sm:$0xff] %vm5088_vm4, %v8856_v47  ;;  %v8857_v19 = vadd.f32 %v17348_v1, %v8594_v41  ;;  %v5838_v15 = vpop.xlane.xlu1 %5837  ;;  %v17662_v63 = vsub.f32 %v19694_v57, %v6101_v22  ;;  %v7343_v41 = vsel %vm5088_vm4, %v6609_v16, 0.0  ;;  %v6104_v57 = vmul.f32 0.125, %v17604_v26 }
 0x621   : > { %v11423_v25 = vpop.eup %11422  ;;  %11428 = vrsqrt.f32 %v7823_v48  ;;  %7341 = vadd.xlane.f32.xlu0 %v7340_v12  ;;  %19698 = vst [vmem:[#allocation128_spill] sm:$0xff] %v17669_v23  ;;  %v7346_v48 = vsel %vm5088_vm4, %v6610_v39, 0.0 }
 0x622   : > { %19695 = vst [vmem:[#allocation83_spill] sm:$0xff] %v17662_v63  ;;  %9113 = vst.msk [vmem:[%s13898_s22 + $0x548] sm:$0xff] %vm5088_vm4, %v8857_v19  ;;  %v8332_v33 = vmul.f32 %v11423_v25, %v19696_v2  ;;  %v7150_v47 = vpop.xlane.xlu0 %7149  ;;  %v6612_v25 = vmul.f32 %v17652_v7, %v17652_v7  ;;  %v19700_v2 = vld [vmem:[#allocation100_spill] sm:$0xff] }
 0x623   : > { %v11425_v61 = vpop.eup %11424  ;;  %v7568_v20 = vmul.f32 0.125, %v7150_v47  ;;  %7344 = vadd.xlane.f32.xlu1 %v7343_v41  ;;  %v17678_v16 = vsub.f32 %v19700_v2, %v6103_v30  ;;  %v7349_v47 = vsel %vm5088_vm4, %v6611_v6, 0.0  ;;  %v6613_v41 = vmul.f32 %v17662_v63, %v17662_v63 }
 0x624   : > { %v8595_v12 = vmul.f32 %v17337_v52, %v8332_v33  ;;  %v8333_v22 = vmul.f32 %v11425_v61, %v19699_v42  ;;  %v7153_v19 = vpop.xlane.xlu1 %7152  ;;  %v6105_v42 = vmul.f32 0.125, %v17617_v49  ;;  %v6106_v61 = vmul.f32 0.125, %v5835_v24 }
 0x625   : > { %19701 = vst [vmem:[#allocation47_spill] sm:$0xff] %v17678_v16  ;;  %v7824_v27 = vadd.f32 1e-05, %v7568_v20  ;;  %v7569_v9 = vmul.f32 0.125, %v7153_v19  ;;  %7347 = vadd.xlane.f32.xlu0 %v7346_v48  ;;  %v6614_v20 = vmul.f32 %v17669_v23, %v17669_v23  ;;  %v19702_v48 = vld [vmem:[#allocation24_spill] sm:$0xff]  ;;  %v6107_v2 = vmul.f32 0.125, %v5838_v15 }
 0x626   : > { %v8858_v39 = vadd.f32 %v17348_v1, %v8595_v12  ;;  %v8596_v33 = vmul.f32 %v17337_v52, %v8333_v22  ;;  %v5841_v26 = vpop.xlane.xlu0 %5840  ;;  %v17692_v12 = vsub.f32 %v19702_v48, %v6104_v57  ;;  %v7352_v22 = vsel %vm5088_vm4, %v6612_v25, 0.0  ;;  %v19705_v23 = vld [vmem:[#allocation65_spill] sm:$0xff] }
 0x627   : > { %11430 = vrsqrt.f32 %v7824_v27  ;;  %v7825_v30 = vadd.f32 1e-05, %v7569_v9  ;;  %7350 = vadd.xlane.f32.xlu1 %v7349_v47  ;;  %v6615_v24 = vmul.f32 %v17678_v16, %v17678_v16  ;;  %v19703_v27 = vld [vmem:[#allocation79_spill] sm:$0xff]  ;;  %v19704_v47 = vld [vmem:[#allocation22_spill] sm:$0xff]  ;;  %v7355_v57 = vsel %vm5088_vm4, %v6613_v41, 0.0 }
 0x628   : > { %9114 = vst.msk [vmem:[%s13898_s22 + $0x550] sm:$0xff] %vm5088_vm4, %v8858_v39  ;;  %v8859_v6 = vadd.f32 %v17348_v1, %v8596_v33  ;;  %v5844_v49 = vpop.xlane.xlu1 %5843  ;;  %v17700_v9 = vsub.f32 %v19703_v27, %v6105_v42  ;;  %v17705_v25 = vsub.f32 %v19705_v23, %v6106_v61  ;;  %v19707_v16 = vld [vmem:[#allocation130_spill] sm:$0xff]  ;;  %v6108_v63 = vmul.f32 0.125, %v5841_v26 }
 0x629   : > { %v11427_v19 = vpop.eup %11426  ;;  %11432 = vrsqrt.f32 %v7825_v30  ;;  %7353 = vadd.xlane.f32.xlu0 %v7352_v22  ;;  %v7358_v30 = vsel %vm5088_vm4, %v6614_v20, 0.0  ;;  %v19708_v27 = vld [vmem:[#allocation154_spill] sm:$0xff]  ;;  %v7361_v61 = vsel %vm5088_vm4, %v6615_v24, 0.0 }
 0x62a   : > { %9115 = vst.msk [vmem:[%s13898_s22 + $0x558] sm:$0xff] %vm5088_vm4, %v8859_v6  ;;  %v8334_v39 = vmul.f32 %v11427_v19, %v19704_v47  ;;  %v7156_v33 = vpop.xlane.xlu0 %7155  ;;  %19706 = vst [vmem:[#allocation137_spill] sm:$0xff] %v17705_v25  ;;  %v6616_v19 = vmul.f32 %v17692_v12, %v17692_v12  ;;  %v17713_v41 = vsub.f32 %v19708_v27, %v6107_v2  ;;  %v19711_v27 = vld [vmem:[#allocation55_spill] sm:$0xff] }
 0x62b   : > { %v11429_v48 = vpop.eup %11428  ;;  %v7570_v15 = vmul.f32 0.125, %v7156_v33  ;;  %7356 = vadd.xlane.f32.xlu1 %v7355_v57  ;;  %v6109_v33 = vmul.f32 0.125, %v5844_v49  ;;  %v6617_v26 = vmul.f32 %v17700_v9, %v17700_v9  ;;  %v6618_v2 = vmul.f32 %v17705_v25, %v17705_v25  ;;  %v19714_v25 = vld [vmem:[#allocation61_spill] sm:$0xff] }
 0x62c   : > { %v8597_v22 = vmul.f32 %v17337_v52, %v8334_v39  ;;  %v8335_v6 = vmul.f32 %v11429_v48, %v19707_v16  ;;  %v7159_v42 = vpop.xlane.xlu1 %7158  ;;  %19709 = vst [vmem:[#allocation102_spill] sm:$0xff] %v17713_v41  ;;  %v19710_v48 = vld [vmem:[#allocation81_spill] sm:$0xff] }
 0x62d   : > { %v7826_v47 = vadd.f32 1e-05, %v7570_v15  ;;  %v7571_v23 = vmul.f32 0.125, %v7159_v42  ;;  %7359 = vadd.xlane.f32.xlu0 %v7358_v30  ;;  %v17726_v15 = vsub.f32 %v19710_v48, %v6108_v63  ;;  %v6619_v42 = vmul.f32 %v17713_v41, %v17713_v41 }
 0x62e   : > { %v8860_v20 = vadd.f32 %v17348_v1, %v8597_v22  ;;  %v8598_v39 = vmul.f32 %v17337_v52, %v8335_v6  ;;  %v5847_v16 = vpop.xlane.xlu0 %5846  ;;  %v7364_v22 = vsel %vm5088_vm4, %v6616_v19, 0.0  ;;  %v7370_v19 = vsel %vm5088_vm4, %v6618_v2, 0.0 }
 0x62f   : > { %11434 = vrsqrt.f32 %v7826_v47  ;;  %v7827_v57 = vadd.f32 1e-05, %v7571_v23  ;;  %7362 = vadd.xlane.f32.xlu1 %v7361_v61  ;;  %v6110_v30 = vmul.f32 0.125, %v5847_v16  ;;  %v19712_v23 = vld [vmem:[#allocation87_spill] sm:$0xff] }
 0x630   : > { %9116 = vst.msk [vmem:[%s13898_s22 + $0x560] sm:$0xff] %vm5088_vm4, %v8860_v20  ;;  %v8861_v24 = vadd.f32 %v17348_v1, %v8598_v39  ;;  %v5850_v49 = vpop.xlane.xlu1 %5849  ;;  %v17735_v61 = vsub.f32 %v19712_v23, %v6109_v33  ;;  %v7367_v39 = vsel %vm5088_vm4, %v6617_v26, 0.0  ;;  %v6620_v33 = vmul.f32 %v17726_v15, %v17726_v15 }
 0x631   : > { %v11431_v6 = vpop.eup %11430  ;;  %11436 = vrsqrt.f32 %v7827_v57  ;;  %7365 = vadd.xlane.f32.xlu0 %v7364_v22  ;;  %v6111_v20 = vmul.f32 0.125, %v5850_v49  ;;  %v19713_v22 = vld [vmem:[#allocation27_spill] sm:$0xff]  ;;  %v7373_v26 = vsel %vm5088_vm4, %v6619_v42, 0.0 }
 0x632   : > { %9117 = vst.msk [vmem:[%s13898_s22 + $0x568] sm:$0xff] %vm5088_vm4, %v8861_v24  ;;  %v8336_v47 = vmul.f32 %v11431_v6, %v19711_v27  ;;  %v7162_v63 = vpop.xlane.xlu0 %7161  ;;  %v17742_v24 = vsub.f32 %v19714_v25, %v6110_v30  ;;  %v6621_v25 = vmul.f32 %v17735_v61, %v17735_v61 }
 0x633   : > { %v11433_v16 = vpop.eup %11432  ;;  %v7572_v48 = vmul.f32 0.125, %v7162_v63  ;;  %7368 = vadd.xlane.f32.xlu1 %v7367_v39 }
 0x634   : > { %v8599_v57 = vmul.f32 %v17337_v52, %v8336_v47  ;;  %v8337_v41 = vmul.f32 %v11433_v16, %v19713_v22  ;;  %v7165_v6 = vpop.xlane.xlu1 %7164  ;;  %v19715_v47 = vld [vmem:[#allocation64_spill] sm:$0xff] }
 0x635   : > { %v7828_v49 = vadd.f32 1e-05, %v7572_v48  ;;  %v7573_v27 = vmul.f32 0.125, %v7165_v6  ;;  %7371 = vadd.xlane.f32.xlu0 %v7370_v19  ;;  %v17750_v63 = vsub.f32 %v19715_v47, %v6111_v20  ;;  %v7376_v19 = vsel %vm5088_vm4, %v6620_v33, 0.0  ;;  %v19719_v47 = vld [vmem:[#allocation160_spill] sm:$0xff] }
 0x636   : > { %v8862_v23 = vadd.f32 %v17348_v1, %v8599_v57  ;;  %v8600_v2 = vmul.f32 %v17337_v52, %v8337_v41  ;;  %v5853_v39 = vpop.xlane.xlu0 %5852  ;;  %v6622_v41 = vmul.f32 %v17742_v24, %v17742_v24  ;;  %v19717_v57 = vld [vmem:[#allocation67_spill] sm:$0xff] }
 0x637   : > { %19716 = vst [vmem:[#allocation84_spill] sm:$0xff] %v17750_v63  ;;  %11438 = vrsqrt.f32 %v7828_v49  ;;  %v7829_v30 = vadd.f32 1e-05, %v7573_v27  ;;  %v6112_v16 = vmul.f32 0.125, %v5853_v39  ;;  %7374 = vadd.xlane.f32.xlu1 %v7373_v26  ;;  %v19718_v49 = vld [vmem:[#allocation72_spill] sm:$0xff]  ;;  %v6623_v33 = vmul.f32 %v17750_v63, %v17750_v63 }
 0x638   : > { %9118 = vst.msk [vmem:[%s13898_s22 + $0x570] sm:$0xff] %vm5088_vm4, %v8862_v23  ;;  %v8863_v42 = vadd.f32 %v17348_v1, %v8600_v2  ;;  %v5856_v48 = vpop.xlane.xlu1 %5855  ;;  %v7379_v23 = vsel %vm5088_vm4, %v6621_v25, 0.0 }
 0x639   : > { %v11435_v20 = vpop.eup %11434  ;;  %11440 = vrsqrt.f32 %v7829_v30  ;;  %v17761_v22 = vsub.f32 %v19717_v57, %v6112_v16  ;;  %v6113_v6 = vmul.f32 0.125, %v5856_v48  ;;  %7377 = vadd.xlane.f32.xlu0 %v7376_v19  ;;  %v19720_v48 = vld [vmem:[#allocation156_spill] sm:$0xff] }
 0x63a   : > { %9119 = vst.msk [vmem:[%s13898_s22 + $0x578] sm:$0xff] %vm5088_vm4, %v8863_v42  ;;  %v8338_v27 = vmul.f32 %v11435_v20, %v19718_v49  ;;  %v7168_v26 = vpop.xlane.xlu0 %7167  ;;  %v7382_v20 = vsel %vm5088_vm4, %v6622_v41, 0.0 }
 0x63b   : > { %v11437_v2 = vpop.eup %11436  ;;  %v17770_v39 = vsub.f32 %v19719_v47, %v6113_v6  ;;  %v7574_v30 = vmul.f32 0.125, %v7168_v26  ;;  %7380 = vadd.xlane.f32.xlu1 %v7379_v23  ;;  %v6624_v25 = vmul.f32 %v17761_v22, %v17761_v22 }
 0x63c   : > { %v8601_v16 = vmul.f32 %v17337_v52, %v8338_v27  ;;  %v8339_v19 = vmul.f32 %v11437_v2, %v19720_v48  ;;  %v7171_v42 = vpop.xlane.xlu1 %7170  ;;  %v7385_v27 = vsel %vm5088_vm4, %v6623_v33, 0.0  ;;  %v19721_v33 = vld [vmem:[#allocation166_spill] sm:$0xff] }
 0x63d   : > { %v7830_v57 = vadd.f32 1e-05, %v7574_v30  ;;  %v7575_v49 = vmul.f32 0.125, %v7171_v42  ;;  %7383 = vadd.xlane.f32.xlu0 %v7382_v20  ;;  %v6625_v23 = vmul.f32 %v17770_v39, %v17770_v39 }
 0x63e   : > { %v8864_v63 = vadd.f32 %v17348_v1, %v8601_v16  ;;  %v8602_v6 = vmul.f32 %v17337_v52, %v8339_v19  ;;  %v7174_v26 = vpop.xlane.xlu0 %7173  ;;  %v7388_v16 = vsel %vm5088_vm4, %v6624_v25, 0.0 }
 0x63f   : > { %11442 = vrsqrt.f32 %v7830_v57  ;;  %v7831_v2 = vadd.f32 1e-05, %v7575_v49  ;;  %v7576_v41 = vmul.f32 0.125, %v7174_v26  ;;  %7386 = vadd.xlane.f32.xlu1 %v7385_v27  ;;  %v7391_v49 = vsel %vm5088_vm4, %v6625_v23, 0.0  ;;  %v19722_v27 = vld [vmem:[#allocation28_spill] sm:$0xff] }
 0x640   : > { %9120 = vst.msk [vmem:[%s13898_s22 + $0x580] sm:$0xff] %vm5088_vm4, %v8864_v63  ;;  %v8865_v47 = vadd.f32 %v17348_v1, %v8602_v6  ;;  %v7177_v30 = vpop.xlane.xlu1 %7176 }
 0x641   : > { %v11439_v48 = vpop.eup %11438  ;;  %11444 = vrsqrt.f32 %v7831_v2  ;;  %v7832_v19 = vadd.f32 1e-05, %v7576_v41  ;;  %v7577_v42 = vmul.f32 0.125, %v7177_v30  ;;  %7389 = vadd.xlane.f32.xlu0 %v7388_v16 }
 0x642   : > { %9121 = vst.msk [vmem:[%s13898_s22 + $0x588] sm:$0xff] %vm5088_vm4, %v8865_v47  ;;  %v8340_v20 = vmul.f32 %v11439_v48, %v19721_v33  ;;  %v7180_v57 = vpop.xlane.xlu0 %7179 }
 0x643   : > { %v11441_v26 = vpop.eup %11440  ;;  %11446 = vrsqrt.f32 %v7832_v19  ;;  %v7833_v63 = vadd.f32 1e-05, %v7577_v42  ;;  %v7578_v6 = vmul.f32 0.125, %v7180_v57  ;;  %7392 = vadd.xlane.f32.xlu1 %v7391_v49 }
 0x644   : > { %v8603_v25 = vmul.f32 %v17337_v52, %v8340_v20  ;;  %v8341_v2 = vmul.f32 %v11441_v26, %v19722_v27  ;;  %v7183_v41 = vpop.xlane.xlu1 %7182 }
 0x645   : > { %11448 = vrsqrt.f32 %v7833_v63  ;;  %v7834_v30 = vadd.f32 1e-05, %v7578_v6  ;;  %v7579_v47 = vmul.f32 0.125, %v7183_v41  ;;  %v19723_v63 = vld [vmem:[#allocation95_spill] sm:$0xff] }
 0x646   : > { %v8866_v16 = vadd.f32 %v17348_v1, %v8603_v25  ;;  %v8604_v48 = vmul.f32 %v17337_v52, %v8341_v2  ;;  %v7186_v23 = vpop.xlane.xlu0 %7185 }
 0x647   : > { %11450 = vrsqrt.f32 %v7834_v30  ;;  %v7835_v19 = vadd.f32 1e-05, %v7579_v47  ;;  %v7580_v33 = vmul.f32 0.125, %v7186_v23  ;;  %v19724_v47 = vld [vmem:[#allocation82_spill] sm:$0xff] }
 0x648   : > { %9122 = vst.msk [vmem:[%s13898_s22 + $0x590] sm:$0xff] %vm5088_vm4, %v8866_v16  ;;  %v8867_v42 = vadd.f32 %v17348_v1, %v8604_v48  ;;  %v7189_v20 = vpop.xlane.xlu1 %7188 }
 0x649   : > { %v11443_v57 = vpop.eup %11442  ;;  %11452 = vrsqrt.f32 %v7835_v19  ;;  %v7836_v49 = vadd.f32 1e-05, %v7580_v33  ;;  %v7581_v26 = vmul.f32 0.125, %v7189_v20 }
 0x64a   : > { %9123 = vst.msk [vmem:[%s13898_s22 + $0x598] sm:$0xff] %vm5088_vm4, %v8867_v42  ;;  %v8342_v6 = vmul.f32 %v11443_v57, %v19723_v63  ;;  %v7192_v25 = vpop.xlane.xlu0 %7191 }
 0x64b   : > { %v11445_v27 = vpop.eup %11444  ;;  %11454 = vrsqrt.f32 %v7836_v49  ;;  %v7837_v2 = vadd.f32 1e-05, %v7581_v26  ;;  %v7582_v41 = vmul.f32 0.125, %v7192_v25 }
 0x64c   : > { %v8605_v30 = vmul.f32 %v17337_v52, %v8342_v6  ;;  %v8343_v16 = vmul.f32 %v11445_v27, %v19724_v47  ;;  %v7195_v48 = vpop.xlane.xlu1 %7194  ;;  %v17808_v27 = vld [vmem:[#allocation7] ss:$0 sm:$0xff] }
 0x64d   : > { %v11447_v23 = vpop.eup %11446  ;;  %11456 = vrsqrt.f32 %v7837_v2  ;;  %v7838_v19 = vadd.f32 1e-05, %v7582_v41  ;;  %v7583_v33 = vmul.f32 0.125, %v7195_v48  ;;  %v19725_v41 = vld [vmem:[#allocation37_spill] sm:$0xff] }
 0x64e   : > { %v8868_v20 = vadd.f32 %v17348_v1, %v8605_v30  ;;  %v8606_v42 = vmul.f32 %v17337_v52, %v8343_v16  ;;  %v8344_v57 = vmul.f32 %v11447_v23, %v17018_v13  ;;  %v7198_v49 = vpop.xlane.xlu0 %7197 }
 0x64f   : > { %v11449_v26 = vpop.eup %11448  ;;  %11458 = vrsqrt.f32 %v7838_v19  ;;  %v7839_v63 = vadd.f32 1e-05, %v7583_v33  ;;  %v7584_v25 = vmul.f32 0.125, %v7198_v49  ;;  %v19726_v19 = vld [vmem:[#allocation30_spill] sm:$0xff] }
 0x650   : > { %9124 = vst.msk [vmem:[%s13898_s22 + $0x5a0] sm:$0xff] %vm5088_vm4, %v8868_v20  ;;  %v8869_v6 = vadd.f32 %v17348_v1, %v8606_v42  ;;  %v8607_v2 = vmul.f32 %v17808_v27, %v8344_v57  ;;  %v8345_v30 = vmul.f32 %v11449_v26, %v19725_v41  ;;  %v7201_v52 = vpop.xlane.xlu1 %7200  ;;  %v17819_v26 = vld [vmem:[#allocation9] ss:$0 sm:$0xff] }
 0x651   : > { %v11451_v47 = vpop.eup %11450  ;;  %11460 = vrsqrt.f32 %v7839_v63  ;;  %v7840_v13 = vadd.f32 1e-05, %v7584_v25  ;;  %v7585_v16 = vmul.f32 0.125, %v7201_v52 }
 0x652   : > { %9125 = vst.msk [vmem:[%s13898_s22 + $0x5a8] sm:$0xff] %vm5088_vm4, %v8869_v6  ;;  %v8870_v48 = vadd.f32 %v17348_v1, %v8607_v2  ;;  %v8608_v23 = vmul.f32 %v17808_v27, %v8345_v30  ;;  %v8346_v33 = vmul.f32 %v11451_v47, %v19726_v19  ;;  %v7204_v20 = vpop.xlane.xlu0 %7203  ;;  %v19727_v6 = vld [vmem:[#allocation117_spill] sm:$0xff] }
 0x653   : > { %v11453_v42 = vpop.eup %11452  ;;  %11462 = vrsqrt.f32 %v7840_v13  ;;  %v7841_v57 = vadd.f32 1e-05, %v7585_v16  ;;  %v7586_v49 = vmul.f32 0.125, %v7204_v20 }
 0x654   : > { %9126 = vst.msk [vmem:[%s13898_s22 + $0x5b0] sm:$0xff] %vm5088_vm4, %v8870_v48  ;;  %v8871_v63 = vadd.f32 %v17819_v26, %v8608_v23  ;;  %v8609_v25 = vmul.f32 %v17808_v27, %v8346_v33  ;;  %v8347_v1 = vmul.f32 %v11453_v42, %v19727_v6  ;;  %v7207_v2 = vpop.xlane.xlu1 %7206 }
 0x655   : > { %v11455_v41 = vpop.eup %11454  ;;  %11464 = vrsqrt.f32 %v7841_v57  ;;  %v7842_v30 = vadd.f32 1e-05, %v7586_v49  ;;  %v7587_v52 = vmul.f32 0.125, %v7207_v2  ;;  %v19728_v2 = vld [vmem:[#allocation161_spill] sm:$0xff] }
 0x656   : > { %9127 = vst.msk [vmem:[%s13898_s22 + $0x5b8] sm:$0xff] %vm5088_vm4, %v8871_v63  ;;  %v8872_v47 = vadd.f32 %v17819_v26, %v8609_v25  ;;  %v8610_v13 = vmul.f32 %v17808_v27, %v8347_v1  ;;  %v8348_v16 = vmul.f32 %v11455_v41, %v17062_v43  ;;  %v7210_v48 = vpop.xlane.xlu0 %7209 }
 0x657   : > { %v11457_v23 = vpop.eup %11456  ;;  %11466 = vrsqrt.f32 %v7842_v30  ;;  %v7843_v19 = vadd.f32 1e-05, %v7587_v52  ;;  %v7588_v33 = vmul.f32 0.125, %v7210_v48  ;;  %v19729_v48 = vld [vmem:[#allocation32_spill] sm:$0xff] }
 0x658   : > { %9128 = vst.msk [vmem:[%s13898_s22 + $0x5c0] sm:$0xff] %vm5088_vm4, %v8872_v47  ;;  %v8873_v20 = vadd.f32 %v17819_v26, %v8610_v13  ;;  %v8611_v42 = vmul.f32 %v17808_v27, %v8348_v16  ;;  %v8349_v57 = vmul.f32 %v11457_v23, %v17074_v44  ;;  %v7213_v49 = vpop.xlane.xlu1 %7212 }
 0x659   : > { %v11459_v63 = vpop.eup %11458  ;;  %11468 = vrsqrt.f32 %v7843_v19  ;;  %v7844_v25 = vadd.f32 1e-05, %v7588_v33  ;;  %v7589_v6 = vmul.f32 0.125, %v7213_v49 }
 0x65a   : > { %9129 = vst.msk [vmem:[%s13898_s22 + $0x5c8] sm:$0xff] %vm5088_vm4, %v8873_v20  ;;  %v8874_v43 = vadd.f32 %v17819_v26, %v8611_v42  ;;  %v8612_v1 = vmul.f32 %v17808_v27, %v8349_v57  ;;  %v8350_v41 = vmul.f32 %v11459_v63, %v19728_v2  ;;  %v7216_v30 = vpop.xlane.xlu0 %7215 }
 0x65b   : > { %v11461_v52 = vpop.eup %11460  ;;  %11470 = vrsqrt.f32 %v7844_v25  ;;  %v7845_v47 = vadd.f32 1e-05, %v7589_v6  ;;  %v7590_v13 = vmul.f32 0.125, %v7216_v30 }
 0x65c   : > { %9130 = vst.msk [vmem:[%s13898_s22 + $0x5d0] sm:$0xff] %vm5088_vm4, %v8874_v43  ;;  %v8875_v44 = vadd.f32 %v17819_v26, %v8612_v1  ;;  %v8613_v16 = vmul.f32 %v17808_v27, %v8350_v41  ;;  %v8351_v23 = vmul.f32 %v11461_v52, %v19729_v48  ;;  %v7219_v19 = vpop.xlane.xlu1 %7218  ;;  %v19730_v48 = vld [vmem:[#allocation71_spill] sm:$0xff] }
 0x65d   : > { %v11463_v33 = vpop.eup %11462  ;;  %11472 = vrsqrt.f32 %v7845_v47  ;;  %v7846_v20 = vadd.f32 1e-05, %v7590_v13  ;;  %v7591_v42 = vmul.f32 0.125, %v7219_v19 }
 0x65e   : > { %9131 = vst.msk [vmem:[%s13898_s22 + $0x5d8] sm:$0xff] %vm5088_vm4, %v8875_v44  ;;  %v8876_v57 = vadd.f32 %v17819_v26, %v8613_v16  ;;  %v8614_v49 = vmul.f32 %v17808_v27, %v8351_v23  ;;  %v8352_v63 = vmul.f32 %v11463_v33, %v17104_v35  ;;  %v7222_v25 = vpop.xlane.xlu0 %7221 }
 0x65f   : > { %v11465_v6 = vpop.eup %11464  ;;  %11474 = vrsqrt.f32 %v7846_v20  ;;  %v7847_v43 = vadd.f32 1e-05, %v7591_v42  ;;  %v7592_v1 = vmul.f32 0.125, %v7222_v25 }
 0x660   : > { %9132 = vst.msk [vmem:[%s13898_s22 + $0x5e0] sm:$0xff] %vm5088_vm4, %v8876_v57  ;;  %v8877_v2 = vadd.f32 %v17819_v26, %v8614_v49  ;;  %v8615_v41 = vmul.f32 %v17808_v27, %v8352_v63  ;;  %v8353_v30 = vmul.f32 %v11465_v6, %v17116_v14  ;;  %v7225_v52 = vpop.xlane.xlu1 %7224  ;;  %v19731_v49 = vld [vmem:[#allocation34_spill] sm:$0xff] }
 0x661   : > { %v11467_v47 = vpop.eup %11466  ;;  %11476 = vrsqrt.f32 %v7847_v43  ;;  %v7848_v13 = vadd.f32 1e-05, %v7592_v1  ;;  %v7593_v44 = vmul.f32 0.125, %v7225_v52 }
 0x662   : > { %9133 = vst.msk [vmem:[%s13898_s22 + $0x5e8] sm:$0xff] %vm5088_vm4, %v8877_v2  ;;  %v8878_v35 = vadd.f32 %v17819_v26, %v8615_v41  ;;  %v8616_v16 = vmul.f32 %v17808_v27, %v8353_v30  ;;  %v8354_v23 = vmul.f32 %v11467_v47, %v19730_v48  ;;  %v7228_v19 = vpop.xlane.xlu0 %7227 }
 0x663   : > { %v11469_v33 = vpop.eup %11468  ;;  %11478 = vrsqrt.f32 %v7848_v13  ;;  %v7849_v20 = vadd.f32 1e-05, %v7593_v44  ;;  %v7594_v42 = vmul.f32 0.125, %v7228_v19 }
 0x664   : > { %9134 = vst.msk [vmem:[%s13898_s22 + $0x5f0] sm:$0xff] %vm5088_vm4, %v8878_v35  ;;  %v8879_v14 = vadd.f32 %v17819_v26, %v8616_v16  ;;  %v8617_v57 = vmul.f32 %v17808_v27, %v8354_v23  ;;  %v8355_v63 = vmul.f32 %v11469_v33, %v19731_v49  ;;  %v7231_v25 = vpop.xlane.xlu1 %7230 }
 0x665   : > { %v11471_v6 = vpop.eup %11470  ;;  %11480 = vrsqrt.f32 %v7849_v20  ;;  %v7850_v43 = vadd.f32 1e-05, %v7594_v42  ;;  %v7595_v1 = vmul.f32 0.125, %v7231_v25 }
 0x666   : > { %9135 = vst.msk [vmem:[%s13898_s22 + $0x5f8] sm:$0xff] %vm5088_vm4, %v8879_v14  ;;  %v8880_v2 = vadd.f32 %v17819_v26, %v8617_v57  ;;  %v8618_v41 = vmul.f32 %v17808_v27, %v8355_v63  ;;  %v8356_v30 = vmul.f32 %v11471_v6, %v17146_v38  ;;  %v7234_v52 = vpop.xlane.xlu0 %7233  ;;  %v19732_v14 = vld [vmem:[#allocation26_spill] sm:$0xff] }
 0x667   : > { %v11473_v47 = vpop.eup %11472  ;;  %11482 = vrsqrt.f32 %v7850_v43  ;;  %v7851_v13 = vadd.f32 1e-05, %v7595_v1  ;;  %v7596_v44 = vmul.f32 0.125, %v7234_v52  ;;  %v19733_v1 = vld [vmem:[#allocation85_spill] sm:$0xff] }
 0x668   : > { %9136 = vst.msk [vmem:[%s13898_s22 + $0x600] sm:$0xff] %vm5088_vm4, %v8880_v2  ;;  %v8881_v35 = vadd.f32 %v17819_v26, %v8618_v41  ;;  %v8619_v16 = vmul.f32 %v17808_v27, %v8356_v30  ;;  %v8357_v48 = vmul.f32 %v11473_v47, %v17158_v45  ;;  %v7237_v23 = vpop.xlane.xlu1 %7236 }
 0x669   : > { %v11475_v19 = vpop.eup %11474  ;;  %11484 = vrsqrt.f32 %v7851_v13  ;;  %v7852_v33 = vadd.f32 1e-05, %v7596_v44  ;;  %v7597_v20 = vmul.f32 0.125, %v7237_v23 }
 0x66a   : > { %9137 = vst.msk [vmem:[%s13898_s22 + $0x608] sm:$0xff] %vm5088_vm4, %v8881_v35  ;;  %v8882_v38 = vadd.f32 %v17819_v26, %v8619_v16  ;;  %v8620_v42 = vmul.f32 %v17808_v27, %v8357_v48  ;;  %v8358_v57 = vmul.f32 %v11475_v19, %v19732_v14  ;;  %v7240_v49 = vpop.xlane.xlu0 %7239 }
 0x66b   : > { %v11477_v63 = vpop.eup %11476  ;;  %11486 = vrsqrt.f32 %v7852_v33  ;;  %v7853_v25 = vadd.f32 1e-05, %v7597_v20  ;;  %v7598_v6 = vmul.f32 0.125, %v7240_v49 }
 0x66c   : > { %9138 = vst.msk [vmem:[%s13898_s22 + $0x610] sm:$0xff] %vm5088_vm4, %v8882_v38  ;;  %v8883_v45 = vadd.f32 %v17819_v26, %v8620_v42  ;;  %v8621_v43 = vmul.f32 %v17808_v27, %v8358_v57  ;;  %v8359_v2 = vmul.f32 %v11477_v63, %v19733_v1  ;;  %v7243_v41 = vpop.xlane.xlu1 %7242 }
 0x66d   : > { %v11479_v30 = vpop.eup %11478  ;;  %11488 = vrsqrt.f32 %v7853_v25  ;;  %v7854_v52 = vadd.f32 1e-05, %v7598_v6  ;;  %v7599_v47 = vmul.f32 0.125, %v7243_v41 }
 0x66e   : > { %9139 = vst.msk [vmem:[%s13898_s22 + $0x618] sm:$0xff] %vm5088_vm4, %v8883_v45  ;;  %v8884_v13 = vadd.f32 %v17819_v26, %v8621_v43  ;;  %v8622_v44 = vmul.f32 %v17808_v27, %v8359_v2  ;;  %v8360_v35 = vmul.f32 %v11479_v30, %v17188_v28  ;;  %v7246_v16 = vpop.xlane.xlu0 %7245 }
 0x66f   : > { %v11481_v48 = vpop.eup %11480  ;;  %11490 = vrsqrt.f32 %v7854_v52  ;;  %v7855_v23 = vadd.f32 1e-05, %v7599_v47  ;;  %v7600_v19 = vmul.f32 0.125, %v7246_v16 }
 0x670   : > { %9140 = vst.msk [vmem:[%s13898_s22 + $0x620] sm:$0xff] %vm5088_vm4, %v8884_v13  ;;  %v8885_v33 = vadd.f32 %v17819_v26, %v8622_v44  ;;  %v8623_v20 = vmul.f32 %v17808_v27, %v8360_v35  ;;  %v8361_v38 = vmul.f32 %v11481_v48, %v17200_v56  ;;  %v7249_v42 = vpop.xlane.xlu1 %7248 }
 0x671   : > { %v11483_v14 = vpop.eup %11482  ;;  %11492 = vrsqrt.f32 %v7855_v23  ;;  %v7856_v57 = vadd.f32 1e-05, %v7600_v19  ;;  %v7601_v49 = vmul.f32 0.125, %v7249_v42 }
 0x672   : > { %9141 = vst.msk [vmem:[%s13898_s22 + $0x628] sm:$0xff] %vm5088_vm4, %v8885_v33  ;;  %v8886_v28 = vadd.f32 %v17819_v26, %v8623_v20  ;;  %v8624_v63 = vmul.f32 %v17808_v27, %v8361_v38  ;;  %v8362_v25 = vmul.f32 %v11483_v14, %v17207_v29  ;;  %v7252_v6 = vpop.xlane.xlu0 %7251 }
 0x673   : > { %v11485_v45 = vpop.eup %11484  ;;  %11494 = vrsqrt.f32 %v7856_v57  ;;  %v7857_v43 = vadd.f32 1e-05, %v7601_v49  ;;  %v7602_v1 = vmul.f32 0.125, %v7252_v6 }
 0x674   : > { %9142 = vst.msk [vmem:[%s13898_s22 + $0x630] sm:$0xff] %vm5088_vm4, %v8886_v28  ;;  %v8887_v56 = vadd.f32 %v17819_v26, %v8624_v63  ;;  %v8625_v2 = vmul.f32 %v17808_v27, %v8362_v25  ;;  %v8363_v41 = vmul.f32 %v11485_v45, %v17216_v51  ;;  %v7255_v30 = vpop.xlane.xlu1 %7254  ;;  %v19734_v28 = vld [vmem:[#allocation33_spill] sm:$0xff] }
 0x675   : > { %v11487_v52 = vpop.eup %11486  ;;  %11496 = vrsqrt.f32 %v7857_v43  ;;  %v7858_v47 = vadd.f32 1e-05, %v7602_v1  ;;  %v7603_v13 = vmul.f32 0.125, %v7255_v30 }
 0x676   : > { %9143 = vst.msk [vmem:[%s13898_s22 + $0x638] sm:$0xff] %vm5088_vm4, %v8887_v56  ;;  %v8888_v29 = vadd.f32 %v17819_v26, %v8625_v2  ;;  %v8626_v44 = vmul.f32 %v17808_v27, %v8363_v41  ;;  %v8364_v35 = vmul.f32 %v11487_v52, %v17230_v46  ;;  %v7258_v16 = vpop.xlane.xlu0 %7257  ;;  %v19735_v56 = vld [vmem:[#allocation107_spill] sm:$0xff] }
 0x677   : > { %v11489_v48 = vpop.eup %11488  ;;  %11498 = vrsqrt.f32 %v7858_v47  ;;  %v7859_v23 = vadd.f32 1e-05, %v7603_v13  ;;  %v7604_v19 = vmul.f32 0.125, %v7258_v16 }
 0x678   : > { %9144 = vst.msk [vmem:[%s13898_s22 + $0x640] sm:$0xff] %vm5088_vm4, %v8888_v29  ;;  %v8889_v51 = vadd.f32 %v17819_v26, %v8626_v44  ;;  %v8627_v33 = vmul.f32 %v17808_v27, %v8364_v35  ;;  %v8365_v20 = vmul.f32 %v11489_v48, %v17242_v53  ;;  %v7261_v38 = vpop.xlane.xlu1 %7260 }
 0x679   : > { %v11491_v42 = vpop.eup %11490  ;;  %11500 = vrsqrt.f32 %v7859_v23  ;;  %v7860_v14 = vadd.f32 1e-05, %v7604_v19  ;;  %v7605_v57 = vmul.f32 0.125, %v7261_v38 }
 0x67a   : > { %9145 = vst.msk [vmem:[%s13898_s22 + $0x648] sm:$0xff] %vm5088_vm4, %v8889_v51  ;;  %v8890_v46 = vadd.f32 %v17819_v26, %v8627_v33  ;;  %v8628_v49 = vmul.f32 %v17808_v27, %v8365_v20  ;;  %v8366_v63 = vmul.f32 %v11491_v42, %v19734_v28  ;;  %v7264_v25 = vpop.xlane.xlu0 %7263 }
 0x67b   : > { %v11493_v6 = vpop.eup %11492  ;;  %11502 = vrsqrt.f32 %v7860_v14  ;;  %v7861_v45 = vadd.f32 1e-05, %v7605_v57  ;;  %v7606_v43 = vmul.f32 0.125, %v7264_v25 }
 0x67c   : > { %9146 = vst.msk [vmem:[%s13898_s22 + $0x650] sm:$0xff] %vm5088_vm4, %v8890_v46  ;;  %v8891_v53 = vadd.f32 %v17819_v26, %v8628_v49  ;;  %v8629_v1 = vmul.f32 %v17808_v27, %v8366_v63  ;;  %v8367_v2 = vmul.f32 %v11493_v6, %v19735_v56  ;;  %v7267_v41 = vpop.xlane.xlu1 %7266 }
 0x67d   : > { %v11495_v30 = vpop.eup %11494  ;;  %11504 = vrsqrt.f32 %v7861_v45  ;;  %v7862_v52 = vadd.f32 1e-05, %v7606_v43  ;;  %v7607_v47 = vmul.f32 0.125, %v7267_v41 }
 0x67e   : > { %9147 = vst.msk [vmem:[%s13898_s22 + $0x658] sm:$0xff] %vm5088_vm4, %v8891_v53  ;;  %v8892_v13 = vadd.f32 %v17819_v26, %v8629_v1  ;;  %v8630_v29 = vmul.f32 %v17808_v27, %v8367_v2  ;;  %v8368_v44 = vmul.f32 %v11495_v30, %v17272_v50  ;;  %v7270_v35 = vpop.xlane.xlu0 %7269 }
 0x67f   : > { %v11497_v16 = vpop.eup %11496  ;;  %11506 = vrsqrt.f32 %v7862_v52  ;;  %v7863_v48 = vadd.f32 1e-05, %v7607_v47  ;;  %v7608_v23 = vmul.f32 0.125, %v7270_v35 }
 0x680   : > { %9148 = vst.msk [vmem:[%s13898_s22 + $0x660] sm:$0xff] %vm5088_vm4, %v8892_v13  ;;  %v8893_v19 = vadd.f32 %v17819_v26, %v8630_v29  ;;  %v8631_v51 = vmul.f32 %v17808_v27, %v8368_v44  ;;  %v8369_v33 = vmul.f32 %v11497_v16, %v17284_v60  ;;  %v7273_v20 = vpop.xlane.xlu1 %7272  ;;  %v19736_v44 = vld [vmem:[#allocation103_spill] sm:$0xff] }
 0x681   : > { %v11499_v38 = vpop.eup %11498  ;;  %11508 = vrsqrt.f32 %v7863_v48  ;;  %v7864_v42 = vadd.f32 1e-05, %v7608_v23  ;;  %v7609_v14 = vmul.f32 0.125, %v7273_v20 }
 0x682   : > { %9149 = vst.msk [vmem:[%s13898_s22 + $0x668] sm:$0xff] %vm5088_vm4, %v8893_v19  ;;  %v8894_v50 = vadd.f32 %v17819_v26, %v8631_v51  ;;  %v8632_v57 = vmul.f32 %v17808_v27, %v8369_v33  ;;  %v8370_v46 = vmul.f32 %v11499_v38, %v17291_v62  ;;  %v7276_v49 = vpop.xlane.xlu0 %7275  ;;  %v19737_v33 = vld [vmem:[#allocation35_spill] sm:$0xff] }
 0x683   : > { %v11501_v28 = vpop.eup %11500  ;;  %11510 = vrsqrt.f32 %v7864_v42  ;;  %v7865_v63 = vadd.f32 1e-05, %v7609_v14  ;;  %v7610_v25 = vmul.f32 0.125, %v7276_v49  ;;  %v19738_v49 = vld [vmem:[#allocation96_spill] sm:$0xff] }
 0x684   : > { %9150 = vst.msk [vmem:[%s13898_s22 + $0x670] sm:$0xff] %vm5088_vm4, %v8894_v50  ;;  %v8895_v60 = vadd.f32 %v17819_v26, %v8632_v57  ;;  %v8633_v6 = vmul.f32 %v17808_v27, %v8370_v46  ;;  %v8371_v45 = vmul.f32 %v11501_v28, %v17300_v11  ;;  %v7279_v43 = vpop.xlane.xlu1 %7278 }
 0x685   : > { %v11503_v53 = vpop.eup %11502  ;;  %11512 = vrsqrt.f32 %v7865_v63  ;;  %v7866_v1 = vadd.f32 1e-05, %v7610_v25  ;;  %v7611_v56 = vmul.f32 0.125, %v7279_v43 }
 0x686   : > { %9151 = vst.msk [vmem:[%s13898_s22 + $0x678] sm:$0xff] %vm5088_vm4, %v8895_v60  ;;  %v8896_v62 = vadd.f32 %v17819_v26, %v8633_v6  ;;  %v8634_v2 = vmul.f32 %v17808_v27, %v8371_v45  ;;  %v8372_v41 = vmul.f32 %v11503_v53, %v17314_v4  ;;  %v7282_v30 = vpop.xlane.xlu0 %7281 }
 0x687   : > { %v11505_v52 = vpop.eup %11504  ;;  %11514 = vrsqrt.f32 %v7866_v1  ;;  %v7867_v47 = vadd.f32 1e-05, %v7611_v56  ;;  %v7612_v13 = vmul.f32 0.125, %v7282_v30 }
 0x688   : > { %9152 = vst.msk [vmem:[%s13898_s22 + $0x680] sm:$0xff] %vm5088_vm4, %v8896_v62  ;;  %v8897_v11 = vadd.f32 %v17819_v26, %v8634_v2  ;;  %v8635_v29 = vmul.f32 %v17808_v27, %v8372_v41  ;;  %v8373_v35 = vmul.f32 %v11505_v52, %v19736_v44  ;;  %v7285_v16 = vpop.xlane.xlu1 %7284 }
 0x689   : > { %v11507_v48 = vpop.eup %11506  ;;  %11516 = vrsqrt.f32 %v7867_v47  ;;  %v7868_v23 = vadd.f32 1e-05, %v7612_v13  ;;  %v7613_v19 = vmul.f32 0.125, %v7285_v16 }
 0x68a   : > { %9153 = vst.msk [vmem:[%s13898_s22 + $0x688] sm:$0xff] %vm5088_vm4, %v8897_v11  ;;  %v8898_v4 = vadd.f32 %v17819_v26, %v8635_v29  ;;  %v8636_v51 = vmul.f32 %v17808_v27, %v8373_v35  ;;  %v8374_v20 = vmul.f32 %v11507_v48, %v19737_v33  ;;  %v7288_v38 = vpop.xlane.xlu0 %7287 }
 0x68b   : > { %v11509_v42 = vpop.eup %11508  ;;  %11518 = vrsqrt.f32 %v7868_v23  ;;  %v7869_v14 = vadd.f32 1e-05, %v7613_v19  ;;  %v7614_v50 = vmul.f32 0.125, %v7288_v38 }
 0x68c   : > { %9154 = vst.msk [vmem:[%s13898_s22 + $0x690] sm:$0xff] %vm5088_vm4, %v8898_v4  ;;  %v8899_v57 = vadd.f32 %v17819_v26, %v8636_v51  ;;  %v8637_v46 = vmul.f32 %v17808_v27, %v8374_v20  ;;  %v8375_v28 = vmul.f32 %v11509_v42, %v19738_v49  ;;  %v7291_v63 = vpop.xlane.xlu1 %7290  ;;  %v19739_v51 = vld [vmem:[#allocation115_spill] sm:$0xff] }
 0x68d   : > { %v11511_v25 = vpop.eup %11510  ;;  %11520 = vrsqrt.f32 %v7869_v14  ;;  %v7870_v60 = vadd.f32 1e-05, %v7614_v50  ;;  %v7615_v6 = vmul.f32 0.125, %v7291_v63 }
 0x68e   : > { %9155 = vst.msk [vmem:[%s13898_s22 + $0x698] sm:$0xff] %vm5088_vm4, %v8899_v57  ;;  %v8900_v45 = vadd.f32 %v17819_v26, %v8637_v46  ;;  %v8638_v43 = vmul.f32 %v17808_v27, %v8375_v28  ;;  %v8376_v53 = vmul.f32 %v11511_v25, %v17360_v37  ;;  %v7294_v1 = vpop.xlane.xlu0 %7293 }
 0x68f   : > { %v11513_v56 = vpop.eup %11512  ;;  %11522 = vrsqrt.f32 %v7870_v60  ;;  %v7871_v62 = vadd.f32 1e-05, %v7615_v6  ;;  %v7616_v2 = vmul.f32 0.125, %v7294_v1 }
 0x690   : > { %9156 = vst.msk [vmem:[%s13898_s22 + $0x6a0] sm:$0xff] %vm5088_vm4, %v8900_v45  ;;  %v8901_v41 = vadd.f32 %v17819_v26, %v8638_v43  ;;  %v8639_v30 = vmul.f32 %v17808_v27, %v8376_v53  ;;  %v8377_v52 = vmul.f32 %v11513_v56, %v17372_v8  ;;  %v7297_v47 = vpop.xlane.xlu1 %7296 }
 0x691   : > { %v11515_v13 = vpop.eup %11514  ;;  %11524 = vrsqrt.f32 %v7871_v62  ;;  %v7872_v11 = vadd.f32 1e-05, %v7616_v2  ;;  %v7617_v29 = vmul.f32 0.125, %v7297_v47  ;;  %v19740_v62 = vld [vmem:[#allocation97_spill] sm:$0xff] }
 0x692   : > { %9157 = vst.msk [vmem:[%s13898_s22 + $0x6a8] sm:$0xff] %vm5088_vm4, %v8901_v41  ;;  %v8902_v37 = vadd.f32 %v17819_v26, %v8639_v30  ;;  %v8640_v44 = vmul.f32 %v17808_v27, %v8377_v52  ;;  %v8378_v35 = vmul.f32 %v11515_v13, %v17379_v32  ;;  %v7300_v16 = vpop.xlane.xlu0 %7299 }
 0x693   : > { %v11517_v48 = vpop.eup %11516  ;;  %11526 = vrsqrt.f32 %v7872_v11  ;;  %v7873_v23 = vadd.f32 1e-05, %v7617_v29  ;;  %v7618_v19 = vmul.f32 0.125, %v7300_v16  ;;  %v19741_v11 = vld [vmem:[#allocation77_spill] sm:$0xff] }
 0x694   : > { %9158 = vst.msk [vmem:[%s13898_s22 + $0x6b0] sm:$0xff] %vm5088_vm4, %v8902_v37  ;;  %v8903_v8 = vadd.f32 %v17819_v26, %v8640_v44  ;;  %v8641_v4 = vmul.f32 %v17808_v27, %v8378_v35  ;;  %v8379_v33 = vmul.f32 %v11517_v48, %v19739_v51  ;;  %v7303_v20 = vpop.xlane.xlu1 %7302 }
 0x695   : > { %v11519_v38 = vpop.eup %11518  ;;  %11528 = vrsqrt.f32 %v7873_v23  ;;  %v7874_v42 = vadd.f32 1e-05, %v7618_v19  ;;  %v7619_v14 = vmul.f32 0.125, %v7303_v20 }
 0x696   : > { %9159 = vst.msk [vmem:[%s13898_s22 + $0x6b8] sm:$0xff] %vm5088_vm4, %v8903_v8  ;;  %v8904_v32 = vadd.f32 %v17819_v26, %v8641_v4  ;;  %v8642_v50 = vmul.f32 %v17808_v27, %v8379_v33  ;;  %v8380_v57 = vmul.f32 %v11519_v38, %v17402_v0  ;;  %v7306_v46 = vpop.xlane.xlu0 %7305 }
 0x697   : > { %v11521_v49 = vpop.eup %11520  ;;  %11530 = vrsqrt.f32 %v7874_v42  ;;  %v7875_v28 = vadd.f32 1e-05, %v7619_v14  ;;  %v7620_v63 = vmul.f32 0.125, %v7306_v46 }
 0x698   : > { %9160 = vst.msk [vmem:[%s13898_s22 + $0x6c0] sm:$0xff] %vm5088_vm4, %v8904_v32  ;;  %v8905_v25 = vadd.f32 %v17819_v26, %v8642_v50  ;;  %v8643_v60 = vmul.f32 %v17808_v27, %v8380_v57  ;;  %v8381_v6 = vmul.f32 %v11521_v49, %v17414_v17  ;;  %v7309_v45 = vpop.xlane.xlu1 %7308 }
 0x699   : > { %v11523_v43 = vpop.eup %11522  ;;  %11532 = vrsqrt.f32 %v7875_v28  ;;  %v7876_v53 = vadd.f32 1e-05, %v7620_v63  ;;  %v7621_v1 = vmul.f32 0.125, %v7309_v45 }
 0x69a   : > { %9161 = vst.msk [vmem:[%s13898_s22 + $0x6c8] sm:$0xff] %vm5088_vm4, %v8905_v25  ;;  %v8906_v0 = vadd.f32 %v17819_v26, %v8643_v60  ;;  %v8644_v56 = vmul.f32 %v17808_v27, %v8381_v6  ;;  %v8382_v2 = vmul.f32 %v11523_v43, %v19740_v62  ;;  %v7312_v41 = vpop.xlane.xlu0 %7311 }
 0x69b   : > { %v11525_v30 = vpop.eup %11524  ;;  %11534 = vrsqrt.f32 %v7876_v53  ;;  %v7877_v52 = vadd.f32 1e-05, %v7621_v1  ;;  %v7622_v47 = vmul.f32 0.125, %v7312_v41 }
 0x69c   : > { %9162 = vst.msk [vmem:[%s13898_s22 + $0x6d0] sm:$0xff] %vm5088_vm4, %v8906_v0  ;;  %v8907_v17 = vadd.f32 %v17819_v26, %v8644_v56  ;;  %v8645_v13 = vmul.f32 %v17808_v27, %v8382_v2  ;;  %v8383_v29 = vmul.f32 %v11525_v30, %v19741_v11  ;;  %v7315_v37 = vpop.xlane.xlu1 %7314 }
 0x69d   : > { %v11527_v44 = vpop.eup %11526  ;;  %11536 = vrsqrt.f32 %v7877_v52  ;;  %v7878_v35 = vadd.f32 1e-05, %v7622_v47  ;;  %v7623_v16 = vmul.f32 0.125, %v7315_v37 }
 0x69e   : > { %9163 = vst.msk [vmem:[%s13898_s22 + $0x6d8] sm:$0xff] %vm5088_vm4, %v8907_v17  ;;  %v8908_v48 = vadd.f32 %v17819_v26, %v8645_v13  ;;  %v8646_v23 = vmul.f32 %v17808_v27, %v8383_v29  ;;  %v8384_v19 = vmul.f32 %v11527_v44, %v17444_v40  ;;  %v7318_v8 = vpop.xlane.xlu0 %7317 }
 0x69f   : > { %v11529_v4 = vpop.eup %11528  ;;  %11538 = vrsqrt.f32 %v7878_v35  ;;  %v7879_v51 = vadd.f32 1e-05, %v7623_v16  ;;  %v7624_v33 = vmul.f32 0.125, %v7318_v8  ;;  %v19742_v35 = vld [vmem:[#allocation98_spill] sm:$0xff] }
 0x6a0   : > { %9164 = vst.msk [vmem:[%s13898_s22 + $0x6e0] sm:$0xff] %vm5088_vm4, %v8908_v48  ;;  %v8909_v20 = vadd.f32 %v17819_v26, %v8646_v23  ;;  %v8647_v38 = vmul.f32 %v17808_v27, %v8384_v19  ;;  %v8385_v42 = vmul.f32 %v11529_v4, %v17456_v31  ;;  %v7321_v14 = vpop.xlane.xlu1 %7320 }
 0x6a1   : > { %v11531_v32 = vpop.eup %11530  ;;  %11540 = vrsqrt.f32 %v7879_v51  ;;  %v7880_v50 = vadd.f32 1e-05, %v7624_v33  ;;  %v7625_v57 = vmul.f32 0.125, %v7321_v14  ;;  %v19743_v51 = vld [vmem:[#allocation165_spill] sm:$0xff] }
 0x6a2   : > { %9165 = vst.msk [vmem:[%s13898_s22 + $0x6e8] sm:$0xff] %vm5088_vm4, %v8909_v20  ;;  %v8910_v40 = vadd.f32 %v17819_v26, %v8647_v38  ;;  %v8648_v46 = vmul.f32 %v17808_v27, %v8385_v42  ;;  %v8386_v49 = vmul.f32 %v11531_v32, %v17463_v34  ;;  %v7324_v28 = vpop.xlane.xlu0 %7323 }
 0x6a3   : > { %v11533_v63 = vpop.eup %11532  ;;  %11542 = vrsqrt.f32 %v7880_v50  ;;  %v7881_v25 = vadd.f32 1e-05, %v7625_v57  ;;  %v7626_v60 = vmul.f32 0.125, %v7324_v28 }
 0x6a4   : > { %9166 = vst.msk [vmem:[%s13898_s22 + $0x6f0] sm:$0xff] %vm5088_vm4, %v8910_v40  ;;  %v8911_v31 = vadd.f32 %v17819_v26, %v8648_v46  ;;  %v8649_v6 = vmul.f32 %v17808_v27, %v8386_v49  ;;  %v8387_v45 = vmul.f32 %v11533_v63, %v17472_v55  ;;  %v7327_v43 = vpop.xlane.xlu1 %7326 }
 0x6a5   : > { %v11535_v53 = vpop.eup %11534  ;;  %11544 = vrsqrt.f32 %v7881_v25  ;;  %v7882_v1 = vadd.f32 1e-05, %v7626_v60  ;;  %v7627_v0 = vmul.f32 0.125, %v7327_v43 }
 0x6a6   : > { %9167 = vst.msk [vmem:[%s13898_s22 + $0x6f8] sm:$0xff] %vm5088_vm4, %v8911_v31  ;;  %v8912_v34 = vadd.f32 %v17819_v26, %v8649_v6  ;;  %v8650_v56 = vmul.f32 %v17808_v27, %v8387_v45  ;;  %v8388_v62 = vmul.f32 %v11535_v53, %v17486_v10  ;;  %v7330_v2 = vpop.xlane.xlu0 %7329 }
 0x6a7   : > { %v11537_v41 = vpop.eup %11536  ;;  %11546 = vrsqrt.f32 %v7882_v1  ;;  %v7883_v30 = vadd.f32 1e-05, %v7627_v0  ;;  %v7628_v52 = vmul.f32 0.125, %v7330_v2 }
 0x6a8   : > { %9168 = vst.msk [vmem:[%s13898_s22 + $0x700] sm:$0xff] %vm5088_vm4, %v8912_v34  ;;  %v8913_v55 = vadd.f32 %v17819_v26, %v8650_v56  ;;  %v8651_v47 = vmul.f32 %v17808_v27, %v8388_v62  ;;  %v8389_v17 = vmul.f32 %v11537_v41, %v17498_v21  ;;  %v7333_v13 = vpop.xlane.xlu1 %7332  ;;  %v19744_v41 = vld [vmem:[#allocation127_spill] sm:$0xff] }
 0x6a9   : > { %v11539_v11 = vpop.eup %11538  ;;  %11548 = vrsqrt.f32 %v7883_v30  ;;  %v7884_v29 = vadd.f32 1e-05, %v7628_v52  ;;  %v7629_v37 = vmul.f32 0.125, %v7333_v13 }
 0x6aa   : > { %9169 = vst.msk [vmem:[%s13898_s22 + $0x708] sm:$0xff] %vm5088_vm4, %v8913_v55  ;;  %v8914_v10 = vadd.f32 %v17819_v26, %v8651_v47  ;;  %v8652_v44 = vmul.f32 %v17808_v27, %v8389_v17  ;;  %v8390_v16 = vmul.f32 %v11539_v11, %v19742_v35  ;;  %v7336_v48 = vpop.xlane.xlu0 %7335 }
 0x6ab   : > { %v11541_v23 = vpop.eup %11540  ;;  %11550 = vrsqrt.f32 %v7884_v29  ;;  %v7885_v19 = vadd.f32 1e-05, %v7629_v37  ;;  %v7630_v8 = vmul.f32 0.125, %v7336_v48 }
 0x6ac   : > { %9170 = vst.msk [vmem:[%s13898_s22 + $0x710] sm:$0xff] %vm5088_vm4, %v8914_v10  ;;  %v8915_v21 = vadd.f32 %v17819_v26, %v8652_v44  ;;  %v8653_v4 = vmul.f32 %v17808_v27, %v8390_v16  ;;  %v8391_v33 = vmul.f32 %v11541_v23, %v19743_v51  ;;  %v7339_v20 = vpop.xlane.xlu1 %7338  ;;  %v19745_v51 = vld [vmem:[#allocation116_spill] sm:$0xff] }
 0x6ad   : > { %v11543_v38 = vpop.eup %11542  ;;  %11552 = vrsqrt.f32 %v7885_v19  ;;  %v7886_v42 = vadd.f32 1e-05, %v7630_v8  ;;  %v7631_v14 = vmul.f32 0.125, %v7339_v20 }
 0x6ae   : > { %9171 = vst.msk [vmem:[%s13898_s22 + $0x718] sm:$0xff] %vm5088_vm4, %v8915_v21  ;;  %v8916_v32 = vadd.f32 %v17819_v26, %v8653_v4  ;;  %v8654_v50 = vmul.f32 %v17808_v27, %v8391_v33  ;;  %v8392_v57 = vmul.f32 %v11543_v38, %v17528_v58  ;;  %v7342_v40 = vpop.xlane.xlu0 %7341 }
 0x6af   : > { %v11545_v46 = vpop.eup %11544  ;;  %11554 = vrsqrt.f32 %v7886_v42  ;;  %v7887_v49 = vadd.f32 1e-05, %v7631_v14  ;;  %v7632_v28 = vmul.f32 0.125, %v7342_v40 }
 0x6b0   : > { %9172 = vst.msk [vmem:[%s13898_s22 + $0x720] sm:$0xff] %vm5088_vm4, %v8916_v32  ;;  %v8917_v63 = vadd.f32 %v17819_v26, %v8654_v50  ;;  %v8655_v25 = vmul.f32 %v17808_v27, %v8392_v57  ;;  %v8393_v60 = vmul.f32 %v11545_v46, %v17540_v54  ;;  %v7345_v31 = vpop.xlane.xlu1 %7344  ;;  %v19746_v50 = vld [vmem:[#allocation43_spill] sm:$0xff] }
 0x6b1   : > { %v11547_v6 = vpop.eup %11546  ;;  %11556 = vrsqrt.f32 %v7887_v49  ;;  %v7888_v45 = vadd.f32 1e-05, %v7632_v28  ;;  %v7633_v43 = vmul.f32 0.125, %v7345_v31 }
 0x6b2   : > { %9173 = vst.msk [vmem:[%s13898_s22 + $0x728] sm:$0xff] %vm5088_vm4, %v8917_v63  ;;  %v8918_v58 = vadd.f32 %v17819_v26, %v8655_v25  ;;  %v8656_v53 = vmul.f32 %v17808_v27, %v8393_v60  ;;  %v8394_v1 = vmul.f32 %v11547_v6, %v17547_v5  ;;  %v7348_v0 = vpop.xlane.xlu0 %7347 }
 0x6b3   : > { %v11549_v34 = vpop.eup %11548  ;;  %11558 = vrsqrt.f32 %v7888_v45  ;;  %v7889_v56 = vadd.f32 1e-05, %v7633_v43  ;;  %v7634_v62 = vmul.f32 0.125, %v7348_v0 }
 0x6b4   : > { %9174 = vst.msk [vmem:[%s13898_s22 + $0x730] sm:$0xff] %vm5088_vm4, %v8918_v58  ;;  %v8919_v54 = vadd.f32 %v17819_v26, %v8656_v53  ;;  %v8657_v2 = vmul.f32 %v17808_v27, %v8394_v1  ;;  %v8395_v30 = vmul.f32 %v11549_v34, %v19744_v41  ;;  %v7351_v52 = vpop.xlane.xlu1 %7350  ;;  %v19747_v41 = vld [vmem:[#allocation36_spill] sm:$0xff] }
 0x6b5   : > { %v11551_v55 = vpop.eup %11550  ;;  %11560 = vrsqrt.f32 %v7889_v56  ;;  %v7890_v47 = vadd.f32 1e-05, %v7634_v62  ;;  %v7635_v17 = vmul.f32 0.125, %v7351_v52 }
 0x6b6   : > { %9175 = vst.msk [vmem:[%s13898_s22 + $0x738] sm:$0xff] %vm5088_vm4, %v8919_v54  ;;  %v8920_v5 = vadd.f32 %v17819_v26, %v8657_v2  ;;  %v8658_v13 = vmul.f32 %v17808_v27, %v8395_v30  ;;  %v8396_v11 = vmul.f32 %v11551_v55, %v17570_v59  ;;  %v7354_v29 = vpop.xlane.xlu0 %7353  ;;  %v18097_v54 = vld [vmem:[#allocation7] ss:$0 sm:$0xff] }
 0x6b7   : > { %v11553_v37 = vpop.eup %11552  ;;  %11562 = vrsqrt.f32 %v7890_v47  ;;  %v7891_v10 = vadd.f32 1e-05, %v7635_v17  ;;  %v7636_v44 = vmul.f32 0.125, %v7354_v29 }
 0x6b8   : > { %9176 = vst.msk [vmem:[%s13898_s22 + $0x740] sm:$0xff] %vm5088_vm4, %v8920_v5  ;;  %v8921_v35 = vadd.f32 %v17819_v26, %v8658_v13  ;;  %v8659_v16 = vmul.f32 %v17808_v27, %v8396_v11  ;;  %v8397_v48 = vmul.f32 %v11553_v37, %v17582_v36  ;;  %v7357_v23 = vpop.xlane.xlu1 %7356  ;;  %v19748_v5 = vld [vmem:[#allocation119_spill] sm:$0xff] }
 0x6b9   : > { %v11555_v19 = vpop.eup %11554  ;;  %11564 = vrsqrt.f32 %v7891_v10  ;;  %v7892_v8 = vadd.f32 1e-05, %v7636_v44  ;;  %v7637_v21 = vmul.f32 0.125, %v7357_v23  ;;  %v18108_v44 = vld [vmem:[#allocation9] ss:$0 sm:$0xff] }
 0x6ba   : > { %9177 = vst.msk [vmem:[%s13898_s22 + $0x748] sm:$0xff] %vm5088_vm4, %v8921_v35  ;;  %v8922_v59 = vadd.f32 %v17819_v26, %v8659_v16  ;;  %v8660_v4 = vmul.f32 %v17808_v27, %v8397_v48  ;;  %v8398_v33 = vmul.f32 %v11555_v19, %v19745_v51  ;;  %v7360_v20 = vpop.xlane.xlu0 %7359 }
 0x6bb   : > { %v11557_v38 = vpop.eup %11556  ;;  %11566 = vrsqrt.f32 %v7892_v8  ;;  %v7893_v42 = vadd.f32 1e-05, %v7637_v21  ;;  %v7638_v14 = vmul.f32 0.125, %v7360_v20 }
 0x6bc   : > { %9178 = vst.msk [vmem:[%s13898_s22 + $0x750] sm:$0xff] %vm5088_vm4, %v8922_v59  ;;  %v8923_v36 = vadd.f32 %v17819_v26, %v8660_v4  ;;  %v8661_v32 = vmul.f32 %v17808_v27, %v8398_v33  ;;  %v8399_v57 = vmul.f32 %v11557_v38, %v19746_v50  ;;  %v7363_v40 = vpop.xlane.xlu1 %7362  ;;  %v19749_v4 = vld [vmem:[#allocation83_spill] sm:$0xff] }
 0x6bd   : > { %v11559_v46 = vpop.eup %11558  ;;  %11568 = vrsqrt.f32 %v7893_v42  ;;  %v7894_v49 = vadd.f32 1e-05, %v7638_v14  ;;  %v7639_v28 = vmul.f32 0.125, %v7363_v40 }
 0x6be   : > { %9179 = vst.msk [vmem:[%s13898_s22 + $0x758] sm:$0xff] %vm5088_vm4, %v8923_v36  ;;  %v8924_v63 = vadd.f32 %v17819_v26, %v8661_v32  ;;  %v8662_v25 = vmul.f32 %v17808_v27, %v8399_v57  ;;  %v8400_v60 = vmul.f32 %v11559_v46, %v17612_v18  ;;  %v7366_v31 = vpop.xlane.xlu0 %7365  ;;  %v19750_v36 = vld [vmem:[#allocation128_spill] sm:$0xff] }
 0x6bf   : > { %v11561_v6 = vpop.eup %11560  ;;  %11570 = vrsqrt.f32 %v7894_v49  ;;  %v7895_v45 = vadd.f32 1e-05, %v7639_v28  ;;  %v7640_v43 = vmul.f32 0.125, %v7366_v31 }
 0x6c0   : > { %9180 = vst.msk [vmem:[%s13898_s22 + $0x760] sm:$0xff] %vm5088_vm4, %v8924_v63  ;;  %v8925_v58 = vadd.f32 %v17819_v26, %v8662_v25  ;;  %v8663_v53 = vmul.f32 %v17808_v27, %v8400_v60  ;;  %v8401_v1 = vmul.f32 %v11561_v6, %v17624_v3  ;;  %v7369_v0 = vpop.xlane.xlu1 %7368  ;;  %v19751_v63 = vld [vmem:[#allocation47_spill] sm:$0xff] }
 0x6c1   : > { %v11563_v34 = vpop.eup %11562  ;;  %11572 = vrsqrt.f32 %v7895_v45  ;;  %v7896_v56 = vadd.f32 1e-05, %v7640_v43  ;;  %v7641_v62 = vmul.f32 0.125, %v7369_v0 }
 0x6c2   : > { %9181 = vst.msk [vmem:[%s13898_s22 + $0x768] sm:$0xff] %vm5088_vm4, %v8925_v58  ;;  %v8926_v18 = vadd.f32 %v17819_v26, %v8663_v53  ;;  %v8664_v2 = vmul.f32 %v18097_v54, %v8401_v1  ;;  %v8402_v30 = vmul.f32 %v11563_v34, %v19747_v41  ;;  %v7372_v27 = vpop.xlane.xlu0 %7371 }
 0x6c3   : > { %v11565_v52 = vpop.eup %11564  ;;  %11574 = vrsqrt.f32 %v7896_v56  ;;  %v7897_v3 = vadd.f32 1e-05, %v7641_v62  ;;  %v7642_v55 = vmul.f32 0.125, %v7372_v27 }
 0x6c4   : > { %9182 = vst.msk [vmem:[%s13898_s22 + $0x770] sm:$0xff] %vm5088_vm4, %v8926_v18  ;;  %v8927_v47 = vadd.f32 %v17819_v26, %v8664_v2  ;;  %v8665_v17 = vmul.f32 %v18097_v54, %v8402_v30  ;;  %v8403_v13 = vmul.f32 %v11565_v52, %v19748_v5  ;;  %v7375_v11 = vpop.xlane.xlu1 %7374 }
 0x6c5   : > { %v11567_v29 = vpop.eup %11566  ;;  %11576 = vrsqrt.f32 %v7897_v3  ;;  %v7898_v37 = vadd.f32 1e-05, %v7642_v55  ;;  %v7643_v10 = vmul.f32 0.125, %v7375_v11  ;;  %v19752_v55 = vld [vmem:[#allocation137_spill] sm:$0xff]  ;;  %v19753_v11 = vld [vmem:[#allocation102_spill] sm:$0xff] }
 0x6c6   : > { %9183 = vst.msk [vmem:[%s13898_s22 + $0x778] sm:$0xff] %vm5088_vm4, %v8927_v47  ;;  %v8928_v35 = vadd.f32 %v18108_v44, %v8665_v17  ;;  %v8666_v16 = vmul.f32 %v18097_v54, %v8403_v13  ;;  %v8404_v26 = vmul.f32 %v11567_v29, %v17652_v7  ;;  %v7378_v48 = vpop.xlane.xlu0 %7377 }
 0x6c7   : > { %v11569_v23 = vpop.eup %11568  ;;  %11578 = vrsqrt.f32 %v7898_v37  ;;  %v7899_v19 = vadd.f32 1e-05, %v7643_v10  ;;  %v7644_v8 = vmul.f32 0.125, %v7378_v48 }
 0x6c8   : > { %9184 = vst.msk [vmem:[%s13898_s22 + $0x780] sm:$0xff] %vm5088_vm4, %v8928_v35  ;;  %v8929_v21 = vadd.f32 %v18108_v44, %v8666_v16  ;;  %v8667_v59 = vmul.f32 %v18097_v54, %v8404_v26  ;;  %v8405_v51 = vmul.f32 %v11569_v23, %v19749_v4  ;;  %v7381_v33 = vpop.xlane.xlu1 %7380 }
 0x6c9   : > { %v11571_v20 = vpop.eup %11570  ;;  %11580 = vrsqrt.f32 %v7899_v19  ;;  %v7900_v38 = vadd.f32 1e-05, %v7644_v8  ;;  %v7645_v42 = vmul.f32 0.125, %v7381_v33 }
 0x6ca   : > { %9185 = vst.msk [vmem:[%s13898_s22 + $0x788] sm:$0xff] %vm5088_vm4, %v8929_v21  ;;  %v8930_v7 = vadd.f32 %v18108_v44, %v8667_v59  ;;  %v8668_v14 = vmul.f32 %v18097_v54, %v8405_v51  ;;  %v8406_v32 = vmul.f32 %v11571_v20, %v19750_v36  ;;  %v7384_v50 = vpop.xlane.xlu0 %7383 }
 0x6cb   : > { %v11573_v57 = vpop.eup %11572  ;;  %11582 = vrsqrt.f32 %v7900_v38  ;;  %v7901_v40 = vadd.f32 1e-05, %v7645_v42  ;;  %v7646_v46 = vmul.f32 0.125, %v7384_v50 }
 0x6cc   : > { %9186 = vst.msk [vmem:[%s13898_s22 + $0x790] sm:$0xff] %vm5088_vm4, %v8930_v7  ;;  %v8931_v49 = vadd.f32 %v18108_v44, %v8668_v14  ;;  %v8669_v28 = vmul.f32 %v18097_v54, %v8406_v32  ;;  %v8407_v25 = vmul.f32 %v11573_v57, %v19751_v63  ;;  %v7387_v60 = vpop.xlane.xlu1 %7386 }
 0x6cd   : > { %v11575_v31 = vpop.eup %11574  ;;  %11584 = vrsqrt.f32 %v7901_v40  ;;  %v7902_v6 = vadd.f32 1e-05, %v7646_v46  ;;  %v7647_v45 = vmul.f32 0.125, %v7387_v60 }
 0x6ce   : > { %9187 = vst.msk [vmem:[%s13898_s22 + $0x798] sm:$0xff] %vm5088_vm4, %v8931_v49  ;;  %v8932_v43 = vadd.f32 %v18108_v44, %v8669_v28  ;;  %v8670_v58 = vmul.f32 %v18097_v54, %v8407_v25  ;;  %v8408_v53 = vmul.f32 %v11575_v31, %v17692_v12  ;;  %v7390_v1 = vpop.xlane.xlu0 %7389 }
 0x6cf   : > { %v11577_v0 = vpop.eup %11576  ;;  %11586 = vrsqrt.f32 %v7902_v6  ;;  %v7903_v34 = vadd.f32 1e-05, %v7647_v45  ;;  %v7648_v56 = vmul.f32 0.125, %v7390_v1 }
 0x6d0   : > { %9188 = vst.msk [vmem:[%s13898_s22 + $0x7a0] sm:$0xff] %vm5088_vm4, %v8932_v43  ;;  %v8933_v62 = vadd.f32 %v18108_v44, %v8670_v58  ;;  %v8671_v18 = vmul.f32 %v18097_v54, %v8408_v53  ;;  %v8409_v2 = vmul.f32 %v11577_v0, %v17700_v9  ;;  %v7393_v41 = vpop.xlane.xlu1 %7392 }
 0x6d1   : > { %v11579_v30 = vpop.eup %11578  ;;  %11588 = vrsqrt.f32 %v7903_v34  ;;  %v7904_v27 = vadd.f32 1e-05, %v7648_v56  ;;  %v7649_v12 = vmul.f32 0.125, %v7393_v41 }
 0x6d2   : > { %9189 = vst.msk [vmem:[%s13898_s22 + $0x7a8] sm:$0xff] %vm5088_vm4, %v8933_v62  ;;  %v8934_v52 = vadd.f32 %v18108_v44, %v8671_v18  ;;  %v8672_v3 = vmul.f32 %v18097_v54, %v8409_v2  ;;  %v8410_v47 = vmul.f32 %v11579_v30, %v19752_v55 }
 0x6d3   : > { %v11581_v17 = vpop.eup %11580  ;;  %11590 = vrsqrt.f32 %v7904_v27  ;;  %v7905_v5 = vadd.f32 1e-05, %v7649_v12 }
 0x6d4   : > { %9190 = vst.msk [vmem:[%s13898_s22 + $0x7b0] sm:$0xff] %vm5088_vm4, %v8934_v52  ;;  %v8935_v9 = vadd.f32 %v18108_v44, %v8672_v3  ;;  %v8673_v13 = vmul.f32 %v18097_v54, %v8410_v47  ;;  %v8411_v29 = vmul.f32 %v11581_v17, %v19753_v11 }
 0x6d5   : > { %v11583_v37 = vpop.eup %11582  ;;  %11592 = vrsqrt.f32 %v7905_v5 }
 0x6d6   : > { %9191 = vst.msk [vmem:[%s13898_s22 + $0x7b8] sm:$0xff] %vm5088_vm4, %v8935_v9  ;;  %v8936_v10 = vadd.f32 %v18108_v44, %v8673_v13  ;;  %v8674_v35 = vmul.f32 %v18097_v54, %v8411_v29  ;;  %v8412_v16 = vmul.f32 %v11583_v37, %v17726_v15 }
 0x6d7   : > { %v11585_v26 = vpop.eup %11584 }
 0x6d8   : > { %9192 = vst.msk [vmem:[%s13898_s22 + $0x7c0] sm:$0xff] %vm5088_vm4, %v8936_v10  ;;  %v8937_v48 = vadd.f32 %v18108_v44, %v8674_v35  ;;  %v8675_v23 = vmul.f32 %v18097_v54, %v8412_v16  ;;  %v8413_v19 = vmul.f32 %v11585_v26, %v17735_v61  ;;  %v19754_v61 = vld [vmem:[#allocation84_spill] sm:$0xff] }
 0x6d9   : > { %v11587_v8 = vpop.eup %11586 }
 0x6da   : > { %9193 = vst.msk [vmem:[%s13898_s22 + $0x7c8] sm:$0xff] %vm5088_vm4, %v8937_v48  ;;  %v8938_v21 = vadd.f32 %v18108_v44, %v8675_v23  ;;  %v8676_v59 = vmul.f32 %v18097_v54, %v8413_v19  ;;  %v8414_v15 = vmul.f32 %v11587_v8, %v17742_v24 }
 0x6db   : > { %v11589_v4 = vpop.eup %11588 }
 0x6dc   : > { %9194 = vst.msk [vmem:[%s13898_s22 + $0x7d0] sm:$0xff] %vm5088_vm4, %v8938_v21  ;;  %v8939_v51 = vadd.f32 %v18108_v44, %v8676_v59  ;;  %v8677_v33 = vmul.f32 %v18097_v54, %v8414_v15  ;;  %v8415_v20 = vmul.f32 %v11589_v4, %v19754_v61 }
 0x6dd   : > { %v11591_v38 = vpop.eup %11590 }
 0x6de   : > { %9195 = vst.msk [vmem:[%s13898_s22 + $0x7d8] sm:$0xff] %vm5088_vm4, %v8939_v51  ;;  %v8940_v42 = vadd.f32 %v18108_v44, %v8677_v33  ;;  %v8678_v7 = vmul.f32 %v18097_v54, %v8415_v20  ;;  %v8416_v24 = vmul.f32 %v11591_v38, %v17761_v22 }
 0x6df   : > { %v11593_v14 = vpop.eup %11592 }
 0x6e0   : > { %9196 = vst.msk [vmem:[%s13898_s22 + $0x7e0] sm:$0xff] %vm5088_vm4, %v8940_v42  ;;  %v8941_v36 = vadd.f32 %v18108_v44, %v8678_v7  ;;  %v8679_v32 = vmul.f32 %v18097_v54, %v8416_v24  ;;  %v8417_v50 = vmul.f32 %v11593_v14, %v17770_v39 }
 0x6e2   : > { %9197 = vst.msk [vmem:[%s13898_s22 + $0x7e8] sm:$0xff] %vm5088_vm4, %v8941_v36  ;;  %v8942_v57 = vadd.f32 %v18108_v44, %v8679_v32  ;;  %v8680_v40 = vmul.f32 %v18097_v54, %v8417_v50 }
 0x6e4   : > { %9198 = vst.msk [vmem:[%s13898_s22 + $0x7f0] sm:$0xff] %vm5088_vm4, %v8942_v57  ;;  %v8943_v46 = vadd.f32 %v18108_v44, %v8680_v40 }
 0x6e6   : > { %9199 = vst.msk [vmem:[%s13898_s22 + $0x7f8] sm:$0xff] %vm5088_vm4, %v8943_v46 }
 0x6e7 PF: > { %s20_s24 = sadd.s32 1, %s11780_s24  }
 0x6e8   : > { %p17_p7 = scmp.ge.s32.totalorder %s20_s24, 4  }
 0x6ea   :  { %19 = sbr.rel (!%p17_p7) target bundleno = 3 (0x3), region = 99 }
 0x6f1   :  { %9222 = vsyncpa [#allocation3], 1 }
 0x6f2   :  { %9224 = vsyncpa [#allocation3 + $0x1], 1 }
 0x6f3   :  { %9225 = vsyncpa [#allocation5], 1 }
 0x6f4   :  { %9226 = vsyncpa [#allocation8], 1 }

</bundles_post_ra>
